<compile_context>
chip_gen: v6e
topology: v6e:2x2x1
jax: 0.10.0
libtpu: 0.0.40
codegen_flags: <defaults>
</compile_context>

<pallas_src>
import jax
import jax.numpy as jnp
from jax import lax
from jax.experimental import pallas as pl
from jax.experimental.pallas import tpu as pltpu

BN_EPS = 1e-5
HIDDEN = 300
LANE = 128
HPAD = 384                                  # 300 rounded up to a lane multiple
VMEM_CEILING_BYTES = 48 * 1024 * 1024       # safe on v7x (64 MiB physical) and below


def _round_up(n, m):
    return ((n + m - 1) // m) * m


def ddqn_mlp_kernel(x_ref, w1_ref, w2_ref, w3_ref, w4_ref, vec_ref, o_ref):
    """One independent forward pass (one BN group) per grid step.

    vec_ref rows: 0..2 = gamma1..3, 3..5 = beta1..3, 6 = final bias, 7 = pad.
    """
    h = x_ref[...]                                   # (B, DPAD) bf16

    def bn_relu_layer(h, w_ref, g_row, b_row):
        # bf16 MXU matmul, f32 accumulation; BN / reduce math stays f32.
        z = jnp.dot(h, w_ref[...], preferred_element_type=jnp.float32)   # (B,H) f32
        inv_b = 1.0 / z.shape[0]
        # One-pass moments (biased variance, matching PyTorch BN forward).
        s1 = jnp.sum(z, axis=0, keepdims=True)                           # (1,H)
        s2 = jnp.sum(z * z, axis=0, keepdims=True)                       # (1,H)
        mean = s1 * inv_b
        var = jnp.maximum(s2 * inv_b - mean * mean, 0.0)
        gamma = vec_ref[g_row:g_row + 1, :]                              # (1,H)
        beta = vec_ref[b_row:b_row + 1, :]                               # (1,H)
        scale = gamma * lax.rsqrt(var + BN_EPS)                          # EUP rsqrt
        shift = beta - mean * scale
        # Fused BN affine + ReLU: one mul, one add, one max over (B,H).
        # Inter-layer activation kept bf16 (it is the next matmul's input).
        return jnp.maximum(z * scale + shift, 0.0).astype(jnp.bfloat16)

    h = bn_relu_layer(h, w1_ref, 0, 3)
    h = bn_relu_layer(h, w2_ref, 1, 4)
    h = bn_relu_layer(h, w3_ref, 2, 5)

    out = jnp.dot(h, w4_ref[...], preferred_element_type=jnp.float32)
    o_ref[...] = out + vec_ref[6:7, :o_ref.shape[1]]


def init_params(input_dims, action_nums, key):
    """PyTorch-style init (uniform +-1/sqrt(fan_in)); BN gamma=1, beta=0.

    Weights stored as (in_features, out_features); vectors as (1, features).
    """
    neuron_nums = [HIDDEN, HIDDEN, HIDDEN]
    params = []
    d_in = input_dims
    for n in neuron_nums:
        key, kw, kb = jax.random.split(key, 3)
        bound = 1.0 / jnp.sqrt(jnp.float32(d_in))
        w = jax.random.uniform(kw, (d_in, n), jnp.float32, -bound, bound)
        b = jax.random.uniform(kb, (1, n), jnp.float32, -bound, bound)
        params.extend([w, b, jnp.ones((1, n), jnp.float32),
                       jnp.zeros((1, n), jnp.float32)])
        d_in = n
    key, kw, kb = jax.random.split(key, 3)
    bound = 1.0 / jnp.sqrt(jnp.float32(d_in))
    w4 = jax.random.uniform(kw, (d_in, action_nums), jnp.float32, -bound, bound)
    b4 = jax.random.uniform(kb, (1, action_nums), jnp.float32, -bound, bound)
    params.extend([w4, b4])
    return params


def pack_params(params, input_dims, action_nums):
    """Pad to lane-aligned shapes, cast weights to bf16, pack tiny vectors."""
    (w1, b1, g1, be1,
     w2, b2, g2, be2,
     w3, b3, g3, be3,
     w4, b4) = params
    del b1, b2, b3  # cancelled exactly by BatchNorm's mean subtraction (train mode)

    dpad = _round_up(input_dims, LANE)
    opad = _round_up(action_nums, LANE)

    def pad2(a, rows, cols):
        return jnp.pad(a, ((0, rows - a.shape[0]), (0, cols - a.shape[1])))

    w1p = pad2(w1, dpad, HPAD).astype(jnp.bfloat16)
    w2p = pad2(w2, HPAD, HPAD).astype(jnp.bfloat16)
    w3p = pad2(w3, HPAD, HPAD).astype(jnp.bfloat16)
    w4p = pad2(w4, HPAD, opad).astype(jnp.bfloat16)
    vecs = jnp.concatenate(
        [pad2(g1, 1, HPAD), pad2(g2, 1, HPAD), pad2(g3, 1, HPAD),
         pad2(be1, 1, HPAD), pad2(be2, 1, HPAD), pad2(be3, 1, HPAD),
         pad2(b4, 1, HPAD), jnp.zeros((1, HPAD), jnp.float32)],
        axis=0).astype(jnp.float32)                                     # (8, HPAD)
    return (w1p, w2p, w3p, w4p, vecs), dpad, opad


def _vmem_bytes_estimate(b_tile, dpad, opad):
    w = 2 * (dpad * HPAD + 2 * HPAD * HPAD + HPAD * opad)   # resident bf16 weights
    vec = 4 * 8 * HPAD
    io = 2 * (2 * b_tile * dpad) + 2 * (4 * b_tile * opad)  # double-buffered x / out
    live = 5 * b_tile * HPAD * 4                            # ~5 live (B,384) temporaries
    return w + vec + io + live


def ddqn_net_forward_stacked(xs, packed, dpad, opad, action_nums):
    """xs: (G, B, input_dims) f32.  Runs G independent Net.forward() calls
    (each with its own BatchNorm batch statistics) as a batch-parallel grid
    with the weights resident in VMEM across grid steps."""
    G, B, D = xs.shape
    assert B % 16 == 0, "group batch must be a multiple of 16 (bf16 sublanes)"
    est = _vmem_bytes_estimate(B, dpad, opad)
    assert est <= VMEM_CEILING_BYTES, (
        f"group batch {B} needs ~{est} B of VMEM; shrink the group size")

    xp = jnp.pad(xs.astype(jnp.bfloat16).reshape(G * B, D),
                 ((0, 0), (0, dpad - D)))
    w1p, w2p, w3p, w4p, vecs = packed

    out = pl.pallas_call(
        ddqn_mlp_kernel,
        out_shape=jax.ShapeDtypeStruct((G * B, opad), jnp.float32),
        grid=(G,),
        in_specs=[
            pl.BlockSpec((B, dpad), lambda g: (g, 0)),       # x: per-group block
            pl.BlockSpec((dpad, HPAD), lambda g: (0, 0)),    # weights: resident
            pl.BlockSpec((HPAD, HPAD), lambda g: (0, 0)),
            pl.BlockSpec((HPAD, HPAD), lambda g: (0, 0)),
            pl.BlockSpec((HPAD, opad), lambda g: (0, 0)),
            pl.BlockSpec((8, HPAD), lambda g: (0, 0)),       # gamma/beta/bias pack
        ],
        out_specs=pl.BlockSpec((B, opad), lambda g: (g, 0)),
        compiler_params=pltpu.CompilerParams(
            dimension_semantics=("parallel",),   # v7x: shard groups over both TCs
            vmem_limit_bytes=VMEM_CEILING_BYTES,
        ),
    )(xp, w1p, w2p, w3p, w4p, vecs)
    return out.reshape(G, B, opad)[:, :, :action_nums]


def ddqn_net_forward(x, packed, dpad, opad, action_nums):
    """PyTorch `Net.forward`: one BatchNorm group over the whole batch.

    # TODO(synk): a single forward is NOT tiled over the batch axis because
    # training-mode BatchNorm couples all rows through the per-layer batch
    # statistics; only independent forward calls are gridded (see stacked).
    """
    return ddqn_net_forward_stacked(x[None], packed, dpad, opad, action_nums)[0]


def reference_forward(x, params):
    """Pure-JAX reference with the same dtype policy (bf16 matmul inputs,
    f32 accumulation / BN math), textbook formulation (biases kept, two-pass
    variance, unfused BN affine)."""
    (w1, b1, g1, be1, w2, b2, g2, be2, w3, b3, g3, be3, w4, b4) = params

    def layer(h, w, b, g, be):
        z = jnp.dot(h.astype(jnp.bfloat16), w.astype(jnp.bfloat16),
                    preferred_element_type=jnp.float32) + b
        mean = jnp.mean(z, axis=0, keepdims=True)
        var = jnp.mean((z - mean) ** 2, axis=0, keepdims=True)
        return jnp.maximum((z - mean) * lax.rsqrt(var + BN_EPS) * g + be, 0.0)

    h = x.astype(jnp.float32)
    h = layer(h, w1, b1, g1, be1)
    h = layer(h, w2, b2, g2, be2)
    h = layer(h, w3, b3, g3, be3)
    return jnp.dot(h.astype(jnp.bfloat16), w4.astype(jnp.bfloat16),
                   preferred_element_type=jnp.float32) + b4


if __name__ == "__main__":
    # Module-consistent sizes.
    field_nums = 4
    feature_nums = 100   # embedding-table size in the full model; unused here
    latent_dims = 8
    action_nums = 3
    input_dims = field_nums * (field_nums - 1) // 2 + field_nums * latent_dims  # 38

    batch = 256          # multiple of 16; fills the 2x256x256 MXU rows (v6e/v7x)
    groups = 2           # stacked independent forward passes -> grid=(2,), parallel

    key = jax.random.PRNGKey(0)
    key, kx = jax.random.split(key)
    xs = jax.random.normal(kx, (groups, batch, input_dims), jnp.float32)

    params = init_params(input_dims, action_nums, key)
    packed, dpad, opad = pack_params(params, input_dims, action_nums)

    # 1) Module-equivalent single forward (one BN group over the whole batch).
    out0 = ddqn_net_forward(xs[0], packed, dpad, opad, action_nums)
    out0 = jax.block_until_ready(out0)
    assert out0.shape == (batch, action_nums), out0.shape
    ref0 = reference_forward(xs[0], params)
    err0 = float(jnp.max(jnp.abs(out0 - ref0)))
    assert err0 < 5e-2, err0

    # 2) Stacked independent forwards: batch-parallel grid, resident weights.
    outs = ddqn_net_forward_stacked(xs, packed, dpad, opad, action_nums)
    outs = jax.block_until_ready(outs)
    assert outs.shape == (groups, batch, action_nums), outs.shape
    assert bool(jnp.all(jnp.isfinite(outs)))
    for g in range(groups):
        refg = reference_forward(xs[g], params)
        errg = float(jnp.max(jnp.abs(outs[g] - refg)))
        assert errg < 5e-2, errg

    print("KERNEL_OK")
</pallas_src>

<mosaic_0001>
module attributes {stable_mosaic.version = 11 : i64} {
  func.func @ddqn_mlp_kernel(%arg0: i32, %arg1: memref<256x128xbf16, #tpu.memory_space<vmem>>, %arg2: memref<128x384xbf16, #tpu.memory_space<vmem>>, %arg3: memref<384x384xbf16, #tpu.memory_space<vmem>>, %arg4: memref<384x384xbf16, #tpu.memory_space<vmem>>, %arg5: memref<384x128xbf16, #tpu.memory_space<vmem>>, %arg6: memref<8x384xf32, #tpu.memory_space<vmem>>, %arg7: memref<256x128xf32, #tpu.memory_space<vmem>>) attributes {dimension_semantics = [#tpu.dimension_semantics<parallel>], iteration_bounds = array<i64: 1>, scalar_prefetch = 0 : i64, scratch_operands = 0 : i64, tpu.core_type = #tpu.core_type<tc>, window_params = [{transform_indices = @transform_0, window_bounds = array<i64: 256, 128>}, {pipeline_mode = #tpu.pipeline_mode<synchronous>, transform_indices = @transform_1, window_bounds = array<i64: 128, 384>}, {pipeline_mode = #tpu.pipeline_mode<synchronous>, transform_indices = @transform_2, window_bounds = array<i64: 384, 384>}, {pipeline_mode = #tpu.pipeline_mode<synchronous>, transform_indices = @transform_3, window_bounds = array<i64: 384, 384>}, {pipeline_mode = #tpu.pipeline_mode<synchronous>, transform_indices = @transform_4, window_bounds = array<i64: 384, 128>}, {pipeline_mode = #tpu.pipeline_mode<synchronous>, transform_indices = @transform_5, window_bounds = array<i64: 8, 384>}, {transform_indices = @transform_6, window_bounds = array<i64: 256, 128>}]} {
    %c0 = arith.constant 0 : index
    %c0_0 = arith.constant 0 : index
    %0 = vector.load %arg1[%c0, %c0_0] : memref<256x128xbf16, #tpu.memory_space<vmem>>, vector<256x128xbf16>
    %c0_1 = arith.constant 0 : index
    %c0_2 = arith.constant 0 : index
    %1 = vector.load %arg2[%c0_1, %c0_2] : memref<128x384xbf16, #tpu.memory_space<vmem>>, vector<128x384xbf16>
    %cst = arith.constant dense<0.000000e+00> : vector<256x384xf32>
    %2 = tpu.matmul %0, %1, %cst {dimension_numbers = #tpu.dot_dimension_numbers<[1], [0], [0], [1], [0, 0, 1, 1], [], []>} : vector<256x128xbf16>, vector<128x384xbf16>, vector<256x384xf32> -> vector<256x384xf32>
    %cst_3 = arith.constant dense<0.000000e+00> : vector<384xf32>
    %3 = vector.multi_reduction <add>, %2, %cst_3 [0] : vector<256x384xf32> to vector<384xf32>
    %4 = vector.shape_cast %3 : vector<384xf32> to vector<1x384xf32>
    %5 = arith.mulf %2, %2 : vector<256x384xf32>
    %cst_4 = arith.constant dense<0.000000e+00> : vector<384xf32>
    %6 = vector.multi_reduction <add>, %5, %cst_4 [0] : vector<256x384xf32> to vector<384xf32>
    %7 = vector.shape_cast %6 : vector<384xf32> to vector<1x384xf32>
    %cst_5 = arith.constant 3.906250e-03 : f32
    %8 = vector.broadcast %cst_5 : f32 to vector<1x384xf32>
    %9 = arith.mulf %4, %8 : vector<1x384xf32>
    %cst_6 = arith.constant 3.906250e-03 : f32
    %10 = vector.broadcast %cst_6 : f32 to vector<1x384xf32>
    %11 = arith.mulf %7, %10 : vector<1x384xf32>
    %12 = arith.mulf %9, %9 : vector<1x384xf32>
    %13 = arith.subf %11, %12 : vector<1x384xf32>
    %cst_7 = arith.constant 0.000000e+00 : f32
    %14 = vector.broadcast %cst_7 : f32 to vector<1x384xf32>
    %15 = arith.maximumf %13, %14 : vector<1x384xf32>
    %c0_8 = arith.constant 0 : index
    %c0_9 = arith.constant 0 : index
    %16 = vector.load %arg6[%c0_8, %c0_9] : memref<8x384xf32, #tpu.memory_space<vmem>>, vector<1x384xf32>
    %c3 = arith.constant 3 : index
    %c0_10 = arith.constant 0 : index
    %17 = vector.load %arg6[%c3, %c0_10] : memref<8x384xf32, #tpu.memory_space<vmem>>, vector<1x384xf32>
    %cst_11 = arith.constant 9.99999974E-6 : f32
    %18 = vector.broadcast %cst_11 : f32 to vector<1x384xf32>
    %19 = arith.addf %15, %18 : vector<1x384xf32>
    %20 = math.rsqrt %19 : vector<1x384xf32>
    %21 = arith.mulf %16, %20 : vector<1x384xf32>
    %22 = arith.mulf %9, %21 : vector<1x384xf32>
    %23 = arith.subf %17, %22 : vector<1x384xf32>
    %24 = vector.broadcast %21 : vector<1x384xf32> to vector<256x384xf32>
    %25 = arith.mulf %2, %24 : vector<256x384xf32>
    %26 = vector.broadcast %23 : vector<1x384xf32> to vector<256x384xf32>
    %27 = arith.addf %25, %26 : vector<256x384xf32>
    %cst_12 = arith.constant 0.000000e+00 : f32
    %28 = vector.broadcast %cst_12 : f32 to vector<256x384xf32>
    %29 = arith.maximumf %27, %28 : vector<256x384xf32>
    %30 = arith.truncf %29 : vector<256x384xf32> to vector<256x384xbf16>
    %c0_13 = arith.constant 0 : index
    %c0_14 = arith.constant 0 : index
    %31 = vector.load %arg3[%c0_13, %c0_14] : memref<384x384xbf16, #tpu.memory_space<vmem>>, vector<384x384xbf16>
    %cst_15 = arith.constant dense<0.000000e+00> : vector<256x384xf32>
    %32 = tpu.matmul %30, %31, %cst_15 {dimension_numbers = #tpu.dot_dimension_numbers<[1], [0], [0], [1], [0, 0, 1, 1], [], []>} : vector<256x384xbf16>, vector<384x384xbf16>, vector<256x384xf32> -> vector<256x384xf32>
    %cst_16 = arith.constant dense<0.000000e+00> : vector<384xf32>
    %33 = vector.multi_reduction <add>, %32, %cst_16 [0] : vector<256x384xf32> to vector<384xf32>
    %34 = vector.shape_cast %33 : vector<384xf32> to vector<1x384xf32>
    %35 = arith.mulf %32, %32 : vector<256x384xf32>
    %cst_17 = arith.constant dense<0.000000e+00> : vector<384xf32>
    %36 = vector.multi_reduction <add>, %35, %cst_17 [0] : vector<256x384xf32> to vector<384xf32>
    %37 = vector.shape_cast %36 : vector<384xf32> to vector<1x384xf32>
    %cst_18 = arith.constant 3.906250e-03 : f32
    %38 = vector.broadcast %cst_18 : f32 to vector<1x384xf32>
    %39 = arith.mulf %34, %38 : vector<1x384xf32>
    %cst_19 = arith.constant 3.906250e-03 : f32
    %40 = vector.broadcast %cst_19 : f32 to vector<1x384xf32>
    %41 = arith.mulf %37, %40 : vector<1x384xf32>
    %42 = arith.mulf %39, %39 : vector<1x384xf32>
    %43 = arith.subf %41, %42 : vector<1x384xf32>
    %cst_20 = arith.constant 0.000000e+00 : f32
    %44 = vector.broadcast %cst_20 : f32 to vector<1x384xf32>
    %45 = arith.maximumf %43, %44 : vector<1x384xf32>
    %c1 = arith.constant 1 : index
    %c0_21 = arith.constant 0 : index
    %46 = vector.load %arg6[%c1, %c0_21] : memref<8x384xf32, #tpu.memory_space<vmem>>, vector<1x384xf32>
    %c4 = arith.constant 4 : index
    %c0_22 = arith.constant 0 : index
    %47 = vector.load %arg6[%c4, %c0_22] : memref<8x384xf32, #tpu.memory_space<vmem>>, vector<1x384xf32>
    %cst_23 = arith.constant 9.99999974E-6 : f32
    %48 = vector.broadcast %cst_23 : f32 to vector<1x384xf32>
    %49 = arith.addf %45, %48 : vector<1x384xf32>
    %50 = math.rsqrt %49 : vector<1x384xf32>
    %51 = arith.mulf %46, %50 : vector<1x384xf32>
    %52 = arith.mulf %39, %51 : vector<1x384xf32>
    %53 = arith.subf %47, %52 : vector<1x384xf32>
    %54 = vector.broadcast %51 : vector<1x384xf32> to vector<256x384xf32>
    %55 = arith.mulf %32, %54 : vector<256x384xf32>
    %56 = vector.broadcast %53 : vector<1x384xf32> to vector<256x384xf32>
    %57 = arith.addf %55, %56 : vector<256x384xf32>
    %cst_24 = arith.constant 0.000000e+00 : f32
    %58 = vector.broadcast %cst_24 : f32 to vector<256x384xf32>
    %59 = arith.maximumf %57, %58 : vector<256x384xf32>
    %60 = arith.truncf %59 : vector<256x384xf32> to vector<256x384xbf16>
    %c0_25 = arith.constant 0 : index
    %c0_26 = arith.constant 0 : index
    %61 = vector.load %arg4[%c0_25, %c0_26] : memref<384x384xbf16, #tpu.memory_space<vmem>>, vector<384x384xbf16>
    %cst_27 = arith.constant dense<0.000000e+00> : vector<256x384xf32>
    %62 = tpu.matmul %60, %61, %cst_27 {dimension_numbers = #tpu.dot_dimension_numbers<[1], [0], [0], [1], [0, 0, 1, 1], [], []>} : vector<256x384xbf16>, vector<384x384xbf16>, vector<256x384xf32> -> vector<256x384xf32>
    %cst_28 = arith.constant dense<0.000000e+00> : vector<384xf32>
    %63 = vector.multi_reduction <add>, %62, %cst_28 [0] : vector<256x384xf32> to vector<384xf32>
    %64 = vector.shape_cast %63 : vector<384xf32> to vector<1x384xf32>
    %65 = arith.mulf %62, %62 : vector<256x384xf32>
    %cst_29 = arith.constant dense<0.000000e+00> : vector<384xf32>
    %66 = vector.multi_reduction <add>, %65, %cst_29 [0] : vector<256x384xf32> to vector<384xf32>
    %67 = vector.shape_cast %66 : vector<384xf32> to vector<1x384xf32>
    %cst_30 = arith.constant 3.906250e-03 : f32
    %68 = vector.broadcast %cst_30 : f32 to vector<1x384xf32>
    %69 = arith.mulf %64, %68 : vector<1x384xf32>
    %cst_31 = arith.constant 3.906250e-03 : f32
    %70 = vector.broadcast %cst_31 : f32 to vector<1x384xf32>
    %71 = arith.mulf %67, %70 : vector<1x384xf32>
    %72 = arith.mulf %69, %69 : vector<1x384xf32>
    %73 = arith.subf %71, %72 : vector<1x384xf32>
    %cst_32 = arith.constant 0.000000e+00 : f32
    %74 = vector.broadcast %cst_32 : f32 to vector<1x384xf32>
    %75 = arith.maximumf %73, %74 : vector<1x384xf32>
    %c2 = arith.constant 2 : index
    %c0_33 = arith.constant 0 : index
    %76 = vector.load %arg6[%c2, %c0_33] : memref<8x384xf32, #tpu.memory_space<vmem>>, vector<1x384xf32>
    %c5 = arith.constant 5 : index
    %c0_34 = arith.constant 0 : index
    %77 = vector.load %arg6[%c5, %c0_34] : memref<8x384xf32, #tpu.memory_space<vmem>>, vector<1x384xf32>
    %cst_35 = arith.constant 9.99999974E-6 : f32
    %78 = vector.broadcast %cst_35 : f32 to vector<1x384xf32>
    %79 = arith.addf %75, %78 : vector<1x384xf32>
    %80 = math.rsqrt %79 : vector<1x384xf32>
    %81 = arith.mulf %76, %80 : vector<1x384xf32>
    %82 = arith.mulf %69, %81 : vector<1x384xf32>
    %83 = arith.subf %77, %82 : vector<1x384xf32>
    %84 = vector.broadcast %81 : vector<1x384xf32> to vector<256x384xf32>
    %85 = arith.mulf %62, %84 : vector<256x384xf32>
    %86 = vector.broadcast %83 : vector<1x384xf32> to vector<256x384xf32>
    %87 = arith.addf %85, %86 : vector<256x384xf32>
    %cst_36 = arith.constant 0.000000e+00 : f32
    %88 = vector.broadcast %cst_36 : f32 to vector<256x384xf32>
    %89 = arith.maximumf %87, %88 : vector<256x384xf32>
    %90 = arith.truncf %89 : vector<256x384xf32> to vector<256x384xbf16>
    %c0_37 = arith.constant 0 : index
    %c0_38 = arith.constant 0 : index
    %91 = vector.load %arg5[%c0_37, %c0_38] : memref<384x128xbf16, #tpu.memory_space<vmem>>, vector<384x128xbf16>
    %cst_39 = arith.constant dense<0.000000e+00> : vector<256x128xf32>
    %92 = tpu.matmul %90, %91, %cst_39 {dimension_numbers = #tpu.dot_dimension_numbers<[1], [0], [0], [1], [0, 0, 1, 1], [], []>} : vector<256x384xbf16>, vector<384x128xbf16>, vector<256x128xf32> -> vector<256x128xf32>
    %c6 = arith.constant 6 : index
    %c0_40 = arith.constant 0 : index
    %93 = vector.load %arg6[%c6, %c0_40] : memref<8x384xf32, #tpu.memory_space<vmem>>, vector<1x128xf32>
    %94 = vector.broadcast %93 : vector<1x128xf32> to vector<256x128xf32>
    %95 = arith.addf %92, %94 : vector<256x128xf32>
    %c0_41 = arith.constant 0 : index
    %c0_42 = arith.constant 0 : index
    %96 = vector.load %arg7[%c0_41, %c0_42] : memref<256x128xf32, #tpu.memory_space<vmem>>, vector<256x128xf32>
    tpu.vector_store %arg7[%c0_41, %c0_42], %95 {strides = array<i32>} : memref<256x128xf32, #tpu.memory_space<vmem>>, vector<256x128xf32>,
    return
  }
  func.func @transform_0(%arg0: i32) -> (i32, i32) {
    %c0_i32 = arith.constant 0 : i32
    %c0_i32_0 = arith.constant 0 : i32
    return %arg0, %c0_i32 : i32, i32
  }
  func.func @transform_1(%arg0: i32) -> (i32, i32) {
    %c0_i32 = arith.constant 0 : i32
    %c0_i32_0 = arith.constant 0 : i32
    %c0_i32_1 = arith.constant 0 : i32
    return %c0_i32, %c0_i32_0 : i32, i32
  }
  func.func @transform_2(%arg0: i32) -> (i32, i32) {
    %c0_i32 = arith.constant 0 : i32
    %c0_i32_0 = arith.constant 0 : i32
    %c0_i32_1 = arith.constant 0 : i32
    return %c0_i32, %c0_i32_0 : i32, i32
  }
  func.func @transform_3(%arg0: i32) -> (i32, i32) {
    %c0_i32 = arith.constant 0 : i32
    %c0_i32_0 = arith.constant 0 : i32
    %c0_i32_1 = arith.constant 0 : i32
    return %c0_i32, %c0_i32_0 : i32, i32
  }
  func.func @transform_4(%arg0: i32) -> (i32, i32) {
    %c0_i32 = arith.constant 0 : i32
    %c0_i32_0 = arith.constant 0 : i32
    %c0_i32_1 = arith.constant 0 : i32
    return %c0_i32, %c0_i32_0 : i32, i32
  }
  func.func @transform_5(%arg0: i32) -> (i32, i32) {
    %c0_i32 = arith.constant 0 : i32
    %c0_i32_0 = arith.constant 0 : i32
    %c0_i32_1 = arith.constant 0 : i32
    return %c0_i32, %c0_i32_0 : i32, i32
  }
  func.func @transform_6(%arg0: i32) -> (i32, i32) {
    %c0_i32 = arith.constant 0 : i32
    %c0_i32_0 = arith.constant 0 : i32
    return %arg0, %c0_i32 : i32, i32
  }
}

</mosaic_0001>

<bundles_post_ra>
// kernel: tpu_custom_call.1
= control target key start
LH: loop header
LB: loop body
LE: loop exit
PB: predicated region body
PF: predicated region fallthrough
CT: control target
= control target key end

     0   :  { %11 = vsyncpa [#allocation3], 0  ;;  %s11955_s0 = inlined_call_operand.hbm [shape: bf16[256,128], index: 0, kind: input, shape index: {}]   ;;  %s11956_s1 = inlined_call_operand.hbm [shape: bf16[128,384], index: 1, kind: input, shape index: {}]   ;;  %s11957_s2 = inlined_call_operand.hbm [shape: bf16[384,384], index: 2, kind: input, shape index: {}]   ;;  %s11958_s3 = inlined_call_operand.hbm [shape: bf16[384,384], index: 3, kind: input, shape index: {}]   ;;  %s11959_s4 = inlined_call_operand.hbm [shape: bf16[384,128], index: 4, kind: input, shape index: {}]   ;;  %s11960_s5 = inlined_call_operand.hbm [shape: f32[8,384], index: 5, kind: input, shape index: {}]   ;;  %s11961_s6 = inlined_call_operand.hbm [shape: f32[256,128], index: 6, kind: output, shape index: {}]  }
   0x1   :  { %12 = vsyncpa [#allocation6], 0 }
   0x2   :  { %13 = vsyncpa [#allocation9], 0 }
   0x3   :  { %14 = vsyncpa [#allocation12], 0 }
   0x4   :  { %15 = vsyncpa [#allocation4], 0  ;;  %s7278_s21 = smov [#allocation5]  }
   0x5   :  { %s33_s22 = sshll.u32 %s7278_s21, 4  ;;  %s34_s22 = int_to_ptr.vmem [resolvable:$true] %s33_s22 }
   0x6   :  { %s7136_s23 = scalar_lea.vmem %s34_s22, 3072  ;;  %p7141_p1 = scmp.lt.s32.totalorder %s34_s22, %s34_s22 }
   0x7   :  { %p7137_p0 = scmp.ne.s32.totalorder %s34_s22, %s7136_s23  ;;  %p7142_p2 = scmp.lt.s32.totalorder %s7136_s23, %s7136_s23 }
   0x9   :  { %p7143_p3 = por %p7142_p2, %p7141_p1 }
   0xb   :  { %p7144_p4 = pnand %p7143_p3, %p7137_p0 }
   0xd   :  { %7147 = shalt.err (!%p7144_p4)
}
   0xe   :  { %s7279_s24 = smov 192   ;;  %s7280_s25 = smov 12  }
   0xf   :  { %39 = dma.hbm_to_vmem [thread:$0]  %s11956_s1, 3072, %s34_s22, [#allocation6], %s7279_s24, %s7279_s24, %s7280_s25  }
  0x10   :  { %s7281_s28 = smov [#allocation8]   ;;  %s7282_s30 = smov [#allocation2]  }
  0x11   :  { %s57_s29 = sshll.u32 %s7281_s28, 4  ;;  %s21_s7 = sshll.u32 %s7282_s30, 4  ;;  %s58_s29 = int_to_ptr.vmem [resolvable:$true] %s57_s29  ;;  %s22_s7 = int_to_ptr.vmem [resolvable:$true] %s21_s7 }
  0x12   :  { %s7156_s8 = scalar_lea.vmem %s58_s29, 9216  ;;  %p7161_p6 = scmp.lt.s32.totalorder %s58_s29, %s58_s29 }
  0x13   :  { %p7157_p5 = scmp.ne.s32.totalorder %s58_s29, %s7156_s8  ;;  %p7162_p7 = scmp.lt.s32.totalorder %s7156_s8, %s7156_s8 }
  0x15   :  { %p7163_p8 = por %p7162_p7, %p7161_p6 }
  0x17   :  { %p7164_p9 = pnand %p7163_p8, %p7157_p5 }
  0x19   :  { %7167 = shalt.err (!%p7164_p9)
}
  0x1a   :  { %63 = dma.hbm_to_vmem [thread:$0]  %s11958_s3, 9216, %s58_s29, [#allocation9], %s7279_s24, %s7279_s24, %s7280_s25  }
  0x1b   :  { %s7176_s1 = scalar_lea.vmem %s22_s7, 2048  ;;  %p7181_p11 = scmp.lt.s32.totalorder %s22_s7, %s22_s7 }
  0x1c   :  { %p7177_p10 = scmp.ne.s32.totalorder %s22_s7, %s7176_s1  ;;  %p7182_p12 = scmp.lt.s32.totalorder %s7176_s1, %s7176_s1 }
  0x1e   :  { %p7183_p13 = por %p7182_p12, %p7181_p11 }
  0x20   :  { %p7184_p0 = pnand %p7183_p13, %p7177_p10 }
  0x22   :  { %7187 = shalt.err (!%p7184_p0)
}
  0x23   :  { %s7283_s11 = smov 64   ;;  %s7284_s12 = smov 4  }
  0x24   :  { %27 = dma.hbm_to_vmem [thread:$0]  %s11955_s0, 2048, %s22_s7, [#allocation3], %s7283_s11, %s7283_s11, %s7284_s12  }
  0x25   :  { %s7285_s15 = smov [#allocation7]   ;;  %s7286_s17 = smov [#allocation10]  }
  0x26   :  { %s45_s16 = sshll.u32 %s7285_s15, 4  ;;  %s69_s18 = sshll.u32 %s7286_s17, 4  ;;  %s46_s16 = int_to_ptr.vmem [resolvable:$true] %s45_s16  ;;  %s70_s18 = int_to_ptr.vmem [resolvable:$true] %s69_s18 }
  0x27   :  { %s7196_s3 = scalar_lea.vmem %s46_s16, 9216  ;;  %p7201_p2 = scmp.lt.s32.totalorder %s46_s16, %s46_s16 }
  0x28   :  { %p7197_p1 = scmp.ne.s32.totalorder %s46_s16, %s7196_s3  ;;  %p7202_p3 = scmp.lt.s32.totalorder %s7196_s3, %s7196_s3 }
  0x2a   :  { %p7203_p4 = por %p7202_p3, %p7201_p2 }
  0x2c   :  { %p7204_p5 = pnand %p7203_p4, %p7197_p1 }
  0x2e   :  { %7207 = shalt.err (!%p7204_p5)
}
  0x2f   :  { %51 = dma.hbm_to_vmem [thread:$0]  %s11957_s2, 9216, %s46_s16, [#allocation6], %s7279_s24, %s7279_s24, %s7280_s25  }
  0x30   :  { %s7216_s0 = scalar_lea.vmem %s70_s18, 3072  ;;  %p7221_p7 = scmp.lt.s32.totalorder %s70_s18, %s70_s18 }
  0x31   :  { %p7217_p6 = scmp.ne.s32.totalorder %s70_s18, %s7216_s0  ;;  %p7222_p8 = scmp.lt.s32.totalorder %s7216_s0, %s7216_s0 }
  0x33   :  { %p7223_p9 = por %p7222_p8, %p7221_p7 }
  0x35   :  { %p7224_p10 = pnand %p7223_p9, %p7217_p6 }
  0x37   :  { %7227 = shalt.err (!%p7224_p10)
}
  0x38   :  { %75 = dma.hbm_to_vmem [thread:$0]  %s11959_s4, 3072, %s70_s18, [#allocation9], %s7283_s11, %s7283_s11, %s7284_s12  }
  0x39   :  { %s7287_s23 = smov [#allocation11]  }
  0x3a   :  { %s82_s26 = sshll.u32 %s7287_s23, 4  ;;  %s83_s26 = int_to_ptr.vmem [resolvable:$true] %s82_s26 }
  0x3b   :  { %s7236_s27 = scalar_lea.vmem %s83_s26, 384  ;;  %p7241_p12 = scmp.lt.s32.totalorder %s83_s26, %s83_s26 }
  0x3c   :  { %p7237_p11 = scmp.ne.s32.totalorder %s83_s26, %s7236_s27  ;;  %p7242_p13 = scmp.lt.s32.totalorder %s7236_s27, %s7236_s27 }
  0x3e   :  { %p7243_p0 = por %p7242_p13, %p7241_p12 }
  0x40   :  { %p7244_p1 = pnand %p7243_p0, %p7237_p11 }
  0x42   :  { %7247 = shalt.err (!%p7244_p1)
}
  0x43   :  { %85 = dma.hbm_to_vmem [thread:$0]  %s11960_s5, 384, %s83_s26, [#allocation12]  }
  0x44   :  { %7268 = dma.done.wait [#allocation3], 2048  }
  0x45   :  { %7269 = vsyncadd [#allocation3], 4294965248 }
  0x46   :  { %7270 = dma.done.wait [#allocation6], 12288  }
  0x47   :  { %7271 = vsyncadd [#allocation6], 4294955008 }
  0x48   :  { %7272 = dma.done.wait [#allocation9], 12288  }
  0x49   :  { %7273 = vsyncadd [#allocation9], 4294955008 }
  0x4a   :  { %7274 = dma.done.wait [#allocation12], 384  }
  0x4b   :  { %7275 = vsyncadd [#allocation12], 4294966912  ;;  %v11962_v0 = vmov 0   ;;  %v6846_v1 = vld [vmem:[#allocation5 + $0xac] ss:$12 sps:$4 sm:$0xff]   ;;  %v6870_v9 = vld [vmem:[#allocation2] sm:$0xff]  }
  0x4c   :  { %425 = vmatprep.mubr.bf16.mxu0 %v11962_v0  ;;  %v6848_v2 = vld [vmem:[#allocation5 + $0xa8] ss:$12 sps:$4 sm:$0xff]   ;;  %393 = vmatprep.subr.bf16.mxu0 %v6846_v1  ;;  %v6851_v4 = vld [vmem:[#allocation5 + $0x90] ss:$12 sps:$4 sm:$0xff]   ;;  %v6854_v6 = vld [vmem:[#allocation5 + $0x78] ss:$12 sps:$4 sm:$0xff]  }
  0x4d   :  { %v6849_v3 = vld [vmem:[#allocation5 + $0x94] ss:$12 sps:$4 sm:$0xff]   ;;  %394 = vmatpush1.bf16.msra.mxu0 %v6848_v2  ;;  %v6852_v5 = vld [vmem:[#allocation5 + $0x7c] ss:$12 sps:$4 sm:$0xff]   ;;  %v6855_v7 = vld [vmem:[#allocation5 + $0x64] ss:$12 sps:$4 sm:$0xff]   ;;  %6655 = vmatprep.mubr.bf16.mxu1 %v6870_v9 }
  0x4e   :  { %395 = vmatprep.subr.bf16.mxu0 %v6849_v3  ;;  %v6857_v8 = vld [vmem:[#allocation5 + $0x60] ss:$12 sps:$4 sm:$0xff]   ;;  %v6872_v11 = vld [vmem:[#allocation5 + $0xb0] ss:$12 sps:$4 sm:$0xff]   ;;  %v6860_v12 = vld [vmem:[#allocation5 + $0x48] ss:$12 sps:$4 sm:$0xff]  }
  0x4f   :  { %v6858_v10 = vld [vmem:[#allocation5 + $0x4c] ss:$12 sps:$4 sm:$0xff]   ;;  %6639 = vmatprep.subr.bf16.mxu1 %v6872_v11  ;;  %v6861_v14 = vld [vmem:[#allocation5 + $0x34] ss:$12 sps:$4 sm:$0xff]   ;;  %v6863_v16 = vld [vmem:[#allocation5 + $0x30] ss:$12 sps:$4 sm:$0xff]  }
  0x50   :  { %v6874_v13 = vld [vmem:[#allocation5 + $0x98] ss:$12 sps:$4 sm:$0xff]   ;;  %6640 = vmatpush3.bf16.msra.mxu1 %v6872_v11  ;;  %v6875_v15 = vld [vmem:[#allocation5 + $0x80] ss:$12 sps:$4 sm:$0xff]   ;;  %v6864_v17 = vld [vmem:[#allocation5 + $0x1c] ss:$12 sps:$4 sm:$0xff]  }
  0x51   :  { %396 = vmatpush1.bf16.msra.mxu0 %v6851_v4  ;;  %6641 = vmatprep.subr.bf16.mxu1 %v6874_v13  ;;  %v6877_v18 = vld [vmem:[#allocation5 + $0x68] ss:$12 sps:$4 sm:$0xff]   ;;  %v6866_v19 = vld [vmem:[#allocation5 + $0x18] ss:$12 sps:$4 sm:$0xff]   ;;  %v6878_v21 = vld [vmem:[#allocation5 + $0x50] ss:$12 sps:$4 sm:$0xff]  }
  0x52   :  { %397 = vmatprep.subr.bf16.mxu0 %v6852_v5  ;;  %v6867_v20 = vld [vmem:[#allocation5 + $0x4] ss:$12 sps:$4 sm:$0xff]   ;;  %v6869_v22 = vld [vmem:[#allocation5] ss:$12 sps:$4 sm:$0xff]   ;;  %v6883_v25 = vld [vmem:[#allocation5 + $0x8] ss:$12 sps:$4 sm:$0xff]  }
  0x53   :  { %v6880_v23 = vld [vmem:[#allocation5 + $0x38] ss:$12 sps:$4 sm:$0xff]   ;;  %v6881_v24 = vld [vmem:[#allocation5 + $0x20] ss:$12 sps:$4 sm:$0xff]   ;;  %v6873_v27 = vld [vmem:[#allocation2 + $0x10] sm:$0xff]   ;;  %s7290_s4 = smov [#allocation13]  }
  0x54   :  { %6642 = vmatpush3.bf16.msra.mxu1 %v6874_v13  ;;  %v6871_v26 = vld [vmem:[#allocation2 + $0x8] sm:$0xff]   ;;  %v6876_v28 = vld [vmem:[#allocation2 + $0x18] sm:$0xff]   ;;  %v6879_v29 = vld [vmem:[#allocation2 + $0x20] sm:$0xff]   ;;  %s5984_s5 = sshll.u32 %s7290_s4, 4  ;;  %s5985_s5 = int_to_ptr.vmem [resolvable:$true] %s5984_s5 }
  0x55   :  { %398 = vmatpush1.bf16.msra.mxu0 %v6854_v6  ;;  %6643 = vmatprep.subr.bf16.mxu1 %v6875_v15  ;;  %v6882_v30 = vld [vmem:[#allocation2 + $0x28] sm:$0xff]   ;;  %v6884_v31 = vld [vmem:[#allocation2 + $0x30] sm:$0xff]   ;;  %v6885_v32 = vld [vmem:[#allocation2 + $0x38] sm:$0xff]   ;;  %s7248_s25 = scalar_lea.vmem %s5985_s5, 4096  ;;  %p7253_p3 = scmp.lt.s32.totalorder %s5985_s5, %s5985_s5 }
  0x56   :  { %399 = vmatprep.subr.bf16.mxu0 %v6855_v7  ;;  %v6886_v33 = vld [vmem:[#allocation2 + $0x40] sm:$0xff]   ;;  %v6887_v34 = vld [vmem:[#allocation2 + $0x48] sm:$0xff]   ;;  %v6888_v35 = vld [vmem:[#allocation2 + $0x50] sm:$0xff]   ;;  %p7249_p2 = scmp.ne.s32.totalorder %s5985_s5, %s7248_s25  ;;  %p7254_p4 = scmp.lt.s32.totalorder %s7248_s25, %s7248_s25 }
  0x57   :  { %v6889_v36 = vld [vmem:[#allocation2 + $0x58] sm:$0xff]   ;;  %v6890_v37 = vld [vmem:[#allocation2 + $0x60] sm:$0xff]   ;;  %v6891_v38 = vld [vmem:[#allocation2 + $0x68] sm:$0xff]  }
  0x58   :  { %6644 = vmatpush3.bf16.msra.mxu1 %v6875_v15  ;;  %v6892_v39 = vld [vmem:[#allocation2 + $0x70] sm:$0xff]   ;;  %v6893_v40 = vld [vmem:[#allocation2 + $0x78] sm:$0xff]   ;;  %p7255_p5 = por %p7254_p4, %p7253_p3 }
  0x59   :  { %400 = vmatpush1.bf16.msra.mxu0 %v6857_v8  ;;  %6645 = vmatprep.subr.bf16.mxu1 %v6877_v18 }
  0x5a   :  { %401 = vmatprep.subr.bf16.mxu0 %v6858_v10  ;;  %p7256_p6 = pnand %p7255_p5, %p7249_p2 }
  0x5c   :  { %6646 = vmatpush3.bf16.msra.mxu1 %v6877_v18 }
  0x5d   :  { %402 = vmatpush1.bf16.msra.mxu0 %v6860_v12  ;;  %6647 = vmatprep.subr.bf16.mxu1 %v6878_v21 }
  0x5e   :  { %403 = vmatprep.subr.bf16.mxu0 %v6861_v14 }
  0x60   :  { %6648 = vmatpush3.bf16.msra.mxu1 %v6878_v21 }
  0x61   :  { %404 = vmatpush1.bf16.msra.mxu0 %v6863_v16  ;;  %6649 = vmatprep.subr.bf16.mxu1 %v6880_v23 }
  0x62   :  { %405 = vmatprep.subr.bf16.mxu0 %v6864_v17 }
  0x64   :  { %6650 = vmatpush3.bf16.msra.mxu1 %v6880_v23 }
  0x65   :  { %406 = vmatpush1.bf16.msra.mxu0 %v6866_v19  ;;  %6651 = vmatprep.subr.bf16.mxu1 %v6881_v24 }
  0x66   :  { %407 = vmatprep.subr.bf16.mxu0 %v6867_v20 }
  0x68   :  { %6652 = vmatpush3.bf16.msra.mxu1 %v6881_v24 }
  0x69   :  { %408 = vmatpush1.bf16.msra.mxu0 %v6869_v22  ;;  %6653 = vmatprep.subr.bf16.mxu1 %v6883_v25 }
  0x6c   :  { %426 = vmatmul.mubr.bf16.vlgmr.msra.gmra.mxu0 %v6870_v9  ;;  %6654 = vmatpush3.bf16.msra.mxu1 %v6883_v25 }
  0x6d   :  { %435 = vmatprep.mubr.bf16.mxu0 %v11962_v0 }
  0x6f   :  { %6656 = vmatmul.mubr.bf16.vlgmr.msra.gmra.mxu1 %v6871_v26 }
  0x70   :  { %6659 = vmatprep.mubr.bf16.mxu1 %v6873_v27 }
  0x74   :  { %436 = vmatmul.mubr.bf16.gmra.mxu0 %v6871_v26 }
  0x75   :  { %445 = vmatprep.mubr.bf16.mxu0 %v11962_v0 }
  0x77   :  { %6660 = vmatmul.mubr.bf16.gmra.mxu1 %v6876_v28 }
  0x78   :  { %6663 = vmatprep.mubr.bf16.mxu1 %v6879_v29 }
  0x7c   :  { %446 = vmatmul.mubr.bf16.gmra.mxu0 %v6873_v27 }
  0x7d   :  { %455 = vmatprep.mubr.bf16.mxu0 %v11962_v0 }
  0x7f   :  { %6664 = vmatmul.mubr.bf16.gmra.mxu1 %v6882_v30 }
  0x80   :  { %6667 = vmatprep.mubr.bf16.mxu1 %v6884_v31 }
  0x84   :  { %456 = vmatmul.mubr.bf16.gmra.mxu0 %v6876_v28 }
  0x85   :  { %465 = vmatprep.mubr.bf16.mxu0 %v11962_v0 }
  0x87   :  { %6668 = vmatmul.mubr.bf16.gmra.mxu1 %v6885_v32 }
  0x88   :  { %6671 = vmatprep.mubr.bf16.mxu1 %v6886_v33 }
  0x8c   :  { %466 = vmatmul.mubr.bf16.gmra.mxu0 %v6879_v29 }
  0x8d   :  { %475 = vmatprep.mubr.bf16.mxu0 %v11962_v0 }
  0x8f   :  { %6672 = vmatmul.mubr.bf16.gmra.mxu1 %v6887_v34 }
  0x90   :  { %6675 = vmatprep.mubr.bf16.mxu1 %v6888_v35 }
  0x94   :  { %476 = vmatmul.mubr.bf16.gmra.mxu0 %v6882_v30 }
  0x95   :  { %485 = vmatprep.mubr.bf16.mxu0 %v11962_v0 }
  0x97   :  { %6676 = vmatmul.mubr.bf16.gmra.mxu1 %v6889_v36 }
  0x98   :  { %6679 = vmatprep.mubr.bf16.mxu1 %v6890_v37 }
  0x9c   :  { %486 = vmatmul.mubr.bf16.gmra.mxu0 %v6884_v31 }
  0x9d   :  { %495 = vmatprep.mubr.bf16.mxu0 %v11962_v0 }
  0x9f   :  { %6680 = vmatmul.mubr.bf16.gmra.mxu1 %v6891_v38 }
  0xa0   :  { %6683 = vmatprep.mubr.bf16.mxu1 %v6892_v39 }
  0xa4   :  { %496 = vmatmul.mubr.bf16.gmra.mxu0 %v6885_v32 }
  0xa5   :  { %505 = vmatprep.mubr.bf16.mxu0 %v11962_v0 }
  0xa7   :  { %6684 = vmatmul.mubr.bf16.gmra.mxu1 %v6893_v40 }
  0xac   :  { %506 = vmatmul.mubr.bf16.gmra.mxu0 %v6886_v33 }
  0xad   :  { %515 = vmatprep.mubr.bf16.mxu0 %v11962_v0 }
  0xb4   :  { %516 = vmatmul.mubr.bf16.gmra.mxu0 %v6887_v34 }
  0xb5   :  { %525 = vmatprep.mubr.bf16.mxu0 %v11962_v0 }
  0xbc   :  { %526 = vmatmul.mubr.bf16.gmra.mxu0 %v6888_v35 }
  0xbd   :  { %535 = vmatprep.mubr.bf16.mxu0 %v11962_v0 }
  0xc4   :  { %536 = vmatmul.mubr.bf16.gmra.mxu0 %v6889_v36 }
  0xc5   :  { %545 = vmatprep.mubr.bf16.mxu0 %v11962_v0 }
  0xcc   :  { %546 = vmatmul.mubr.bf16.gmra.mxu0 %v6890_v37  ;;  %v6899_v37 = vld [vmem:[#allocation7 + $0xac] ss:$12 sps:$4 sm:$0xff]  }
  0xcd   :  { %555 = vmatprep.mubr.bf16.mxu0 %v11962_v0  ;;  %1996 = vmatprep.subr.bf16.mxu1 %v6899_v37 }
  0xd4   :  { %556 = vmatmul.mubr.bf16.gmra.mxu0 %v6891_v38 }
  0xd5   :  { %565 = vmatprep.mubr.bf16.mxu0 %v11962_v0 }
  0xdc   :  { %566 = vmatmul.mubr.bf16.gmra.mxu0 %v6892_v39  ;;  %v6897_v39 = vld [vmem:[#allocation7 + $0xa8] ss:$12 sps:$4 sm:$0xff]  }
  0xdd   :  { %575 = vmatprep.mubr.bf16.mxu0 %v11962_v0  ;;  %1997 = vmatpush1.bf16.msra.mxu1 %v6897_v39 }
  0xe4   :  { %576 = vmatmul.mubr.bf16.gmra.mxu0 %v6893_v40 }
  0xe5   :  { %2221 = vmatprep.mubr.bf16.mxu0 %v11962_v0  ;;  %v6917_v0 = vld [vmem:[#allocation7 + $0x34] ss:$12 sps:$4 sm:$0xff]  }
 0x12c   :  { %v7372_v41 = vpop.f32.mrf.mxu0 }
 0x12e   :  { %v7374_v42 = vpop.f32.mrf.mxu0 }
 0x12f   :  { %v7386_v48 = vpop.f32.mrf.mxu1 }
 0x130   :  { %v7376_v43 = vpop.f32.mrf.mxu0  ;;  %v866_v57 = vmul.f32 %v7386_v48, %v7386_v48 }
 0x131   :  { %v7390_v50 = vpop.f32.mrf.mxu1 }
 0x132   :  { %v7378_v44 = vpop.f32.mrf.mxu0  ;;  %v860_v54 = vmul.f32 %v7390_v50, %v7390_v50 }
 0x133   :  { %v7394_v52 = vpop.f32.mrf.mxu1 }
 0x134   :  { %v7380_v45 = vpop.f32.mrf.mxu0  ;;  %12253 = vst [vmem:[#allocation21_spill] sm:$0xff] %v7394_v52  ;;  %v869_v62 = vmul.f32 %v7394_v52, %v7394_v52 }
 0x135   :  { %v7400_v55 = vpop.f32.mrf.mxu1 }
 0x136   :  { %v7382_v46 = vpop.f32.mrf.mxu0  ;;  %v821_v58 = vadd.f32 %v7400_v55, %v7390_v50  ;;  %v863_v59 = vmul.f32 %v7400_v55, %v7400_v55 }
 0x137   :  { %v7410_v60 = vpop.f32.mrf.mxu1 }
 0x138   :  { %v7384_v47 = vpop.f32.mrf.mxu0  ;;  %12254 = vst [vmem:[#allocation22_spill] sm:$0xff] %v7410_v60  ;;  %v1028_v63 = vadd.f32 %v863_v59, %v860_v54  ;;  %v822_v1 = vadd.f32 %v7386_v48, %v821_v58  ;;  %v878_v13 = vmul.f32 %v7410_v60, %v7410_v60 }
 0x139   :  { %12251 = vst [vmem:[#allocation19_spill] sm:$0xff] %v7384_v47  ;;  %v7417_v2 = vpop.f32.mrf.mxu1 }
 0x13a   :  { %v7388_v49 = vpop.f32.mrf.mxu0  ;;  %12256 = vst [vmem:[#allocation24_spill] sm:$0xff] %v7417_v2  ;;  %v823_v4 = vadd.f32 %v7394_v52, %v822_v1  ;;  %v872_v5 = vmul.f32 %v7417_v2, %v7417_v2  ;;  %v1029_v6 = vadd.f32 %v1028_v63, %v866_v57 }
 0x13b   :  { %v7424_v7 = vpop.f32.mrf.mxu1 }
 0x13c   :  { %v7392_v51 = vpop.f32.mrf.mxu0  ;;  %12257 = vst [vmem:[#allocation25_spill] sm:$0xff] %v7424_v7  ;;  %v824_v9 = vadd.f32 %v823_v4, %v7417_v2  ;;  %v1030_v10 = vadd.f32 %v1029_v6, %v869_v62  ;;  %v881_v19 = vmul.f32 %v7424_v7, %v7424_v7 }
 0x13d   :  { %12252 = vst [vmem:[#allocation20_spill] sm:$0xff] %v7392_v51  ;;  %v7429_v11 = vpop.f32.mrf.mxu1  ;;  %v870_v2 = vmul.f32 %v7392_v51, %v7392_v51 }
 0x13e   :  { %v7396_v53 = vpop.f32.mrf.mxu0  ;;  %12259 = vst [vmem:[#allocation27_spill] sm:$0xff] %v7429_v11  ;;  %v1031_v14 = vadd.f32 %v1030_v10, %v872_v5  ;;  %v825_v15 = vadd.f32 %v824_v9, %v7429_v11  ;;  %v875_v16 = vmul.f32 %v7429_v11, %v7429_v11  ;;  %v6902_v5 = vld [vmem:[#allocation7 + $0x94] ss:$12 sps:$4 sm:$0xff]   ;;  %v6900_v9 = vld [vmem:[#allocation7 + $0x90] ss:$12 sps:$4 sm:$0xff]  }
 0x13f   :  { %v7438_v17 = vpop.f32.mrf.mxu1  ;;  %1998 = vmatprep.subr.bf16.mxu1 %v6902_v5 }
 0x140   :  { %v7402_v56 = vpop.f32.mrf.mxu0  ;;  %12260 = vst [vmem:[#allocation28_spill] sm:$0xff] %v7438_v17  ;;  %v1032_v20 = vadd.f32 %v1031_v14, %v875_v16  ;;  %v826_v21 = vadd.f32 %v7410_v60, %v825_v15  ;;  %v890_v33 = vmul.f32 %v7438_v17, %v7438_v17  ;;  %1999 = vmatpush1.bf16.msra.mxu1 %v6900_v9  ;;  %v6921_v60 = vld [vmem:[#allocation7] ss:$12 sps:$4 sm:$0xff]  }
 0x141   :  { %v7445_v22 = vpop.f32.mrf.mxu1 }
 0x142   :  { %v7412_v61 = vpop.f32.mrf.mxu0  ;;  %12261 = vst [vmem:[#allocation29_spill] sm:$0xff] %v7445_v22  ;;  %v827_v24 = vadd.f32 %v7424_v7, %v826_v21  ;;  %v884_v25 = vmul.f32 %v7445_v22, %v7445_v22  ;;  %v1033_v26 = vadd.f32 %v1032_v20, %v878_v13 }
 0x143   :  { %12255 = vst [vmem:[#allocation23_spill] sm:$0xff] %v7412_v61  ;;  %v7452_v27 = vpop.f32.mrf.mxu1 }
 0x144   :  { %v7419_v3 = vpop.f32.mrf.mxu0  ;;  %12263 = vst [vmem:[#allocation31_spill] sm:$0xff] %v7452_v27  ;;  %v828_v29 = vadd.f32 %v827_v24, %v7445_v22  ;;  %v1034_v30 = vadd.f32 %v1033_v26, %v881_v19  ;;  %v893_v54 = vmul.f32 %v7452_v27, %v7452_v27 }
 0x145   :  { %v7457_v31 = vpop.f32.mrf.mxu1  ;;  %v876_v52 = vmul.f32 %v7419_v3, %v7419_v3 }
 0x146   :  { %v7426_v8 = vpop.f32.mrf.mxu0  ;;  %12264 = vst [vmem:[#allocation32_spill] sm:$0xff] %v7457_v31  ;;  %v1035_v34 = vadd.f32 %v1034_v30, %v884_v25  ;;  %v829_v35 = vadd.f32 %v828_v29, %v7457_v31  ;;  %v887_v36 = vmul.f32 %v7457_v31, %v7457_v31  ;;  %v6905_v25 = vld [vmem:[#allocation7 + $0x7c] ss:$12 sps:$4 sm:$0xff]   ;;  %v6903_v29 = vld [vmem:[#allocation7 + $0x78] ss:$12 sps:$4 sm:$0xff]  }
 0x147   :  { %12258 = vst [vmem:[#allocation26_spill] sm:$0xff] %v7426_v8  ;;  %v7466_v38 = vpop.f32.mrf.mxu1  ;;  %2000 = vmatprep.subr.bf16.mxu1 %v6905_v25  ;;  %v6914_v25 = vld [vmem:[#allocation7 + $0x4c] ss:$12 sps:$4 sm:$0xff]  }
 0x148   :  { %v7431_v12 = vpop.f32.mrf.mxu0  ;;  %12266 = vst [vmem:[#allocation34_spill] sm:$0xff] %v7466_v38  ;;  %v1036_v57 = vadd.f32 %v1035_v34, %v887_v36  ;;  %v830_v58 = vadd.f32 %v7438_v17, %v829_v35  ;;  %v902_v19 = vmul.f32 %v7466_v38, %v7466_v38  ;;  %2001 = vmatpush1.bf16.msra.mxu1 %v6903_v29 }
 0x149   :  { %v7473_v59 = vpop.f32.mrf.mxu1 }
 0x14a   :  { %v7440_v18 = vpop.f32.mrf.mxu0  ;;  %12268 = vst [vmem:[#allocation36_spill] sm:$0xff] %v7473_v59  ;;  %v831_v63 = vadd.f32 %v7452_v27, %v830_v58  ;;  %v896_v1 = vmul.f32 %v7473_v59, %v7473_v59  ;;  %v1037_v4 = vadd.f32 %v1036_v57, %v890_v33  ;;  %v6908_v58 = vld [vmem:[#allocation7 + $0x64] ss:$12 sps:$4 sm:$0xff]  }
 0x14b   :  { %v7480_v6 = vpop.f32.mrf.mxu1  ;;  %2002 = vmatprep.subr.bf16.mxu1 %v6908_v58 }
 0x14c   :  { %v7447_v23 = vpop.f32.mrf.mxu0  ;;  %12270 = vst [vmem:[#allocation38_spill] sm:$0xff] %v7480_v6  ;;  %v832_v13 = vadd.f32 %v831_v63, %v7473_v59  ;;  %v1038_v14 = vadd.f32 %v1037_v4, %v893_v54  ;;  %v905_v33 = vmul.f32 %v7480_v6, %v7480_v6  ;;  %v784_v59 = vadd.f32 %v7378_v44, %v7374_v42 }
 0x14d   :  { %12262 = vst [vmem:[#allocation30_spill] sm:$0xff] %v7447_v23  ;;  %v7485_v15 = vpop.f32.mrf.mxu1 }
 0x14e   :  { %v7454_v28 = vpop.f32.mrf.mxu0  ;;  %12272 = vst [vmem:[#allocation40_spill] sm:$0xff] %v7485_v15  ;;  %v1039_v20 = vadd.f32 %v1038_v14, %v896_v1  ;;  %v833_v21 = vadd.f32 %v832_v13, %v7485_v15  ;;  %v899_v24 = vmul.f32 %v7485_v15, %v7485_v15  ;;  %v6906_v1 = vld [vmem:[#allocation7 + $0x60] ss:$12 sps:$4 sm:$0xff]   ;;  %v867_v15 = vmul.f32 %v7384_v47, %v7384_v47 }
 0x14f   :  { %v7494_v26 = vpop.f32.mrf.mxu1  ;;  %2003 = vmatpush1.bf16.msra.mxu1 %v6906_v1  ;;  %v785_v11 = vadd.f32 %v784_v59, %v7382_v46 }
 0x150   :  { %v7459_v32 = vpop.f32.mrf.mxu0  ;;  %12274 = vst [vmem:[#allocation42_spill] sm:$0xff] %v7494_v26  ;;  %v1040_v34 = vadd.f32 %v1039_v20, %v899_v24  ;;  %v834_v35 = vadd.f32 %v7466_v38, %v833_v21  ;;  %v914_v20 = vmul.f32 %v7494_v26, %v7494_v26  ;;  %2004 = vmatprep.subr.bf16.mxu1 %v6914_v25  ;;  %v6915_v38 = vld [vmem:[#allocation7 + $0x30] ss:$12 sps:$4 sm:$0xff]  }
 0x151   :  { %12265 = vst [vmem:[#allocation33_spill] sm:$0xff] %v7459_v32  ;;  %v7501_v36 = vpop.f32.mrf.mxu1 }
 0x152   :  { %v7468_v40 = vpop.f32.mrf.mxu0  ;;  %12275 = vst [vmem:[#allocation43_spill] sm:$0xff] %v7501_v36  ;;  %v835_v39 = vadd.f32 %v7480_v6, %v834_v35  ;;  %v908_v54 = vmul.f32 %v7501_v36, %v7501_v36  ;;  %v1041_v57 = vadd.f32 %v1040_v34, %v902_v19  ;;  %v6912_v34 = vld [vmem:[#allocation7 + $0x48] ss:$12 sps:$4 sm:$0xff]  }
 0x153   :  { %12267 = vst [vmem:[#allocation35_spill] sm:$0xff] %v7468_v40  ;;  %v7508_v63 = vpop.f32.mrf.mxu1  ;;  %2005 = vmatpush1.bf16.msra.mxu1 %v6912_v34 }
 0x154   :  { %v7475_v62 = vpop.f32.mrf.mxu0  ;;  %12277 = vst [vmem:[#allocation45_spill] sm:$0xff] %v7508_v63  ;;  %v836_v5 = vadd.f32 %v835_v39, %v7501_v36  ;;  %v1042_v9 = vadd.f32 %v1041_v57, %v905_v33  ;;  %v917_v35 = vmul.f32 %v7508_v63, %v7508_v63  ;;  %2006 = vmatprep.subr.bf16.mxu1 %v6917_v0 }
 0x155   :  { %12269 = vst [vmem:[#allocation37_spill] sm:$0xff] %v7475_v62  ;;  %v7513_v13 = vpop.f32.mrf.mxu1  ;;  %v862_v0 = vmul.f32 %v7378_v44, %v7378_v44  ;;  %v865_v36 = vmul.f32 %v7382_v46, %v7382_v46 }
 0x156   :  { %v7482_v10 = vpop.f32.mrf.mxu0  ;;  %12278 = vst [vmem:[#allocation46_spill] sm:$0xff] %v7513_v13  ;;  %v1043_v21 = vadd.f32 %v1042_v9, %v908_v54  ;;  %v837_v19 = vadd.f32 %v836_v5, %v7513_v13  ;;  %v911_v24 = vmul.f32 %v7513_v13, %v7513_v13 }
 0x157   :  { %12271 = vst [vmem:[#allocation39_spill] sm:$0xff] %v7482_v10  ;;  %v7522_v29 = vpop.f32.mrf.mxu1  ;;  %2007 = vmatpush1.bf16.msra.mxu1 %v6915_v38  ;;  %v6896_v38 = vld [vmem:[#allocation7 + $0x22c] ss:$12 sps:$4 sm:$0xff]  }
 0x158   :  { %v7487_v16 = vpop.f32.mrf.mxu0  ;;  %12280 = vst [vmem:[#allocation48_spill] sm:$0xff] %v7522_v29  ;;  %v1044_v39 = vadd.f32 %v1043_v21, %v911_v24  ;;  %v838_v57 = vadd.f32 %v7494_v26, %v837_v19  ;;  %v861_v24 = vmul.f32 %v7376_v43, %v7376_v43  ;;  %2189 = vmatprep.subr.bf16.mxu0 %v6896_v38 }
 0x159   :  { %12273 = vst [vmem:[#allocation41_spill] sm:$0xff] %v7487_v16  ;;  %v7529_v58 = vpop.f32.mrf.mxu1  ;;  %v926_v17 = vmul.f32 %v7522_v29, %v7522_v29 }
 0x15a   :  { %v7496_v30 = vpop.f32.mrf.mxu0  ;;  %12281 = vst [vmem:[#allocation49_spill] sm:$0xff] %v7529_v58  ;;  %v839_v1 = vadd.f32 %v7508_v63, %v838_v57  ;;  %v920_v5 = vmul.f32 %v7529_v58, %v7529_v58  ;;  %v1045_v9 = vadd.f32 %v1044_v39, %v914_v20  ;;  %v6920_v63 = vld [vmem:[#allocation7 + $0x1c] ss:$12 sps:$4 sm:$0xff]  }
 0x15b   :  { %v7536_v6 = vpop.f32.mrf.mxu1  ;;  %2008 = vmatprep.subr.bf16.mxu1 %v6920_v63 }
 0x15c   :  { %v7503_v37 = vpop.f32.mrf.mxu0  ;;  %12283 = vst [vmem:[#allocation51_spill] sm:$0xff] %v7536_v6  ;;  %v840_v21 = vadd.f32 %v839_v1, %v7529_v58  ;;  %v1046_v19 = vadd.f32 %v1045_v9, %v917_v35  ;;  %v858_v1 = vmul.f32 %v7372_v41, %v7372_v41  ;;  %v864_v35 = vmul.f32 %v7380_v45, %v7380_v45  ;;  %v6918_v58 = vld [vmem:[#allocation7 + $0x18] ss:$12 sps:$4 sm:$0xff]  }
 0x15d   :  { %12276 = vst [vmem:[#allocation44_spill] sm:$0xff] %v7503_v37  ;;  %v7543_v25 = vpop.f32.mrf.mxu1  ;;  %2009 = vmatpush1.bf16.msra.mxu1 %v6918_v58  ;;  %v868_v58 = vmul.f32 %v7388_v49, %v7388_v49  ;;  %v929_v59 = vmul.f32 %v7536_v6, %v7536_v6 }
 0x15e   :  { %v7510_v4 = vpop.f32.mrf.mxu0  ;;  %12285 = vst [vmem:[#allocation53_spill] sm:$0xff] %v7543_v25  ;;  %v1047_v57 = vadd.f32 %v1046_v19, %v920_v5  ;;  %v841_v20 = vadd.f32 %v840_v21, %v7543_v25  ;;  %v923_v39 = vmul.f32 %v7543_v25, %v7543_v25  ;;  %v859_v5 = vmul.f32 %v7374_v42, %v7374_v42  ;;  %v6894_v25 = vld [vmem:[#allocation7 + $0x228] ss:$12 sps:$4 sm:$0xff]  }
 0x15f   :  { %v7556_v9 = vpop.f32.mrf.mxu1  ;;  %v747_v21 = vadd.f32 %v7376_v43, %v7372_v41  ;;  %v954_v26 = vadd.f32 %v861_v24, %v858_v1  ;;  %2190 = vmatpush1.bf16.msra.mxu0 %v6894_v25  ;;  %v6923_v24 = vld [vmem:[#allocation7 + $0x4] ss:$12 sps:$4 sm:$0xff]  }
 0x160   :  { %v7515_v14 = vpop.f32.mrf.mxu0  ;;  %12287 = vst [vmem:[#allocation55_spill] sm:$0xff] %v7556_v9  ;;  %v1048_v31 = vadd.f32 %v1047_v57, %v923_v39  ;;  %v842_v63 = vadd.f32 %v7522_v29, %v841_v20  ;;  %v991_v7 = vadd.f32 %v862_v0, %v859_v5  ;;  %2010 = vmatprep.subr.bf16.mxu1 %v6923_v24  ;;  %v6929_v24 = vld [vmem:[#allocation7 + $0x16c] ss:$12 sps:$4 sm:$0xff]  }
 0x161   :  { %12279 = vst [vmem:[#allocation47_spill] sm:$0xff] %v7515_v14  ;;  %v748_v1 = vadd.f32 %v747_v21, %v7380_v45  ;;  %v955_v22 = vadd.f32 %v954_v26, %v864_v35  ;;  %v7578_v38 = vpop.f32.mrf.mxu1  ;;  %v871_v26 = vmul.f32 %v7396_v53, %v7396_v53  ;;  %2011 = vmatpush1.bf16.msra.mxu1 %v6921_v60 }
 0x162   :  { %v7524_v33 = vpop.f32.mrf.mxu0  ;;  %12289 = vst [vmem:[#allocation57_spill] sm:$0xff] %v7578_v38  ;;  %v992_v25 = vadd.f32 %v991_v7, %v865_v36  ;;  %v873_v0 = vmul.f32 %v7402_v56, %v7402_v56  ;;  %v843_v5 = vadd.f32 %v7536_v6, %v842_v63  ;;  %v1049_v21 = vadd.f32 %v1048_v31, %v926_v17 }
 0x163   :  { %v749_v20 = vadd.f32 %v748_v1, %v7384_v47  ;;  %v956_v39 = vadd.f32 %v955_v22, %v867_v15  ;;  %v786_v22 = vadd.f32 %v785_v11, %v7388_v49  ;;  %v874_v60 = vmul.f32 %v7412_v61, %v7412_v61  ;;  %v7599_v36 = vpop.f32.mrf.mxu1  ;;  %v6927_v1 = vld [vmem:[#allocation7 + $0x168] ss:$12 sps:$4 sm:$0xff]   ;;  %2012 = vmatprep.subr.bf16.mxu1 %v6929_v24  ;;  %v6909_v24 = vld [vmem:[#allocation7 + $0x210] ss:$12 sps:$4 sm:$0xff]  }
 0x164   :  { %v7531_v54 = vpop.f32.mrf.mxu0  ;;  %v993_v15 = vadd.f32 %v992_v25, %v868_v58  ;;  %12291 = vst [vmem:[#allocation59_spill] sm:$0xff] %v7599_v36  ;;  %v877_v11 = vmul.f32 %v7426_v8, %v7426_v8  ;;  %v6911_v58 = vld [vmem:[#allocation7 + $0x214] ss:$12 sps:$4 sm:$0xff]   ;;  %v1050_v6 = vadd.f32 %v1049_v21, %v929_v59 }
 0x165   :  { %12282 = vst [vmem:[#allocation50_spill] sm:$0xff] %v7531_v54  ;;  %v750_v7 = vadd.f32 %v749_v20, %v7392_v51  ;;  %v957_v29 = vadd.f32 %v956_v39, %v870_v2  ;;  %v787_v17 = vadd.f32 %v786_v22, %v7396_v53  ;;  %2013 = vmatpush2.bf16.msra.mxu1 %v6927_v1  ;;  %v6932_v51 = vld [vmem:[#allocation7 + $0x154] ss:$12 sps:$4 sm:$0xff]  }
 0x166   :  { %v7538_v13 = vpop.f32.mrf.mxu0  ;;  %v994_v31 = vadd.f32 %v993_v15, %v871_v26  ;;  %v844_v2 = vadd.f32 %v843_v5, %v7578_v38  ;;  %v932_v39 = vmul.f32 %v7578_v38, %v7578_v38  ;;  %v880_v15 = vmul.f32 %v7440_v18, %v7440_v18  ;;  %2191 = vmatprep.subr.bf16.mxu0 %v6911_v58 }
 0x167   :  { %12284 = vst [vmem:[#allocation52_spill] sm:$0xff] %v7538_v13  ;;  %v751_v63 = vadd.f32 %v750_v7, %v7402_v56  ;;  %v958_v25 = vadd.f32 %v957_v29, %v873_v0  ;;  %v788_v26 = vadd.f32 %v787_v17, %v7412_v61  ;;  %v879_v7 = vmul.f32 %v7431_v12, %v7431_v12  ;;  %v7619_v29 = vpop.f32.mrf.mxu1  ;;  %v6930_v0 = vld [vmem:[#allocation7 + $0x150] ss:$12 sps:$4 sm:$0xff]  }
 0x168   :  { %v7545_v34 = vpop.f32.mrf.mxu0  ;;  %v995_v22 = vadd.f32 %v994_v31, %v874_v60  ;;  %12293 = vst [vmem:[#allocation61_spill] sm:$0xff] %v7619_v29  ;;  %2192 = vmatpush1.bf16.msra.mxu0 %v6909_v24  ;;  %2014 = vmatprep.subr.bf16.mxu1 %v6932_v51  ;;  %v882_v60 = vmul.f32 %v7447_v23, %v7447_v23  ;;  %v6926_v31 = vld [vmem:[#allocation7 + $0x1fc] ss:$12 sps:$4 sm:$0xff]  }
 0x169   :  { %12286 = vst [vmem:[#allocation54_spill] sm:$0xff] %v7545_v34  ;;  %v752_v5 = vadd.f32 %v751_v63, %v7419_v3  ;;  %v959_v1 = vadd.f32 %v958_v25, %v876_v52  ;;  %v789_v59 = vadd.f32 %v788_v26, %v7426_v8  ;;  %v883_v17 = vmul.f32 %v7454_v28, %v7454_v28  ;;  %v6924_v25 = vld [vmem:[#allocation7 + $0x1f8] ss:$12 sps:$4 sm:$0xff]  }
 0x16a   :  { %v7562_v19 = vpop.f32.mrf.mxu0  ;;  %v996_v21 = vadd.f32 %v995_v22, %v877_v11  ;;  %2015 = vmatpush2.bf16.msra.mxu1 %v6930_v0  ;;  %v1051_v52 = vadd.f32 %v1050_v6, %v932_v39  ;;  %v845_v63 = vadd.f32 %v844_v2, %v7619_v29  ;;  %v935_v51 = vmul.f32 %v7619_v29, %v7619_v29  ;;  %v6935_v11 = vld [vmem:[#allocation7 + $0x13c] ss:$12 sps:$4 sm:$0xff]   ;;  %v7638_v0 = vpop.f32.mrf.mxu1 }
 0x16b   :  { %12288 = vst [vmem:[#allocation56_spill] sm:$0xff] %v7562_v19  ;;  %v753_v58 = vadd.f32 %v752_v5, %v7431_v12  ;;  %v960_v24 = vadd.f32 %v959_v1, %v879_v7  ;;  %v790_v26 = vadd.f32 %v789_v59, %v7440_v18  ;;  %v885_v8 = vmul.f32 %v7459_v32, %v7459_v32  ;;  %v6933_v5 = vld [vmem:[#allocation7 + $0x138] ss:$12 sps:$4 sm:$0xff]  }
 0x16c   :  { %v7570_v27 = vpop.f32.mrf.mxu0  ;;  %v997_v22 = vadd.f32 %v996_v21, %v880_v15  ;;  %12294 = vst [vmem:[#allocation62_spill] sm:$0xff] %v7638_v0  ;;  %2193 = vmatprep.subr.bf16.mxu0 %v6926_v31  ;;  %v886_v2 = vmul.f32 %v7468_v40, %v7468_v40  ;;  %2016 = vmatprep.subr.bf16.mxu1 %v6935_v11  ;;  %v6941_v21 = vld [vmem:[#allocation7 + $0x1e4] ss:$12 sps:$4 sm:$0xff]  }
 0x16d   :  { %v754_v6 = vadd.f32 %v753_v58, %v7447_v23  ;;  %2194 = vmatpush1.bf16.msra.mxu0 %v6924_v25  ;;  %v961_v7 = vadd.f32 %v960_v24, %v882_v60  ;;  %v791_v1 = vadd.f32 %v790_v26, %v7454_v28  ;;  %v888_v59 = vmul.f32 %v7475_v62, %v7475_v62  ;;  %v6938_v11 = vld [vmem:[#allocation7 + $0x124] ss:$12 sps:$4 sm:$0xff]   ;;  %v6939_v60 = vld [vmem:[#allocation7 + $0x1e0] ss:$12 sps:$4 sm:$0xff]  }
 0x16e   :  { %v7583_v57 = vpop.f32.mrf.mxu0  ;;  %v998_v15 = vadd.f32 %v997_v22, %v883_v17  ;;  %2017 = vmatpush2.bf16.msra.mxu1 %v6933_v5  ;;  %v938_v58 = vmul.f32 %v7556_v9, %v7556_v9  ;;  %v1052_v23 = vadd.f32 %v1051_v52, %v935_v51  ;;  %v846_v25 = vadd.f32 %v7556_v9, %v845_v63  ;;  %v7659_v5 = vpop.f32.mrf.mxu1  ;;  %v6947_v9 = vld [vmem:[#allocation7 + $0x1cc] ss:$12 sps:$4 sm:$0xff]  }
 0x16f   :  { %12290 = vst [vmem:[#allocation58_spill] sm:$0xff] %v7583_v57  ;;  %v755_v31 = vadd.f32 %v754_v6, %v7459_v32  ;;  %v962_v24 = vadd.f32 %v961_v7, %v885_v8  ;;  %v792_v17 = vadd.f32 %v791_v1, %v7468_v40  ;;  %v889_v26 = vmul.f32 %v7482_v10, %v7482_v10  ;;  %v6936_v6 = vld [vmem:[#allocation7 + $0x120] ss:$12 sps:$4 sm:$0xff]  }
 0x170   :  { %v7590_v35 = vpop.f32.mrf.mxu0  ;;  %v891_v22 = vmul.f32 %v7487_v16, %v7487_v16  ;;  %12295 = vst [vmem:[#allocation63_spill] sm:$0xff] %v7659_v5  ;;  %2195 = vmatprep.subr.bf16.mxu0 %v6941_v21  ;;  %v999_v52 = vadd.f32 %v998_v15, %v886_v2  ;;  %2018 = vmatprep.subr.bf16.mxu1 %v6938_v11  ;;  %v6945_v11 = vld [vmem:[#allocation7 + $0x1c8] ss:$12 sps:$4 sm:$0xff]  }
 0x171   :  { %v756_v32 = vadd.f32 %v755_v31, %v7475_v62  ;;  %2196 = vmatpush1.bf16.msra.mxu0 %v6939_v60  ;;  %v963_v8 = vadd.f32 %v962_v24, %v888_v59  ;;  %v793_v63 = vadd.f32 %v792_v17, %v7482_v10  ;;  %v892_v7 = vmul.f32 %v7496_v30, %v7496_v30  ;;  %v6944_v31 = vld [vmem:[#allocation7 + $0x10c] ss:$12 sps:$4 sm:$0xff]   ;;  %v7679_v10 = vpop.f32.mrf.mxu1 }
 0x172   :  { %v7603_v47 = vpop.f32.mrf.mxu0  ;;  %v894_v1 = vmul.f32 %v7503_v37, %v7503_v37  ;;  %2019 = vmatpush2.bf16.msra.mxu1 %v6936_v6  ;;  %v941_v2 = vmul.f32 %v7599_v36, %v7599_v36  ;;  %v847_v15 = vadd.f32 %v7599_v36, %v846_v25  ;;  %v1053_v59 = vadd.f32 %v1052_v23, %v938_v58 }
 0x173   :  { %12292 = vst [vmem:[#allocation60_spill] sm:$0xff] %v7603_v47  ;;  %v757_v21 = vadd.f32 %v756_v32, %v7487_v16  ;;  %v1000_v60 = vadd.f32 %v999_v52, %v889_v26  ;;  %v964_v24 = vadd.f32 %v963_v8, %v891_v22  ;;  %v895_v17 = vmul.f32 %v7510_v4, %v7510_v4  ;;  %v6942_v32 = vld [vmem:[#allocation7 + $0x108] ss:$12 sps:$4 sm:$0xff]  }
 0x174   :  { %v7609_v20 = vpop.f32.mrf.mxu0  ;;  %v897_v6 = vmul.f32 %v7515_v14, %v7515_v14  ;;  %12296 = vst [vmem:[#allocation64_spill] sm:$0xff] %v7679_v10  ;;  %2197 = vmatprep.subr.bf16.mxu0 %v6947_v9  ;;  %v794_v62 = vadd.f32 %v793_v63, %v7496_v30  ;;  %2020 = vmatprep.subr.bf16.mxu1 %v6944_v31  ;;  %v6953_v52 = vld [vmem:[#allocation7 + $0x1b4] ss:$12 sps:$4 sm:$0xff]  }
 0x175   :  { %v758_v16 = vadd.f32 %v757_v21, %v7503_v37  ;;  %2198 = vmatpush1.bf16.msra.mxu0 %v6945_v11  ;;  %v965_v23 = vadd.f32 %v964_v24, %v894_v1  ;;  %v1001_v58 = vadd.f32 %v1000_v60, %v892_v7  ;;  %v898_v26 = vmul.f32 %v7524_v33, %v7524_v33  ;;  %v6950_v1 = vld [vmem:[#allocation7 + $0xf4] ss:$12 sps:$4 sm:$0xff]   ;;  %v6951_v7 = vld [vmem:[#allocation7 + $0x1b0] ss:$12 sps:$4 sm:$0xff]   ;;  %v7698_v37 = vpop.f32.mrf.mxu1 }
 0x176   :  { %v7622_v38 = vpop.f32.mrf.mxu0  ;;  %v900_v22 = vmul.f32 %v7531_v54, %v7531_v54  ;;  %2021 = vmatpush2.bf16.msra.mxu1 %v6942_v32  ;;  %v795_v9 = vadd.f32 %v794_v62, %v7510_v4  ;;  %v848_v63 = vadd.f32 %v847_v15, %v7659_v5  ;;  %v944_v21 = vmul.f32 %v7659_v5, %v7659_v5  ;;  %v6948_v62 = vld [vmem:[#allocation7 + $0xf0] ss:$12 sps:$4 sm:$0xff]  }
 0x177   :  { %v1054_v31 = vadd.f32 %v1053_v59, %v941_v2  ;;  %v1002_v11 = vadd.f32 %v1001_v58, %v895_v17  ;;  %v759_v60 = vadd.f32 %v758_v16, %v7515_v14  ;;  %v966_v24 = vadd.f32 %v965_v23, %v897_v6  ;;  %12297 = vst [vmem:[#allocation65_spill] sm:$0xff] %v7698_v37  ;;  %v6959_v6 = vld [vmem:[#allocation7 + $0x19c] ss:$12 sps:$4 sm:$0xff]  }
 0x178   :  { %v7630_v61 = vpop.f32.mrf.mxu0  ;;  %v901_v32 = vmul.f32 %v7538_v13, %v7538_v13  ;;  %2199 = vmatprep.subr.bf16.mxu0 %v6953_v52  ;;  %v796_v36 = vadd.f32 %v795_v9, %v7524_v33  ;;  %v903_v15 = vmul.f32 %v7545_v34, %v7545_v34  ;;  %2022 = vmatprep.subr.bf16.mxu1 %v6950_v1 }
 0x179   :  { %2200 = vmatpush1.bf16.msra.mxu0 %v6951_v7  ;;  %v760_v2 = vadd.f32 %v759_v60, %v7531_v54  ;;  %v967_v16 = vadd.f32 %v966_v24, %v900_v22  ;;  %v1003_v59 = vadd.f32 %v1002_v11, %v898_v26  ;;  %v904_v17 = vmul.f32 %v7562_v19, %v7562_v19  ;;  %v6956_v7 = vld [vmem:[#allocation7 + $0xdc] ss:$12 sps:$4 sm:$0xff]   ;;  %v6957_v60 = vld [vmem:[#allocation7 + $0x198] ss:$12 sps:$4 sm:$0xff]  }
 0x17a   :  { %v7643_v39 = vpop.f32.mrf.mxu0  ;;  %2023 = vmatpush2.bf16.msra.mxu1 %v6948_v62  ;;  %v906_v23 = vmul.f32 %v7570_v27, %v7570_v27  ;;  %v1055_v52 = vadd.f32 %v1054_v31, %v944_v21  ;;  %v849_v9 = vadd.f32 %v848_v63, %v7698_v37  ;;  %v947_v1 = vmul.f32 %v7698_v37, %v7698_v37  ;;  %v6954_v62 = vld [vmem:[#allocation7 + $0xd8] ss:$12 sps:$4 sm:$0xff]  }
 0x17b   :  { %v797_v26 = vadd.f32 %v796_v36, %v7538_v13  ;;  %v1004_v22 = vadd.f32 %v1003_v59, %v901_v32  ;;  %v761_v11 = vadd.f32 %v760_v2, %v7545_v34  ;;  %v907_v24 = vmul.f32 %v7583_v57, %v7583_v57  ;;  %2201 = vmatprep.subr.bf16.mxu0 %v6959_v6  ;;  %v6965_v59 = vld [vmem:[#allocation7 + $0x184] ss:$12 sps:$4 sm:$0xff]   ;;  %v6963_v13 = vld [vmem:[#allocation7 + $0x180] ss:$12 sps:$4 sm:$0xff]  }
 0x17c   :  { %v7649_v29 = vpop.f32.mrf.mxu0  ;;  %v968_v54 = vadd.f32 %v967_v16, %v903_v15  ;;  %v909_v21 = vmul.f32 %v7590_v35, %v7590_v35  ;;  %2024 = vmatprep.subr.bf16.mxu1 %v6956_v7  ;;  %v910_v2 = vmul.f32 %v7603_v47, %v7603_v47  ;;  %v950_v15 = vmul.f32 %v7638_v0, %v7638_v0 }
 0x17d   :  { %2202 = vmatpush1.bf16.msra.mxu0 %v6957_v60  ;;  %v762_v31 = vadd.f32 %v761_v11, %v7570_v27  ;;  %v798_v36 = vadd.f32 %v797_v26, %v7562_v19  ;;  %v1005_v32 = vadd.f32 %v1004_v22, %v904_v17  ;;  %v850_v16 = vadd.f32 %v7638_v0, %v849_v9  ;;  %v6962_v60 = vld [vmem:[#allocation7 + $0xc4] ss:$12 sps:$4 sm:$0xff]  }
 0x17e   :  { %v7662_v51 = vpop.f32.mrf.mxu0  ;;  %2025 = vmatpush2.bf16.msra.mxu1 %v6954_v62  ;;  %v969_v34 = vadd.f32 %v968_v54, %v906_v23  ;;  %v1056_v7 = vadd.f32 %v1055_v52, %v947_v1  ;;  %v912_v22 = vmul.f32 %v7609_v20, %v7609_v20  ;;  %v6960_v62 = vld [vmem:[#allocation7 + $0xc0] ss:$12 sps:$4 sm:$0xff]   ;;  %2203 = vmatprep.subr.bf16.mxu0 %v6965_v59 }
 0x17f   :  { %v799_v11 = vadd.f32 %v798_v36, %v7583_v57  ;;  %v1006_v26 = vadd.f32 %v1005_v32, %v907_v24  ;;  %v763_v17 = vadd.f32 %v762_v31, %v7590_v35  ;;  %v913_v23 = vmul.f32 %v7622_v38, %v7622_v38  ;;  %2026 = vmatprep.subr.bf16.mxu1 %v6962_v60 }
 0x180   :  { %v7670_v40 = vpop.f32.mrf.mxu0  ;;  %v970_v54 = vadd.f32 %v969_v34, %v909_v21  ;;  %v915_v24 = vmul.f32 %v7630_v61, %v7630_v61  ;;  %v916_v31 = vmul.f32 %v7643_v39, %v7643_v39  ;;  %v953_v21 = vmul.f32 %v7679_v10, %v7679_v10 }
 0x181   :  { %2204 = vmatpush1.bf16.msra.mxu0 %v6963_v13  ;;  %v764_v52 = vadd.f32 %v763_v17, %v7609_v20  ;;  %v800_v9 = vadd.f32 %v799_v11, %v7603_v47  ;;  %v1007_v1 = vadd.f32 %v1006_v26, %v910_v2  ;;  %v851_v36 = vadd.f32 %v7679_v10, %v850_v16 }
 0x182   :  { %v7683_v25 = vpop.f32.mrf.mxu0  ;;  %2027 = vmatpush2.bf16.msra.mxu1 %v6960_v62  ;;  %v1057_v13 = vadd.f32 %v1056_v7, %v950_v15  ;;  %v971_v32 = vadd.f32 %v970_v54, %v912_v22  ;;  %v918_v60 = vmul.f32 %v7649_v29, %v7649_v29  ;;  %v919_v26 = vmul.f32 %v7662_v51, %v7662_v51 }
 0x183   :  { %v801_v59 = vadd.f32 %v800_v9, %v7622_v38  ;;  %v765_v2 = vadd.f32 %v764_v52, %v7630_v61  ;;  %v1008_v11 = vadd.f32 %v1007_v1, %v913_v23  ;;  %v921_v15 = vmul.f32 %v7670_v40, %v7670_v40  ;;  %v6966_v9 = vld [vmem:[#allocation7 + $0x170] ss:$12 sps:$4 sm:$0xff]  }
 0x184   :  { %v7690_v8 = vpop.f32.mrf.mxu0  ;;  %v972_v62 = vadd.f32 %v971_v32, %v915_v24  ;;  %v922_v22 = vmul.f32 %v7683_v25, %v7683_v25  ;;  %v852_v23 = vrot.slane %v851_v36, 4  ;;  %v1058_v52 = vadd.f32 %v1057_v13, %v953_v21  ;;  %6231 = vmatprep.subr.bf16.mxu1 %v6966_v9 }
 0x185   :  { %v766_v47 = vadd.f32 %v765_v2, %v7649_v29  ;;  %v802_v16 = vadd.f32 %v801_v59, %v7643_v39  ;;  %v1009_v7 = vadd.f32 %v1008_v11, %v916_v31  ;;  %v924_v32 = vmul.f32 %v7690_v8, %v7690_v8 }
 0x186   :  { %v7703_v5 = vpop.f32.mrf.mxu0  ;;  %v973_v1 = vadd.f32 %v972_v62, %v918_v60 }
 0x187   :  { %v803_v57 = vadd.f32 %v802_v16, %v7662_v51  ;;  %v767_v24 = vadd.f32 %v766_v47, %v7670_v40  ;;  %v1010_v59 = vadd.f32 %v1009_v7, %v919_v26  ;;  %v925_v31 = vmul.f32 %v7703_v5, %v7703_v5 }
 0x188   :  { %v7710_v58 = vpop.f32.mrf.mxu0  ;;  %v974_v11 = vadd.f32 %v973_v1, %v921_v15  ;;  %v853_v26 = vadd.f32 %v852_v23, %v851_v36  ;;  %v1059_v16 = vrot.slane %v1058_v52, 4 }
 0x189   :  { %v768_v14 = vadd.f32 %v767_v24, %v7690_v8  ;;  %v804_v21 = vadd.f32 %v803_v57, %v7683_v25  ;;  %v927_v13 = vmul.f32 %v7710_v58, %v7710_v58  ;;  %v1011_v60 = vadd.f32 %v1010_v59, %v922_v22 }
 0x18a   :  { %v7721_v63 = vpop.f32.mrf.mxu0  ;;  %v975_v7 = vadd.f32 %v974_v11, %v924_v32  ;;  %v854_v11 = vrot.slane %v853_v26, 2 }
 0x18b   :  { %12298 = vst [vmem:[#allocation66_spill] sm:$0xff] %v7721_v63  ;;  %v928_v47 = vmul.f32 %v7721_v63, %v7721_v63  ;;  %v805_v10 = vadd.f32 %v804_v21, %v7703_v5  ;;  %v769_v15 = vadd.f32 %v768_v14, %v7710_v58  ;;  %v1012_v57 = vadd.f32 %v1011_v60, %v925_v31 }
 0x18c   :  { %v7727_v6 = vpop.f32.mrf.mxu0  ;;  %v976_v24 = vadd.f32 %v975_v7, %v927_v13  ;;  %v1060_v21 = vadd.f32 %v1059_v16, %v1058_v52 }
 0x18d   :  { %v930_v9 = vmul.f32 %v7727_v6, %v7727_v6  ;;  %v770_v59 = vadd.f32 %v769_v15, %v7727_v6  ;;  %v806_v36 = vadd.f32 %v805_v10, %v7721_v63  ;;  %v1013_v32 = vadd.f32 %v1012_v57, %v928_v47 }
 0x18e   :  { %v7738_v19 = vpop.f32.mrf.mxu0 }
 0x18f   :  { %12299 = vst [vmem:[#allocation67_spill] sm:$0xff] %v7738_v19  ;;  %v931_v1 = vmul.f32 %v7738_v19, %v7738_v19  ;;  %v977_v60 = vadd.f32 %v976_v24, %v930_v9  ;;  %v807_v0 = vadd.f32 %v806_v36, %v7738_v19  ;;  %v855_v24 = vadd.f32 %v854_v11, %v853_v26 }
 0x190   :  { %v7746_v34 = vpop.f32.mrf.mxu0 }
 0x191   :  { %12300 = vst [vmem:[#allocation68_spill] sm:$0xff] %v7746_v34  ;;  %v933_v23 = vmul.f32 %v7746_v34, %v7746_v34  ;;  %v771_v13 = vadd.f32 %v770_v59, %v7746_v34  ;;  %v1014_v10 = vadd.f32 %v1013_v32, %v931_v1  ;;  %v1061_v59 = vrot.slane %v1060_v21, 2 }
 0x192   :  { %v7757_v17 = vpop.f32.mrf.mxu0 }
 0x193   :  { %12301 = vst [vmem:[#allocation69_spill] sm:$0xff] %v7757_v17  ;;  %v934_v14 = vmul.f32 %v7757_v17, %v7757_v17  ;;  %v978_v57 = vadd.f32 %v977_v60, %v933_v23  ;;  %v808_v52 = vadd.f32 %v807_v0, %v7757_v17 }
 0x194   :  { %v7765_v54 = vpop.f32.mrf.mxu0 }
 0x195   :  { %12302 = vst [vmem:[#allocation70_spill] sm:$0xff] %v7765_v54  ;;  %v936_v7 = vmul.f32 %v7765_v54, %v7765_v54  ;;  %v772_v63 = vadd.f32 %v771_v13, %v7765_v54  ;;  %v1015_v9 = vadd.f32 %v1014_v10, %v934_v14 }
 0x196   :  { %v7773_v2 = vpop.f32.mrf.mxu0 }
 0x197   :  { %12303 = vst [vmem:[#allocation71_spill] sm:$0xff] %v7773_v2  ;;  %v937_v15 = vmul.f32 %v7773_v2, %v7773_v2  ;;  %v979_v32 = vadd.f32 %v978_v57, %v936_v7  ;;  %v809_v37 = vadd.f32 %v808_v52, %v7773_v2  ;;  %v856_v57 = vrot.slane %v855_v24, 1 }
 0x198   :  { %v7781_v62 = vpop.f32.mrf.mxu0  ;;  %v1062_v52 = vadd.f32 %v1061_v59, %v1060_v21 }
 0x199   :  { %12304 = vst [vmem:[#allocation72_spill] sm:$0xff] %v7781_v62  ;;  %v939_v16 = vmul.f32 %v7781_v62, %v7781_v62  ;;  %v773_v23 = vadd.f32 %v772_v63, %v7781_v62  ;;  %v1016_v0 = vadd.f32 %v1015_v9, %v937_v15 }
 0x19a   :  { %v7789_v22 = vpop.f32.mrf.mxu0 }
 0x19b   :  { %12305 = vst [vmem:[#allocation73_spill] sm:$0xff] %v7789_v22  ;;  %v940_v36 = vmul.f32 %v7789_v22, %v7789_v22  ;;  %v980_v26 = vadd.f32 %v979_v32, %v939_v16  ;;  %v810_v10 = vadd.f32 %v809_v37, %v7789_v22 }
 0x19c   :  { %v7797_v31 = vpop.f32.mrf.mxu0 }
 0x19d   :  { %12306 = vst [vmem:[#allocation74_spill] sm:$0xff] %v7797_v31  ;;  %v942_v60 = vmul.f32 %v7797_v31, %v7797_v31  ;;  %v774_v11 = vadd.f32 %v773_v23, %v7797_v31  ;;  %v1017_v63 = vadd.f32 %v1016_v0, %v940_v36  ;;  %v857_v0 = vadd.f32 %v856_v57, %v855_v24 }
 0x19e   :  { %v7805_v47 = vpop.f32.mrf.mxu0 }
 0x19f   :  { %12307 = vst [vmem:[#allocation75_spill] sm:$0xff] %v7805_v47  ;;  %v943_v13 = vmul.f32 %v7805_v47, %v7805_v47  ;;  %v981_v9 = vadd.f32 %v980_v26, %v942_v60  ;;  %v811_v62 = vadd.f32 %v810_v10, %v7805_v47  ;;  %v1063_v60 = vrot.slane %v1062_v52, 1 }
 0x1a0   :  { %v7813_v1 = vpop.f32.mrf.mxu0  ;;  %v7852_v57 = vmul.f32 0.00390625, %v857_v0 }
 0x1a1   :  { %12308 = vst [vmem:[#allocation76_spill] sm:$0xff] %v7813_v1  ;;  %v945_v7 = vmul.f32 %v7813_v1, %v7813_v1  ;;  %v775_v16 = vadd.f32 %v774_v11, %v7813_v1  ;;  %v1018_v37 = vadd.f32 %v1017_v63, %v943_v13  ;;  %v1064_v24 = vadd.f32 %v1063_v60, %v1062_v52 }
 0x1a2   :  { %v7821_v14 = vpop.f32.mrf.mxu0 }
 0x1a3   :  { %12309 = vst [vmem:[#allocation77_spill] sm:$0xff] %v7821_v14  ;;  %v946_v17 = vmul.f32 %v7821_v14, %v7821_v14  ;;  %v982_v22 = vadd.f32 %v981_v9, %v945_v7  ;;  %v812_v59 = vadd.f32 %v811_v62, %v7821_v14 }
 0x1a4   :  { %v7829_v15 = vpop.f32.mrf.mxu0 }
 0x1a5   :  { %12310 = vst [vmem:[#allocation78_spill] sm:$0xff] %v7829_v15  ;;  %v948_v32 = vmul.f32 %v7829_v15, %v7829_v15  ;;  %v776_v21 = vadd.f32 %v775_v16, %v7829_v15  ;;  %v1019_v26 = vadd.f32 %v1018_v37, %v946_v17 }
 0x1a6   :  { %v7835_v23 = vpop.f32.mrf.mxu0 }
 0x1a7   :  { %12311 = vst [vmem:[#allocation79_spill] sm:$0xff] %v7835_v23  ;;  %v949_v36 = vmul.f32 %v7835_v23, %v7835_v23  ;;  %v983_v11 = vadd.f32 %v982_v22, %v948_v32  ;;  %v813_v1 = vadd.f32 %v812_v59, %v7835_v23 }
 0x1a8   :  { %v7841_v10 = vpop.f32.mrf.mxu0 }
 0x1a9   :  { %12312 = vst [vmem:[#allocation80_spill] sm:$0xff] %v7841_v10  ;;  %v777_v13 = vadd.f32 %v776_v21, %v7841_v10  ;;  %v951_v7 = vmul.f32 %v7841_v10, %v7841_v10  ;;  %v1020_v63 = vadd.f32 %v1019_v26, %v949_v36  ;;  %v1070_v26 = vmul.f32 0.00390625, %v1064_v24 }
 0x1aa   :  { %v7847_v9 = vpop.f32.mrf.mxu0 }
 0x1ab   :  { %v778_v62 = vrot.slane %v777_v13, 4  ;;  %v984_v16 = vadd.f32 %v983_v11, %v951_v7  ;;  %v814_v14 = vadd.f32 %v813_v1, %v7847_v9  ;;  %v952_v17 = vmul.f32 %v7847_v9, %v7847_v9 }
 0x1ac   :  { %v1073_v11 = vmul.f32 %v7852_v57, %v7852_v57 }
 0x1ad   :  { %v779_v22 = vadd.f32 %v778_v62, %v777_v13  ;;  %v985_v32 = vrot.slane %v984_v16, 4  ;;  %v815_v37 = vrot.slane %v814_v14, 4  ;;  %v1021_v21 = vadd.f32 %v1020_v63, %v952_v17 }
 0x1ae   :  { %v1076_v13 = vsub.f32 %v1070_v26, %v1073_v11 }
 0x1af   :  { %v780_v59 = vrot.slane %v779_v22, 2  ;;  %v986_v23 = vadd.f32 %v985_v32, %v984_v16  ;;  %v816_v10 = vadd.f32 %v815_v37, %v814_v14  ;;  %v1022_v36 = vrot.slane %v1021_v21, 4 }
 0x1b0   :  { %v1079_v37 = vmax.f32 %v1076_v13, 0.0 }
 0x1b1   :  { %v781_v7 = vadd.f32 %v780_v59, %v779_v22  ;;  %v987_v1 = vrot.slane %v986_v23, 2  ;;  %v817_v15 = vrot.slane %v816_v10, 2  ;;  %v1023_v47 = vadd.f32 %v1022_v36, %v1021_v21 }
 0x1b3   :  { %v782_v31 = vrot.slane %v781_v7, 1  ;;  %v988_v52 = vadd.f32 %v987_v1, %v986_v23  ;;  %v818_v0 = vadd.f32 %v817_v15, %v816_v10  ;;  %v1024_v60 = vrot.slane %v1023_v47, 2 }
 0x1b4   :  { %v1085_v23 = vadd.f32 1e-05, %v1079_v37 }
 0x1b5   :  { %v783_v62 = vadd.f32 %v782_v31, %v781_v7  ;;  %v989_v2 = vrot.slane %v988_v52, 1  ;;  %v819_v63 = vrot.slane %v818_v0, 1  ;;  %v1025_v17 = vadd.f32 %v1024_v60, %v1023_v47  ;;  %v7856_v60 = vld [vmem:[#allocation7 + $0x230] ss:$12 sps:$4 sm:$0xff]  }
 0x1b6   :  { %7110 = vrsqrt.f32 %v1085_v23  ;;  %v1096_v7 = vlaneseq  ;;  %12313 = vst [vmem:[#allocation81_spill] sm:$0xff] %v7856_v60  ;;  %6687 = vmatprep.subr.bf16.mxu0 %v7856_v60  ;;  %v12395_v60 = vld [vmem:[#allocation79_spill] sm:$0xff] }
 0x1b7   :  { %v990_v16 = vadd.f32 %v989_v2, %v988_v52  ;;  %v1065_v14 = vmul.f32 0.00390625, %v783_v62  ;;  %v820_v32 = vadd.f32 %v819_v63, %v818_v0  ;;  %v1026_v24 = vrot.slane %v1025_v17, 1 }
 0x1b8   :  { %v7289_v2 = vmov 1966171168   ;;  %v1097_v52 = vshrl.u32 %v1096_v7, 7 }
 0x1b9   :  { %v1068_v54 = vmul.f32 0.00390625, %v990_v16  ;;  %v1071_v34 = vmul.f32 %v1065_v14, %v1065_v14  ;;  %v1027_v22 = vadd.f32 %v1026_v24, %v1025_v17  ;;  %v1066_v59 = vmul.f32 0.00390625, %v820_v32  ;;  %v1080_v16 = vld [vmem:[#allocation11] ss:$8 sm:$0x7] }
 0x1ba   :  { %v1094_v47 = vunpack.c.l.s4 %v7289_v2  ;;  %v7863_v32 = vsub.s32 0, %v1097_v52  ;;  %v7865_v24 = vsub.s32 1, %v1097_v52 }
 0x1bb   :  { %v1074_v19 = vsub.f32 %v1068_v54, %v1071_v34  ;;  %v1069_v21 = vmul.f32 0.00390625, %v1027_v22  ;;  %v1072_v36 = vmul.f32 %v1066_v59, %v1066_v59 }
 0x1bc   :  { %v1095_v1 = vunpack.c.0.s8 %v1094_v47  ;;  %12315 = vst [vmem:[#allocation83_spill] sm:$0xff] %v7863_v32  ;;  %12316 = vst [vmem:[#allocation84_spill] sm:$0xff] %v7865_v24 }
 0x1bd   :  { %v1077_v15 = vmax.f32 %v1074_v19, 0.0  ;;  %v1075_v10 = vsub.f32 %v1069_v21, %v1072_v36  ;;  %v7868_v21 = vsub.s32 2, %v1097_v52 }
 0x1be   :  { %v7858_v54 = vsub.s32 %v1095_v1, %v1097_v52 }
 0x1bf   :  { %v1083_v26 = vadd.f32 1e-05, %v1077_v15  ;;  %v1078_v31 = vmax.f32 %v1075_v10, 0.0  ;;  %12317 = vst [vmem:[#allocation85_spill] sm:$0xff] %v7868_v21 }
 0x1c0   :  { %12314 = vst [vmem:[#allocation82_spill] sm:$0xff] %v7858_v54 }
 0x1c1   :  { %v1084_v11 = vadd.f32 1e-05, %v1078_v31  ;;  %7112 = vrsqrt.f32 %v1083_v26 }
 0x1c3   :  { %7114 = vrsqrt.f32 %v1084_v11  ;;  %v7111_v0 = vpop.eup %7110 }
 0x1c4   :  { %v1106_v62 = vrot.slane %v7111_v0, %v7858_v54 }
 0x1ce   :  { %v7113_v34 = vpop.eup %7112 }
 0x1d0   :  { %v7115_v13 = vpop.eup %7114 }
 0x1d1   :  { %v1092_v19 = vcombine.low %v7113_v34, %v7115_v13 }
 0x1d3   :  { %v1099_v63 = vrot.slane %v1092_v19, %v7858_v54 }
 0x1d5   :  { %v1107_v17 = vcombine.low %v1099_v63, %v1106_v62  ;;  %v12324_v62 = vld [vmem:[#allocation20_spill] sm:$0xff] }
 0x1d6   :  { %v12325_v63 = vld [vmem:[#allocation24_spill] sm:$0xff] }
 0x1d7   :  { %v1114_v37 = vrot.slane %v1107_v17, %v7858_v54 }
 0x1d9   :  { %v1116_v22 = vmul.f32 %v1114_v37, %v1080_v16  ;;  %v12328_v16 = vld [vmem:[#allocation23_spill] sm:$0xff] }
 0x1db   :  { %v7871_v36 = vrot.slane %v1116_v22, %v7863_v32  ;;  %v7874_v23 = vrot.slane %v1116_v22, %v7865_v24  ;;  %v7879_v26 = vrot.slane %v1116_v22, %v7868_v21  ;;  %v12330_v22 = vld [vmem:[#allocation27_spill] sm:$0xff] }
 0x1dd   :  { %12318 = vst [vmem:[#allocation86_spill] sm:$0xff] %v7871_v36  ;;  %12319 = vst [vmem:[#allocation87_spill] sm:$0xff] %v7874_v23  ;;  %v1133_v15 = vmul.f32 %v7871_v36, %v1065_v14  ;;  %v1134_v10 = vmul.f32 %v7874_v23, %v1066_v59  ;;  %v1135_v11 = vmul.f32 %v7879_v26, %v7852_v57 }
 0x1de   :  { %12320 = vst [vmem:[#allocation88_spill] sm:$0xff] %v7879_v26  ;;  %v7887_v1 = vmul.f32 %v7874_v23, %v7847_v9  ;;  %v7891_v14 = vmul.f32 %v7871_v36, %v7372_v41  ;;  %v7895_v59 = vmul.f32 %v7874_v23, %v7374_v42  ;;  %v7899_v57 = vmul.f32 %v7879_v26, %v7390_v50 }
 0x1df   :  { %v1139_v31 = vcombine.low %v1133_v15, %v1134_v10  ;;  %v1153_v47 = vrot.slane %v1135_v11, %v7858_v54  ;;  %v7903_v52 = vmul.f32 %v7871_v36, %v7376_v43  ;;  %v7907_v9 = vmul.f32 %v7874_v23, %v7378_v44  ;;  %v12322_v44 = vld [vmem:[#allocation19_spill] sm:$0xff]  ;;  %v12333_v10 = vld [vmem:[#allocation26_spill] sm:$0xff] }
 0x1e0   :  { %12321 = vst [vmem:[#allocation89_spill] sm:$0xff] %v7887_v1  ;;  %v7911_v41 = vmul.f32 %v7879_v26, %v7400_v55  ;;  %v7915_v42 = vmul.f32 %v7871_v36, %v7380_v45  ;;  %v7920_v50 = vmul.f32 %v7874_v23, %v7382_v46  ;;  %v7924_v43 = vmul.f32 %v7386_v48, %v7879_v26  ;;  %v1082_v55 = vld [vmem:[#allocation11 + $0x3] ss:$8 sm:$0x7] }
 0x1e1   :  { %v1146_v2 = vrot.slane %v1139_v31, %v7858_v54  ;;  %v7928_v34 = vmul.f32 %v7871_v36, %v12322_v44  ;;  %v7932_v13 = vmul.f32 %v7874_v23, %v7388_v49  ;;  %v12323_v45 = vld [vmem:[#allocation21_spill] sm:$0xff]  ;;  %v7940_v46 = vmul.f32 %v7871_v36, %v12324_v62  ;;  %v12335_v11 = vld [vmem:[#allocation22_spill] sm:$0xff] }
 0x1e2   :  { %v7936_v19 = vmul.f32 %v12323_v45, %v7879_v26  ;;  %v7944_v48 = vmul.f32 %v7874_v23, %v7396_v53  ;;  %v7948_v17 = vmul.f32 %v7879_v26, %v12325_v63  ;;  %v7952_v49 = vmul.f32 %v7871_v36, %v7402_v56  ;;  %v12341_v45 = vld [vmem:[#allocation30_spill] sm:$0xff]  ;;  %v12358_v1 = vld [vmem:[#allocation41_spill] sm:$0xff] }
 0x1e3   :  { %v1154_v7 = vcombine.low %v1146_v2, %v1153_v47  ;;  %v7956_v37 = vmul.f32 %v7874_v23, %v12328_v16  ;;  %v7960_v15 = vmul.f32 %v7879_v26, %v12330_v22  ;;  %v7964_v53 = vmul.f32 %v7871_v36, %v7419_v3  ;;  %v12339_v3 = vld [vmem:[#allocation25_spill] sm:$0xff] }
 0x1e4   :  { %12326 = vst [vmem:[#allocation19_spill] sm:$0xff] %v7948_v17  ;;  %12327 = vst [vmem:[#allocation21_spill] sm:$0xff] %v7952_v49  ;;  %v7968_v31 = vmul.f32 %v7874_v23, %v12333_v10  ;;  %v7972_v56 = vmul.f32 %v12335_v11, %v7879_v26  ;;  %v7976_v2 = vmul.f32 %v7871_v36, %v7431_v12  ;;  %v12344_v16 = vld [vmem:[#allocation29_spill] sm:$0xff]  ;;  %v12350_v10 = vld [vmem:[#allocation32_spill] sm:$0xff] }
 0x1e5   :  { %v1161_v0 = vrot.slane %v1154_v7, %v7858_v54  ;;  %12329 = vst [vmem:[#allocation20_spill] sm:$0xff] %v7956_v37  ;;  %12331 = vst [vmem:[#allocation24_spill] sm:$0xff] %v7960_v15  ;;  %v7980_v7 = vmul.f32 %v7874_v23, %v7440_v18  ;;  %v7984_v44 = vmul.f32 %v12339_v3, %v7879_v26  ;;  %v12352_v3 = vld [vmem:[#allocation37_spill] sm:$0xff]  ;;  %v12356_v54 = vld [vmem:[#allocation28_spill] sm:$0xff] }
 0x1e6   :  { %12332 = vst [vmem:[#allocation23_spill] sm:$0xff] %v7964_v53  ;;  %12334 = vst [vmem:[#allocation27_spill] sm:$0xff] %v7968_v31  ;;  %v7988_v62 = vmul.f32 %v7871_v36, %v12341_v45  ;;  %v7992_v63 = vmul.f32 %v7874_v23, %v7454_v28  ;;  %v7996_v12 = vmul.f32 %v7879_v26, %v12344_v16  ;;  %v12354_v45 = vld [vmem:[#allocation39_spill] sm:$0xff]  ;;  %v12383_v15 = vld [vmem:[#allocation61_spill] sm:$0xff] }
 0x1e7   :  { %12336 = vst [vmem:[#allocation26_spill] sm:$0xff] %v7972_v56  ;;  %12337 = vst [vmem:[#allocation22_spill] sm:$0xff] %v7976_v2  ;;  %v1163_v47 = vsub.f32 %v1082_v55, %v1161_v0  ;;  %v12346_v0 = vld [vmem:[#allocation33_spill] sm:$0xff]  ;;  %v12348_v55 = vld [vmem:[#allocation35_spill] sm:$0xff]  ;;  %v8008_v11 = vmul.f32 %v7879_v26, %v12350_v10  ;;  %v8012_v28 = vmul.f32 %v7871_v36, %v12352_v3 }
 0x1e8   :  { %12338 = vst [vmem:[#allocation90_spill] sm:$0xff] %v7980_v7  ;;  %12340 = vst [vmem:[#allocation25_spill] sm:$0xff] %v7984_v44  ;;  %v8000_v18 = vmul.f32 %v7871_v36, %v12346_v0  ;;  %v8004_v22 = vmul.f32 %v7874_v23, %v12348_v55  ;;  %v8016_v16 = vmul.f32 %v7874_v23, %v12354_v45  ;;  %v12387_v37 = vld [vmem:[#allocation72_spill] sm:$0xff]  ;;  %v12391_v44 = vld [vmem:[#allocation63_spill] sm:$0xff] }
 0x1e9   :  { %12342 = vst [vmem:[#allocation30_spill] sm:$0xff] %v7988_v62  ;;  %12343 = vst [vmem:[#allocation91_spill] sm:$0xff] %v7992_v63  ;;  %v8020_v0 = vmul.f32 %v12356_v54, %v7879_v26  ;;  %v8024_v55 = vmul.f32 %v7871_v36, %v12358_v1  ;;  %v8028_v10 = vmul.f32 %v7874_v23, %v7496_v30  ;;  %v12389_v63 = vld [vmem:[#allocation74_spill] sm:$0xff]  ;;  %v12390_v62 = vld [vmem:[#allocation75_spill] sm:$0xff] }
 0x1ea   :  { %12345 = vst [vmem:[#allocation29_spill] sm:$0xff] %v7996_v12  ;;  %12347 = vst [vmem:[#allocation33_spill] sm:$0xff] %v8000_v18  ;;  %v8036_v45 = vmul.f32 %v7874_v23, %v7510_v4  ;;  %v8042_v54 = vrot.slane %v1163_v47, %v7865_v24  ;;  %v8045_v1 = vrot.slane %v1163_v47, %v7868_v21  ;;  %v12370_v24 = vld [vmem:[#allocation43_spill] sm:$0xff]  ;;  %v12371_v21 = vld [vmem:[#allocation46_spill] sm:$0xff] }
 0x1eb   :  { %12349 = vst [vmem:[#allocation35_spill] sm:$0xff] %v8004_v22  ;;  %12351 = vst [vmem:[#allocation32_spill] sm:$0xff] %v8008_v11  ;;  %v12361_v11 = vld [vmem:[#allocation31_spill] sm:$0xff]  ;;  %v8039_v22 = vrot.slane %v1163_v47, %v7863_v32  ;;  %v1212_v32 = vmul.f32 %v7871_v36, %v7570_v27  ;;  %v1215_v47 = vmul.f32 %v7871_v36, %v7590_v35  ;;  %v12375_v35 = vld [vmem:[#allocation45_spill] sm:$0xff] }
 0x1ec   :  { %12353 = vst [vmem:[#allocation37_spill] sm:$0xff] %v8012_v28  ;;  %12355 = vst [vmem:[#allocation39_spill] sm:$0xff] %v8016_v16  ;;  %v8032_v3 = vmul.f32 %v12361_v11, %v7879_v26  ;;  %v8053_v11 = vmul.f32 %v7874_v23, %v7524_v33  ;;  %v1218_v33 = vmul.f32 %v7871_v36, %v7609_v20  ;;  %v12384_v16 = vld [vmem:[#allocation70_spill] sm:$0xff]  ;;  %v12385_v28 = vld [vmem:[#allocation71_spill] sm:$0xff] }
 0x1ed   :  { %12357 = vst [vmem:[#allocation28_spill] sm:$0xff] %v8020_v0  ;;  %12359 = vst [vmem:[#allocation41_spill] sm:$0xff] %v8024_v55  ;;  %v12365_v55 = vld [vmem:[#allocation36_spill] sm:$0xff]  ;;  %v1221_v27 = vmul.f32 %v7871_v36, %v7630_v61  ;;  %v1225_v20 = vmul.f32 %v7874_v23, %v7662_v51  ;;  %v8093_v61 = vmul.f32 %v7874_v23, %v7683_v25  ;;  %v12380_v25 = vld [vmem:[#allocation67_spill] sm:$0xff] }
 0x1ee   :  { %12360 = vst [vmem:[#allocation92_spill] sm:$0xff] %v8028_v10  ;;  %12362 = vst [vmem:[#allocation31_spill] sm:$0xff] %v8032_v3  ;;  %v8049_v30 = vmul.f32 %v7879_v26, %v12365_v55  ;;  %v12368_v10 = vld [vmem:[#allocation40_spill] sm:$0xff]  ;;  %v8067_v55 = vmul.f32 %v7879_v26, %v12371_v21  ;;  %v1223_v21 = vmul.f32 %v12375_v35, %v7879_v26  ;;  %v12381_v3 = vld [vmem:[#allocation57_spill] sm:$0xff] }
 0x1ef   :  { %12363 = vst [vmem:[#allocation93_spill] sm:$0xff] %v8036_v45  ;;  %12364 = vst [vmem:[#allocation94_spill] sm:$0xff] %v8039_v22  ;;  %v8057_v4 = vmul.f32 %v7879_v26, %v12368_v10  ;;  %v1214_v45 = vmul.f32 %v7879_v26, %v12370_v24  ;;  %v1219_v10 = vmul.f32 %v7874_v23, %v7622_v38  ;;  %v12376_v38 = vld [vmem:[#allocation49_spill] sm:$0xff]  ;;  %v12382_v0 = vld [vmem:[#allocation68_spill] sm:$0xff] }
 0x1f0   :  { %12366 = vst [vmem:[#allocation36_spill] sm:$0xff] %v8049_v30  ;;  %12367 = vst [vmem:[#allocation95_spill] sm:$0xff] %v8053_v11  ;;  %v8079_v24 = vmul.f32 %v7874_v23, %v7643_v39  ;;  %v1224_v11 = vmul.f32 %v7871_v36, %v7649_v29  ;;  %v1230_v39 = vmul.f32 %v7871_v36, %v7690_v8  ;;  %v12378_v29 = vld [vmem:[#allocation48_spill] sm:$0xff]  ;;  %v12393_v56 = vld [vmem:[#allocation65_spill] sm:$0xff] }
 0x1f1   :  { %12369 = vst [vmem:[#allocation40_spill] sm:$0xff] %v8057_v4  ;;  %12372 = vst [vmem:[#allocation43_spill] sm:$0xff] %v8067_v55  ;;  %v12373_v4 = vld [vmem:[#allocation42_spill] sm:$0xff]  ;;  %v1226_v55 = vmul.f32 %v7879_v26, %v12376_v38  ;;  %v1231_v35 = vmul.f32 %v7874_v23, %v7703_v5  ;;  %v1233_v51 = vmul.f32 %v7871_v36, %v7710_v58  ;;  %v12379_v38 = vld [vmem:[#allocation51_spill] sm:$0xff] }
 0x1f2   :  { %v1220_v30 = vmul.f32 %v12373_v4, %v7879_v26  ;;  %12374 = vst [vmem:[#allocation46_spill] sm:$0xff] %v8079_v24  ;;  %v1227_v4 = vmul.f32 %v7871_v36, %v7670_v40  ;;  %12377 = vst [vmem:[#allocation42_spill] sm:$0xff] %v8093_v61  ;;  %v1232_v24 = vmul.f32 %v12378_v29, %v7879_v26  ;;  %v12392_v2 = vld [vmem:[#allocation76_spill] sm:$0xff]  ;;  %v12394_v31 = vld [vmem:[#allocation78_spill] sm:$0xff] }
 0x1f3   :  { %v1235_v7 = vmul.f32 %v12379_v38, %v7879_v26  ;;  %v1236_v40 = vmul.f32 %v7871_v36, %v7727_v6  ;;  %v1237_v61 = vmul.f32 %v7874_v23, %v12380_v25  ;;  %v1238_v8 = vmul.f32 %v7879_v26, %v12381_v3  ;;  %v12386_v6 = vld [vmem:[#allocation55_spill] sm:$0xff]  ;;  %v12397_v49 = vld [vmem:[#allocation80_spill] sm:$0xff] }
 0x1f4   :  { %v1239_v5 = vmul.f32 %v7871_v36, %v12382_v0  ;;  %v1241_v29 = vmul.f32 %v7879_v26, %v12383_v15  ;;  %v1242_v58 = vmul.f32 %v7871_v36, %v12384_v16  ;;  %v1243_v38 = vmul.f32 %v7874_v23, %v12385_v28  ;;  %v12388_v3 = vld [vmem:[#allocation59_spill] sm:$0xff] }
 0x1f5   :  { %v1244_v18 = vmul.f32 %v12386_v6, %v7879_v26  ;;  %v1245_v25 = vmul.f32 %v7871_v36, %v12387_v37  ;;  %v1247_v12 = vmul.f32 %v12388_v3, %v7879_v26  ;;  %v1248_v0 = vmul.f32 %v7871_v36, %v12389_v63  ;;  %v12396_v63 = vld [vmem:[#allocation62_spill] sm:$0xff] }
 0x1f6   :  { %v1249_v15 = vmul.f32 %v7874_v23, %v12390_v62  ;;  %v1250_v16 = vmul.f32 %v7879_v26, %v12391_v44  ;;  %v1251_v28 = vmul.f32 %v7871_v36, %v12392_v2  ;;  %v1253_v6 = vmul.f32 %v7879_v26, %v12393_v56  ;;  %v12398_v44 = vld [vmem:[#allocation64_spill] sm:$0xff] }
 0x1f7   :  { %v1254_v37 = vmul.f32 %v7871_v36, %v12394_v31  ;;  %v1255_v3 = vmul.f32 %v7874_v23, %v12395_v60  ;;  %v1256_v53 = vmul.f32 %v12396_v63, %v7879_v26  ;;  %v1257_v62 = vmul.f32 %v7871_v36, %v12397_v49 }
 0x1f8   :  { %v1259_v17 = vmul.f32 %v12398_v44, %v7879_v26  ;;  %v8147_v2 = vadd.f32 %v8039_v22, %v7891_v14  ;;  %v1278_v56 = vadd.f32 %v8045_v1, %v7899_v57  ;;  %v8153_v31 = vadd.f32 %v8039_v22, %v7903_v52 }
 0x1f9   :  { %v1281_v60 = vadd.f32 %v8045_v1, %v7911_v41  ;;  %v8158_v63 = vadd.f32 %v8039_v22, %v1212_v32  ;;  %v8161_v49 = vadd.f32 %v8045_v1, %v1214_v45  ;;  %v8164_v44 = vadd.f32 %v8039_v22, %v1215_v47 }
 0x1fa   :  { %v8167_v14 = vadd.f32 %v8039_v22, %v1218_v33  ;;  %v8170_v57 = vadd.f32 %v8042_v54, %v1219_v10  ;;  %v8173_v52 = vadd.f32 %v8045_v1, %v1220_v30  ;;  %v8176_v41 = vadd.f32 %v8039_v22, %v1221_v27 }
 0x1fb   :  { %v8179_v32 = vadd.f32 %v8045_v1, %v1223_v21  ;;  %v8182_v45 = vadd.f32 %v8039_v22, %v1224_v11  ;;  %v8185_v47 = vadd.f32 %v8042_v54, %v1225_v20  ;;  %v8188_v33 = vadd.f32 %v8045_v1, %v1226_v55 }
 0x1fc   :  { %v8191_v10 = vadd.f32 %v8039_v22, %v1227_v4  ;;  %v8194_v30 = vadd.f32 %v8039_v22, %v1230_v39  ;;  %v8197_v27 = vadd.f32 %v8042_v54, %v1231_v35  ;;  %v8200_v21 = vadd.f32 %v8045_v1, %v1232_v24 }
 0x1fd   :  { %v8203_v11 = vadd.f32 %v8039_v22, %v1233_v51  ;;  %v8206_v20 = vadd.f32 %v8045_v1, %v1235_v7  ;;  %v8209_v55 = vadd.f32 %v8039_v22, %v1236_v40  ;;  %v8212_v4 = vadd.f32 %v8042_v54, %v1237_v61 }
 0x1fe   :  { %v8215_v39 = vadd.f32 %v8045_v1, %v1238_v8  ;;  %v8218_v35 = vadd.f32 %v8039_v22, %v1239_v5  ;;  %v8221_v24 = vadd.f32 %v8045_v1, %v1241_v29  ;;  %v8224_v51 = vadd.f32 %v8039_v22, %v1242_v58 }
 0x1ff   :  { %12399 = vst [vmem:[#allocation45_spill] sm:$0xff] %v8203_v11  ;;  %12400 = vst [vmem:[#allocation49_spill] sm:$0xff] %v8209_v55  ;;  %v8227_v7 = vadd.f32 %v8042_v54, %v1243_v38  ;;  %v8230_v40 = vadd.f32 %v8045_v1, %v1244_v18  ;;  %v8233_v61 = vadd.f32 %v8039_v22, %v1245_v25  ;;  %v12438_v55 = vld [vmem:[#allocation33_spill] sm:$0xff]  ;;  %v12441_v11 = vld [vmem:[#allocation39_spill] sm:$0xff] }
 0x200   :  { %12401 = vst [vmem:[#allocation48_spill] sm:$0xff] %v8212_v4  ;;  %12402 = vst [vmem:[#allocation51_spill] sm:$0xff] %v8218_v35  ;;  %v8236_v8 = vadd.f32 %v8045_v1, %v1247_v12  ;;  %v8239_v5 = vadd.f32 %v8039_v22, %v1248_v0  ;;  %v8242_v29 = vadd.f32 %v8042_v54, %v1249_v15  ;;  %v12439_v4 = vld [vmem:[#allocation37_spill] sm:$0xff] }
 0x201   :  { %12403 = vst [vmem:[#allocation67_spill] sm:$0xff] %v8224_v51  ;;  %12404 = vst [vmem:[#allocation57_spill] sm:$0xff] %v8227_v7  ;;  %v8245_v58 = vadd.f32 %v8045_v1, %v1250_v16  ;;  %v8248_v38 = vadd.f32 %v8039_v22, %v1251_v28  ;;  %v8251_v18 = vadd.f32 %v8045_v1, %v1253_v6  ;;  %v12413_v6 = vld [vmem:[#allocation53_spill] sm:$0xff] }
 0x202   :  { %12405 = vst [vmem:[#allocation68_spill] sm:$0xff] %v8233_v61  ;;  %12406 = vst [vmem:[#allocation61_spill] sm:$0xff] %v8236_v8  ;;  %v8254_v25 = vadd.f32 %v8039_v22, %v1254_v37  ;;  %v8257_v12 = vadd.f32 %v8042_v54, %v1255_v3  ;;  %v1277_v0 = vadd.f32 %v8042_v54, %v7895_v59  ;;  %v12414_v37 = vld [vmem:[#allocation66_spill] sm:$0xff]  ;;  %v12415_v59 = vld [vmem:[#allocation69_spill] sm:$0xff] }
 0x203   :  { %12407 = vst [vmem:[#allocation70_spill] sm:$0xff] %v8239_v5  ;;  %12408 = vst [vmem:[#allocation71_spill] sm:$0xff] %v8242_v29  ;;  %v8262_v15 = vadd.f32 %v8045_v1, %v1256_v53  ;;  %v8265_v16 = vadd.f32 %v8039_v22, %v1257_v62  ;;  %v8268_v28 = vadd.f32 %v8045_v1, %v1259_v17  ;;  %v12419_v17 = vld [vmem:[#allocation77_spill] sm:$0xff]  ;;  %v12424_v5 = vld [vmem:[#allocation23_spill] sm:$0xff]  ;;  %v1458_v8 = vmax.f32 %v8245_v58, 0.0 }
 0x204   :  { %12409 = vst [vmem:[#allocation55_spill] sm:$0xff] %v8248_v38  ;;  %12410 = vst [vmem:[#allocation72_spill] sm:$0xff] %v8254_v25  ;;  %v8272_v36 = vmul.f32 %v7879_v26, %v12413_v6  ;;  %v8276_v3 = vmul.f32 %v7874_v23, %v12414_v37  ;;  %v1374_v25 = vmax.f32 %v1278_v56, 0.0  ;;  %v8280_v53 = vmul.f32 %v7874_v23, %v12415_v59  ;;  %v12417_v38 = vld [vmem:[#allocation73_spill] sm:$0xff]  ;;  %v12430_v61 = vld [vmem:[#allocation26_spill] sm:$0xff] }
 0x205   :  { %12411 = vst [vmem:[#allocation59_spill] sm:$0xff] %v8257_v12  ;;  %12412 = vst [vmem:[#allocation74_spill] sm:$0xff] %v8265_v16  ;;  %v1377_v12 = vmax.f32 %v1281_v60, 0.0  ;;  %v8284_v62 = vmul.f32 %v7874_v23, %v12417_v38  ;;  %v8288_v16 = vmul.f32 %v7874_v23, %v12419_v17  ;;  %v1283_v6 = vadd.f32 %v8042_v54, %v7920_v50  ;;  %v6977_v50 = vld [vmem:[#allocation7 + $0x218] ss:$12 sps:$4 sm:$0xff]   ;;  %v12432_v51 = vld [vmem:[#allocation25_spill] sm:$0xff] }
 0x206   :  { %12416 = vst [vmem:[#allocation75_spill] sm:$0xff] %v8280_v53  ;;  %v1284_v37 = vadd.f32 %v8045_v1, %v7924_v43  ;;  %v1287_v56 = vadd.f32 %v8045_v1, %v7936_v19  ;;  %v1372_v60 = vmax.f32 %v8147_v2, 0.0  ;;  %v1375_v59 = vmax.f32 %v8153_v31, 0.0 }
 0x207   :  { %12418 = vst [vmem:[#allocation63_spill] sm:$0xff] %v8284_v62  ;;  %12420 = vst [vmem:[#allocation76_spill] sm:$0xff] %v8288_v16  ;;  %v8298_v26 = vpack.c.bf16 %v1377_v12, %v1374_v25  ;;  %v1280_v38 = vadd.f32 %v8042_v54, %v7907_v9  ;;  %v1373_v17 = vmax.f32 %v1277_v0, 0.0  ;;  %v1286_v23 = vadd.f32 %v8042_v54, %v7932_v13  ;;  %v12422_v9 = vld [vmem:[#allocation19_spill] sm:$0xff]  ;;  %v12423_v0 = vld [vmem:[#allocation21_spill] sm:$0xff] }
 0x208   :  { %v1282_v43 = vadd.f32 %v8039_v22, %v7915_v42  ;;  %v1285_v19 = vadd.f32 %v8039_v22, %v7928_v34  ;;  %v8310_v2 = vadd.f32 %v8039_v22, %v7940_v46  ;;  %v8314_v31 = vadd.f32 %v8042_v54, %v7944_v48  ;;  %v12427_v16 = vld [vmem:[#allocation81_spill] sm:$0xff] }
 0x209   :  { %12421 = vst [vmem:[#allocation65_spill] sm:$0xff] %v8298_v26  ;;  %v8318_v25 = vadd.f32 %v8045_v1, %v12422_v9  ;;  %v1376_v13 = vmax.f32 %v1280_v38, 0.0  ;;  %2222 = vmatmul.mubr.bf16.vlgmr.msra.gmra.mxu0 %v8298_v26  ;;  %v1379_v12 = vmax.f32 %v1283_v6, 0.0  ;;  %v1382_v42 = vmax.f32 %v1286_v23, 0.0  ;;  %v12428_v9 = vld [vmem:[#allocation27_spill] sm:$0xff] }
 0x20a   :  { %v8323_v34 = vadd.f32 %v8039_v22, %v12423_v0  ;;  %v8327_v46 = vadd.f32 %v8039_v22, %v12424_v5  ;;  %v8329_v29 = vpack.c.bf16 %v1375_v59, %v1372_v60  ;;  %v12426_v48 = vmov 0   ;;  %6688 = vmatpush3.bf16.msra.mxu0 %v12427_v16  ;;  %v6967_v23 = vld [vmem:[#allocation7 + $0xb0] ss:$12 sps:$4 sm:$0xff]  }
 0x20b   :  { %2231 = vmatprep.mubr.bf16.mxu0 %v12426_v48  ;;  %v8335_v38 = vadd.f32 %v8042_v54, %v12428_v9  ;;  %v8337_v6 = vpack.c.bf16 %v1376_v13, %v1373_v17  ;;  %v1380_v26 = vmax.f32 %v1284_v37, 0.0  ;;  %v1383_v0 = vmax.f32 %v1287_v56, 0.0  ;;  %6689 = vmatprep.subr.bf16.mxu0 %v6977_v50  ;;  %v12431_v60 = vld [vmem:[#allocation22_spill] sm:$0xff]  ;;  %v6968_v13 = vld [vmem:[#allocation7 + $0x158] ss:$12 sps:$4 sm:$0xff]  }
 0x20c   :  { %12425 = vst [vmem:[#allocation78_spill] sm:$0xff] %v8329_v29  ;;  %v8341_v5 = vadd.f32 %v8045_v1, %v12430_v61  ;;  %v8345_v59 = vadd.f32 %v8039_v22, %v12431_v60  ;;  %v8349_v16 = vadd.f32 %v8045_v1, %v12432_v51  ;;  %v12433_v9 = vld [vmem:[#allocation30_spill] sm:$0xff]  ;;  %v6980_v37 = vld [vmem:[#allocation7 + $0x200] ss:$12 sps:$4 sm:$0xff]   ;;  %v12434_v56 = vld [vmem:[#allocation91_spill] sm:$0xff]  ;;  %v8364_v60 = vpack.c.bf16 %v1382_v42, %v1379_v12 }
 0x20d   :  { %12429 = vst [vmem:[#allocation79_spill] sm:$0xff] %v8337_v6  ;;  %v8353_v17 = vadd.f32 %v8039_v22, %v12433_v9  ;;  %v8357_v7 = vadd.f32 %v8042_v54, %v12434_v56  ;;  %v12435_v61 = vld [vmem:[#allocation29_spill] sm:$0xff]  ;;  %2028 = vmatprep.mubr.bf16.mxu1 %v8337_v6  ;;  %v12437_v51 = vld [vmem:[#allocation20_spill] sm:$0xff]  ;;  %v8370_v9 = vadd.f32 %v8039_v22, %v12438_v55  ;;  %v1378_v56 = vmax.f32 %v1282_v43, 0.0  ;;  %v12445_v43 = vld [vmem:[#allocation31_spill] sm:$0xff] }
 0x20e   :  { %v8361_v62 = vadd.f32 %v8045_v1, %v12435_v61  ;;  %12436 = vst [vmem:[#allocation62_spill] sm:$0xff] %v8364_v60  ;;  %v1292_v35 = vadd.f32 %v8042_v54, %v12437_v51  ;;  %v8374_v53 = vadd.f32 %v8039_v22, %v12439_v4  ;;  %2029 = vmatmul.mubr.bf16.vlgmr.msra.gmra.mxu1 %v8329_v29  ;;  %v1381_v61 = vmax.f32 %v1285_v19, 0.0  ;;  %v12443_v55 = vld [vmem:[#allocation24_spill] sm:$0xff]  ;;  %v6983_v4 = vld [vmem:[#allocation7 + $0x1e8] ss:$12 sps:$4 sm:$0xff]  }
 0x20f   :  { %6690 = vmatpush3.bf16.msra.mxu0 %v6977_v50  ;;  %v8379_v12 = vadd.f32 %v8042_v54, %v12441_v11  ;;  %6232 = vmatpush3.bf16.msra.mxu1 %v6967_v23  ;;  %v8382_v42 = vpack.c.bf16 %v1383_v0, %v1380_v26  ;;  %v1293_v51 = vadd.f32 %v8045_v1, %v12443_v55  ;;  %v6969_v6 = vld [vmem:[#allocation7 + $0x98] ss:$12 sps:$4 sm:$0xff]   ;;  %v12446_v11 = vld [vmem:[#allocation90_spill] sm:$0xff]  ;;  %v6970_v23 = vld [vmem:[#allocation7 + $0x140] ss:$12 sps:$4 sm:$0xff]   ;;  %v1385_v55 = vmax.f32 %v8314_v31, 0.0 }
 0x210   :  { %12440 = vst [vmem:[#allocation80_spill] sm:$0xff] %v8374_v53  ;;  %2038 = vmatprep.mubr.bf16.mxu1 %v8364_v60  ;;  %v12444_v53 = vld [vmem:[#allocation28_spill] sm:$0xff]  ;;  %v8392_v50 = vadd.f32 %v8045_v1, %v12445_v43  ;;  %6233 = vmatprep.subr.bf16.mxu1 %v6968_v13  ;;  %v1298_v19 = vadd.f32 %v8042_v54, %v12446_v11  ;;  %v1386_v13 = vmax.f32 %v8318_v25, 0.0  ;;  %v1384_v0 = vmax.f32 %v8310_v2, 0.0  ;;  %v12447_v31 = vld [vmem:[#allocation35_spill] sm:$0xff] }
 0x211   :  { %12442 = vst [vmem:[#allocation64_spill] sm:$0xff] %v8382_v42  ;;  %v8388_v29 = vadd.f32 %v8045_v1, %v12444_v53  ;;  %6691 = vmatprep.subr.bf16.mxu0 %v6980_v37  ;;  %2232 = vmatmul.mubr.bf16.gmra.mxu0 %v8382_v42  ;;  %v1388_v53 = vmax.f32 %v1292_v35, 0.0  ;;  %v8402_v22 = vpack.c.bf16 %v1381_v61, %v1378_v56  ;;  %v6971_v11 = vld [vmem:[#allocation7 + $0x80] ss:$12 sps:$4 sm:$0xff]   ;;  %v1389_v26 = vmax.f32 %v1293_v51, 0.0 }
 0x212   :  { %2241 = vmatprep.mubr.bf16.mxu0 %v12426_v48  ;;  %v1387_v42 = vmax.f32 %v8323_v34, 0.0  ;;  %v1304_v35 = vadd.f32 %v8042_v54, %v12447_v31  ;;  %v6972_v60 = vld [vmem:[#allocation7 + $0x128] ss:$12 sps:$4 sm:$0xff]   ;;  %v1391_v56 = vmax.f32 %v8335_v38, 0.0  ;;  %v1394_v61 = vmax.f32 %v1298_v19, 0.0 }
 0x213   :  { %6692 = vmatpush3.bf16.msra.mxu0 %v6980_v37  ;;  %6234 = vmatpush3.bf16.msra.mxu1 %v6969_v6  ;;  %v1392_v43 = vmax.f32 %v8341_v5, 0.0  ;;  %v1395_v25 = vmax.f32 %v8349_v16, 0.0  ;;  %v6985_v37 = vld [vmem:[#allocation7 + $0x1d0] ss:$12 sps:$4 sm:$0xff]   ;;  %v8413_v51 = vpack.c.bf16 %v1388_v53, %v1385_v55  ;;  %v1390_v2 = vmax.f32 %v8327_v46, 0.0  ;;  %v12448_v6 = vld [vmem:[#allocation32_spill] sm:$0xff] }
 0x214   :  { %6693 = vmatprep.subr.bf16.mxu0 %v6983_v4  ;;  %6235 = vmatprep.subr.bf16.mxu1 %v6970_v23  ;;  %v1393_v34 = vmax.f32 %v8345_v59, 0.0  ;;  %v1305_v31 = vadd.f32 %v8045_v1, %v12448_v6  ;;  %v8425_v16 = vpack.c.bf16 %v1389_v26, %v1386_v13  ;;  %v1397_v46 = vmax.f32 %v8357_v7, 0.0  ;;  %v12449_v23 = vld [vmem:[#allocation92_spill] sm:$0xff]  ;;  %v6973_v53 = vld [vmem:[#allocation7 + $0x68] ss:$12 sps:$4 sm:$0xff]  }
 0x215   :  { %v1400_v59 = vmax.f32 %v1304_v35, 0.0  ;;  %v8430_v55 = vadd.f32 %v8042_v54, %v12449_v23  ;;  %v6987_v6 = vld [vmem:[#allocation7 + $0x1b8] ss:$12 sps:$4 sm:$0xff]   ;;  %v8432_v19 = vpack.c.bf16 %v1387_v42, %v1384_v0  ;;  %v8434_v5 = vpack.c.bf16 %v1394_v61, %v1391_v56  ;;  %v6975_v26 = vld [vmem:[#allocation7 + $0x110] ss:$12 sps:$4 sm:$0xff]  }
 0x216   :  { %2039 = vmatmul.mubr.bf16.gmra.mxu1 %v8402_v22  ;;  %v8436_v38 = vpack.c.bf16 %v1395_v25, %v1392_v43  ;;  %v8440_v7 = vpack.c.bf16 %v1393_v34, %v1390_v2  ;;  %v1401_v13 = vmax.f32 %v1305_v31, 0.0  ;;  %v1399_v35 = vmax.f32 %v8370_v9, 0.0  ;;  %v12450_v43 = vld [vmem:[#allocation43_spill] sm:$0xff] }
 0x217   :  { %6694 = vmatpush3.bf16.msra.mxu0 %v6983_v4  ;;  %2048 = vmatprep.mubr.bf16.mxu1 %v8413_v51  ;;  %v1398_v4 = vmax.f32 %v8361_v62, 0.0  ;;  %v1403_v42 = vmax.f32 %v8379_v12, 0.0  ;;  %v1329_v62 = vadd.f32 %v8045_v1, %v12450_v43  ;;  %v6976_v56 = vld [vmem:[#allocation7 + $0x50] ss:$12 sps:$4 sm:$0xff]   ;;  %v8450_v61 = vpack.c.bf16 %v1400_v59, %v1397_v46  ;;  %v6978_v31 = vld [vmem:[#allocation7 + $0xf8] ss:$12 sps:$4 sm:$0xff]  }
 0x218   :  { %6236 = vmatpush3.bf16.msra.mxu1 %v6971_v11  ;;  %6695 = vmatprep.subr.bf16.mxu0 %v6985_v37  ;;  %v1396_v11 = vmax.f32 %v8353_v17, 0.0  ;;  %v1407_v2 = vmax.f32 %v8392_v50, 0.0  ;;  %v1420_v34 = vmax.f32 %v8158_v63, 0.0  ;;  %v1423_v0 = vmax.f32 %v8164_v44, 0.0  ;;  %v12451_v43 = vld [vmem:[#allocation46_spill] sm:$0xff]  ;;  %v12490_v50 = vld [vmem:[#allocation52_spill] sm:$0xff] }
 0x219   :  { %6237 = vmatprep.subr.bf16.mxu1 %v6972_v60  ;;  %2242 = vmatmul.mubr.bf16.gmra.mxu0 %v8425_v16  ;;  %v1422_v60 = vmax.f32 %v8161_v49, 0.0  ;;  %v1425_v23 = vmax.f32 %v1329_v62, 0.0  ;;  %v1334_v49 = vadd.f32 %v8042_v54, %v12451_v43  ;;  %v6988_v46 = vld [vmem:[#allocation7 + $0x1a0] ss:$12 sps:$4 sm:$0xff]   ;;  %v8459_v59 = vpack.c.bf16 %v1401_v13, %v1398_v4  ;;  %v6979_v13 = vld [vmem:[#allocation7 + $0x38] ss:$12 sps:$4 sm:$0xff]  }
 0x21a   :  { %2251 = vmatprep.mubr.bf16.mxu0 %v12426_v48  ;;  %v1428_v25 = vmax.f32 %v8173_v52, 0.0  ;;  %v1426_v63 = vmax.f32 %v8167_v14, 0.0  ;;  %v1429_v43 = vmax.f32 %v8176_v41, 0.0  ;;  %v12452_v52 = vld [vmem:[#allocation42_spill] sm:$0xff]  ;;  %v1433_v14 = vmax.f32 %v8185_v47, 0.0 }
 0x21b   :  { %6696 = vmatpush3.bf16.msra.mxu0 %v6985_v37  ;;  %v1427_v37 = vmax.f32 %v8170_v57, 0.0  ;;  %v8465_v62 = vpack.c.bf16 %v1425_v23, %v1422_v60  ;;  %v1430_v44 = vmax.f32 %v1334_v49, 0.0  ;;  %v1341_v4 = vadd.f32 %v8045_v1, %v8272_v36 }
 0x21c   :  { %6238 = vmatpush3.bf16.msra.mxu1 %v6973_v53  ;;  %6697 = vmatprep.subr.bf16.mxu0 %v6987_v6  ;;  %v1431_v53 = vmax.f32 %v8179_v32, 0.0  ;;  %v1340_v32 = vadd.f32 %v8042_v54, %v12452_v52  ;;  %v1434_v41 = vmax.f32 %v8188_v33, 0.0  ;;  %v1435_v23 = vmax.f32 %v8191_v10, 0.0  ;;  %v12455_v52 = vld [vmem:[#allocation48_spill] sm:$0xff] }
 0x21d   :  { %6239 = vmatprep.subr.bf16.mxu1 %v6975_v26  ;;  %v8467_v26 = vpack.c.bf16 %v1423_v0, %v1420_v34  ;;  %v6989_v0 = vld [vmem:[#allocation7 + $0x188] ss:$12 sps:$4 sm:$0xff]   ;;  %v8478_v60 = vpack.c.bf16 %v1430_v44, %v1427_v37  ;;  %v8480_v34 = vpack.c.bf16 %v1429_v43, %v1426_v63  ;;  %v1437_v47 = vmax.f32 %v1341_v4, 0.0 }
 0x21e   :  { %2049 = vmatmul.mubr.bf16.gmra.mxu1 %v8432_v19  ;;  %v8471_v57 = vpack.c.bf16 %v1431_v53, %v1428_v25  ;;  %v1436_v25 = vmax.f32 %v1340_v32, 0.0  ;;  %v1346_v36 = vadd.f32 %v8042_v54, %v8276_v3  ;;  %v1439_v49 = vmax.f32 %v8197_v27, 0.0  ;;  %v6982_v3 = vld [vmem:[#allocation7 + $0x20] ss:$12 sps:$4 sm:$0xff]  }
 0x21f   :  { %6698 = vmatpush3.bf16.msra.mxu0 %v6987_v6  ;;  %2058 = vmatprep.mubr.bf16.mxu1 %v8434_v5  ;;  %v1432_v6 = vmax.f32 %v8182_v45, 0.0  ;;  %v1440_v33 = vmax.f32 %v8200_v21, 0.0  ;;  %v1438_v45 = vmax.f32 %v8194_v30, 0.0  ;;  %v8495_v53 = vpack.c.bf16 %v1437_v47, %v1434_v41  ;;  %v12453_v27 = vld [vmem:[#allocation45_spill] sm:$0xff]  ;;  %v12454_v21 = vld [vmem:[#allocation75_spill] sm:$0xff] }
 0x220   :  { %6240 = vmatpush3.bf16.msra.mxu1 %v6976_v56  ;;  %v6981_v56 = vld [vmem:[#allocation7 + $0xe0] ss:$12 sps:$4 sm:$0xff]   ;;  %6699 = vmatprep.subr.bf16.mxu0 %v6988_v46  ;;  %v8493_v37 = vpack.c.bf16 %v1436_v25, %v1433_v14  ;;  %v1442_v10 = vmax.f32 %v1346_v36, 0.0  ;;  %v1441_v43 = vmax.f32 %v12453_v27, 0.0  ;;  %v1445_v30 = vmax.f32 %v12455_v52, 0.0  ;;  %v12459_v25 = vld [vmem:[#allocation51_spill] sm:$0xff] }
 0x221   :  { %6241 = vmatprep.subr.bf16.mxu1 %v6978_v31  ;;  %2252 = vmatmul.mubr.bf16.gmra.mxu0 %v8436_v38  ;;  %v1443_v31 = vmax.f32 %v8206_v20, 0.0  ;;  %v8497_v63 = vpack.c.bf16 %v1435_v23, %v1432_v6  ;;  %v1352_v20 = vadd.f32 %v8042_v54, %v12454_v21  ;;  %v12456_v14 = vmax.f32 %v8215_v39, 0.0  ;;  %v12458_v41 = vld [vmem:[#allocation49_spill] sm:$0xff] }
 0x222   :  { %2261 = vmatprep.mubr.bf16.mxu0 %v12426_v48  ;;  %v8505_v32 = vpack.c.bf16 %v1442_v10, %v1439_v49  ;;  %v12457_v4 = vmax.f32 %v8221_v24, 0.0  ;;  %v1444_v6 = vmax.f32 %v12458_v41, 0.0  ;;  %v1447_v47 = vmax.f32 %v12459_v25, 0.0  ;;  %v12461_v49 = vld [vmem:[#allocation57_spill] sm:$0xff] }
 0x223   :  { %6700 = vmatpush3.bf16.msra.mxu0 %v6988_v46  ;;  %v8499_v44 = vpack.c.bf16 %v1443_v31, %v1440_v33  ;;  %v6984_v46 = vld [vmem:[#allocation7 + $0xc8] ss:$12 sps:$4 sm:$0xff]   ;;  %v8516_v23 = vpack.c.bf16 %v1441_v43, %v1438_v45  ;;  %v1448_v36 = vmax.f32 %v1352_v20, 0.0  ;;  %v12460_v33 = vld [vmem:[#allocation63_spill] sm:$0xff]  ;;  %v1451_v31 = vmax.f32 %v12461_v49, 0.0  ;;  %v12466_v20 = vld [vmem:[#allocation68_spill] sm:$0xff] }
 0x224   :  { %6242 = vmatpush3.bf16.msra.mxu1 %v6979_v13  ;;  %6701 = vmatprep.subr.bf16.mxu0 %v6989_v0  ;;  %v8511_v13 = vpack.c.bf16 %v12457_v4, %v12456_v14  ;;  %v8522_v39 = vpack.c.bf16 %v1447_v47, %v1444_v6  ;;  %v12462_v24 = vmax.f32 %v8230_v40, 0.0  ;;  %v12463_v10 = vld [vmem:[#allocation61_spill] sm:$0xff]  ;;  %v12465_v45 = vld [vmem:[#allocation67_spill] sm:$0xff]  ;;  %v1453_v52 = vmax.f32 %v12466_v20, 0.0  ;;  %v12470_v49 = vld [vmem:[#allocation70_spill] sm:$0xff] }
 0x225   :  { %6243 = vmatprep.subr.bf16.mxu1 %v6981_v56  ;;  %v1358_v56 = vadd.f32 %v8042_v54, %v12460_v33  ;;  %v12464_v27 = vmax.f32 %v12463_v10, 0.0  ;;  %v1450_v43 = vmax.f32 %v12465_v45, 0.0  ;;  %v6986_v14 = vld [vmem:[#allocation7 + $0x8] ss:$12 sps:$4 sm:$0xff]   ;;  %v8532_v4 = vpack.c.bf16 %v1448_v36, %v1445_v30  ;;  %v12468_v6 = vld [vmem:[#allocation71_spill] sm:$0xff] }
 0x226   :  { %2059 = vmatmul.mubr.bf16.gmra.mxu1 %v8440_v7  ;;  %v1457_v47 = vmax.f32 %v12468_v6, 0.0  ;;  %v1456_v30 = vmax.f32 %v12470_v49, 0.0  ;;  %v12471_v36 = vld [vmem:[#allocation55_spill] sm:$0xff]  ;;  %v12475_v58 = vmax.f32 %v8268_v28, 0.0  ;;  %v12477_v6 = vld [vmem:[#allocation74_spill] sm:$0xff]  ;;  %v8570_v49 = vpack.c.bf16 %v1399_v35, %v1396_v11  ;;  %v12483_v11 = vld [vmem:[#allocation36_spill] sm:$0xff] }
 0x227   :  { %6702 = vmatpush3.bf16.msra.mxu0 %v6989_v0  ;;  %2068 = vmatprep.mubr.bf16.mxu1 %v8450_v61  ;;  %v8528_v21 = vpack.c.bf16 %v12464_v27, %v12462_v24  ;;  %v1454_v41 = vmax.f32 %v1358_v56, 0.0  ;;  %v12467_v0 = vld [vmem:[#allocation76_spill] sm:$0xff]  ;;  %v8538_v40 = vpack.c.bf16 %v1453_v52, %v1450_v43  ;;  %v1459_v56 = vmax.f32 %v12471_v36, 0.0  ;;  %v12473_v45 = vld [vmem:[#allocation59_spill] sm:$0xff] }
 0x228   :  { %6244 = vmatpush3.bf16.msra.mxu1 %v6982_v3  ;;  %v1364_v25 = vadd.f32 %v8042_v54, %v12467_v0  ;;  %v12469_v3 = vmax.f32 %v8251_v18, 0.0  ;;  %v1463_v43 = vmax.f32 %v12473_v45, 0.0  ;;  %v12476_v52 = vld [vmem:[#allocation72_spill] sm:$0xff]  ;;  %v12481_v36 = vmax.f32 %v8430_v55, 0.0 }
 0x229   :  { %6245 = vmatprep.subr.bf16.mxu1 %v6984_v46  ;;  %2262 = vmatmul.mubr.bf16.gmra.mxu0 %v8459_v59  ;;  %v8549_v24 = vpack.c.bf16 %v1454_v41, %v1451_v31  ;;  %v12472_v46 = vld [vmem:[#allocation89_spill] sm:$0xff]  ;;  %v8554_v20 = vpack.c.bf16 %v1459_v56, %v1456_v30  ;;  %v1462_v0 = vmax.f32 %v12476_v52, 0.0  ;;  %v1465_v31 = vmax.f32 %v12477_v6, 0.0  ;;  %v12487_v52 = vld [vmem:[#allocation44_spill] sm:$0xff] }
 0x22a   :  { %v8544_v33 = vpack.c.bf16 %v12469_v3, %v1458_v8  ;;  %2271 = vmatprep.mubr.bf16.mxu0 %v12426_v48  ;;  %v1460_v10 = vmax.f32 %v1364_v25, 0.0  ;;  %v1370_v27 = vadd.f32 %v8042_v54, %v12472_v46  ;;  %v12474_v8 = vmax.f32 %v8262_v15, 0.0  ;;  %v12478_v41 = vld [vmem:[#allocation41_spill] sm:$0xff]  ;;  %v12479_v25 = vld [vmem:[#allocation94_spill] sm:$0xff]  ;;  %v12482_v46 = vld [vmem:[#allocation95_spill] sm:$0xff] }
 0x22b   :  { %v1309_v3 = vadd.f32 %v12479_v25, %v12478_v41  ;;  %v12480_v30 = vld [vmem:[#allocation93_spill] sm:$0xff]  ;;  %v8580_v56 = vpack.c.bf16 %v12481_v36, %v1403_v42  ;;  %v1316_v45 = vadd.f32 %v8042_v54, %v12482_v46  ;;  %v8584_v17 = vpack.c.bf16 %v1465_v31, %v1462_v0  ;;  %v12485_v42 = vld [vmem:[#allocation40_spill] sm:$0xff]  ;;  %v12488_v0 = vld [vmem:[#allocation86_spill] sm:$0xff] }
 0x22c   :  { %6246 = vmatpush3.bf16.msra.mxu1 %v6986_v14  ;;  %v8560_v18 = vpack.c.bf16 %v12475_v58, %v12474_v8  ;;  %v8572_v14 = vpack.c.bf16 %v1460_v10, %v1457_v47  ;;  %v1466_v15 = vmax.f32 %v1370_v27, 0.0  ;;  %v1313_v28 = vadd.f32 %v8042_v54, %v12480_v30  ;;  %v12486_v10 = vld [vmem:[#allocation80_spill] sm:$0xff]  ;;  %v12489_v31 = vld [vmem:[#allocation47_spill] sm:$0xff] }
 0x22d   :  { %v1314_v35 = vadd.f32 %v8045_v1, %v12483_v11  ;;  %v12484_v12 = vmax.f32 %v8388_v29, 0.0  ;;  %v1317_v47 = vadd.f32 %v8045_v1, %v12485_v42  ;;  %v1402_v27 = vmax.f32 %v12486_v10, 0.0  ;;  %v12493_v46 = vld [vmem:[#allocation88_spill] sm:$0xff]  ;;  %v12494_v11 = vld [vmem:[#allocation34_spill] sm:$0xff] }
 0x22e   :  { %2069 = vmatmul.mubr.bf16.gmra.mxu1 %v8570_v49  ;;  %v8587_v9 = vpack.c.bf16 %v1466_v15, %v1463_v43  ;;  %v1405_v8 = vmax.f32 %v1309_v3, 0.0  ;;  %v1409_v43 = vmax.f32 %v1313_v28, 0.0  ;;  %v1412_v58 = vmax.f32 %v1316_v45, 0.0  ;;  %v12492_v15 = vld [vmem:[#allocation56_spill] sm:$0xff]  ;;  %v12495_v10 = vld [vmem:[#allocation38_spill] sm:$0xff] }
 0x22f   :  { %2078 = vmatprep.mubr.bf16.mxu1 %v8580_v56  ;;  %v8596_v55 = vpack.c.bf16 %v1407_v2, %v12484_v12  ;;  %v1200_v6 = vmul.f32 %v12488_v0, %v12487_v52  ;;  %v1203_v29 = vmul.f32 %v12488_v0, %v12489_v31  ;;  %v12491_v2 = vld [vmem:[#allocation87_spill] sm:$0xff]  ;;  %v1410_v36 = vmax.f32 %v1314_v35, 0.0 }
 0x230   :  { %v1207_v41 = vmul.f32 %v12491_v2, %v12490_v50  ;;  %v1210_v30 = vmul.f32 %v12491_v2, %v12492_v15  ;;  %v1413_v3 = vmax.f32 %v1317_v47, 0.0  ;;  %v1208_v28 = vmul.f32 %v12494_v11, %v12493_v46  ;;  %v12498_v11 = vld [vmem:[#allocation58_spill] sm:$0xff] }
 0x231   :  { %2272 = vmatmul.mubr.bf16.gmra.mxu0 %v8596_v55  ;;  %v1312_v45 = vadd.f32 %v12479_v25, %v1200_v6  ;;  %v1315_v12 = vadd.f32 %v12479_v25, %v1203_v29  ;;  %v8615_v42 = vpack.c.bf16 %v1405_v8, %v1402_v27  ;;  %v1211_v52 = vmul.f32 %v12495_v10, %v12493_v46 }
 0x232   :  { %2281 = vmatprep.mubr.bf16.mxu0 %v12426_v48  ;;  %v1319_v31 = vadd.f32 %v8042_v54, %v1207_v41  ;;  %v8620_v50 = vpack.c.bf16 %v1412_v58, %v1409_v43  ;;  %v1322_v15 = vadd.f32 %v8042_v54, %v1210_v30  ;;  %v1320_v35 = vadd.f32 %v8045_v1, %v1208_v28  ;;  %v12496_v43 = vld [vmem:[#allocation50_spill] sm:$0xff]  ;;  %v12499_v28 = vld [vmem:[#allocation60_spill] sm:$0xff] }
 0x233   :  { %v1323_v47 = vadd.f32 %v8045_v1, %v1211_v52  ;;  %v8627_v6 = vpack.c.bf16 %v1413_v3, %v1410_v36  ;;  %v1408_v27 = vmax.f32 %v1312_v45, 0.0  ;;  %v1411_v8 = vmax.f32 %v1315_v12, 0.0  ;;  %v12497_v30 = vld [vmem:[#allocation54_spill] sm:$0xff] }
 0x234   :  { %v1415_v29 = vmax.f32 %v1319_v31, 0.0  ;;  %v1418_v41 = vmax.f32 %v1322_v15, 0.0  ;;  %v1206_v58 = vmul.f32 %v12488_v0, %v12496_v43  ;;  %v1209_v46 = vmul.f32 %v12488_v0, %v12497_v30  ;;  %v12504_v30 = vld [vmem:[#allocation62_spill] sm:$0xff] }
 0x235   :  { %v1213_v1 = vmul.f32 %v12491_v2, %v12498_v11  ;;  %v1216_v36 = vmul.f32 %v12491_v2, %v12499_v28  ;;  %v1416_v3 = vmax.f32 %v1320_v35, 0.0  ;;  %v1419_v45 = vmax.f32 %v1323_v47, 0.0 }
 0x236   :  { %2079 = vmatmul.mubr.bf16.gmra.mxu1 %v8615_v42  ;;  %v1318_v12 = vadd.f32 %v12479_v25, %v1206_v58  ;;  %v1321_v10 = vadd.f32 %v12479_v25, %v1209_v46  ;;  %v8641_v52 = vpack.c.bf16 %v1411_v8, %v1408_v27  ;;  %v8644_v15 = vpack.c.bf16 %v1418_v41, %v1415_v29  ;;  %v12501_v8 = vld [vmem:[#allocation79_spill] sm:$0xff]  ;;  %v12502_v29 = vld [vmem:[#allocation64_spill] sm:$0xff]  ;;  %v12503_v41 = vld [vmem:[#allocation78_spill] sm:$0xff] }
 0x237   :  { %2088 = vmatprep.mubr.bf16.mxu1 %v8620_v50  ;;  %v1325_v31 = vadd.f32 %v8042_v54, %v1213_v1  ;;  %v1328_v0 = vadd.f32 %v8042_v54, %v1216_v36  ;;  %v1491_v43 = vpack.c.bf16 %v1419_v45, %v1416_v3  ;;  %v12500_v54 = vld [vmem:[#allocation65_spill] sm:$0xff] }
 0x238   :  { %v1414_v2 = vmax.f32 %v1318_v12, 0.0  ;;  %v1417_v35 = vmax.f32 %v1321_v10, 0.0 }
 0x239   :  { %2282 = vmatmul.mubr.bf16.gmra.mxu0 %v8627_v6  ;;  %v1421_v47 = vmax.f32 %v1325_v31, 0.0  ;;  %v1424_v58 = vmax.f32 %v1328_v0, 0.0 }
 0x23a   :  { %2291 = vmatprep.mubr.bf16.mxu0 %v12426_v48  ;;  %v8650_v25 = vpack.c.bf16 %v1417_v35, %v1414_v2 }
 0x23b   :  { %v8652_v27 = vpack.c.bf16 %v1424_v58, %v1421_v47 }
 0x23e   :  { %2089 = vmatmul.mubr.bf16.gmra.mxu1 %v8641_v52 }
 0x23f   :  { %2098 = vmatprep.mubr.bf16.mxu1 %v8644_v15 }
 0x241   :  { %2292 = vmatmul.mubr.bf16.gmra.mxu0 %v1491_v43 }
 0x242   :  { %2301 = vmatprep.mubr.bf16.mxu0 %v12426_v48 }
 0x246   :  { %2099 = vmatmul.mubr.bf16.gmra.mxu1 %v8650_v25 }
 0x247   :  { %2108 = vmatprep.mubr.bf16.mxu1 %v8652_v27 }
 0x249   :  { %2302 = vmatmul.mubr.bf16.gmra.mxu0 %v8465_v62 }
 0x24a   :  { %2311 = vmatprep.mubr.bf16.mxu0 %v12426_v48 }
 0x24e   :  { %2109 = vmatmul.mubr.bf16.gmra.mxu1 %v8467_v26 }
 0x24f   :  { %2118 = vmatprep.mubr.bf16.mxu1 %v8478_v60 }
 0x251   :  { %2312 = vmatmul.mubr.bf16.gmra.mxu0 %v8471_v57 }
 0x252   :  { %2321 = vmatprep.mubr.bf16.mxu0 %v12426_v48 }
 0x256   :  { %2119 = vmatmul.mubr.bf16.gmra.mxu1 %v8480_v34 }
 0x257   :  { %2128 = vmatprep.mubr.bf16.mxu1 %v8493_v37 }
 0x259   :  { %2322 = vmatmul.mubr.bf16.gmra.mxu0 %v8495_v53 }
 0x25a   :  { %2331 = vmatprep.mubr.bf16.mxu0 %v12426_v48 }
 0x25e   :  { %2129 = vmatmul.mubr.bf16.gmra.mxu1 %v8497_v63 }
 0x25f   :  { %2138 = vmatprep.mubr.bf16.mxu1 %v8505_v32 }
 0x261   :  { %2332 = vmatmul.mubr.bf16.gmra.mxu0 %v8499_v44 }
 0x262   :  { %2341 = vmatprep.mubr.bf16.mxu0 %v12426_v48 }
 0x266   :  { %2139 = vmatmul.mubr.bf16.gmra.mxu1 %v8516_v23 }
 0x267   :  { %2148 = vmatprep.mubr.bf16.mxu1 %v8532_v4 }
 0x269   :  { %2342 = vmatmul.mubr.bf16.gmra.mxu0 %v8511_v13 }
 0x26a   :  { %2351 = vmatprep.mubr.bf16.mxu0 %v12426_v48 }
 0x26e   :  { %2149 = vmatmul.mubr.bf16.gmra.mxu1 %v8522_v39 }
 0x26f   :  { %2158 = vmatprep.mubr.bf16.mxu1 %v8549_v24 }
 0x271   :  { %2352 = vmatmul.mubr.bf16.gmra.mxu0 %v8528_v21 }
 0x272   :  { %2361 = vmatprep.mubr.bf16.mxu0 %v12426_v48 }
 0x276   :  { %2159 = vmatmul.mubr.bf16.gmra.mxu1 %v8538_v40 }
 0x277   :  { %2168 = vmatprep.mubr.bf16.mxu1 %v8572_v14 }
 0x279   :  { %2362 = vmatmul.mubr.bf16.gmra.mxu0 %v8544_v33 }
 0x27a   :  { %2371 = vmatprep.mubr.bf16.mxu0 %v12426_v48 }
 0x27e   :  { %2169 = vmatmul.mubr.bf16.gmra.mxu1 %v8554_v20 }
 0x27f   :  { %2178 = vmatprep.mubr.bf16.mxu1 %v8587_v9 }
 0x281   :  { %2372 = vmatmul.mubr.bf16.gmra.mxu0 %v8560_v18 }
 0x282   :  { %6703 = vmatprep.mubr.bf16.mxu0 %v12500_v54 }
 0x286   :  { %2179 = vmatmul.mubr.bf16.gmra.mxu1 %v8584_v17 }
 0x287   :  { %2414 = vmatprep.mubr.bf16.mxu1 %v12501_v8 }
 0x289   :  { %6704 = vmatmul.mubr.bf16.vlgmr.msra.gmra.mxu0 %v12502_v29 }
 0x28a   :  { %6707 = vmatprep.mubr.bf16.mxu0 %v8425_v16 }
 0x28e   :  { %2415 = vmatmul.mubr.bf16.vlgmr.msra.gmra.mxu1 %v12503_v41 }
 0x28f   :  { %2422 = vmatprep.mubr.bf16.mxu1 %v12504_v30 }
 0x291   :  { %6708 = vmatmul.mubr.bf16.gmra.mxu0 %v8436_v38 }
 0x292   :  { %6711 = vmatprep.mubr.bf16.mxu0 %v8459_v59 }
 0x296   :  { %2423 = vmatmul.mubr.bf16.gmra.mxu1 %v8402_v22 }
 0x297   :  { %2430 = vmatprep.mubr.bf16.mxu1 %v8413_v51 }
 0x299   :  { %6712 = vmatmul.mubr.bf16.gmra.mxu0 %v8596_v55 }
 0x29a   :  { %6715 = vmatprep.mubr.bf16.mxu0 %v8627_v6 }
 0x29e   :  { %2431 = vmatmul.mubr.bf16.gmra.mxu1 %v8432_v19 }
 0x29f   :  { %2438 = vmatprep.mubr.bf16.mxu1 %v8434_v5 }
 0x2a1   :  { %6716 = vmatmul.mubr.bf16.gmra.mxu0 %v1491_v43 }
 0x2a2   :  { %6719 = vmatprep.mubr.bf16.mxu0 %v8465_v62 }
 0x2a6   :  { %2439 = vmatmul.mubr.bf16.gmra.mxu1 %v8440_v7 }
 0x2a7   :  { %2446 = vmatprep.mubr.bf16.mxu1 %v8450_v61 }
 0x2a9   :  { %6720 = vmatmul.mubr.bf16.gmra.mxu0 %v8471_v57 }
 0x2aa   :  { %6723 = vmatprep.mubr.bf16.mxu0 %v8495_v53 }
 0x2ae   :  { %2447 = vmatmul.mubr.bf16.gmra.mxu1 %v8570_v49 }
 0x2af   :  { %2454 = vmatprep.mubr.bf16.mxu1 %v8580_v56 }
 0x2b1   :  { %6724 = vmatmul.mubr.bf16.gmra.mxu0 %v8499_v44 }
 0x2b2   :  { %6727 = vmatprep.mubr.bf16.mxu0 %v8511_v13 }
 0x2b6   :  { %2455 = vmatmul.mubr.bf16.gmra.mxu1 %v8615_v42 }
 0x2b7   :  { %2462 = vmatprep.mubr.bf16.mxu1 %v8620_v50 }
 0x2b9   :  { %6728 = vmatmul.mubr.bf16.gmra.mxu0 %v8528_v21 }
 0x2ba   :  { %6731 = vmatprep.mubr.bf16.mxu0 %v8544_v33 }
 0x2be   :  { %2463 = vmatmul.mubr.bf16.gmra.mxu1 %v8641_v52 }
 0x2bf   :  { %2470 = vmatprep.mubr.bf16.mxu1 %v8644_v15 }
 0x2c1   :  { %6732 = vmatmul.mubr.bf16.gmra.mxu0 %v8560_v18 }
 0x2c6   :  { %2471 = vmatmul.mubr.bf16.gmra.mxu1 %v8650_v25 }
 0x2c7   :  { %2478 = vmatprep.mubr.bf16.mxu1 %v8652_v27 }
 0x2c9   :  { %v2223_v22 = vpop.f32.mrf.mxu0 }
 0x2cb   :  { %v2225_v51 = vpop.f32.mrf.mxu0 }
 0x2cd   :  { %v2227_v38 = vpop.f32.mrf.mxu0 }
 0x2ce   :  { %v2030_v19 = vpop.f32.mrf.mxu1  ;;  %2479 = vmatmul.mubr.bf16.gmra.mxu1 %v8467_v26 }
 0x2cf   :  { %v8719_v5 = vadd.f32 %v2223_v22, %v2030_v19  ;;  %2486 = vmatprep.mubr.bf16.mxu1 %v8478_v60  ;;  %v8722_v16 = vpop.f32.mrf.mxu0 }
 0x2d0   :  { %v2032_v7 = vpop.f32.mrf.mxu1 }
 0x2d1   :  { %12505 = vst [vmem:[#allocation53_spill] sm:$0xff] %v8719_v5  ;;  %v8724_v61 = vadd.f32 %v2225_v51, %v2032_v7  ;;  %v2233_v59 = vpop.f32.mrf.mxu0 }
 0x2d2   :  { %v2034_v62 = vpop.f32.mrf.mxu1 }
 0x2d3   :  { %12506 = vst [vmem:[#allocation66_spill] sm:$0xff] %v8724_v61  ;;  %v8726_v57 = vadd.f32 %v2227_v38, %v2034_v62  ;;  %v2235_v53 = vpop.f32.mrf.mxu0 }
 0x2d4   :  { %v8728_v44 = vpop.f32.mrf.mxu1 }
 0x2d5   :  { %12507 = vst [vmem:[#allocation69_spill] sm:$0xff] %v8726_v57  ;;  %v2237_v13 = vpop.f32.mrf.mxu0 }
 0x2d6   :  { %v2040_v21 = vpop.f32.mrf.mxu1  ;;  %2487 = vmatmul.mubr.bf16.gmra.mxu1 %v8480_v34 }
 0x2d7   :  { %v8731_v26 = vadd.f32 %v2233_v59, %v2040_v21  ;;  %2494 = vmatprep.mubr.bf16.mxu1 %v8493_v37  ;;  %v8734_v60 = vpop.f32.mrf.mxu0 }
 0x2d8   :  { %v2042_v33 = vpop.f32.mrf.mxu1 }
 0x2d9   :  { %12508 = vst [vmem:[#allocation73_spill] sm:$0xff] %v8731_v26  ;;  %v8736_v18 = vadd.f32 %v2235_v53, %v2042_v33  ;;  %v2243_v49 = vpop.f32.mrf.mxu0 }
 0x2da   :  { %v2044_v56 = vpop.f32.mrf.mxu1 }
 0x2db   :  { %12509 = vst [vmem:[#allocation77_spill] sm:$0xff] %v8736_v18  ;;  %v8738_v55 = vadd.f32 %v2237_v13, %v2044_v56  ;;  %v2245_v42 = vpop.f32.mrf.mxu0 }
 0x2dc   :  { %v8740_v50 = vpop.f32.mrf.mxu1 }
 0x2dd   :  { %12510 = vst [vmem:[#allocation19_spill] sm:$0xff] %v8738_v55  ;;  %v2247_v6 = vpop.f32.mrf.mxu0 }
 0x2de   :  { %v2050_v46 = vpop.f32.mrf.mxu1  ;;  %2495 = vmatmul.mubr.bf16.gmra.mxu1 %v8497_v63 }
 0x2df   :  { %v8743_v34 = vadd.f32 %v2243_v49, %v2050_v46  ;;  %2502 = vmatprep.mubr.bf16.mxu1 %v8505_v32  ;;  %v8746_v37 = vpop.f32.mrf.mxu0 }
 0x2e0   :  { %v2052_v11 = vpop.f32.mrf.mxu1 }
 0x2e1   :  { %12511 = vst [vmem:[#allocation21_spill] sm:$0xff] %v8743_v34  ;;  %v8748_v1 = vadd.f32 %v2245_v42, %v2052_v11  ;;  %v2253_v28 = vpop.f32.mrf.mxu0 }
 0x2e2   :  { %v2054_v36 = vpop.f32.mrf.mxu1 }
 0x2e3   :  { %12512 = vst [vmem:[#allocation23_spill] sm:$0xff] %v8748_v1  ;;  %v8750_v3 = vadd.f32 %v2247_v6, %v2054_v36  ;;  %v2255_v45 = vpop.f32.mrf.mxu0 }
 0x2e4   :  { %v8752_v12 = vpop.f32.mrf.mxu1 }
 0x2e5   :  { %12513 = vst [vmem:[#allocation81_spill] sm:$0xff] %v8750_v3  ;;  %v2257_v10 = vpop.f32.mrf.mxu0 }
 0x2e6   :  { %v2060_v52 = vpop.f32.mrf.mxu1  ;;  %2503 = vmatmul.mubr.bf16.gmra.mxu1 %v8516_v23 }
 0x2e7   :  { %v8755_v63 = vadd.f32 %v2253_v28, %v2060_v52  ;;  %2510 = vmatprep.mubr.bf16.mxu1 %v8532_v4  ;;  %v8758_v32 = vpop.f32.mrf.mxu0 }
 0x2e8   :  { %v2062_v31 = vpop.f32.mrf.mxu1 }
 0x2e9   :  { %12514 = vst [vmem:[#allocation27_spill] sm:$0xff] %v8755_v63  ;;  %v8760_v15 = vadd.f32 %v2255_v45, %v2062_v31  ;;  %v2263_v0 = vpop.f32.mrf.mxu0 }
 0x2ea   :  { %v2064_v43 = vpop.f32.mrf.mxu1 }
 0x2eb   :  { %12515 = vst [vmem:[#allocation26_spill] sm:$0xff] %v8760_v15  ;;  %v8762_v2 = vadd.f32 %v2257_v10, %v2064_v43  ;;  %v2265_v35 = vpop.f32.mrf.mxu0 }
 0x2ec   :  { %v8764_v47 = vpop.f32.mrf.mxu1 }
 0x2ed   :  { %12516 = vst [vmem:[#allocation22_spill] sm:$0xff] %v8762_v2  ;;  %v2267_v58 = vpop.f32.mrf.mxu0 }
 0x2ee   :  { %v2070_v25 = vpop.f32.mrf.mxu1  ;;  %2511 = vmatmul.mubr.bf16.gmra.mxu1 %v8522_v39 }
 0x2ef   :  { %v8767_v23 = vadd.f32 %v2263_v0, %v2070_v25  ;;  %2518 = vmatprep.mubr.bf16.mxu1 %v8549_v24  ;;  %v8770_v4 = vpop.f32.mrf.mxu0 }
 0x2f0   :  { %v2072_v27 = vpop.f32.mrf.mxu1 }
 0x2f1   :  { %12517 = vst [vmem:[#allocation25_spill] sm:$0xff] %v8767_v23  ;;  %v8772_v54 = vadd.f32 %v2265_v35, %v2072_v27  ;;  %v2273_v8 = vpop.f32.mrf.mxu0 }
 0x2f2   :  { %v2074_v29 = vpop.f32.mrf.mxu1 }
 0x2f3   :  { %12518 = vst [vmem:[#allocation30_spill] sm:$0xff] %v8772_v54  ;;  %v8774_v41 = vadd.f32 %v2267_v58, %v2074_v29  ;;  %v2275_v30 = vpop.f32.mrf.mxu0 }
 0x2f4   :  { %v8776_v22 = vpop.f32.mrf.mxu1 }
 0x2f5   :  { %12519 = vst [vmem:[#allocation91_spill] sm:$0xff] %v8774_v41  ;;  %v2277_v51 = vpop.f32.mrf.mxu0 }
 0x2f6   :  { %v2080_v38 = vpop.f32.mrf.mxu1  ;;  %2519 = vmatmul.mubr.bf16.gmra.mxu1 %v8538_v40 }
 0x2f7   :  { %v8779_v39 = vadd.f32 %v2273_v8, %v2080_v38  ;;  %2526 = vmatprep.mubr.bf16.mxu1 %v8572_v14  ;;  %v8782_v24 = vpop.f32.mrf.mxu0 }
 0x2f8   :  { %v2082_v19 = vpop.f32.mrf.mxu1 }
 0x2f9   :  { %12520 = vst [vmem:[#allocation29_spill] sm:$0xff] %v8779_v39  ;;  %v8784_v7 = vadd.f32 %v2275_v30, %v2082_v19  ;;  %v2283_v59 = vpop.f32.mrf.mxu0 }
 0x2fa   :  { %v2084_v62 = vpop.f32.mrf.mxu1 }
 0x2fb   :  { %12521 = vst [vmem:[#allocation20_spill] sm:$0xff] %v8784_v7  ;;  %v8786_v53 = vadd.f32 %v2277_v51, %v2084_v62  ;;  %v2285_v13 = vpop.f32.mrf.mxu0 }
 0x2fc   :  { %v8788_v21 = vpop.f32.mrf.mxu1 }
 0x2fd   :  { %12522 = vst [vmem:[#allocation33_spill] sm:$0xff] %v8786_v53  ;;  %v2287_v33 = vpop.f32.mrf.mxu0 }
 0x2fe   :  { %v2090_v49 = vpop.f32.mrf.mxu1  ;;  %2527 = vmatmul.mubr.bf16.gmra.mxu1 %v8554_v20 }
 0x2ff   :  { %v8791_v40 = vadd.f32 %v2283_v59, %v2090_v49  ;;  %2534 = vmatprep.mubr.bf16.mxu1 %v8587_v9  ;;  %v8794_v14 = vpop.f32.mrf.mxu0 }
 0x300   :  { %v2092_v56 = vpop.f32.mrf.mxu1 }
 0x301   :  { %12523 = vst [vmem:[#allocation37_spill] sm:$0xff] %v8791_v40  ;;  %v8796_v42 = vadd.f32 %v2285_v13, %v2092_v56  ;;  %v2293_v6 = vpop.f32.mrf.mxu0 }
 0x302   :  { %v2094_v46 = vpop.f32.mrf.mxu1 }
 0x303   :  { %12524 = vst [vmem:[#allocation39_spill] sm:$0xff] %v8796_v42  ;;  %v8798_v11 = vadd.f32 %v2287_v33, %v2094_v46  ;;  %v2295_v28 = vpop.f32.mrf.mxu0 }
 0x304   :  { %v8800_v36 = vpop.f32.mrf.mxu1 }
 0x305   :  { %12525 = vst [vmem:[#allocation24_spill] sm:$0xff] %v8798_v11  ;;  %v2297_v45 = vpop.f32.mrf.mxu0 }
 0x306   :  { %v2100_v10 = vpop.f32.mrf.mxu1  ;;  %2535 = vmatmul.mubr.bf16.gmra.mxu1 %v8584_v17 }
 0x307   :  { %v8803_v20 = vadd.f32 %v2293_v6, %v2100_v10  ;;  %v8805_v52 = vpop.f32.mrf.mxu0  ;;  %4179 = vmatprep.mubr.bf16.mxu1 %v12426_v48 }
 0x308   :  { %v2102_v9 = vpop.f32.mrf.mxu1 }
 0x309   :  { %12526 = vst [vmem:[#allocation28_spill] sm:$0xff] %v8803_v20  ;;  %v8808_v31 = vadd.f32 %v2295_v28, %v2102_v9  ;;  %v2303_v0 = vpop.f32.mrf.mxu0 }
 0x30a   :  { %v2104_v43 = vpop.f32.mrf.mxu1 }
 0x30b   :  { %12527 = vst [vmem:[#allocation31_spill] sm:$0xff] %v8808_v31  ;;  %v8810_v35 = vadd.f32 %v2297_v45, %v2104_v43  ;;  %v2305_v58 = vpop.f32.mrf.mxu0 }
 0x30c   :  { %v8812_v25 = vpop.f32.mrf.mxu1 }
 0x30d   :  { %12528 = vst [vmem:[#allocation90_spill] sm:$0xff] %v8810_v35  ;;  %v2307_v27 = vpop.f32.mrf.mxu0 }
 0x30e   :  { %v2110_v8 = vpop.f32.mrf.mxu1 }
 0x30f   :  { %v8814_v29 = vadd.f32 %v2303_v0, %v2110_v8  ;;  %v8816_v17 = vpop.f32.mrf.mxu0 }
 0x310   :  { %v2112_v30 = vpop.f32.mrf.mxu1 }
 0x311   :  { %12529 = vst [vmem:[#allocation35_spill] sm:$0xff] %v8814_v29  ;;  %v8818_v51 = vadd.f32 %v2305_v58, %v2112_v30  ;;  %v2313_v38 = vpop.f32.mrf.mxu0 }
 0x312   :  { %v2114_v19 = vpop.f32.mrf.mxu1 }
 0x313   :  { %12530 = vst [vmem:[#allocation32_spill] sm:$0xff] %v8818_v51  ;;  %v8820_v59 = vadd.f32 %v2307_v27, %v2114_v19  ;;  %v2315_v62 = vpop.f32.mrf.mxu0 }
 0x314   :  { %v8822_v13 = vpop.f32.mrf.mxu1 }
 0x315   :  { %12531 = vst [vmem:[#allocation92_spill] sm:$0xff] %v8820_v59  ;;  %v2317_v33 = vpop.f32.mrf.mxu0 }
 0x316   :  { %v2120_v49 = vpop.f32.mrf.mxu1 }
 0x317   :  { %v8824_v56 = vadd.f32 %v2313_v38, %v2120_v49  ;;  %v8826_v6 = vpop.f32.mrf.mxu0 }
 0x318   :  { %v2122_v46 = vpop.f32.mrf.mxu1 }
 0x319   :  { %12532 = vst [vmem:[#allocation43_spill] sm:$0xff] %v8824_v56  ;;  %v8828_v28 = vadd.f32 %v2315_v62, %v2122_v46  ;;  %v2323_v45 = vpop.f32.mrf.mxu0 }
 0x31a   :  { %v2124_v10 = vpop.f32.mrf.mxu1 }
 0x31b   :  { %12533 = vst [vmem:[#allocation46_spill] sm:$0xff] %v8828_v28  ;;  %v8830_v9 = vadd.f32 %v2317_v33, %v2124_v10  ;;  %v2325_v0 = vpop.f32.mrf.mxu0 }
 0x31c   :  { %v8832_v43 = vpop.f32.mrf.mxu1 }
 0x31d   :  { %12534 = vst [vmem:[#allocation42_spill] sm:$0xff] %v8830_v9  ;;  %v2327_v58 = vpop.f32.mrf.mxu0 }
 0x31e   :  { %v2130_v27 = vpop.f32.mrf.mxu1 }
 0x31f   :  { %v8834_v8 = vadd.f32 %v2323_v45, %v2130_v27  ;;  %v8836_v30 = vpop.f32.mrf.mxu0 }
 0x320   :  { %12536 = vst [vmem:[#allocation75_spill] sm:$0xff] %v8836_v30  ;;  %v2132_v38 = vpop.f32.mrf.mxu1 }
 0x321   :  { %12535 = vst [vmem:[#allocation45_spill] sm:$0xff] %v8834_v8  ;;  %v8838_v19 = vadd.f32 %v2325_v0, %v2132_v38  ;;  %v2333_v49 = vpop.f32.mrf.mxu0 }
 0x322   :  { %v2134_v48 = vpop.f32.mrf.mxu1 }
 0x323   :  { %12537 = vst [vmem:[#allocation48_spill] sm:$0xff] %v8838_v19  ;;  %v8840_v62 = vadd.f32 %v2327_v58, %v2134_v48  ;;  %v2335_v46 = vpop.f32.mrf.mxu0 }
 0x324   :  { %v8842_v28 = vpop.f32.mrf.mxu1 }
 0x325   :  { %12538 = vst [vmem:[#allocation49_spill] sm:$0xff] %v8840_v62  ;;  %12539 = vst [vmem:[#allocation51_spill] sm:$0xff] %v8842_v28  ;;  %v2337_v33 = vpop.f32.mrf.mxu0 }
 0x326   :  { %v2140_v10 = vpop.f32.mrf.mxu1 }
 0x327   :  { %v8844_v9 = vadd.f32 %v2333_v49, %v2140_v10  ;;  %v8846_v56 = vpop.f32.mrf.mxu0 }
 0x328   :  { %12541 = vst [vmem:[#allocation57_spill] sm:$0xff] %v8846_v56  ;;  %v2142_v45 = vpop.f32.mrf.mxu1 }
 0x329   :  { %12540 = vst [vmem:[#allocation63_spill] sm:$0xff] %v8844_v9  ;;  %v8848_v27 = vadd.f32 %v2335_v46, %v2142_v45  ;;  %v2343_v8 = vpop.f32.mrf.mxu0 }
 0x32a   :  { %v2144_v30 = vpop.f32.mrf.mxu1 }
 0x32b   :  { %12542 = vst [vmem:[#allocation61_spill] sm:$0xff] %v8848_v27  ;;  %v8850_v0 = vadd.f32 %v2337_v33, %v2144_v30  ;;  %v2345_v38 = vpop.f32.mrf.mxu0 }
 0x32c   :  { %v8852_v19 = vpop.f32.mrf.mxu1 }
 0x32d   :  { %12543 = vst [vmem:[#allocation67_spill] sm:$0xff] %v8850_v0  ;;  %12544 = vst [vmem:[#allocation68_spill] sm:$0xff] %v8852_v19  ;;  %v2347_v48 = vpop.f32.mrf.mxu0 }
 0x32e   :  { %v2150_v58 = vpop.f32.mrf.mxu1 }
 0x32f   :  { %v8854_v62 = vadd.f32 %v2343_v8, %v2150_v58  ;;  %v8856_v28 = vpop.f32.mrf.mxu0 }
 0x330   :  { %12546 = vst [vmem:[#allocation71_spill] sm:$0xff] %v8856_v28  ;;  %v2152_v49 = vpop.f32.mrf.mxu1 }
 0x331   :  { %12545 = vst [vmem:[#allocation76_spill] sm:$0xff] %v8854_v62  ;;  %v8858_v10 = vadd.f32 %v2345_v38, %v2152_v49  ;;  %v2353_v56 = vpop.f32.mrf.mxu0 }
 0x332   :  { %v2154_v9 = vpop.f32.mrf.mxu1 }
 0x333   :  { %12547 = vst [vmem:[#allocation70_spill] sm:$0xff] %v8858_v10  ;;  %v8860_v46 = vadd.f32 %v2347_v48, %v2154_v9  ;;  %v2355_v45 = vpop.f32.mrf.mxu0 }
 0x334   :  { %v8862_v27 = vpop.f32.mrf.mxu1 }
 0x335   :  { %12548 = vst [vmem:[#allocation55_spill] sm:$0xff] %v8860_v46  ;;  %12549 = vst [vmem:[#allocation89_spill] sm:$0xff] %v8862_v27  ;;  %v2357_v30 = vpop.f32.mrf.mxu0 }
 0x336   :  { %v2160_v33 = vpop.f32.mrf.mxu1 }
 0x337   :  { %v8864_v0 = vadd.f32 %v2353_v56, %v2160_v33  ;;  %v8866_v19 = vpop.f32.mrf.mxu0 }
 0x338   :  { %12551 = vst [vmem:[#allocation72_spill] sm:$0xff] %v8866_v19  ;;  %v2162_v8 = vpop.f32.mrf.mxu1 }
 0x339   :  { %12550 = vst [vmem:[#allocation59_spill] sm:$0xff] %v8864_v0  ;;  %v8868_v58 = vadd.f32 %v2355_v45, %v2162_v8  ;;  %v2363_v28 = vpop.f32.mrf.mxu0 }
 0x33a   :  { %v2164_v62 = vpop.f32.mrf.mxu1 }
 0x33b   :  { %12552 = vst [vmem:[#allocation74_spill] sm:$0xff] %v8868_v58  ;;  %v8870_v38 = vadd.f32 %v2357_v30, %v2164_v62  ;;  %v2365_v49 = vpop.f32.mrf.mxu0 }
 0x33c   :  { %v8872_v10 = vpop.f32.mrf.mxu1 }
 0x33d   :  { %12553 = vst [vmem:[#allocation41_spill] sm:$0xff] %v8870_v38  ;;  %12554 = vst [vmem:[#allocation94_spill] sm:$0xff] %v8872_v10  ;;  %v2367_v9 = vpop.f32.mrf.mxu0 }
 0x33e   :  { %v2170_v48 = vpop.f32.mrf.mxu1 }
 0x33f   :  { %v8874_v46 = vadd.f32 %v2363_v28, %v2170_v48  ;;  %v8876_v27 = vpop.f32.mrf.mxu0 }
 0x340   :  { %12556 = vst [vmem:[#allocation95_spill] sm:$0xff] %v8876_v27  ;;  %v2172_v56 = vpop.f32.mrf.mxu1 }
 0x341   :  { %12555 = vst [vmem:[#allocation93_spill] sm:$0xff] %v8874_v46  ;;  %v8878_v33 = vadd.f32 %v2365_v49, %v2172_v56  ;;  %v2373_v19 = vpop.f32.mrf.mxu0 }
 0x342   :  { %v2174_v0 = vpop.f32.mrf.mxu1 }
 0x343   :  { %12557 = vst [vmem:[#allocation36_spill] sm:$0xff] %v8878_v33  ;;  %v8880_v45 = vadd.f32 %v2367_v9, %v2174_v0  ;;  %v2375_v8 = vpop.f32.mrf.mxu0 }
 0x344   :  { %v8882_v58 = vpop.f32.mrf.mxu1 }
 0x345   :  { %12558 = vst [vmem:[#allocation40_spill] sm:$0xff] %v8880_v45  ;;  %12559 = vst [vmem:[#allocation80_spill] sm:$0xff] %v8882_v58  ;;  %v2377_v62 = vpop.f32.mrf.mxu0 }
 0x346   :  { %v2180_v30 = vpop.f32.mrf.mxu1 }
 0x347   :  { %v8884_v38 = vadd.f32 %v2373_v19, %v2180_v30  ;;  %v8886_v10 = vpop.f32.mrf.mxu0 }
 0x348   :  { %12561 = vst [vmem:[#allocation86_spill] sm:$0xff] %v8886_v10  ;;  %v2182_v28 = vpop.f32.mrf.mxu1 }
 0x349   :  { %12560 = vst [vmem:[#allocation44_spill] sm:$0xff] %v8884_v38  ;;  %v8888_v48 = vadd.f32 %v2375_v8, %v2182_v28  ;;  %v8890_v46 = vpop.f32.mrf.mxu0  ;;  %v2818_v38 = vmul.f32 %v8726_v57, %v8726_v57 }
 0x34a   :  { %v2184_v27 = vpop.f32.mrf.mxu1  ;;  %12563 = vst [vmem:[#allocation52_spill] sm:$0xff] %v8890_v46  ;;  %v2704_v46 = vadd.f32 %v8726_v57, %v8719_v5  ;;  %v8961_v57 = vadd.f32 %v8746_v37, %v8752_v12  ;;  %v2830_v12 = vmul.f32 %v8750_v3, %v8750_v3 }
 0x34b   :  { %12562 = vst [vmem:[#allocation47_spill] sm:$0xff] %v8888_v48  ;;  %v8892_v49 = vadd.f32 %v2377_v62, %v2184_v27  ;;  %v8896_v9 = vpop.f32.mrf.mxu0 }
 0x34c   :  { %v8894_v56 = vpop.f32.mrf.mxu1  ;;  %12566 = vst [vmem:[#allocation88_spill] sm:$0xff] %v8896_v9  ;;  %v2824_v9 = vmul.f32 %v8738_v55, %v8738_v55  ;;  %12579 = vst [vmem:[#allocation97_spill] sm:$0xff] %v8961_v57 }
 0x34d   :  { %12564 = vst [vmem:[#allocation87_spill] sm:$0xff] %v8892_v49  ;;  %12565 = vst [vmem:[#allocation56_spill] sm:$0xff] %v8894_v56  ;;  %v8900_v19 = vpop.f32.mrf.mxu0 }
 0x34e   :  { %v6247_v0 = vpop.f32.mrf.mxu1  ;;  %12568 = vst [vmem:[#allocation38_spill] sm:$0xff] %v8900_v19  ;;  %v8934_v19 = vadd.f32 %v8734_v60, %v8740_v50  ;;  %v2822_v60 = vmul.f32 %v8736_v18, %v8736_v18 }
 0x34f   :  { %v8906_v8 = vpop.f32.mrf.mxu0 }
 0x350   :  { %v6248_v45 = vpop.f32.mrf.mxu1  ;;  %12576 = vst [vmem:[#allocation78_spill] sm:$0xff] %v8934_v19 }
 0x351   :  { %v8898_v33 = vadd.f32 %v6248_v45, %v6247_v0  ;;  %v8912_v62 = vpop.f32.mrf.mxu0  ;;  %v8920_v45 = vadd.f32 %v8722_v16, %v8728_v44  ;;  %v2815_v16 = vmul.f32 %v8719_v5, %v8719_v5  ;;  %v2821_v44 = vmul.f32 %v8731_v26, %v8731_v26 }
 0x352   :  { %v8902_v30 = vpop.f32.mrf.mxu1  ;;  %12569 = vst [vmem:[#allocation50_spill] sm:$0xff] %v8912_v62 }
 0x353   :  { %12567 = vst [vmem:[#allocation34_spill] sm:$0xff] %v8898_v33  ;;  %12572 = vst [vmem:[#allocation60_spill] sm:$0xff] %v8920_v45  ;;  %v8922_v0 = vpop.f32.mrf.mxu0  ;;  %v2819_v62 = vmul.f32 %v8920_v45, %v8920_v45  ;;  %v2911_v50 = vadd.f32 %v2818_v38, %v2815_v16  ;;  %v2741_v33 = vadd.f32 %v8920_v45, %v8724_v61 }
 0x354   :  { %v8904_v10 = vpop.f32.mrf.mxu1  ;;  %12573 = vst [vmem:[#allocation65_spill] sm:$0xff] %v8922_v0  ;;  %v2827_v16 = vmul.f32 %v8743_v34, %v8743_v34 }
 0x355   :  { %v8940_v0 = vpop.f32.mrf.mxu0  ;;  %v2912_v5 = vadd.f32 %v2911_v50, %v2821_v44  ;;  %v2742_v38 = vadd.f32 %v2741_v33, %v8736_v18  ;;  %v2831_v18 = vmul.f32 %v8961_v57, %v8961_v57 }
 0x356   :  { %v8908_v28 = vpop.f32.mrf.mxu1  ;;  %12577 = vst [vmem:[#allocation62_spill] sm:$0xff] %v8940_v0 }
 0x357   :  { %v8966_v45 = vpop.f32.mrf.mxu0  ;;  %v2743_v37 = vadd.f32 %v2742_v38, %v8934_v19 }
 0x358   :  { %v8910_v27 = vpop.f32.mrf.mxu1 }
 0x35a   :  { %v8914_v49 = vpop.f32.mrf.mxu1 }
 0x35b   :  { %12570 = vst [vmem:[#allocation54_spill] sm:$0xff] %v8914_v49  ;;  %v2825_v49 = vmul.f32 %v8934_v19, %v8934_v19 }
 0x35c   :  { %v8916_v48 = vpop.f32.mrf.mxu1 }
 0x35d   :  { %12571 = vst [vmem:[#allocation58_spill] sm:$0xff] %v8916_v48 }
 0x35e   :  { %v8924_v56 = vpop.f32.mrf.mxu1 }
 0x35f   :  { %12574 = vst [vmem:[#allocation79_spill] sm:$0xff] %v8924_v56 }
 0x360   :  { %v8928_v58 = vpop.f32.mrf.mxu1 }
 0x361   :  { %12575 = vst [vmem:[#allocation64_spill] sm:$0xff] %v8928_v58  ;;  %v2816_v58 = vmul.f32 %v8724_v61, %v8724_v61 }
 0x362   :  { %v8942_v56 = vpop.f32.mrf.mxu1 }
 0x363   :  { %12578 = vst [vmem:[#allocation96_spill] sm:$0xff] %v8942_v56  ;;  %v2948_v0 = vadd.f32 %v2819_v62, %v2816_v58  ;;  %v2705_v56 = vadd.f32 %v2704_v46, %v8731_v26  ;;  %v2828_v62 = vmul.f32 %v8748_v1, %v8748_v1  ;;  %v2913_v26 = vadd.f32 %v2912_v5, %v2824_v9 }
 0x364   :  { %v8954_v48 = vpop.f32.mrf.mxu1  ;;  %v2744_v5 = vadd.f32 %v2743_v37, %v8748_v1  ;;  %v2833_v9 = vmul.f32 %v8755_v63, %v8755_v63 }
 0x365   :  { %v2949_v58 = vadd.f32 %v2948_v0, %v2822_v60  ;;  %v2706_v46 = vadd.f32 %v2705_v56, %v8738_v55  ;;  %v8983_v56 = vadd.f32 %v8758_v32, %v8764_v47  ;;  %v2914_v0 = vadd.f32 %v2913_v26, %v2827_v16  ;;  %v8988_v60 = vpop.f32.mrf.mxu0 }
 0x366   :  { %v8968_v61 = vpop.f32.mrf.mxu1  ;;  %v2745_v32 = vadd.f32 %v2744_v5, %v8961_v57  ;;  %v2836_v26 = vmul.f32 %v8762_v2, %v8762_v2 }
 0x367   :  { %v2950_v44 = vadd.f32 %v2949_v58, %v2825_v49  ;;  %v2707_v50 = vadd.f32 %v2706_v46, %v8743_v34  ;;  %12580 = vst [vmem:[#allocation98_spill] sm:$0xff] %v8983_v56  ;;  %v2834_v46 = vmul.f32 %v8760_v15, %v8760_v15  ;;  %v2915_v34 = vadd.f32 %v2914_v0, %v2830_v12  ;;  %v9010_v0 = vpop.f32.mrf.mxu0 }
 0x368   :  { %v8976_v33 = vpop.f32.mrf.mxu1  ;;  %v2837_v1 = vmul.f32 %v8983_v56, %v8983_v56  ;;  %v2746_v12 = vadd.f32 %v2745_v32, %v8760_v15 }
 0x369   :  { %v2951_v49 = vadd.f32 %v2950_v44, %v2828_v62  ;;  %v2708_v58 = vadd.f32 %v2707_v50, %v8750_v3  ;;  %v9005_v62 = vadd.f32 %v8770_v4, %v8776_v22  ;;  %v2916_v44 = vadd.f32 %v2915_v34, %v2833_v9 }
 0x36a   :  { %v8990_v38 = vpop.f32.mrf.mxu1  ;;  %v2839_v50 = vmul.f32 %v8767_v23, %v8767_v23  ;;  %v2747_v4 = vadd.f32 %v2746_v12, %v8983_v56  ;;  %v2842_v34 = vmul.f32 %v8774_v41, %v8774_v41 }
 0x36b   :  { %v2952_v16 = vadd.f32 %v2951_v49, %v2831_v18  ;;  %v2709_v37 = vadd.f32 %v2708_v58, %v8755_v63  ;;  %12581 = vst [vmem:[#allocation99_spill] sm:$0xff] %v9005_v62  ;;  %v2840_v58 = vmul.f32 %v8772_v54, %v8772_v54  ;;  %v2917_v63 = vadd.f32 %v2916_v44, %v2836_v26  ;;  %v9032_v44 = vpop.f32.mrf.mxu0 }
 0x36c   :  { %v8998_v47 = vpop.f32.mrf.mxu1  ;;  %v2843_v15 = vmul.f32 %v9005_v62, %v9005_v62  ;;  %v2748_v26 = vadd.f32 %v2747_v4, %v8772_v54 }
 0x36d   :  { %v2953_v18 = vadd.f32 %v2952_v16, %v2834_v46  ;;  %v2710_v49 = vadd.f32 %v2709_v37, %v8762_v2  ;;  %v9027_v46 = vadd.f32 %v8782_v24, %v8788_v21  ;;  %v2918_v16 = vadd.f32 %v2917_v63, %v2839_v50 }
 0x36e   :  { %v9012_v5 = vpop.f32.mrf.mxu1  ;;  %v2845_v37 = vmul.f32 %v8779_v39, %v8779_v39  ;;  %v2749_v24 = vadd.f32 %v2748_v26, %v9005_v62  ;;  %v2848_v63 = vmul.f32 %v8786_v53, %v8786_v53 }
 0x36f   :  { %v2954_v9 = vadd.f32 %v2953_v18, %v2837_v1  ;;  %v2711_v32 = vadd.f32 %v2710_v49, %v8767_v23  ;;  %12582 = vst [vmem:[#allocation100_spill] sm:$0xff] %v9027_v46  ;;  %v2846_v49 = vmul.f32 %v8784_v7, %v8784_v7  ;;  %v2919_v23 = vadd.f32 %v2918_v16, %v2842_v34  ;;  %v9054_v16 = vpop.f32.mrf.mxu0 }
 0x370   :  { %v9020_v22 = vpop.f32.mrf.mxu1  ;;  %v2849_v54 = vmul.f32 %v9027_v46, %v9027_v46  ;;  %v2750_v34 = vadd.f32 %v2749_v24, %v8784_v7 }
 0x371   :  { %v2955_v1 = vadd.f32 %v2954_v9, %v2840_v58  ;;  %v2712_v18 = vadd.f32 %v2711_v32, %v8774_v41  ;;  %v9049_v58 = vadd.f32 %v8794_v14, %v8800_v36  ;;  %v2920_v9 = vadd.f32 %v2919_v23, %v2845_v37  ;;  %v6993_v37 = vld [vmem:[#allocation8 + $0xa8] ss:$12 sps:$4 sm:$0xff]  }
 0x372   :  { %v9034_v12 = vpop.f32.mrf.mxu1  ;;  %v2851_v32 = vmul.f32 %v8791_v40, %v8791_v40  ;;  %v2751_v14 = vadd.f32 %v2750_v34, %v9027_v46  ;;  %v2854_v23 = vmul.f32 %v8798_v11, %v8798_v11  ;;  %v9076_v34 = vpop.f32.mrf.mxu0 }
 0x373   :  { %v2956_v50 = vadd.f32 %v2955_v1, %v2843_v15  ;;  %v2713_v4 = vadd.f32 %v2712_v18, %v8779_v39  ;;  %12583 = vst [vmem:[#allocation101_spill] sm:$0xff] %v9049_v58  ;;  %v2852_v18 = vmul.f32 %v8796_v42, %v8796_v42  ;;  %v6995_v39 = vld [vmem:[#allocation8 + $0xac] ss:$12 sps:$4 sm:$0xff]   ;;  %v2921_v62 = vadd.f32 %v2920_v9, %v2848_v63 }
 0x374   :  { %v9042_v21 = vpop.f32.mrf.mxu1  ;;  %3954 = vmatprep.subr.bf16.mxu0 %v6995_v39  ;;  %v2857_v9 = vmul.f32 %v8803_v20, %v8803_v20 }
 0x375   :  { %v2957_v15 = vadd.f32 %v2956_v50, %v2846_v49  ;;  %v2714_v1 = vadd.f32 %v2713_v4, %v8786_v53  ;;  %v2855_v49 = vmul.f32 %v9049_v58, %v9049_v58  ;;  %v9071_v50 = vadd.f32 %v8805_v52, %v8812_v25  ;;  %3955 = vmatpush1.bf16.msra.mxu0 %v6993_v37  ;;  %v6998_v52 = vld [vmem:[#allocation8 + $0x94] ss:$12 sps:$4 sm:$0xff]  }
 0x376   :  { %v9056_v26 = vpop.f32.mrf.mxu1  ;;  %v2922_v63 = vadd.f32 %v2921_v62, %v2851_v32  ;;  %v2752_v4 = vadd.f32 %v2751_v14, %v8796_v42  ;;  %v2860_v62 = vmul.f32 %v8810_v35, %v8810_v35  ;;  %v6996_v14 = vld [vmem:[#allocation8 + $0x90] ss:$12 sps:$4 sm:$0xff]   ;;  %3956 = vmatprep.subr.bf16.mxu0 %v6998_v52  ;;  %v2866_v52 = vmul.f32 %v8820_v59, %v8820_v59  ;;  %v7008_v53 = vld [vmem:[#allocation8 + $0x48] ss:$12 sps:$4 sm:$0xff]  }
 0x377   :  { %v2958_v24 = vadd.f32 %v2957_v15, %v2849_v54  ;;  %v2715_v7 = vadd.f32 %v2714_v1, %v8791_v40  ;;  %12584 = vst [vmem:[#allocation102_spill] sm:$0xff] %v9071_v50  ;;  %v2858_v1 = vmul.f32 %v8808_v31, %v8808_v31 }
 0x378   :  { %v9064_v36 = vpop.f32.mrf.mxu1  ;;  %v2923_v25 = vadd.f32 %v2922_v63, %v2854_v23  ;;  %v2753_v39 = vadd.f32 %v2752_v4, %v9049_v58  ;;  %v9098_v63 = vpop.f32.mrf.mxu0 }
 0x379   :  { %v2959_v54 = vadd.f32 %v2958_v24, %v2852_v18  ;;  %v2716_v15 = vadd.f32 %v2715_v7, %v8798_v11  ;;  %v2861_v18 = vmul.f32 %v9071_v50, %v9071_v50  ;;  %v9093_v7 = vadd.f32 %v8816_v17, %v8822_v13  ;;  %3957 = vmatpush1.bf16.msra.mxu0 %v6996_v14  ;;  %v7001_v17 = vld [vmem:[#allocation8 + $0x7c] ss:$12 sps:$4 sm:$0xff]  }
 0x37a   :  { %v9078_v46 = vpop.f32.mrf.mxu1  ;;  %v2924_v23 = vadd.f32 %v2923_v25, %v2857_v9  ;;  %v2754_v37 = vadd.f32 %v2753_v39, %v8808_v31  ;;  %v2863_v24 = vmul.f32 %v8814_v29, %v8814_v29  ;;  %v6999_v39 = vld [vmem:[#allocation8 + $0x78] ss:$12 sps:$4 sm:$0xff]   ;;  %3958 = vmatprep.subr.bf16.mxu0 %v7001_v17  ;;  %v12589_v17 = vld [vmem:[#allocation42_spill] sm:$0xff] }
 0x37b   :  { %v2960_v40 = vadd.f32 %v2959_v54, %v2855_v49  ;;  %v2717_v42 = vadd.f32 %v2716_v15, %v8803_v20  ;;  %12585 = vst [vmem:[#allocation103_spill] sm:$0xff] %v9093_v7  ;;  %v2864_v15 = vmul.f32 %v8818_v51, %v8818_v51  ;;  %v12587_v14 = vld [vmem:[#allocation43_spill] sm:$0xff] }
 0x37c   :  { %v9086_v32 = vpop.f32.mrf.mxu1  ;;  %v2925_v13 = vadd.f32 %v2924_v23, %v2860_v62  ;;  %v2755_v9 = vadd.f32 %v2754_v37, %v9071_v50  ;;  %v2869_v23 = vmul.f32 %v12587_v14, %v12587_v14  ;;  %v9120_v37 = vpop.f32.mrf.mxu0 }
 0x37d   :  { %v2961_v49 = vadd.f32 %v2960_v40, %v2858_v1  ;;  %v2718_v54 = vadd.f32 %v2717_v42, %v8810_v35  ;;  %v2867_v40 = vmul.f32 %v9093_v7, %v9093_v7  ;;  %v9115_v42 = vadd.f32 %v8826_v6, %v8832_v43  ;;  %3959 = vmatpush1.bf16.msra.mxu0 %v6999_v39  ;;  %v7004_v6 = vld [vmem:[#allocation8 + $0x64] ss:$12 sps:$4 sm:$0xff]  }
 0x37e   :  { %v9100_v4 = vpop.f32.mrf.mxu1  ;;  %v2926_v1 = vadd.f32 %v2925_v13, %v2863_v24  ;;  %v2756_v62 = vadd.f32 %v2755_v9, %v8818_v51  ;;  %v2872_v13 = vmul.f32 %v12589_v17, %v12589_v17  ;;  %v7002_v51 = vld [vmem:[#allocation8 + $0x60] ss:$12 sps:$4 sm:$0xff]   ;;  %3960 = vmatprep.subr.bf16.mxu0 %v7004_v6 }
 0x37f   :  { %v2962_v20 = vadd.f32 %v2961_v49, %v2861_v18  ;;  %v2719_v31 = vadd.f32 %v2718_v54, %v8814_v29  ;;  %12586 = vst [vmem:[#allocation104_spill] sm:$0xff] %v9115_v42  ;;  %v12588_v54 = vld [vmem:[#allocation46_spill] sm:$0xff]  ;;  %v12595_v6 = vld [vmem:[#allocation49_spill] sm:$0xff] }
 0x380   :  { %v9108_v25 = vpop.f32.mrf.mxu1  ;;  %v2870_v50 = vmul.f32 %v12588_v54, %v12588_v54  ;;  %v2927_v43 = vadd.f32 %v2926_v1, %v2866_v52  ;;  %v2757_v24 = vadd.f32 %v2756_v62, %v9093_v7  ;;  %v12593_v1 = vld [vmem:[#allocation45_spill] sm:$0xff]  ;;  %v9141_v7 = vpop.f32.mrf.mxu0 }
 0x381   :  { %v2963_v18 = vadd.f32 %v2962_v20, %v2864_v15  ;;  %v2720_v49 = vadd.f32 %v2719_v31, %v8820_v59  ;;  %v2873_v20 = vmul.f32 %v9115_v42, %v9115_v42  ;;  %v12590_v31 = vld [vmem:[#allocation51_spill] sm:$0xff]  ;;  %v2875_v62 = vmul.f32 %v12593_v1, %v12593_v1  ;;  %3961 = vmatpush1.bf16.msra.mxu0 %v7002_v51 }
 0x382   :  { %v9122_v35 = vpop.f32.mrf.mxu1  ;;  %v12591_v15 = vld [vmem:[#allocation75_spill] sm:$0xff]  ;;  %v2928_v52 = vadd.f32 %v2927_v43, %v2869_v23  ;;  %v2878_v23 = vmul.f32 %v12595_v6, %v12595_v6  ;;  %v9165_v2 = vpop.f32.mrf.mxu0 }
 0x383   :  { %v2964_v11 = vadd.f32 %v2963_v18, %v2867_v40  ;;  %v2721_v29 = vadd.f32 %v2720_v49, %v12587_v14  ;;  %v9137_v39 = vadd.f32 %v12591_v15, %v12590_v31  ;;  %v2758_v40 = vadd.f32 %v2757_v24, %v12588_v54  ;;  %v12594_v14 = vld [vmem:[#allocation48_spill] sm:$0xff]  ;;  %v7010_v31 = vld [vmem:[#allocation8 + $0x4c] ss:$12 sps:$4 sm:$0xff]  }
 0x384   :  { %v9130_v9 = vpop.f32.mrf.mxu1  ;;  %v2876_v58 = vmul.f32 %v12594_v14, %v12594_v14  ;;  %v2929_v15 = vadd.f32 %v2928_v52, %v2872_v13  ;;  %3962 = vmatprep.subr.bf16.mxu0 %v7010_v31  ;;  %v12597_v13 = vld [vmem:[#allocation68_spill] sm:$0xff]  ;;  %v12598_v52 = vld [vmem:[#allocation57_spill] sm:$0xff]  ;;  %v6252_v54 = vadd.f32 %v8904_v10, %v8902_v30  ;;  %v7011_v10 = vld [vmem:[#allocation8 + $0x30] ss:$12 sps:$4 sm:$0xff]  }
 0x385   :  { %12592 = vst [vmem:[#allocation51_spill] sm:$0xff] %v9137_v39  ;;  %v2965_v18 = vadd.f32 %v2964_v11, %v2870_v50  ;;  %v2722_v49 = vadd.f32 %v2721_v29, %v12589_v17  ;;  %v2759_v41 = vadd.f32 %v2758_v40, %v9115_v42  ;;  %v2879_v11 = vmul.f32 %v9137_v39, %v9137_v39  ;;  %v12596_v50 = vld [vmem:[#allocation63_spill] sm:$0xff] }
 0x386   :  { %v9143_v59 = vpop.f32.mrf.mxu1  ;;  %v2930_v29 = vadd.f32 %v2929_v15, %v2875_v62  ;;  %v2881_v24 = vmul.f32 %v12596_v50, %v12596_v50  ;;  %v9161_v17 = vadd.f32 %v12598_v52, %v12597_v13  ;;  %3963 = vmatpush1.bf16.msra.mxu0 %v7008_v53  ;;  %v7013_v15 = vld [vmem:[#allocation8 + $0x34] ss:$12 sps:$4 sm:$0xff]   ;;  %v6255_v13 = vadd.f32 %v8910_v27, %v8908_v28 }
 0x387   :  { %v2966_v56 = vadd.f32 %v2965_v18, %v2873_v20  ;;  %v2723_v51 = vadd.f32 %v2722_v49, %v12593_v1  ;;  %v2760_v40 = vadd.f32 %v2759_v41, %v12594_v14  ;;  %v12600_v49 = vld [vmem:[#allocation61_spill] sm:$0xff]  ;;  %v12601_v41 = vld [vmem:[#allocation67_spill] sm:$0xff]  ;;  %3964 = vmatprep.subr.bf16.mxu0 %v7013_v15  ;;  %v12602_v28 = vld [vmem:[#allocation54_spill] sm:$0xff] }
 0x388   :  { %v9151_v43 = vpop.f32.mrf.mxu1  ;;  %12599 = vst [vmem:[#allocation75_spill] sm:$0xff] %v9161_v17  ;;  %v2882_v31 = vmul.f32 %v12600_v49, %v12600_v49  ;;  %v2931_v1 = vadd.f32 %v2930_v29, %v2878_v23  ;;  %v9184_v23 = vadd.f32 %v6252_v54, %v8906_v8  ;;  %v12603_v27 = vld [vmem:[#allocation58_spill] sm:$0xff]  ;;  %v12606_v15 = vld [vmem:[#allocation71_spill] sm:$0xff]  ;;  %v12610_v14 = vld [vmem:[#allocation52_spill] sm:$0xff] }
 0x389   :  { %v2967_v18 = vadd.f32 %v2966_v56, %v2876_v58  ;;  %v2724_v62 = vadd.f32 %v2723_v51, %v12595_v6  ;;  %v2761_v30 = vadd.f32 %v2760_v40, %v9137_v39  ;;  %v2884_v56 = vmul.f32 %v12601_v41, %v12601_v41  ;;  %v9188_v6 = vpop.f32.mrf.mxu0  ;;  %v7016_v8 = vld [vmem:[#allocation8 + $0x1c] ss:$12 sps:$4 sm:$0xff]   ;;  %v12608_v39 = vld [vmem:[#allocation88_spill] sm:$0xff] }
 0x38a   :  { %v9167_v20 = vpop.f32.mrf.mxu1  ;;  %v2932_v58 = vadd.f32 %v2931_v1, %v2881_v24  ;;  %v2885_v51 = vmul.f32 %v9161_v17, %v9161_v17  ;;  %v6258_v29 = vadd.f32 %v12603_v27, %v12602_v28  ;;  %3965 = vmatpush1.bf16.msra.mxu0 %v7011_v10  ;;  %v12605_v24 = vld [vmem:[#allocation89_spill] sm:$0xff]  ;;  %v12609_v28 = vld [vmem:[#allocation34_spill] sm:$0xff]  ;;  %v9205_v57 = vadd.f32 %v12610_v14, %v6255_v13  ;;  %v12612_v10 = vld [vmem:[#allocation79_spill] sm:$0xff] }
 0x38b   :  { %v2968_v42 = vadd.f32 %v2967_v18, %v2879_v11  ;;  %v2725_v53 = vadd.f32 %v2724_v62, %v12596_v50  ;;  %v2762_v11 = vadd.f32 %v2761_v30, %v12600_v49  ;;  %v12604_v62 = vld [vmem:[#allocation76_spill] sm:$0xff]  ;;  %v9197_v50 = vadd.f32 %v12606_v15, %v12605_v24  ;;  %v12614_v15 = vld [vmem:[#allocation70_spill] sm:$0xff]  ;;  %3966 = vmatprep.subr.bf16.mxu0 %v7016_v8 }
 0x38c   :  { %v9175_v52 = vpop.f32.mrf.mxu1  ;;  %v2887_v1 = vmul.f32 %v12604_v62, %v12604_v62  ;;  %v9202_v27 = vadd.f32 %v12609_v28, %v12608_v39  ;;  %12611 = vst [vmem:[#allocation57_spill] sm:$0xff] %v9205_v57  ;;  %v12613_v30 = vld [vmem:[#allocation64_spill] sm:$0xff]  ;;  %v2933_v3 = vadd.f32 %v2932_v58, %v2884_v56  ;;  %v2888_v19 = vmul.f32 %v12614_v15, %v12614_v15  ;;  %v12616_v13 = vld [vmem:[#allocation38_spill] sm:$0xff]  ;;  %v9223_v56 = vpop.f32.mrf.mxu0 }
 0x38d   :  { %v2969_v18 = vadd.f32 %v2968_v42, %v2882_v31  ;;  %12607 = vst [vmem:[#allocation68_spill] sm:$0xff] %v9197_v50  ;;  %v2726_v54 = vadd.f32 %v2725_v53, %v12601_v41  ;;  %v6261_v42 = vadd.f32 %v12613_v30, %v12612_v10  ;;  %v7014_v49 = vld [vmem:[#allocation8 + $0x18] ss:$12 sps:$4 sm:$0xff]   ;;  %v2763_v24 = vadd.f32 %v2762_v11, %v9161_v17 }
 0x38e   :  { %v9190_v40 = vpop.f32.mrf.mxu1  ;;  %v12615_v53 = vld [vmem:[#allocation55_spill] sm:$0xff]  ;;  %v2820_v14 = vmul.f32 %v9184_v23, %v9184_v23  ;;  %v9219_v28 = vadd.f32 %v12616_v13, %v6258_v29  ;;  %v12618_v10 = vld [vmem:[#allocation96_spill] sm:$0xff]  ;;  %12619 = vst [vmem:[#allocation58_spill] sm:$0xff] %v9223_v56  ;;  %3967 = vmatpush1.bf16.msra.mxu0 %v7014_v49  ;;  %v2934_v17 = vadd.f32 %v2933_v3, %v2887_v1  ;;  %v12620_v13 = vld [vmem:[#allocation65_spill] sm:$0xff] }
 0x38f   :  { %v2890_v41 = vmul.f32 %v12615_v53, %v12615_v53  ;;  %v2970_v39 = vadd.f32 %v2969_v18, %v2885_v51  ;;  %v6264_v30 = vadd.f32 %v8954_v48, %v12618_v10  ;;  %v2727_v11 = vadd.f32 %v2726_v54, %v12604_v62  ;;  %v7019_v18 = vld [vmem:[#allocation8 + $0x4] ss:$12 sps:$4 sm:$0xff]   ;;  %v7017_v3 = vld [vmem:[#allocation8] ss:$12 sps:$4 sm:$0xff]  }
 0x390   :  { %v9209_v31 = vpop.f32.mrf.mxu1  ;;  %12617 = vst [vmem:[#allocation54_spill] sm:$0xff] %v9219_v28  ;;  %v2764_v8 = vadd.f32 %v2763_v24, %v12614_v15  ;;  %v2891_v51 = vmul.f32 %v9197_v50, %v9197_v50  ;;  %v2817_v29 = vmul.f32 %v9202_v27, %v9202_v27  ;;  %v2823_v48 = vmul.f32 %v9205_v57, %v9205_v57 }
 0x391   :  { %v9236_v10 = vadd.f32 %v6261_v42, %v12620_v13  ;;  %v6267_v49 = vadd.f32 %v8976_v33, %v8968_v61  ;;  %v2971_v1 = vadd.f32 %v2970_v39, %v2888_v19  ;;  %v2728_v24 = vadd.f32 %v2727_v11, %v12615_v53  ;;  %3968 = vmatprep.subr.bf16.mxu0 %v7019_v18  ;;  %v9252_v33 = vpop.f32.mrf.mxu0  ;;  %v6992_v39 = vld [vmem:[#allocation8 + $0x22c] ss:$12 sps:$4 sm:$0xff]  }
 0x392   :  { %v9225_v58 = vpop.f32.mrf.mxu1  ;;  %v2935_v15 = vadd.f32 %v2934_v17, %v2890_v41  ;;  %v2778_v62 = vadd.f32 %v9184_v23, %v9202_v27  ;;  %v2985_v55 = vadd.f32 %v2820_v14, %v2817_v29  ;;  %v2826_v56 = vmul.f32 %v9219_v28, %v9219_v28  ;;  %3969 = vmatpush1.bf16.msra.mxu0 %v7017_v3  ;;  %v12621_v11 = vld [vmem:[#allocation59_spill] sm:$0xff]  ;;  %v6990_v29 = vld [vmem:[#allocation8 + $0x228] ss:$12 sps:$4 sm:$0xff]  }
 0x393   :  { %v9248_v42 = vadd.f32 %v6264_v30, %v8966_v45  ;;  %v6270_v61 = vadd.f32 %v8998_v47, %v8990_v38  ;;  %v2765_v17 = vadd.f32 %v2764_v8, %v9197_v50  ;;  %v2972_v41 = vadd.f32 %v2971_v1, %v2891_v51  ;;  %v7025_v45 = vld [vmem:[#allocation8 + $0x16c] ss:$12 sps:$4 sm:$0xff]   ;;  %v12622_v47 = vld [vmem:[#allocation50_spill] sm:$0xff]  ;;  %4147 = vmatprep.subr.bf16.mxu1 %v6992_v39 }
 0x394   :  { %v9240_v54 = vpop.f32.mrf.mxu1  ;;  %v2893_v14 = vmul.f32 %v12621_v11, %v12621_v11  ;;  %v2779_v18 = vadd.f32 %v2778_v62, %v9205_v57  ;;  %v2986_v30 = vadd.f32 %v2985_v55, %v2823_v48  ;;  %v2829_v38 = vmul.f32 %v9236_v10, %v9236_v10  ;;  %v7023_v8 = vld [vmem:[#allocation8 + $0x168] ss:$12 sps:$4 sm:$0xff]   ;;  %4148 = vmatpush1.bf16.msra.mxu1 %v6990_v29 }
 0x395   :  { %v9263_v13 = vadd.f32 %v12622_v47, %v6267_v49  ;;  %v6273_v3 = vadd.f32 %v9020_v22, %v9012_v5  ;;  %v2729_v51 = vadd.f32 %v2728_v24, %v12621_v11  ;;  %v12623_v1 = vld [vmem:[#allocation74_spill] sm:$0xff]  ;;  %3970 = vmatprep.subr.bf16.mxu0 %v7025_v45  ;;  %v2832_v49 = vmul.f32 %v9248_v42, %v9248_v42  ;;  %v9280_v22 = vpop.f32.mrf.mxu0  ;;  %v12627_v45 = vld [vmem:[#allocation72_spill] sm:$0xff] }
 0x396   :  { %v9254_v19 = vpop.f32.mrf.mxu1  ;;  %v2894_v62 = vmul.f32 %v12623_v1, %v12623_v1  ;;  %v2780_v55 = vadd.f32 %v2779_v18, %v9219_v28  ;;  %v2987_v48 = vadd.f32 %v2986_v30, %v2826_v56  ;;  %v12624_v47 = vld [vmem:[#allocation62_spill] sm:$0xff]  ;;  %v6276_v5 = vadd.f32 %v9042_v21, %v9034_v12  ;;  %3971 = vmatpush2.bf16.msra.mxu0 %v7023_v8  ;;  %v12625_v18 = vld [vmem:[#allocation41_spill] sm:$0xff] }
 0x397   :  { %v9276_v50 = vadd.f32 %v12624_v47, %v6270_v61  ;;  %v7007_v39 = vld [vmem:[#allocation8 + $0x214] ss:$12 sps:$4 sm:$0xff]   ;;  %v2936_v11 = vadd.f32 %v2935_v15, %v2893_v14  ;;  %v2896_v29 = vmul.f32 %v12625_v18, %v12625_v18  ;;  %v7005_v47 = vld [vmem:[#allocation8 + $0x210] ss:$12 sps:$4 sm:$0xff]   ;;  %v2835_v12 = vmul.f32 %v9263_v13, %v9263_v13 }
 0x398   :  { %v9267_v53 = vpop.f32.mrf.mxu1  ;;  %v12626_v56 = vld [vmem:[#allocation94_spill] sm:$0xff]  ;;  %v2781_v61 = vadd.f32 %v2780_v55, %v9236_v10  ;;  %v2988_v57 = vadd.f32 %v2987_v48, %v2829_v38  ;;  %v9294_v21 = vadd.f32 %v6273_v3, %v9010_v0  ;;  %v6279_v15 = vadd.f32 %v9064_v36, %v9056_v26  ;;  %4149 = vmatprep.subr.bf16.mxu1 %v7007_v39  ;;  %v9307_v3 = vpop.f32.mrf.mxu0 }
 0x399   :  { %v9288_v30 = vadd.f32 %v12627_v45, %v12626_v56  ;;  %v7028_v28 = vld [vmem:[#allocation8 + $0x154] ss:$12 sps:$4 sm:$0xff]   ;;  %v7026_v8 = vld [vmem:[#allocation8 + $0x150] ss:$12 sps:$4 sm:$0xff]   ;;  %v2766_v56 = vadd.f32 %v2765_v17, %v12623_v1  ;;  %v2973_v45 = vadd.f32 %v2972_v41, %v2894_v62  ;;  %4150 = vmatpush1.bf16.msra.mxu1 %v7005_v47  ;;  %v2838_v48 = vmul.f32 %v9276_v50, %v9276_v50 }
 0x39a   :  { %v9282_v24 = vpop.f32.mrf.mxu1  ;;  %v2782_v55 = vadd.f32 %v2781_v61, %v9248_v42  ;;  %3972 = vmatprep.subr.bf16.mxu0 %v7028_v28  ;;  %v2989_v38 = vadd.f32 %v2988_v57, %v2832_v49  ;;  %v9305_v0 = vadd.f32 %v6276_v5, %v9054_v16  ;;  %v6282_v26 = vadd.f32 %v9086_v32, %v9078_v46  ;;  %v7022_v17 = vld [vmem:[#allocation8 + $0x1fc] ss:$12 sps:$4 sm:$0xff]   ;;  %v7020_v49 = vld [vmem:[#allocation8 + $0x1f8] ss:$12 sps:$4 sm:$0xff]  }
 0x39b   :  { %12628 = vst [vmem:[#allocation89_spill] sm:$0xff] %v9288_v30  ;;  %3973 = vmatpush2.bf16.msra.mxu0 %v7026_v8  ;;  %v2730_v41 = vadd.f32 %v2729_v51, %v12625_v18  ;;  %v2937_v62 = vadd.f32 %v2936_v11, %v2896_v29  ;;  %v2897_v57 = vmul.f32 %v9288_v30, %v9288_v30  ;;  %v7031_v16 = vld [vmem:[#allocation8 + $0x13c] ss:$12 sps:$4 sm:$0xff]   ;;  %v7029_v11 = vld [vmem:[#allocation8 + $0x138] ss:$12 sps:$4 sm:$0xff]  }
 0x39c   :  { %v9298_v14 = vpop.f32.mrf.mxu1  ;;  %v2783_v28 = vadd.f32 %v2782_v55, %v9263_v13  ;;  %v2990_v5 = vadd.f32 %v2989_v38, %v2835_v12  ;;  %v2841_v39 = vmul.f32 %v9294_v21, %v9294_v21  ;;  %v9320_v46 = vadd.f32 %v8988_v60, %v6279_v15  ;;  %4151 = vmatprep.subr.bf16.mxu1 %v7022_v17  ;;  %v12629_v29 = vld [vmem:[#allocation93_spill] sm:$0xff]  ;;  %v9332_v15 = vpop.f32.mrf.mxu0  ;;  %v7037_v55 = vld [vmem:[#allocation8 + $0x1e4] ss:$12 sps:$4 sm:$0xff]  }
 0x39d   :  { %v6285_v32 = vadd.f32 %v9108_v25, %v9100_v4  ;;  %v2767_v51 = vadd.f32 %v2766_v56, %v9288_v30  ;;  %v2899_v47 = vmul.f32 %v12629_v29, %v12629_v29  ;;  %4152 = vmatpush1.bf16.msra.mxu1 %v7020_v49  ;;  %3974 = vmatprep.subr.bf16.mxu0 %v7031_v16  ;;  %v7035_v30 = vld [vmem:[#allocation8 + $0x1e0] ss:$12 sps:$4 sm:$0xff]  }
 0x39e   :  { %v9311_v36 = vpop.f32.mrf.mxu1  ;;  %v2784_v12 = vadd.f32 %v2783_v28, %v9276_v50  ;;  %v2991_v8 = vadd.f32 %v2990_v5, %v2838_v48  ;;  %v2844_v60 = vmul.f32 %v9305_v0, %v9305_v0  ;;  %v9335_v4 = vadd.f32 %v9032_v44, %v6282_v26  ;;  %v12630_v28 = vld [vmem:[#allocation80_spill] sm:$0xff]  ;;  %v12631_v48 = vld [vmem:[#allocation95_spill] sm:$0xff]  ;;  %4153 = vmatprep.subr.bf16.mxu1 %v7037_v55 }
 0x39f   :  { %v6288_v25 = vadd.f32 %v9130_v9, %v9122_v35  ;;  %3975 = vmatpush2.bf16.msra.mxu0 %v7029_v11  ;;  %v2974_v38 = vadd.f32 %v2973_v45, %v2897_v57  ;;  %v2731_v17 = vadd.f32 %v2730_v41, %v12629_v29  ;;  %v9344_v49 = vadd.f32 %v12631_v48, %v12630_v28  ;;  %v7034_v5 = vld [vmem:[#allocation8 + $0x124] ss:$12 sps:$4 sm:$0xff]   ;;  %v7032_v41 = vld [vmem:[#allocation8 + $0x120] ss:$12 sps:$4 sm:$0xff]  }
 0x3a0   :  { %v9324_v61 = vpop.f32.mrf.mxu1  ;;  %v2785_v16 = vadd.f32 %v2784_v12, %v9294_v21  ;;  %v2992_v44 = vadd.f32 %v2991_v8, %v2841_v39  ;;  %v2847_v26 = vmul.f32 %v9320_v46, %v9320_v46  ;;  %v9350_v35 = vadd.f32 %v6285_v32, %v9098_v63  ;;  %v12633_v11 = vld [vmem:[#allocation36_spill] sm:$0xff]  ;;  %3976 = vmatprep.subr.bf16.mxu0 %v7034_v5  ;;  %v9359_v8 = vpop.f32.mrf.mxu0  ;;  %v7043_v32 = vld [vmem:[#allocation8 + $0x1cc] ss:$12 sps:$4 sm:$0xff]  }
 0x3a1   :  { %12632 = vst [vmem:[#allocation71_spill] sm:$0xff] %v9344_v49  ;;  %v6291_v9 = vadd.f32 %v9151_v43, %v9143_v59  ;;  %v2938_v57 = vadd.f32 %v2937_v62, %v2899_v47  ;;  %v2900_v12 = vmul.f32 %v12633_v11, %v12633_v11  ;;  %4154 = vmatpush1.bf16.msra.mxu1 %v7035_v30  ;;  %v12634_v55 = vld [vmem:[#allocation40_spill] sm:$0xff] }
 0x3a2   :  { %v9339_v56 = vpop.f32.mrf.mxu1  ;;  %v2786_v28 = vadd.f32 %v2785_v16, %v9305_v0  ;;  %v2993_v39 = vadd.f32 %v2992_v44, %v2844_v60  ;;  %v2850_v63 = vmul.f32 %v9335_v4, %v9335_v4  ;;  %v9364_v59 = vadd.f32 %v6288_v25, %v9141_v7  ;;  %v7040_v16 = vld [vmem:[#allocation8 + $0x10c] ss:$12 sps:$4 sm:$0xff]   ;;  %v7041_v7 = vld [vmem:[#allocation8 + $0x1c8] ss:$12 sps:$4 sm:$0xff]   ;;  %4155 = vmatprep.subr.bf16.mxu1 %v7043_v32 }
 0x3a3   :  { %v6294_v43 = vadd.f32 %v9175_v52, %v9167_v20  ;;  %3977 = vmatpush2.bf16.msra.mxu0 %v7032_v41  ;;  %v2768_v47 = vadd.f32 %v2767_v51, %v12633_v11  ;;  %v2902_v30 = vmul.f32 %v12634_v55, %v12634_v55  ;;  %v2903_v60 = vmul.f32 %v9344_v49, %v9344_v49  ;;  %v7038_v44 = vld [vmem:[#allocation8 + $0x108] ss:$12 sps:$4 sm:$0xff]  }
 0x3a4   :  { %v9354_v45 = vpop.f32.mrf.mxu1  ;;  %v2787_v48 = vadd.f32 %v2786_v28, %v9320_v46  ;;  %v2994_v25 = vadd.f32 %v2993_v39, %v2847_v26  ;;  %v2853_v20 = vmul.f32 %v9350_v35, %v9350_v35  ;;  %v9379_v52 = vadd.f32 %v9076_v34, %v6291_v9  ;;  %3978 = vmatprep.subr.bf16.mxu0 %v7040_v16  ;;  %v9387_v39 = vpop.f32.mrf.mxu0  ;;  %v7047_v16 = vld [vmem:[#allocation8 + $0x1b0] ss:$12 sps:$4 sm:$0xff]  }
 0x3a5   :  { %v6297_v51 = vadd.f32 %v9209_v31, %v9190_v40  ;;  %v2975_v41 = vadd.f32 %v2974_v38, %v2900_v12  ;;  %v2732_v11 = vadd.f32 %v2731_v17, %v12634_v55  ;;  %4156 = vmatpush1.bf16.msra.mxu1 %v7041_v7  ;;  %v2856_v34 = vmul.f32 %v9364_v59, %v9364_v59  ;;  %v7049_v38 = vld [vmem:[#allocation8 + $0x1b4] ss:$12 sps:$4 sm:$0xff]  }
 0x3a6   :  { %v9368_v62 = vpop.f32.mrf.mxu1  ;;  %12635 = vst [vmem:[#allocation88_spill] sm:$0xff] %v9379_v52  ;;  %v2788_v28 = vadd.f32 %v2787_v48, %v9335_v4  ;;  %v2995_v26 = vadd.f32 %v2994_v25, %v2850_v63  ;;  %v9392_v9 = vadd.f32 %v9120_v37, %v6294_v43  ;;  %v6300_v40 = vadd.f32 %v9240_v54, %v9225_v58  ;;  %v7046_v48 = vld [vmem:[#allocation8 + $0xf4] ss:$12 sps:$4 sm:$0xff]  }
 0x3a7   :  { %3979 = vmatpush2.bf16.msra.mxu0 %v7038_v44  ;;  %v9398_v17 = vadd.f32 %v2938_v57, %v2902_v30  ;;  %v2769_v12 = vadd.f32 %v2768_v47, %v9344_v49  ;;  %v2976_v63 = vadd.f32 %v2975_v41, %v2903_v60  ;;  %v2859_v37 = vmul.f32 %v9379_v52, %v9379_v52  ;;  %v7044_v57 = vld [vmem:[#allocation8 + $0xf0] ss:$12 sps:$4 sm:$0xff]   ;;  %v12637_v47 = vld [vmem:[#allocation44_spill] sm:$0xff]  ;;  %v9417_v41 = vpop.f32.mrf.mxu0 }
 0x3a8   :  { %v9383_v5 = vpop.f32.mrf.mxu1  ;;  %12636 = vst [vmem:[#allocation34_spill] sm:$0xff] %v9392_v9  ;;  %v2789_v32 = vadd.f32 %v2788_v28, %v9350_v35  ;;  %v2996_v7 = vadd.f32 %v2995_v26, %v2853_v20  ;;  %v9405_v43 = vadd.f32 %v6297_v51, %v9188_v6  ;;  %v6303_v58 = vadd.f32 %v9267_v53, %v9254_v19  ;;  %v12638_v60 = vld [vmem:[#allocation56_spill] sm:$0xff]  ;;  %v12639_v25 = vld [vmem:[#allocation86_spill] sm:$0xff]  ;;  %v7055_v28 = vld [vmem:[#allocation8 + $0x19c] ss:$12 sps:$4 sm:$0xff]  }
 0x3a9   :  { %4157 = vmatprep.subr.bf16.mxu1 %v7049_v38  ;;  %v2733_v30 = vadd.f32 %v2732_v11, %v12637_v47  ;;  %v9414_v44 = vadd.f32 %v12639_v25, %v12638_v60  ;;  %3980 = vmatprep.subr.bf16.mxu0 %v7046_v48  ;;  %v2862_v53 = vmul.f32 %v9392_v9, %v9392_v9  ;;  %v12641_v38 = vld [vmem:[#allocation47_spill] sm:$0xff] }
 0x3aa   :  { %v9396_v31 = vpop.f32.mrf.mxu1  ;;  %v2790_v20 = vadd.f32 %v2789_v32, %v9364_v59  ;;  %4158 = vmatpush1.bf16.msra.mxu1 %v7047_v16  ;;  %v2997_v6 = vadd.f32 %v2996_v7, %v2856_v34  ;;  %v9422_v19 = vadd.f32 %v6300_v40, %v9252_v33  ;;  %v6306_v11 = vadd.f32 %v9298_v14, %v9282_v24  ;;  %v7052_v16 = vld [vmem:[#allocation8 + $0xdc] ss:$12 sps:$4 sm:$0xff]   ;;  %v7053_v7 = vld [vmem:[#allocation8 + $0x198] ss:$12 sps:$4 sm:$0xff]  }
 0x3ab   :  { %12640 = vst [vmem:[#allocation52_spill] sm:$0xff] %v9414_v44  ;;  %3981 = vmatpush2.bf16.msra.mxu0 %v7044_v57  ;;  %v2905_v26 = vmul.f32 %v12637_v47, %v12637_v47  ;;  %v2770_v32 = vadd.f32 %v2769_v12, %v12641_v38  ;;  %v2906_v34 = vmul.f32 %v12641_v38, %v12641_v38  ;;  %v7050_v60 = vld [vmem:[#allocation8 + $0xd8] ss:$12 sps:$4 sm:$0xff]  }
 0x3ac   :  { %v9409_v54 = vpop.f32.mrf.mxu1  ;;  %v2791_v48 = vadd.f32 %v2790_v20, %v9379_v52  ;;  %v2998_v33 = vadd.f32 %v2997_v6, %v2859_v37  ;;  %v2865_v40 = vmul.f32 %v9405_v43, %v9405_v43  ;;  %v9435_v24 = vadd.f32 %v9165_v2, %v6303_v58  ;;  %4159 = vmatprep.subr.bf16.mxu1 %v7055_v28  ;;  %v7058_v37 = vld [vmem:[#allocation8 + $0xc4] ss:$12 sps:$4 sm:$0xff]   ;;  %v7059_v6 = vld [vmem:[#allocation8 + $0x180] ss:$12 sps:$4 sm:$0xff]   ;;  %v9443_v52 = vpop.f32.mrf.mxu0 }
 0x3ad   :  { %v6309_v14 = vadd.f32 %v9324_v61, %v9311_v36  ;;  %v2771_v12 = vadd.f32 %v2770_v32, %v9414_v44  ;;  %v2909_v25 = vmul.f32 %v9414_v44, %v9414_v44  ;;  %3982 = vmatprep.subr.bf16.mxu0 %v7052_v16  ;;  %v2868_v36 = vmul.f32 %v9422_v19, %v9422_v19  ;;  %v12642_v61 = vld [vmem:[#allocation58_spill] sm:$0xff]  ;;  %v7056_v44 = vld [vmem:[#allocation8 + $0xc0] ss:$12 sps:$4 sm:$0xff]  }
 0x3ae   :  { %v6319_v51 = vpop.f32.mrf.mxu1  ;;  %v2792_v20 = vadd.f32 %v2791_v48, %v9392_v9  ;;  %4160 = vmatpush1.bf16.msra.mxu1 %v7053_v7  ;;  %v2999_v2 = vadd.f32 %v2998_v33, %v2862_v53  ;;  %v9448_v58 = vadd.f32 %v12642_v61, %v6306_v11  ;;  %v6312_v28 = vadd.f32 %v9354_v45, %v9339_v56  ;;  %v7061_v48 = vld [vmem:[#allocation8 + $0x184] ss:$12 sps:$4 sm:$0xff]   ;;  %v12643_v7 = vld [vmem:[#allocation87_spill] sm:$0xff] }
 0x3af   :  { %3983 = vmatpush2.bf16.msra.mxu0 %v7050_v60  ;;  %v2977_v16 = vadd.f32 %v2976_v63, %v2906_v34  ;;  %v2734_v9 = vadd.f32 %v2733_v30, %v12643_v7  ;;  %v2908_v38 = vmul.f32 %v12643_v7, %v12643_v7  ;;  %v2871_v11 = vmul.f32 %v9435_v24, %v9435_v24 }
 0x3b0   :  { %v6320_v57 = vpop.f32.mrf.mxu1  ;;  %v2793_v53 = vadd.f32 %v2792_v20, %v9405_v43  ;;  %3984 = vmatprep.subr.bf16.mxu0 %v7058_v37  ;;  %v3000_v33 = vadd.f32 %v2999_v2, %v2865_v40  ;;  %v9459_v61 = vadd.f32 %v6309_v14, %v9307_v3  ;;  %v6315_v56 = vadd.f32 %v9383_v5, %v9368_v62  ;;  %v2676_v20 = vpop.f32.mrf.mxu0 }
 0x3b1   :  { %4161 = vmatprep.subr.bf16.mxu1 %v7061_v48  ;;  %v2940_v63 = vadd.f32 %v9398_v17, %v2905_v26  ;;  %v2772_v30 = vrot.slane %v2771_v12, 4  ;;  %v2978_v34 = vadd.f32 %v2977_v16, %v2909_v25  ;;  %v2874_v37 = vmul.f32 %v9448_v58, %v9448_v58  ;;  %v7062_v25 = vld [vmem:[#allocation8 + $0x170] ss:$12 sps:$4 sm:$0xff]  }
 0x3b2   :  { %v6322_v32 = vpop.f32.mrf.mxu1  ;;  %v2794_v60 = vadd.f32 %v2793_v53, %v9422_v19  ;;  %4162 = vmatpush1.bf16.msra.mxu1 %v7059_v6  ;;  %v3001_v40 = vadd.f32 %v3000_v33, %v2868_v36  ;;  %v9468_v3 = vadd.f32 %v6312_v28, %v9359_v8  ;;  %v6318_v62 = vadd.f32 %v9409_v54, %v9396_v31  ;;  %v9479_v54 = vpop.f32.mrf.mxu0 }
 0x3b3   :  { %3985 = vmatpush2.bf16.msra.mxu0 %v7056_v44  ;;  %v2735_v14 = vrot.slane %v2734_v9, 4  ;;  %v2941_v17 = vadd.f32 %v2940_v63, %v2908_v38  ;;  %v2877_v6 = vmul.f32 %v9459_v61, %v9459_v61  ;;  %v9476_v36 = vadd.f32 %v9280_v22, %v6315_v56 }
 0x3b4   :  { %v6323_v45 = vpop.f32.mrf.mxu1  ;;  %v2795_v26 = vadd.f32 %v2794_v60, %v9435_v24  ;;  %v3002_v2 = vadd.f32 %v3001_v40, %v2871_v11  ;;  %v6321_v48 = vadd.f32 %v6320_v57, %v6319_v51  ;;  %v2773_v28 = vadd.f32 %v2772_v30, %v2771_v12  ;;  %6367 = vmatprep.subr.bf16.mxu0 %v7062_v25 }
 0x3b5   :  { %v2979_v31 = vrot.slane %v2978_v34, 4  ;;  %v2880_v38 = vmul.f32 %v9468_v3, %v9468_v3  ;;  %v9484_v53 = vadd.f32 %v9332_v15, %v6318_v62  ;;  %v2736_v11 = vadd.f32 %v2735_v14, %v2734_v9  ;;  %v2689_v62 = vpop.f32.mrf.mxu0 }
 0x3b6   :  { %v6325_v5 = vpop.f32.mrf.mxu1  ;;  %v2796_v16 = vadd.f32 %v2795_v26, %v9448_v58  ;;  %v3003_v44 = vadd.f32 %v3002_v2, %v2874_v37  ;;  %v6324_v51 = vadd.f32 %v6323_v45, %v6322_v32  ;;  %v2942_v57 = vrot.slane %v2941_v17, 4 }
 0x3b7   :  { %v2883_v56 = vmul.f32 %v9476_v36, %v9476_v36  ;;  %v9490_v63 = vadd.f32 %v6321_v48, %v9417_v41  ;;  %v2774_v37 = vrot.slane %v2773_v28, 2  ;;  %v2980_v15 = vadd.f32 %v2979_v31, %v2978_v34 }
 0x3b8   :  { %v6326_v8 = vpop.f32.mrf.mxu1  ;;  %v2797_v22 = vadd.f32 %v2796_v16, %v9459_v61  ;;  %v3004_v12 = vadd.f32 %v3003_v44, %v2877_v6  ;;  %v2886_v9 = vmul.f32 %v9484_v53, %v9484_v53  ;;  %v9496_v14 = vadd.f32 %v6324_v51, %v2676_v20 }
 0x3b9   :  { %v6327_v40 = vadd.f32 %v6326_v8, %v6325_v5  ;;  %v2737_v2 = vrot.slane %v2736_v11, 2  ;;  %v2943_v41 = vadd.f32 %v2942_v57, %v2941_v17  ;;  %v2889_v48 = vmul.f32 %v9490_v63, %v9490_v63 }
 0x3ba   :  { %v6328_v33 = vpop.f32.mrf.mxu1  ;;  %v2798_v60 = vadd.f32 %v2797_v22, %v9468_v3  ;;  %v3005_v26 = vadd.f32 %v3004_v12, %v2880_v38  ;;  %v2775_v31 = vadd.f32 %v2774_v37, %v2773_v28  ;;  %v2981_v44 = vrot.slane %v2980_v15, 2  ;;  %v6734_v38 = vpop.f32.mrf.mxu0 }
 0x3bb   :  { %v9502_v8 = vadd.f32 %v9387_v39, %v6327_v40  ;;  %v2892_v17 = vmul.f32 %v9496_v14, %v9496_v14  ;;  %v2738_v57 = vadd.f32 %v2737_v2, %v2736_v11  ;;  %v2944_v12 = vrot.slane %v2943_v41, 2 }
 0x3bc   :  { %v6329_v30 = vpop.f32.mrf.mxu1  ;;  %v2799_v45 = vadd.f32 %v2798_v60, %v9476_v36  ;;  %v3006_v6 = vadd.f32 %v3005_v26, %v2883_v56  ;;  %v2776_v37 = vrot.slane %v2775_v31, 1  ;;  %v2982_v26 = vadd.f32 %v2981_v44, %v2980_v15 }
 0x3bd   :  { %v6330_v25 = vadd.f32 %v6329_v30, %v6328_v33  ;;  %v2895_v28 = vmul.f32 %v9502_v8, %v9502_v8  ;;  %v2739_v2 = vrot.slane %v2738_v57, 1 }
 0x3be   :  { %v6331_v32 = vpop.f32.mrf.mxu1  ;;  %v2800_v34 = vadd.f32 %v2799_v45, %v9484_v53  ;;  %v3007_v22 = vadd.f32 %v3006_v6, %v2886_v9  ;;  %v2692_v9 = vpop.f32.mrf.mxu0  ;;  %v2945_v6 = vadd.f32 %v2944_v12, %v2943_v41  ;;  %v2983_v44 = vrot.slane %v2982_v26, 1 }
 0x3bf   :  { %v9508_v51 = vadd.f32 %v9443_v52, %v6330_v25  ;;  %v2740_v41 = vadd.f32 %v2739_v2, %v2738_v57 }
 0x3c0   :  { %v6332_v5 = vpop.f32.mrf.mxu1  ;;  %v2801_v33 = vadd.f32 %v2800_v34, %v9490_v63  ;;  %v3008_v56 = vadd.f32 %v3007_v22, %v2889_v48  ;;  %v2946_v12 = vrot.slane %v2945_v6, 1 }
 0x3c1   :  { %v6333_v16 = vadd.f32 %v6332_v5, %v6331_v32  ;;  %v2898_v11 = vmul.f32 %v9508_v51, %v9508_v51 }
 0x3c2   :  { %v6334_v20 = vpop.f32.mrf.mxu1  ;;  %v2802_v39 = vadd.f32 %v2801_v33, %v9496_v14  ;;  %v3009_v45 = vadd.f32 %v3008_v56, %v2892_v17 }
 0x3c3   :  { %v9513_v60 = vadd.f32 %v6333_v16, %v2689_v62  ;;  %v2777_v16 = vadd.f32 %v2776_v37, %v2775_v31  ;;  %v2984_v37 = vadd.f32 %v2983_v44, %v2982_v26 }
 0x3c4   :  { %v6335_v30 = vpop.f32.mrf.mxu1  ;;  %v2803_v52 = vadd.f32 %v2802_v39, %v9502_v8  ;;  %v3010_v5 = vadd.f32 %v3009_v45, %v2895_v28 }
 0x3c5   :  { %v6336_v40 = vadd.f32 %v6335_v30, %v6334_v20  ;;  %v2901_v34 = vmul.f32 %v9513_v60, %v9513_v60  ;;  %v3026_v2 = vmul.f32 0.00390625, %v2984_v37 }
 0x3c6   :  { %v6337_v32 = vpop.f32.mrf.mxu1  ;;  %v2804_v62 = vadd.f32 %v2803_v52, %v9508_v51  ;;  %v3011_v20 = vadd.f32 %v3010_v5, %v2898_v11  ;;  %v2947_v11 = vadd.f32 %v2946_v12, %v2945_v6 }
 0x3c7   :  { %v9518_v25 = vadd.f32 %v6336_v40, %v2692_v9  ;;  %v3023_v9 = vmul.f32 0.00390625, %v2777_v16 }
 0x3c8   :  { %v6338_v48 = vpop.f32.mrf.mxu1  ;;  %v2805_v33 = vadd.f32 %v2804_v62, %v9513_v60  ;;  %v3012_v39 = vadd.f32 %v3011_v20, %v2901_v34  ;;  %v3025_v20 = vmul.f32 0.00390625, %v2947_v11 }
 0x3c9   :  { %12644 = vst [vmem:[#allocation79_spill] sm:$0xff] %v9518_v25  ;;  %v6339_v15 = vadd.f32 %v6338_v48, %v6337_v32  ;;  %v2904_v17 = vmul.f32 %v9518_v25, %v9518_v25  ;;  %v3022_v48 = vmul.f32 0.00390625, %v2740_v41  ;;  %v3029_v62 = vmul.f32 %v3023_v9, %v3023_v9 }
 0x3ca   :  { %v6340_v22 = vpop.f32.mrf.mxu1  ;;  %v2806_v28 = vadd.f32 %v2805_v33, %v9518_v25 }
 0x3cb   :  { %v9527_v56 = vadd.f32 %v9479_v54, %v6339_v15  ;;  %v3013_v32 = vadd.f32 %v3012_v39, %v2904_v17  ;;  %v3028_v33 = vmul.f32 %v3022_v48, %v3022_v48 }
 0x3cc   :  { %v6341_v30 = vpop.f32.mrf.mxu1 }
 0x3cd   :  { %v2907_v31 = vmul.f32 %v9527_v56, %v9527_v56  ;;  %v6342_v40 = vadd.f32 %v6341_v30, %v6340_v22  ;;  %v2807_v45 = vadd.f32 %v2806_v28, %v9527_v56  ;;  %v3032_v22 = vsub.f32 %v3026_v2, %v3029_v62 }
 0x3ce   :  { %v3031_v44 = vsub.f32 %v3025_v20, %v3028_v33 }
 0x3cf   :  { %v2701_v52 = vadd.f32 %v6734_v38, %v6342_v40  ;;  %v3014_v54 = vadd.f32 %v3013_v32, %v2907_v31  ;;  %v3035_v38 = vmax.f32 %v3032_v22, 0.0 }
 0x3d0   :  { %v3034_v12 = vmax.f32 %v3031_v44, 0.0 }
 0x3d1   :  { %v2808_v5 = vadd.f32 %v2807_v45, %v2701_v52  ;;  %v2910_v57 = vmul.f32 %v2701_v52, %v2701_v52  ;;  %v3042_v31 = vadd.f32 1e-05, %v3035_v38  ;;  %v12649_v38 = vld [vmem:[#allocation84_spill] sm:$0xff] }
 0x3d2   :  { %v3041_v32 = vadd.f32 1e-05, %v3034_v12 }
 0x3d3   :  { %v2809_v34 = vrot.slane %v2808_v5, 4  ;;  %v3015_v15 = vadd.f32 %v3014_v54, %v2910_v57  ;;  %7116 = vrsqrt.f32 %v3042_v31  ;;  %v9533_v57 = vld [vmem:[#allocation8 + $0x230] ss:$12 sps:$4 sm:$0xff]  }
 0x3d4   :  { %7118 = vrsqrt.f32 %v3041_v32  ;;  %12645 = vst [vmem:[#allocation64_spill] sm:$0xff] %v9533_v57  ;;  %6735 = vmatprep.subr.bf16.mxu1 %v9533_v57  ;;  %v12714_v57 = vld [vmem:[#allocation51_spill] sm:$0xff] }
 0x3d5   :  { %v2810_v25 = vadd.f32 %v2809_v34, %v2808_v5  ;;  %v3016_v49 = vrot.slane %v3015_v15, 4 }
 0x3d7   :  { %v2811_v26 = vrot.slane %v2810_v25, 2  ;;  %v3017_v16 = vadd.f32 %v3016_v49, %v3015_v15  ;;  %v12646_v15 = vld [vmem:[#allocation82_spill] sm:$0xff] }
 0x3d9   :  { %v2812_v17 = vadd.f32 %v2811_v26, %v2810_v25  ;;  %v3018_v30 = vrot.slane %v3017_v16, 2  ;;  %v3038_v26 = vld [vmem:[#allocation11 + $0x1] ss:$8 sm:$0x7] }
 0x3db   :  { %v2813_v6 = vrot.slane %v2812_v17, 1  ;;  %v3019_v41 = vadd.f32 %v3018_v30, %v3017_v16 }
 0x3dd   :  { %v2814_v39 = vadd.f32 %v2813_v6, %v2812_v17  ;;  %v3020_v28 = vrot.slane %v3019_v41, 1  ;;  %v12647_v17 = vld [vmem:[#allocation83_spill] sm:$0xff] }
 0x3df   :  { %v3021_v40 = vadd.f32 %v3020_v28, %v3019_v41  ;;  %v3024_v37 = vmul.f32 0.00390625, %v2814_v39  ;;  %v12651_v41 = vld [vmem:[#allocation85_spill] sm:$0xff] }
 0x3e0   :  { %v7117_v25 = vpop.eup %7116 }
 0x3e1   :  { %v3027_v45 = vmul.f32 0.00390625, %v3021_v40  ;;  %v3030_v11 = vmul.f32 %v3024_v37, %v3024_v37  ;;  %v7119_v2 = vpop.eup %7118 }
 0x3e2   :  { %v3050_v62 = vcombine.low %v7119_v2, %v7117_v25  ;;  %v12655_v25 = vld [vmem:[#allocation66_spill] sm:$0xff]  ;;  %v12657_v2 = vld [vmem:[#allocation60_spill] sm:$0xff] }
 0x3e3   :  { %v3033_v54 = vsub.f32 %v3027_v45, %v3030_v11 }
 0x3e4   :  { %v3057_v20 = vrot.slane %v3050_v62, %v12646_v15 }
 0x3e5   :  { %v3036_v5 = vmax.f32 %v3033_v54, 0.0 }
 0x3e7   :  { %v3043_v49 = vadd.f32 1e-05, %v3036_v5  ;;  %v12654_v5 = vld [vmem:[#allocation53_spill] sm:$0xff] }
 0x3e9   :  { %7120 = vrsqrt.f32 %v3043_v49 }
 0x3f6   :  { %v7121_v34 = vpop.eup %7120 }
 0x3f7   :  { %v3064_v33 = vrot.slane %v7121_v34, %v12646_v15 }
 0x3f9   :  { %v3065_v22 = vcombine.low %v3057_v20, %v3064_v33  ;;  %v12658_v20 = vld [vmem:[#allocation73_spill] sm:$0xff] }
 0x3fb   :  { %v3072_v16 = vrot.slane %v3065_v22, %v12646_v15 }
 0x3fd   :  { %v3074_v44 = vmul.f32 %v3072_v16, %v3038_v26  ;;  %v12660_v16 = vld [vmem:[#allocation57_spill] sm:$0xff] }
 0x3ff   :  { %v9540_v30 = vrot.slane %v3074_v44, %v12647_v17  ;;  %v9543_v6 = vrot.slane %v3074_v44, %v12649_v38  ;;  %v9546_v12 = vrot.slane %v3074_v44, %v12651_v41 }
 0x401   :  { %12648 = vst [vmem:[#allocation38_spill] sm:$0xff] %v9540_v30  ;;  %12650 = vst [vmem:[#allocation96_spill] sm:$0xff] %v9543_v6  ;;  %v3091_v39 = vmul.f32 %v9540_v30, %v3022_v48  ;;  %v3092_v28 = vmul.f32 %v9543_v6, %v3023_v9  ;;  %v9551_v31 = vmul.f32 %v9546_v12, %v2701_v52  ;;  %v12656_v52 = vld [vmem:[#allocation69_spill] sm:$0xff] }
 0x402   :  { %12652 = vst [vmem:[#allocation65_spill] sm:$0xff] %v9546_v12  ;;  %v3093_v32 = vmul.f32 %v9546_v12, %v3024_v37  ;;  %v9558_v49 = vmul.f32 %v9540_v30, %v12654_v5  ;;  %v9562_v48 = vmul.f32 %v9543_v6, %v12655_v25  ;;  %v9566_v9 = vmul.f32 %v9546_v12, %v9202_v27  ;;  %v12659_v27 = vld [vmem:[#allocation77_spill] sm:$0xff]  ;;  %v12666_v25 = vld [vmem:[#allocation23_spill] sm:$0xff] }
 0x403   :  { %12653 = vst [vmem:[#allocation50_spill] sm:$0xff] %v9551_v31  ;;  %v3097_v40 = vcombine.low %v3091_v39, %v3092_v28  ;;  %v9570_v37 = vmul.f32 %v9540_v30, %v12656_v52  ;;  %v9574_v62 = vmul.f32 %v9543_v6, %v12657_v2  ;;  %v9578_v34 = vmul.f32 %v9546_v12, %v9184_v23  ;;  %v12661_v39 = vld [vmem:[#allocation19_spill] sm:$0xff]  ;;  %v3040_v23 = vld [vmem:[#allocation11 + $0x4] ss:$8 sm:$0x7] }
 0x404   :  { %v3111_v11 = vrot.slane %v3093_v32, %v12646_v15  ;;  %v9582_v33 = vmul.f32 %v9540_v30, %v12658_v20  ;;  %v9587_v26 = vmul.f32 %v9543_v6, %v12659_v27  ;;  %v9591_v44 = vmul.f32 %v9546_v12, %v12660_v16  ;;  %v12668_v20 = vld [vmem:[#allocation81_spill] sm:$0xff] }
 0x405   :  { %v3104_v45 = vrot.slane %v3097_v40, %v12646_v15  ;;  %v9595_v28 = vmul.f32 %v9540_v30, %v12661_v39  ;;  %v12662_v40 = vld [vmem:[#allocation78_spill] sm:$0xff]  ;;  %v9611_v52 = vmul.f32 %v9543_v6, %v12666_v25  ;;  %v9615_v2 = vmul.f32 %v9546_v12, %v9236_v10  ;;  %v12669_v16 = vld [vmem:[#allocation97_spill] sm:$0xff] }
 0x406   :  { %v9599_v32 = vmul.f32 %v9543_v6, %v12662_v40  ;;  %v9619_v27 = vmul.f32 %v9540_v30, %v12668_v20  ;;  %v9623_v39 = vmul.f32 %v9543_v6, %v12669_v16  ;;  %v9627_v40 = vmul.f32 %v9546_v12, %v9248_v42  ;;  %v12673_v25 = vld [vmem:[#allocation26_spill] sm:$0xff] }
 0x407   :  { %v3112_v54 = vcombine.low %v3104_v45, %v3111_v11  ;;  %v12663_v45 = vld [vmem:[#allocation54_spill] sm:$0xff]  ;;  %12667 = vst [vmem:[#allocation62_spill] sm:$0xff] %v9611_v52  ;;  %v9635_v10 = vmul.f32 %v9543_v6, %v12673_v25  ;;  %v9639_v20 = vmul.f32 %v9546_v12, %v9263_v13  ;;  %v12711_v52 = vld [vmem:[#allocation48_spill] sm:$0xff] }
 0x408   :  { %v9603_v11 = vmul.f32 %v9546_v12, %v12663_v45  ;;  %12670 = vst [vmem:[#allocation41_spill] sm:$0xff] %v9623_v39  ;;  %12671 = vst [vmem:[#allocation94_spill] sm:$0xff] %v9627_v40  ;;  %v12672_v45 = vld [vmem:[#allocation27_spill] sm:$0xff]  ;;  %v12676_v39 = vld [vmem:[#allocation98_spill] sm:$0xff] }
 0x409   :  { %v3119_v22 = vrot.slane %v3112_v54, %v12646_v15  ;;  %v12665_v54 = vld [vmem:[#allocation21_spill] sm:$0xff]  ;;  %12674 = vst [vmem:[#allocation72_spill] sm:$0xff] %v9635_v10  ;;  %v12675_v15 = vld [vmem:[#allocation22_spill] sm:$0xff]  ;;  %v9647_v42 = vmul.f32 %v9543_v6, %v12676_v39  ;;  %v12683_v39 = vld [vmem:[#allocation99_spill] sm:$0xff] }
 0x40a   :  { %12664 = vst [vmem:[#allocation74_spill] sm:$0xff] %v9603_v11  ;;  %v9607_v5 = vmul.f32 %v9540_v30, %v12665_v54  ;;  %v9631_v54 = vmul.f32 %v9540_v30, %v12672_v45  ;;  %v9643_v16 = vmul.f32 %v9540_v30, %v12675_v15  ;;  %v9651_v45 = vmul.f32 %v9546_v12, %v9276_v50  ;;  %v12679_v40 = vld [vmem:[#allocation25_spill] sm:$0xff]  ;;  %v12680_v10 = vld [vmem:[#allocation30_spill] sm:$0xff] }
 0x40b   :  { %v3121_v31 = vsub.f32 %v3040_v23, %v3119_v22  ;;  %12677 = vst [vmem:[#allocation93_spill] sm:$0xff] %v9647_v42  ;;  %v9655_v25 = vmul.f32 %v9540_v30, %v12679_v40  ;;  %v9659_v13 = vmul.f32 %v9543_v6, %v12680_v10  ;;  %v9663_v15 = vmul.f32 %v9546_v12, %v9294_v21  ;;  %v12682_v22 = vld [vmem:[#allocation91_spill] sm:$0xff]  ;;  %v12689_v42 = vld [vmem:[#allocation33_spill] sm:$0xff] }
 0x40c   :  { %12678 = vst [vmem:[#allocation80_spill] sm:$0xff] %v9651_v45  ;;  %v9667_v23 = vmul.f32 %v9540_v30, %v12682_v22  ;;  %v9671_v50 = vmul.f32 %v9543_v6, %v12683_v39  ;;  %v9675_v40 = vmul.f32 %v9546_v12, %v9305_v0  ;;  %v12686_v45 = vld [vmem:[#allocation29_spill] sm:$0xff]  ;;  %v9687_v22 = vmul.f32 %v9546_v12, %v9320_v46 }
 0x40d   :  { %12681 = vst [vmem:[#allocation95_spill] sm:$0xff] %v9659_v13  ;;  %v9679_v10 = vmul.f32 %v9540_v30, %v12686_v45  ;;  %v12687_v13 = vld [vmem:[#allocation20_spill] sm:$0xff]  ;;  %v9691_v39 = vmul.f32 %v9540_v30, %v12689_v42  ;;  %v9699_v45 = vmul.f32 %v9546_v12, %v9335_v4  ;;  %v9709_v46 = vrot.slane %v3121_v31, %v12649_v38 }
 0x40e   :  { %12684 = vst [vmem:[#allocation40_spill] sm:$0xff] %v9671_v50  ;;  %12685 = vst [vmem:[#allocation44_spill] sm:$0xff] %v9675_v40  ;;  %v9683_v21 = vmul.f32 %v9543_v6, %v12687_v13  ;;  %v12690_v50 = vld [vmem:[#allocation100_spill] sm:$0xff]  ;;  %v12693_v40 = vld [vmem:[#allocation39_spill] sm:$0xff]  ;;  %v9712_v42 = vrot.slane %v3121_v31, %v12651_v41  ;;  %v3172_v38 = vmul.f32 %v9546_v12, %v9405_v43 }
 0x40f   :  { %v9695_v0 = vmul.f32 %v9543_v6, %v12690_v50  ;;  %12692 = vst [vmem:[#allocation58_spill] sm:$0xff] %v9699_v45  ;;  %v9703_v13 = vmul.f32 %v9543_v6, %v12693_v40  ;;  %v9716_v50 = vmul.f32 %v9546_v12, %v9350_v35  ;;  %v9724_v40 = vmul.f32 %v9546_v12, %v9364_v59  ;;  %v12707_v45 = vld [vmem:[#allocation104_spill] sm:$0xff] }
 0x410   :  { %12688 = vst [vmem:[#allocation56_spill] sm:$0xff] %v9683_v21  ;;  %v9706_v21 = vrot.slane %v3121_v31, %v12647_v17  ;;  %v12700_v17 = vld [vmem:[#allocation35_spill] sm:$0xff]  ;;  %v12701_v31 = vld [vmem:[#allocation92_spill] sm:$0xff]  ;;  %v9734_v35 = vmul.f32 %v9546_v12, %v9422_v19  ;;  %v9752_v19 = vmul.f32 %v9546_v12, %v9448_v58  ;;  %v9770_v58 = vmul.f32 %v9546_v12, %v9468_v3 }
 0x411   :  { %12691 = vst [vmem:[#allocation86_spill] sm:$0xff] %v9695_v0  ;;  %12694 = vst [vmem:[#allocation87_spill] sm:$0xff] %v9703_v13  ;;  %v12697_v0 = vld [vmem:[#allocation101_spill] sm:$0xff]  ;;  %v3170_v13 = vmul.f32 %v9540_v30, %v12700_v17  ;;  %v3173_v41 = vmul.f32 %v9540_v30, %v12701_v31  ;;  %v3178_v17 = vmul.f32 %v9546_v12, %v9435_v24  ;;  %v12721_v3 = vld [vmem:[#allocation59_spill] sm:$0xff] }
 0x412   :  { %12695 = vst [vmem:[#allocation53_spill] sm:$0xff] %v9706_v21  ;;  %12696 = vst [vmem:[#allocation66_spill] sm:$0xff] %v9716_v50  ;;  %v9720_v4 = vmul.f32 %v9543_v6, %v12697_v0  ;;  %v12703_v50 = vld [vmem:[#allocation43_spill] sm:$0xff]  ;;  %v9748_v31 = vmul.f32 %v9543_v6, %v12707_v45  ;;  %v3184_v24 = vmul.f32 %v9546_v12, %v9459_v61 }
 0x413   :  { %12699 = vst [vmem:[#allocation60_spill] sm:$0xff] %v9724_v40  ;;  %12702 = vst [vmem:[#allocation73_spill] sm:$0xff] %v9734_v35  ;;  %v3176_v0 = vmul.f32 %v9540_v30, %v12703_v50  ;;  %v12706_v40 = vld [vmem:[#allocation42_spill] sm:$0xff]  ;;  %v12710_v35 = vld [vmem:[#allocation45_spill] sm:$0xff]  ;;  %v9766_v45 = vmul.f32 %v9543_v6, %v12714_v57  ;;  %v3196_v57 = vmul.f32 %v9546_v12, %v9490_v63 }
 0x414   :  { %12698 = vst [vmem:[#allocation69_spill] sm:$0xff] %v9720_v4  ;;  %v12704_v4 = vld [vmem:[#allocation46_spill] sm:$0xff]  ;;  %v3179_v43 = vmul.f32 %v9540_v30, %v12706_v40  ;;  %12708 = vst [vmem:[#allocation57_spill] sm:$0xff] %v9748_v31  ;;  %v3182_v50 = vmul.f32 %v9540_v30, %v12710_v35  ;;  %v12719_v31 = vld [vmem:[#allocation76_spill] sm:$0xff]  ;;  %v3209_v63 = vmul.f32 %v9540_v30, %v12634_v55 }
 0x415   :  { %v9740_v59 = vmul.f32 %v9543_v6, %v12704_v4  ;;  %12709 = vst [vmem:[#allocation19_spill] sm:$0xff] %v9752_v19  ;;  %v9758_v4 = vmul.f32 %v9543_v6, %v12711_v52  ;;  %12715 = vst [vmem:[#allocation54_spill] sm:$0xff] %v9766_v45  ;;  %v12717_v19 = vld [vmem:[#allocation63_spill] sm:$0xff]  ;;  %v3190_v52 = vmul.f32 %v9546_v12, %v9476_v36 }
 0x416   :  { %12716 = vst [vmem:[#allocation21_spill] sm:$0xff] %v9770_v58  ;;  %v3188_v35 = vmul.f32 %v9540_v30, %v12717_v19  ;;  %v12720_v45 = vld [vmem:[#allocation55_spill] sm:$0xff]  ;;  %v3200_v58 = vmul.f32 %v9540_v30, %v12721_v3  ;;  %v3202_v19 = vmul.f32 %v9546_v12, %v9502_v8  ;;  %v3203_v36 = vmul.f32 %v9540_v30, %v12625_v18 }
 0x417   :  { %12705 = vst [vmem:[#allocation77_spill] sm:$0xff] %v9740_v59  ;;  %12712 = vst [vmem:[#allocation78_spill] sm:$0xff] %v9758_v4  ;;  %v12713_v59 = vld [vmem:[#allocation49_spill] sm:$0xff]  ;;  %v12718_v4 = vld [vmem:[#allocation67_spill] sm:$0xff]  ;;  %v3197_v11 = vmul.f32 %v9540_v30, %v12720_v45  ;;  %v3212_v45 = vmul.f32 %v9540_v30, %v12637_v47  ;;  %v3214_v3 = vmul.f32 %v9546_v12, %v9527_v56 }
 0x418   :  { %v3185_v40 = vmul.f32 %v9540_v30, %v12713_v59  ;;  %v3191_v61 = vmul.f32 %v9540_v30, %v12718_v4  ;;  %v3194_v59 = vmul.f32 %v9540_v30, %v12719_v31  ;;  %v3206_v4 = vmul.f32 %v9540_v30, %v12629_v29 }
 0x419   :  { %v3208_v31 = vmul.f32 %v9546_v12, %v9513_v60  ;;  %v3215_v8 = vmul.f32 %v9540_v30, %v12643_v7  ;;  %v9803_v18 = vadd.f32 %v9706_v21, %v3170_v13  ;;  %v9806_v29 = vadd.f32 %v9712_v42, %v3172_v38 }
 0x41a   :  { %v9809_v60 = vadd.f32 %v9706_v21, %v3173_v41  ;;  %v9812_v55 = vadd.f32 %v9706_v21, %v3176_v0  ;;  %v9815_v47 = vadd.f32 %v9712_v42, %v3178_v17  ;;  %v9818_v56 = vadd.f32 %v9706_v21, %v3179_v43 }
 0x41b   :  { %v9821_v7 = vadd.f32 %v9706_v21, %v3182_v50  ;;  %v9824_v13 = vadd.f32 %v9712_v42, %v3184_v24  ;;  %v9827_v38 = vadd.f32 %v9706_v21, %v3185_v40  ;;  %v9830_v41 = vadd.f32 %v9706_v21, %v3188_v35 }
 0x41c   :  { %v9833_v0 = vadd.f32 %v9712_v42, %v3190_v52  ;;  %v9836_v17 = vadd.f32 %v9706_v21, %v3191_v61  ;;  %v9839_v43 = vadd.f32 %v9706_v21, %v3194_v59  ;;  %v9842_v50 = vadd.f32 %v9712_v42, %v3196_v57 }
 0x41d   :  { %v9845_v24 = vadd.f32 %v9706_v21, %v3197_v11  ;;  %v9848_v40 = vadd.f32 %v9706_v21, %v3200_v58  ;;  %v9851_v35 = vadd.f32 %v9712_v42, %v3202_v19  ;;  %v9854_v52 = vadd.f32 %v9706_v21, %v3203_v36  ;;  %v12728_v19 = vld [vmem:[#allocation61_spill] sm:$0xff]  ;;  %v12729_v36 = vld [vmem:[#allocation75_spill] sm:$0xff] }
 0x41e   :  { %12722 = vst [vmem:[#allocation23_spill] sm:$0xff] %v9842_v50  ;;  %v9857_v61 = vadd.f32 %v9706_v21, %v3206_v4  ;;  %v9860_v59 = vadd.f32 %v9712_v42, %v3208_v31  ;;  %v9863_v57 = vadd.f32 %v9706_v21, %v3209_v63  ;;  %v9866_v11 = vadd.f32 %v9706_v21, %v3212_v45  ;;  %v12730_v45 = vld [vmem:[#allocation70_spill] sm:$0xff] }
 0x41f   :  { %12723 = vst [vmem:[#allocation81_spill] sm:$0xff] %v9851_v35  ;;  %12724 = vst [vmem:[#allocation97_spill] sm:$0xff] %v9854_v52  ;;  %v9869_v58 = vadd.f32 %v9712_v42, %v3214_v3  ;;  %v9873_v30 = vmul.f32 %v9543_v6, %v12728_v19  ;;  %v9877_v4 = vmul.f32 %v9543_v6, %v12729_v36  ;;  %v12731_v3 = vld [vmem:[#allocation68_spill] sm:$0xff]  ;;  %v7068_v52 = vld [vmem:[#allocation8 + $0x128] ss:$12 sps:$4 sm:$0xff]  }
 0x420   :  { %12725 = vst [vmem:[#allocation27_spill] sm:$0xff] %v9857_v61  ;;  %12726 = vst [vmem:[#allocation26_spill] sm:$0xff] %v9860_v59  ;;  %v9881_v31 = vmul.f32 %v9546_v12, %v9484_v53  ;;  %v9884_v63 = vadd.f32 %v9706_v21, %v3215_v8  ;;  %v9888_v59 = vmul.f32 %v9543_v6, %v12730_v45  ;;  %v12734_v45 = vld [vmem:[#allocation89_spill] sm:$0xff]  ;;  %v7081_v61 = vld [vmem:[#allocation8 + $0x1d0] ss:$12 sps:$4 sm:$0xff]  }
 0x421   :  { %12727 = vst [vmem:[#allocation22_spill] sm:$0xff] %v9869_v58  ;;  %v9892_v58 = vmul.f32 %v9543_v6, %v12731_v3  ;;  %v3236_v19 = vadd.f32 %v9712_v42, %v9566_v9  ;;  %v3239_v36 = vadd.f32 %v9712_v42, %v9578_v34  ;;  %v9900_v53 = vmul.f32 %v9546_v12, %v9496_v14  ;;  %v12736_v9 = vld [vmem:[#allocation36_spill] sm:$0xff]  ;;  %v12738_v34 = vld [vmem:[#allocation71_spill] sm:$0xff] }
 0x422   :  { %v9904_v8 = vmul.f32 %v9543_v6, %v12623_v1  ;;  %v9908_v35 = vmul.f32 %v9543_v6, %v12734_v45  ;;  %v9912_v3 = vmul.f32 %v9546_v12, %v9508_v51  ;;  %v9916_v50 = vmul.f32 %v9543_v6, %v12736_v9 }
 0x423   :  { %12732 = vst [vmem:[#allocation98_spill] sm:$0xff] %v9900_v53  ;;  %v9920_v14 = vmul.f32 %v9543_v6, %v12738_v34  ;;  %v12740_v53 = vld [vmem:[#allocation79_spill] sm:$0xff]  ;;  %v3234_v9 = vadd.f32 %v9706_v21, %v9558_v49  ;;  %v9940_v34 = vadd.f32 %v9706_v21, %v9582_v33  ;;  %v9952_v49 = vadd.f32 %v9706_v21, %v9607_v5 }
 0x424   :  { %12733 = vst [vmem:[#allocation25_spill] sm:$0xff] %v9904_v8  ;;  %12735 = vst [vmem:[#allocation30_spill] sm:$0xff] %v9908_v35  ;;  %v9924_v1 = vmul.f32 %v9546_v12, %v12740_v53  ;;  %v12742_v8 = vld [vmem:[#allocation47_spill] sm:$0xff]  ;;  %v12744_v35 = vld [vmem:[#allocation52_spill] sm:$0xff]  ;;  %v9944_v53 = vadd.f32 %v9712_v42, %v9591_v44  ;;  %v3335_v12 = vmax.f32 %v3239_v36, 0.0  ;;  %v9960_v33 = vadd.f32 %v9706_v21, %v9619_v27 }
 0x425   :  { %12737 = vst [vmem:[#allocation91_spill] sm:$0xff] %v9916_v50  ;;  %12739 = vst [vmem:[#allocation99_spill] sm:$0xff] %v9920_v14  ;;  %v9928_v45 = vmul.f32 %v9543_v6, %v12742_v8  ;;  %v9932_v51 = vmul.f32 %v9543_v6, %v12744_v35  ;;  %v3237_v50 = vadd.f32 %v9706_v21, %v9570_v37  ;;  %v3332_v35 = vmax.f32 %v3236_v19, 0.0 }
 0x426   :  { %12741 = vst [vmem:[#allocation29_spill] sm:$0xff] %v9924_v1  ;;  %v9948_v8 = vadd.f32 %v9706_v21, %v9595_v28  ;;  %v9956_v37 = vadd.f32 %v9712_v42, %v9615_v2  ;;  %v9964_v44 = vadd.f32 %v9706_v21, %v9631_v54  ;;  %v9968_v28 = vadd.f32 %v9712_v42, %v9639_v20  ;;  %v7067_v1 = vld [vmem:[#allocation8 + $0x80] ss:$12 sps:$4 sm:$0xff]  }
 0x427   :  { %12743 = vst [vmem:[#allocation20_spill] sm:$0xff] %v9928_v45  ;;  %12745 = vst [vmem:[#allocation33_spill] sm:$0xff] %v9932_v51  ;;  %v9972_v5 = vadd.f32 %v9706_v21, %v9643_v16  ;;  %v9976_v2 = vadd.f32 %v9706_v21, %v9655_v25  ;;  %v9980_v27 = vadd.f32 %v9712_v42, %v9663_v15  ;;  %v3330_v19 = vmax.f32 %v3234_v9, 0.0  ;;  %v7073_v51 = vld [vmem:[#allocation8 + $0x218] ss:$12 sps:$4 sm:$0xff]  }
 0x428   :  { %v9984_v54 = vadd.f32 %v9706_v21, %v9667_v23  ;;  %v9988_v20 = vadd.f32 %v9706_v21, %v9679_v10  ;;  %v3333_v36 = vmax.f32 %v3237_v50, 0.0  ;;  %v9990_v16 = vpack.c.bf16 %v3335_v12, %v3332_v35  ;;  %v12749_v50 = vld [vmem:[#allocation74_spill] sm:$0xff] }
 0x429   :  { %v3235_v25 = vadd.f32 %v9709_v46, %v9562_v48  ;;  %v3238_v6 = vadd.f32 %v9709_v46, %v9574_v62  ;;  %v3241_v15 = vadd.f32 %v9709_v46, %v9587_v26  ;;  %v10000_v23 = vadd.f32 %v9712_v42, %v9687_v22 }
 0x42a   :  { %12746 = vst [vmem:[#allocation100_spill] sm:$0xff] %v9988_v20  ;;  %12747 = vst [vmem:[#allocation39_spill] sm:$0xff] %v9990_v16  ;;  %v10004_v10 = vadd.f32 %v9706_v21, %v9691_v39  ;;  %v3244_v12 = vadd.f32 %v9709_v46, %v9599_v32  ;;  %v3245_v48 = vadd.f32 %v9712_v42, %v12749_v50  ;;  %4180 = vmatmul.mubr.bf16.vlgmr.msra.gmra.mxu1 %v9990_v16  ;;  %v12751_v21 = vmov 0   ;;  %v12752_v32 = vld [vmem:[#allocation64_spill] sm:$0xff] }
 0x42b   :  { %v3331_v9 = vmax.f32 %v3235_v25, 0.0  ;;  %v3334_v35 = vmax.f32 %v3238_v6, 0.0  ;;  %v3337_v26 = vmax.f32 %v3241_v15, 0.0  ;;  %v3339_v22 = vmax.f32 %v9948_v8, 0.0  ;;  %4189 = vmatprep.mubr.bf16.mxu1 %v12751_v21  ;;  %6736 = vmatpush3.bf16.msra.mxu1 %v12752_v32  ;;  %v7063_v25 = vld [vmem:[#allocation8 + $0xb0] ss:$12 sps:$4 sm:$0xff]  }
 0x42c   :  { %12748 = vst [vmem:[#allocation101_spill] sm:$0xff] %v10004_v10  ;;  %v10014_v45 = vpack.c.bf16 %v3333_v36, %v3330_v19  ;;  %v3340_v39 = vmax.f32 %v3244_v12, 0.0  ;;  %v3338_v6 = vmax.f32 %v9944_v53, 0.0  ;;  %v3341_v62 = vmax.f32 %v3245_v48, 0.0  ;;  %6737 = vmatprep.subr.bf16.mxu1 %v7073_v51  ;;  %v12754_v36 = vld [vmem:[#allocation62_spill] sm:$0xff]  ;;  %v12756_v53 = vld [vmem:[#allocation41_spill] sm:$0xff] }
 0x42d   :  { %v10019_v10 = vpack.c.bf16 %v3334_v35, %v3331_v9  ;;  %v3247_v12 = vadd.f32 %v9709_v46, %v12754_v36  ;;  %v7064_v20 = vld [vmem:[#allocation8 + $0x158] ss:$12 sps:$4 sm:$0xff]   ;;  %v3250_v48 = vadd.f32 %v9709_v46, %v12756_v53  ;;  %v7076_v8 = vld [vmem:[#allocation8 + $0x200] ss:$12 sps:$4 sm:$0xff]  }
 0x42e   :  { %12750 = vst [vmem:[#allocation35_spill] sm:$0xff] %v10014_v45  ;;  %v10030_v35 = vpack.c.bf16 %v3340_v39, %v3337_v26  ;;  %v10042_v26 = vpack.c.bf16 %v3341_v62, %v3338_v6  ;;  %v12758_v39 = vld [vmem:[#allocation94_spill] sm:$0xff]  ;;  %v7065_v15 = vld [vmem:[#allocation8 + $0x98] ss:$12 sps:$4 sm:$0xff]   ;;  %v7066_v32 = vld [vmem:[#allocation8 + $0x140] ss:$12 sps:$4 sm:$0xff]  }
 0x42f   :  { %12753 = vst [vmem:[#allocation92_spill] sm:$0xff] %v10019_v10  ;;  %3986 = vmatprep.mubr.bf16.mxu0 %v10019_v10  ;;  %v3251_v53 = vadd.f32 %v9712_v42, %v12758_v39  ;;  %v3343_v50 = vmax.f32 %v3247_v12, 0.0  ;;  %v12759_v36 = vld [vmem:[#allocation72_spill] sm:$0xff]  ;;  %v12760_v10 = vld [vmem:[#allocation93_spill] sm:$0xff]  ;;  %6738 = vmatpush3.bf16.msra.mxu1 %v7073_v51  ;;  %v3346_v62 = vmax.f32 %v3250_v48, 0.0  ;;  %v12762_v39 = vld [vmem:[#allocation95_spill] sm:$0xff] }
 0x430   :  { %12755 = vst [vmem:[#allocation43_spill] sm:$0xff] %v10030_v35  ;;  %3987 = vmatmul.mubr.bf16.vlgmr.msra.gmra.mxu0 %v10014_v45  ;;  %12757 = vst [vmem:[#allocation46_spill] sm:$0xff] %v10042_v26  ;;  %v3253_v45 = vadd.f32 %v9709_v46, %v12759_v36  ;;  %v3256_v9 = vadd.f32 %v9709_v46, %v12760_v10  ;;  %v12763_v19 = vld [vmem:[#allocation40_spill] sm:$0xff]  ;;  %6739 = vmatprep.subr.bf16.mxu1 %v7076_v8  ;;  %v7079_v12 = vld [vmem:[#allocation8 + $0x1e8] ss:$12 sps:$4 sm:$0xff]   ;;  %v12765_v36 = vmax.f32 %v9940_v34, 0.0 }
 0x431   :  { %6368 = vmatpush3.bf16.msra.mxu0 %v7063_v25  ;;  %3996 = vmatprep.mubr.bf16.mxu0 %v10030_v35  ;;  %v12761_v25 = vld [vmem:[#allocation80_spill] sm:$0xff]  ;;  %v3259_v35 = vadd.f32 %v9709_v46, %v12762_v39  ;;  %v3347_v39 = vmax.f32 %v3251_v53, 0.0  ;;  %v10072_v48 = vpack.c.bf16 %v3346_v62, %v3343_v50  ;;  %v3420_v34 = vmax.f32 %v9866_v11, 0.0  ;;  %v12769_v62 = vld [vmem:[#allocation86_spill] sm:$0xff] }
 0x432   :  { %6369 = vmatprep.subr.bf16.mxu0 %v7064_v20  ;;  %4190 = vmatmul.mubr.bf16.gmra.mxu1 %v10042_v26  ;;  %v3257_v6 = vadd.f32 %v9712_v42, %v12761_v25  ;;  %v3262_v20 = vadd.f32 %v9709_v46, %v12763_v19  ;;  %v3344_v25 = vmax.f32 %v9956_v37, 0.0  ;;  %v12764_v16 = vld [vmem:[#allocation44_spill] sm:$0xff]  ;;  %v10069_v14 = vpack.c.bf16 %v3339_v22, %v12765_v36 }
 0x433   :  { %4199 = vmatprep.mubr.bf16.mxu1 %v12751_v21  ;;  %v3263_v19 = vadd.f32 %v9712_v42, %v12764_v16  ;;  %v3349_v10 = vmax.f32 %v3253_v45, 0.0  ;;  %v3352_v51 = vmax.f32 %v3256_v9, 0.0  ;;  %v3350_v26 = vmax.f32 %v9968_v28, 0.0  ;;  %6740 = vmatpush3.bf16.msra.mxu1 %v7076_v8  ;;  %v12768_v8 = vld [vmem:[#allocation56_spill] sm:$0xff] }
 0x434   :  { %v3353_v37 = vmax.f32 %v3257_v6, 0.0  ;;  %v3355_v53 = vmax.f32 %v3259_v35, 0.0  ;;  %6741 = vmatprep.subr.bf16.mxu1 %v7079_v12  ;;  %v3417_v16 = vmax.f32 %v9863_v57, 0.0  ;;  %v12766_v45 = vmax.f32 %v9952_v49, 0.0  ;;  %v7069_v49 = vld [vmem:[#allocation8 + $0x68] ss:$12 sps:$4 sm:$0xff]  }
 0x435   :  { %6370 = vmatpush3.bf16.msra.mxu0 %v7065_v15  ;;  %v3358_v15 = vmax.f32 %v3262_v20, 0.0  ;;  %v12767_v28 = vmax.f32 %v9960_v33, 0.0  ;;  %v10085_v50 = vadd.f32 %v9709_v46, %v12768_v8  ;;  %v3356_v9 = vmax.f32 %v9980_v27, 0.0 }
 0x436   :  { %6371 = vmatprep.subr.bf16.mxu0 %v7066_v32  ;;  %v10088_v32 = vpack.c.bf16 %v3347_v39, %v3344_v25  ;;  %v3359_v35 = vmax.f32 %v3263_v19, 0.0  ;;  %v10093_v6 = vadd.f32 %v9709_v46, %v12769_v62  ;;  %v3423_v33 = vmax.f32 %v9884_v63, 0.0  ;;  %v7071_v39 = vld [vmem:[#allocation8 + $0x110] ss:$12 sps:$4 sm:$0xff]  }
 0x437   :  { %v10081_v22 = vpack.c.bf16 %v12767_v28, %v12766_v45  ;;  %v10096_v20 = vpack.c.bf16 %v3352_v51, %v3349_v10  ;;  %v12770_v36 = vmax.f32 %v9964_v44, 0.0  ;;  %v12771_v45 = vmax.f32 %v9972_v5, 0.0  ;;  %6742 = vmatpush3.bf16.msra.mxu1 %v7079_v12  ;;  %v12774_v44 = vld [vmem:[#allocation58_spill] sm:$0xff] }
 0x438   :  { %3997 = vmatmul.mubr.bf16.gmra.mxu0 %v10069_v14  ;;  %v12772_v25 = vmax.f32 %v9976_v2, 0.0  ;;  %v12773_v27 = vmax.f32 %v9984_v54, 0.0  ;;  %v10111_v19 = vpack.c.bf16 %v3353_v37, %v3350_v26  ;;  %v10113_v10 = vpack.c.bf16 %v3358_v15, %v3355_v53  ;;  %6743 = vmatprep.subr.bf16.mxu1 %v7081_v61  ;;  %v7083_v2 = vld [vmem:[#allocation8 + $0x1b8] ss:$12 sps:$4 sm:$0xff]   ;;  %v12775_v54 = vld [vmem:[#allocation73_spill] sm:$0xff]  ;;  %v12785_v62 = vld [vmem:[#allocation54_spill] sm:$0xff] }
 0x439   :  { %4006 = vmatprep.mubr.bf16.mxu0 %v10072_v48  ;;  %6372 = vmatpush3.bf16.msra.mxu0 %v7067_v1  ;;  %v10102_v28 = vpack.c.bf16 %v12771_v45, %v12770_v36  ;;  %v10117_v5 = vadd.f32 %v9712_v42, %v12774_v44  ;;  %v3287_v12 = vadd.f32 %v9712_v42, %v12775_v54  ;;  %v3380_v26 = vmax.f32 %v9806_v29, 0.0  ;;  %v12778_v36 = vld [vmem:[#allocation87_spill] sm:$0xff] }
 0x43a   :  { %v10108_v1 = vpack.c.bf16 %v12773_v27, %v12772_v25  ;;  %6373 = vmatprep.subr.bf16.mxu0 %v7068_v52  ;;  %4200 = vmatmul.mubr.bf16.gmra.mxu1 %v10088_v32  ;;  %v3361_v52 = vmax.f32 %v10085_v50, 0.0  ;;  %v12776_v37 = vmax.f32 %v9803_v18, 0.0  ;;  %v12777_v53 = vmax.f32 %v9809_v60, 0.0  ;;  %v7072_v25 = vld [vmem:[#allocation8 + $0x50] ss:$12 sps:$4 sm:$0xff]   ;;  %v12779_v27 = vld [vmem:[#allocation77_spill] sm:$0xff] }
 0x43b   :  { %4209 = vmatprep.mubr.bf16.mxu1 %v12751_v21  ;;  %v10131_v8 = vpack.c.bf16 %v3359_v35, %v3356_v9  ;;  %v10136_v45 = vadd.f32 %v9709_v46, %v12778_v36  ;;  %v3289_v44 = vadd.f32 %v9709_v46, %v12779_v27  ;;  %v3383_v29 = vmax.f32 %v3287_v12, 0.0  ;;  %v12780_v18 = vld [vmem:[#allocation57_spill] sm:$0xff]  ;;  %v12781_v54 = vld [vmem:[#allocation19_spill] sm:$0xff]  ;;  %6744 = vmatpush3.bf16.msra.mxu1 %v7081_v61  ;;  %v12816_v50 = vld [vmem:[#allocation60_spill] sm:$0xff] }
 0x43c   :  { %v10129_v15 = vpack.c.bf16 %v12777_v53, %v12776_v37  ;;  %v3292_v60 = vadd.f32 %v9709_v46, %v12780_v18  ;;  %v3293_v9 = vadd.f32 %v9712_v42, %v12781_v54  ;;  %v3386_v35 = vmax.f32 %v9815_v47, 0.0  ;;  %v7074_v37 = vld [vmem:[#allocation8 + $0xf8] ss:$12 sps:$4 sm:$0xff]   ;;  %6745 = vmatprep.subr.bf16.mxu1 %v7083_v2  ;;  %v7084_v18 = vld [vmem:[#allocation8 + $0x1a0] ss:$12 sps:$4 sm:$0xff]  }
 0x43d   :  { %6374 = vmatpush3.bf16.msra.mxu0 %v7069_v49  ;;  %v3385_v36 = vmax.f32 %v3289_v44, 0.0  ;;  %v12782_v49 = vmax.f32 %v9812_v55, 0.0  ;;  %v12783_v51 = vmax.f32 %v9818_v56, 0.0  ;;  %v10155_v54 = vpack.c.bf16 %v3383_v29, %v3380_v26  ;;  %v12786_v56 = vld [vmem:[#allocation21_spill] sm:$0xff]  ;;  %v7075_v29 = vld [vmem:[#allocation8 + $0x38] ss:$12 sps:$4 sm:$0xff]  }
 0x43e   :  { %6375 = vmatprep.subr.bf16.mxu0 %v7071_v39  ;;  %v12784_v39 = vld [vmem:[#allocation78_spill] sm:$0xff]  ;;  %v3388_v47 = vmax.f32 %v3292_v60, 0.0  ;;  %v3389_v61 = vmax.f32 %v3293_v9, 0.0  ;;  %v3298_v44 = vadd.f32 %v9709_v46, %v12785_v62  ;;  %v12788_v53 = vmax.f32 %v9827_v38, 0.0 }
 0x43f   :  { %v10150_v27 = vpack.c.bf16 %v12783_v51, %v12782_v49  ;;  %v3295_v12 = vadd.f32 %v9709_v46, %v12784_v39  ;;  %v3299_v51 = vadd.f32 %v9712_v42, %v12786_v56  ;;  %v3392_v49 = vmax.f32 %v9824_v13, 0.0  ;;  %6746 = vmatpush3.bf16.msra.mxu1 %v7083_v2 }
 0x440   :  { %4007 = vmatmul.mubr.bf16.gmra.mxu0 %v10081_v22  ;;  %v12787_v39 = vmax.f32 %v9821_v7, 0.0  ;;  %v10169_v60 = vpack.c.bf16 %v3388_v47, %v3385_v36  ;;  %v10171_v9 = vpack.c.bf16 %v3389_v61, %v3386_v35  ;;  %v3394_v62 = vmax.f32 %v3298_v44, 0.0  ;;  %6747 = vmatprep.subr.bf16.mxu1 %v7084_v18  ;;  %v7085_v35 = vld [vmem:[#allocation8 + $0x188] ss:$12 sps:$4 sm:$0xff]  }
 0x441   :  { %4016 = vmatprep.mubr.bf16.mxu0 %v10096_v20  ;;  %6376 = vmatpush3.bf16.msra.mxu0 %v7072_v25  ;;  %v3391_v55 = vmax.f32 %v3295_v12, 0.0  ;;  %v3301_v25 = vadd.f32 %v9709_v46, %v9873_v30  ;;  %v7077_v12 = vld [vmem:[#allocation8 + $0xe0] ss:$12 sps:$4 sm:$0xff]   ;;  %v3395_v13 = vmax.f32 %v3299_v51, 0.0  ;;  %v3304_v7 = vadd.f32 %v9709_v46, %v9877_v4  ;;  %v12791_v51 = vld [vmem:[#allocation98_spill] sm:$0xff] }
 0x442   :  { %v10167_v26 = vpack.c.bf16 %v12788_v53, %v12787_v39  ;;  %6377 = vmatprep.subr.bf16.mxu0 %v7074_v37  ;;  %4210 = vmatmul.mubr.bf16.gmra.mxu1 %v10111_v19  ;;  %v3305_v38 = vadd.f32 %v9712_v42, %v9881_v31  ;;  %v3398_v53 = vmax.f32 %v9833_v0, 0.0  ;;  %v12789_v2 = vmax.f32 %v9830_v41, 0.0  ;;  %v12792_v39 = vld [vmem:[#allocation23_spill] sm:$0xff] }
 0x443   :  { %4219 = vmatprep.mubr.bf16.mxu1 %v12751_v21  ;;  %v10182_v37 = vpack.c.bf16 %v3394_v62, %v3391_v55  ;;  %v3397_v30 = vmax.f32 %v3301_v25, 0.0  ;;  %v12790_v36 = vmax.f32 %v9836_v17, 0.0  ;;  %v3307_v4 = vadd.f32 %v9709_v46, %v9888_v59  ;;  %v7078_v55 = vld [vmem:[#allocation8 + $0x20] ss:$12 sps:$4 sm:$0xff]   ;;  %6748 = vmatpush3.bf16.msra.mxu1 %v7084_v18 }
 0x444   :  { %v10192_v61 = vpack.c.bf16 %v3395_v13, %v3392_v49  ;;  %v3400_v0 = vmax.f32 %v3304_v7, 0.0  ;;  %v3401_v31 = vmax.f32 %v3305_v38, 0.0  ;;  %v3310_v44 = vadd.f32 %v9709_v46, %v9892_v58  ;;  %v12795_v7 = vld [vmem:[#allocation25_spill] sm:$0xff]  ;;  %6749 = vmatprep.subr.bf16.mxu1 %v7085_v35 }
 0x445   :  { %v10188_v47 = vpack.c.bf16 %v12790_v36, %v12789_v2  ;;  %6378 = vmatpush3.bf16.msra.mxu0 %v7075_v29  ;;  %v3403_v56 = vmax.f32 %v3307_v4, 0.0  ;;  %v3311_v41 = vadd.f32 %v9712_v42, %v12791_v51  ;;  %v3404_v17 = vmax.f32 %v12792_v39, 0.0  ;;  %v7080_v29 = vld [vmem:[#allocation8 + $0xc8] ss:$12 sps:$4 sm:$0xff]   ;;  %v12801_v51 = vld [vmem:[#allocation91_spill] sm:$0xff] }
 0x446   :  { %6379 = vmatprep.subr.bf16.mxu0 %v7077_v12  ;;  %v12793_v62 = vmax.f32 %v9839_v43, 0.0  ;;  %v12794_v59 = vmax.f32 %v9845_v24, 0.0  ;;  %v10205_v25 = vpack.c.bf16 %v3400_v0, %v3397_v30  ;;  %v10207_v13 = vpack.c.bf16 %v3401_v31, %v3398_v53  ;;  %v12796_v2 = vld [vmem:[#allocation30_spill] sm:$0xff]  ;;  %v12797_v36 = vld [vmem:[#allocation81_spill] sm:$0xff] }
 0x447   :  { %v3406_v58 = vmax.f32 %v3310_v44, 0.0  ;;  %v3313_v38 = vadd.f32 %v9709_v46, %v12795_v7  ;;  %v3407_v12 = vmax.f32 %v3311_v41, 0.0  ;;  %v3316_v43 = vadd.f32 %v9709_v46, %v12796_v2  ;;  %v12799_v0 = vld [vmem:[#allocation97_spill] sm:$0xff]  ;;  %v12802_v7 = vld [vmem:[#allocation99_spill] sm:$0xff]  ;;  %6750 = vmatpush3.bf16.msra.mxu1 %v7085_v35 }
 0x448   :  { %v10203_v49 = vpack.c.bf16 %v12794_v59, %v12793_v62  ;;  %4017 = vmatmul.mubr.bf16.gmra.mxu0 %v10102_v28  ;;  %v3317_v24 = vadd.f32 %v9712_v42, %v9912_v3  ;;  %v3410_v18 = vmax.f32 %v12797_v36, 0.0  ;;  %v12798_v4 = vmax.f32 %v9848_v40, 0.0  ;;  %v7082_v39 = vld [vmem:[#allocation8 + $0x8] ss:$12 sps:$4 sm:$0xff]   ;;  %v12805_v36 = vld [vmem:[#allocation27_spill] sm:$0xff] }
 0x449   :  { %4026 = vmatprep.mubr.bf16.mxu0 %v10113_v10  ;;  %v10218_v53 = vpack.c.bf16 %v3406_v58, %v3403_v56  ;;  %6380 = vmatpush3.bf16.msra.mxu0 %v7078_v55  ;;  %v3409_v30 = vmax.f32 %v3313_v38, 0.0  ;;  %v12800_v31 = vmax.f32 %v12799_v0, 0.0  ;;  %v3319_v41 = vadd.f32 %v9709_v46, %v12801_v51  ;;  %v12803_v55 = vld [vmem:[#allocation29_spill] sm:$0xff]  ;;  %v12804_v38 = vld [vmem:[#allocation26_spill] sm:$0xff] }
 0x44a   :  { %v10228_v62 = vpack.c.bf16 %v3407_v12, %v3404_v17  ;;  %v3412_v3 = vmax.f32 %v3316_v43, 0.0  ;;  %v3413_v59 = vmax.f32 %v3317_v24, 0.0  ;;  %v3322_v56 = vadd.f32 %v9709_v46, %v12802_v7  ;;  %6381 = vmatprep.subr.bf16.mxu0 %v7080_v29  ;;  %4220 = vmatmul.mubr.bf16.gmra.mxu1 %v10131_v8  ;;  %v12807_v43 = vld [vmem:[#allocation20_spill] sm:$0xff] }
 0x44b   :  { %v10224_v44 = vpack.c.bf16 %v12800_v31, %v12798_v4  ;;  %v3415_v40 = vmax.f32 %v3319_v41, 0.0  ;;  %v3323_v58 = vadd.f32 %v9712_v42, %v12803_v55  ;;  %v3416_v2 = vmax.f32 %v12804_v38, 0.0  ;;  %4229 = vmatprep.mubr.bf16.mxu1 %v12751_v21  ;;  %v12808_v31 = vld [vmem:[#allocation33_spill] sm:$0xff]  ;;  %v12809_v41 = vld [vmem:[#allocation50_spill] sm:$0xff] }
 0x44c   :  { %v12806_v4 = vmax.f32 %v12805_v36, 0.0  ;;  %v10243_v12 = vpack.c.bf16 %v3412_v3, %v3409_v30  ;;  %v10245_v29 = vpack.c.bf16 %v3413_v59, %v3410_v18  ;;  %v3418_v35 = vmax.f32 %v3322_v56, 0.0  ;;  %v12811_v55 = vld [vmem:[#allocation69_spill] sm:$0xff] }
 0x44d   :  { %v3325_v24 = vadd.f32 %v9709_v46, %v12807_v43  ;;  %v3419_v0 = vmax.f32 %v3323_v58, 0.0  ;;  %6382 = vmatpush3.bf16.msra.mxu0 %v7082_v39  ;;  %v3328_v51 = vadd.f32 %v9709_v46, %v12808_v31  ;;  %v3329_v57 = vadd.f32 %v9712_v42, %v12809_v41  ;;  %v12818_v43 = vld [vmem:[#allocation101_spill] sm:$0xff]  ;;  %v12821_v41 = vld [vmem:[#allocation24_spill] sm:$0xff] }
 0x44e   :  { %v10240_v17 = vpack.c.bf16 %v3417_v16, %v12806_v4  ;;  %v12810_v16 = vld [vmem:[#allocation22_spill] sm:$0xff]  ;;  %v3274_v30 = vadd.f32 %v9709_v46, %v12811_v55  ;;  %v10256_v3 = vpack.c.bf16 %v3418_v35, %v3415_v40  ;;  %v10262_v59 = vpack.c.bf16 %v3423_v33, %v3420_v34  ;;  %v12819_v31 = vld [vmem:[#allocation37_spill] sm:$0xff] }
 0x44f   :  { %v3422_v7 = vmax.f32 %v12810_v16, 0.0  ;;  %v3421_v18 = vmax.f32 %v3325_v24, 0.0  ;;  %v12812_v39 = vmax.f32 %v10093_v6, 0.0  ;;  %v10270_v58 = vpack.c.bf16 %v3419_v0, %v3416_v2  ;;  %v12813_v4 = vld [vmem:[#allocation66_spill] sm:$0xff]  ;;  %v12817_v2 = vld [vmem:[#allocation100_spill] sm:$0xff]  ;;  %v12822_v16 = vld [vmem:[#allocation31_spill] sm:$0xff] }
 0x450   :  { %v3424_v38 = vmax.f32 %v3328_v51, 0.0  ;;  %v3425_v36 = vmax.f32 %v3329_v57, 0.0  ;;  %v3272_v40 = vadd.f32 %v9712_v42, %v12813_v4  ;;  %4027 = vmatmul.mubr.bf16.gmra.mxu0 %v10108_v1  ;;  %v12814_v11 = vmax.f32 %v10000_v23, 0.0  ;;  %v12825_v4 = vld [vmem:[#allocation88_spill] sm:$0xff] }
 0x451   :  { %v10268_v56 = vpack.c.bf16 %v12812_v39, %v3361_v52  ;;  %v12815_v63 = vmax.f32 %v10117_v5, 0.0  ;;  %v3275_v6 = vadd.f32 %v9712_v42, %v12816_v50  ;;  %v3360_v35 = vmax.f32 %v12817_v2, 0.0  ;;  %v12820_v5 = vld [vmem:[#allocation38_spill] sm:$0xff] }
 0x452   :  { %v10284_v33 = vpack.c.bf16 %v3424_v38, %v3421_v18  ;;  %v10286_v52 = vpack.c.bf16 %v3425_v36, %v3422_v7  ;;  %v3363_v24 = vmax.f32 %v12818_v43, 0.0  ;;  %v3367_v0 = vmax.f32 %v10136_v45, 0.0  ;;  %v12823_v7 = vld [vmem:[#allocation96_spill] sm:$0xff]  ;;  %v12824_v18 = vld [vmem:[#allocation102_spill] sm:$0xff] }
 0x453   :  { %4036 = vmatprep.mubr.bf16.mxu0 %v10268_v56  ;;  %v10280_v34 = vpack.c.bf16 %v12815_v63, %v12814_v11  ;;  %v3370_v23 = vmax.f32 %v3274_v30, 0.0  ;;  %v3158_v51 = vmul.f32 %v12820_v5, %v12819_v31  ;;  %v3161_v57 = vmul.f32 %v12820_v5, %v12821_v41  ;;  %v12826_v11 = vld [vmem:[#allocation65_spill] sm:$0xff]  ;;  %v12828_v43 = vld [vmem:[#allocation34_spill] sm:$0xff] }
 0x454   :  { %v3165_v55 = vmul.f32 %v12823_v7, %v12822_v16  ;;  %v3168_v39 = vmul.f32 %v12823_v7, %v12824_v18  ;;  %v3368_v38 = vmax.f32 %v3272_v40, 0.0  ;;  %v3371_v36 = vmax.f32 %v3275_v6, 0.0  ;;  %v12827_v30 = vld [vmem:[#allocation53_spill] sm:$0xff] }
 0x455   :  { %4230 = vmatmul.mubr.bf16.gmra.mxu1 %v10280_v34  ;;  %v3166_v45 = vmul.f32 %v12826_v11, %v12825_v4  ;;  %v3270_v63 = vadd.f32 %v12827_v30, %v3158_v51  ;;  %v3273_v50 = vadd.f32 %v12827_v30, %v3161_v57  ;;  %v10305_v2 = vpack.c.bf16 %v3363_v24, %v3360_v35  ;;  %v12829_v57 = vld [vmem:[#allocation28_spill] sm:$0xff] }
 0x456   :  { %4239 = vmatprep.mubr.bf16.mxu1 %v12751_v21  ;;  %v3169_v31 = vmul.f32 %v12826_v11, %v12828_v43  ;;  %v10309_v41 = vpack.c.bf16 %v3370_v23, %v3367_v0  ;;  %v3277_v16 = vadd.f32 %v9709_v46, %v3165_v55  ;;  %v3280_v18 = vadd.f32 %v9709_v46, %v3168_v39  ;;  %v12830_v39 = vld [vmem:[#allocation90_spill] sm:$0xff]  ;;  %v12831_v11 = vld [vmem:[#allocation32_spill] sm:$0xff] }
 0x457   :  { %v3278_v40 = vadd.f32 %v9712_v42, %v3166_v45  ;;  %v10316_v6 = vpack.c.bf16 %v3371_v36, %v3368_v38  ;;  %v3366_v24 = vmax.f32 %v3270_v63, 0.0  ;;  %v3369_v51 = vmax.f32 %v3273_v50, 0.0  ;;  %v12832_v36 = vld [vmem:[#allocation103_spill] sm:$0xff] }
 0x458   :  { %4037 = vmatmul.mubr.bf16.gmra.mxu0 %v10305_v2  ;;  %v3281_v35 = vadd.f32 %v9712_v42, %v3169_v31  ;;  %v3373_v0 = vmax.f32 %v3277_v16, 0.0  ;;  %v3376_v23 = vmax.f32 %v3280_v18, 0.0  ;;  %v3164_v55 = vmul.f32 %v12820_v5, %v12829_v57 }
 0x459   :  { %4046 = vmatprep.mubr.bf16.mxu0 %v10309_v41  ;;  %v3167_v4 = vmul.f32 %v12820_v5, %v12830_v39  ;;  %v3171_v38 = vmul.f32 %v12823_v7, %v12831_v11  ;;  %v3174_v42 = vmul.f32 %v12823_v7, %v12832_v36  ;;  %v3374_v45 = vmax.f32 %v3278_v40, 0.0  ;;  %v12837_v39 = vld [vmem:[#allocation43_spill] sm:$0xff] }
 0x45a   :  { %v3377_v63 = vmax.f32 %v3281_v35, 0.0  ;;  %v3276_v50 = vadd.f32 %v12827_v30, %v3164_v55  ;;  %v10331_v31 = vpack.c.bf16 %v3369_v51, %v3366_v24  ;;  %v10333_v16 = vpack.c.bf16 %v3376_v23, %v3373_v0  ;;  %v12834_v51 = vld [vmem:[#allocation92_spill] sm:$0xff]  ;;  %v12835_v0 = vld [vmem:[#allocation46_spill] sm:$0xff]  ;;  %v12836_v23 = vld [vmem:[#allocation35_spill] sm:$0xff] }
 0x45b   :  { %v3279_v43 = vadd.f32 %v12827_v30, %v3167_v4  ;;  %v3283_v5 = vadd.f32 %v9709_v46, %v3171_v38  ;;  %v3286_v18 = vadd.f32 %v9709_v46, %v3174_v42  ;;  %v12833_v46 = vld [vmem:[#allocation39_spill] sm:$0xff] }
 0x45c   :  { %v3449_v57 = vpack.c.bf16 %v3377_v63, %v3374_v45  ;;  %v3372_v7 = vmax.f32 %v3276_v50, 0.0 }
 0x45d   :  { %4240 = vmatmul.mubr.bf16.gmra.mxu1 %v10316_v6  ;;  %v3375_v40 = vmax.f32 %v3279_v43, 0.0  ;;  %v3379_v35 = vmax.f32 %v3283_v5, 0.0  ;;  %v3382_v55 = vmax.f32 %v3286_v18, 0.0 }
 0x45e   :  { %4249 = vmatprep.mubr.bf16.mxu1 %v12751_v21 }
 0x45f   :  { %v10340_v30 = vpack.c.bf16 %v3375_v40, %v3372_v7  ;;  %v10342_v24 = vpack.c.bf16 %v3382_v55, %v3379_v35 }
 0x460   :  { %4047 = vmatmul.mubr.bf16.gmra.mxu0 %v10331_v31 }
 0x461   :  { %4056 = vmatprep.mubr.bf16.mxu0 %v10333_v16 }
 0x465   :  { %4250 = vmatmul.mubr.bf16.gmra.mxu1 %v3449_v57 }
 0x466   :  { %4259 = vmatprep.mubr.bf16.mxu1 %v12751_v21 }
 0x468   :  { %4057 = vmatmul.mubr.bf16.gmra.mxu0 %v10340_v30 }
 0x469   :  { %4066 = vmatprep.mubr.bf16.mxu0 %v10342_v24 }
 0x46d   :  { %4260 = vmatmul.mubr.bf16.gmra.mxu1 %v10155_v54 }
 0x46e   :  { %4269 = vmatprep.mubr.bf16.mxu1 %v12751_v21 }
 0x470   :  { %4067 = vmatmul.mubr.bf16.gmra.mxu0 %v10129_v15 }
 0x471   :  { %4076 = vmatprep.mubr.bf16.mxu0 %v10169_v60 }
 0x475   :  { %4270 = vmatmul.mubr.bf16.gmra.mxu1 %v10171_v9 }
 0x476   :  { %4279 = vmatprep.mubr.bf16.mxu1 %v12751_v21 }
 0x478   :  { %4077 = vmatmul.mubr.bf16.gmra.mxu0 %v10150_v27 }
 0x479   :  { %4086 = vmatprep.mubr.bf16.mxu0 %v10182_v37 }
 0x47d   :  { %4280 = vmatmul.mubr.bf16.gmra.mxu1 %v10192_v61 }
 0x47e   :  { %4289 = vmatprep.mubr.bf16.mxu1 %v12751_v21 }
 0x480   :  { %4087 = vmatmul.mubr.bf16.gmra.mxu0 %v10167_v26 }
 0x481   :  { %4096 = vmatprep.mubr.bf16.mxu0 %v10205_v25 }
 0x485   :  { %4290 = vmatmul.mubr.bf16.gmra.mxu1 %v10207_v13 }
 0x486   :  { %4299 = vmatprep.mubr.bf16.mxu1 %v12751_v21 }
 0x488   :  { %4097 = vmatmul.mubr.bf16.gmra.mxu0 %v10188_v47 }
 0x489   :  { %4106 = vmatprep.mubr.bf16.mxu0 %v10218_v53 }
 0x48d   :  { %4300 = vmatmul.mubr.bf16.gmra.mxu1 %v10228_v62 }
 0x48e   :  { %4309 = vmatprep.mubr.bf16.mxu1 %v12751_v21 }
 0x490   :  { %4107 = vmatmul.mubr.bf16.gmra.mxu0 %v10203_v49 }
 0x491   :  { %4116 = vmatprep.mubr.bf16.mxu0 %v10243_v12 }
 0x495   :  { %4310 = vmatmul.mubr.bf16.gmra.mxu1 %v10245_v29 }
 0x496   :  { %4319 = vmatprep.mubr.bf16.mxu1 %v12751_v21 }
 0x498   :  { %4117 = vmatmul.mubr.bf16.gmra.mxu0 %v10224_v44 }
 0x499   :  { %4126 = vmatprep.mubr.bf16.mxu0 %v10256_v3 }
 0x49d   :  { %4320 = vmatmul.mubr.bf16.gmra.mxu1 %v10270_v58 }
 0x49e   :  { %4329 = vmatprep.mubr.bf16.mxu1 %v12751_v21 }
 0x4a0   :  { %4127 = vmatmul.mubr.bf16.gmra.mxu0 %v10240_v17 }
 0x4a1   :  { %4136 = vmatprep.mubr.bf16.mxu0 %v10284_v33 }
 0x4a5   :  { %4330 = vmatmul.mubr.bf16.gmra.mxu1 %v10286_v52 }
 0x4a6   :  { %6751 = vmatprep.mubr.bf16.mxu1 %v12833_v46 }
 0x4a8   :  { %4137 = vmatmul.mubr.bf16.gmra.mxu0 %v10262_v59 }
 0x4a9   :  { %4372 = vmatprep.mubr.bf16.mxu0 %v12834_v51 }
 0x4ad   :  { %6752 = vmatmul.mubr.bf16.vlgmr.msra.gmra.mxu1 %v12835_v0 }
 0x4ae   :  { %6755 = vmatprep.mubr.bf16.mxu1 %v10088_v32 }
 0x4b0   :  { %4373 = vmatmul.mubr.bf16.vlgmr.msra.gmra.mxu0 %v12836_v23 }
 0x4b1   :  { %4380 = vmatprep.mubr.bf16.mxu0 %v12837_v39 }
 0x4b5   :  { %6756 = vmatmul.mubr.bf16.gmra.mxu1 %v10111_v19 }
 0x4b6   :  { %6759 = vmatprep.mubr.bf16.mxu1 %v10131_v8 }
 0x4b8   :  { %4381 = vmatmul.mubr.bf16.gmra.mxu0 %v10069_v14 }
 0x4b9   :  { %4388 = vmatprep.mubr.bf16.mxu0 %v10072_v48 }
 0x4bd   :  { %6760 = vmatmul.mubr.bf16.gmra.mxu1 %v10280_v34 }
 0x4be   :  { %6763 = vmatprep.mubr.bf16.mxu1 %v10316_v6 }
 0x4c0   :  { %4389 = vmatmul.mubr.bf16.gmra.mxu0 %v10081_v22 }
 0x4c1   :  { %4396 = vmatprep.mubr.bf16.mxu0 %v10096_v20 }
 0x4c5   :  { %6764 = vmatmul.mubr.bf16.gmra.mxu1 %v3449_v57 }
 0x4c6   :  { %6767 = vmatprep.mubr.bf16.mxu1 %v10155_v54 }
 0x4c8   :  { %4397 = vmatmul.mubr.bf16.gmra.mxu0 %v10102_v28 }
 0x4c9   :  { %4404 = vmatprep.mubr.bf16.mxu0 %v10113_v10 }
 0x4cd   :  { %6768 = vmatmul.mubr.bf16.gmra.mxu1 %v10171_v9 }
 0x4ce   :  { %6771 = vmatprep.mubr.bf16.mxu1 %v10192_v61 }
 0x4d0   :  { %4405 = vmatmul.mubr.bf16.gmra.mxu0 %v10108_v1 }
 0x4d1   :  { %4412 = vmatprep.mubr.bf16.mxu0 %v10268_v56 }
 0x4d5   :  { %6772 = vmatmul.mubr.bf16.gmra.mxu1 %v10207_v13 }
 0x4d6   :  { %6775 = vmatprep.mubr.bf16.mxu1 %v10228_v62 }
 0x4d8   :  { %4413 = vmatmul.mubr.bf16.gmra.mxu0 %v10305_v2 }
 0x4d9   :  { %4420 = vmatprep.mubr.bf16.mxu0 %v10309_v41 }
 0x4dd   :  { %6776 = vmatmul.mubr.bf16.gmra.mxu1 %v10245_v29 }
 0x4de   :  { %6779 = vmatprep.mubr.bf16.mxu1 %v10270_v58 }
 0x4e0   :  { %4421 = vmatmul.mubr.bf16.gmra.mxu0 %v10331_v31 }
 0x4e1   :  { %4428 = vmatprep.mubr.bf16.mxu0 %v10333_v16 }
 0x4e5   :  { %6780 = vmatmul.mubr.bf16.gmra.mxu1 %v10286_v52 }
 0x4e8   :  { %4429 = vmatmul.mubr.bf16.gmra.mxu0 %v10340_v30 }
 0x4e9   :  { %4436 = vmatprep.mubr.bf16.mxu0 %v10342_v24 }
 0x4ea   :  { %v4181_v21 = vpop.f32.mrf.mxu1 }
 0x4ec   :  { %v4183_v14 = vpop.f32.mrf.mxu1 }
 0x4ee   :  { %v4185_v48 = vpop.f32.mrf.mxu1 }
 0x4f0   :  { %v3988_v22 = vpop.f32.mrf.mxu0  ;;  %4437 = vmatmul.mubr.bf16.gmra.mxu0 %v10129_v15  ;;  %v10412_v20 = vpop.f32.mrf.mxu1 }
 0x4f1   :  { %v10409_v32 = vadd.f32 %v4181_v21, %v3988_v22  ;;  %4444 = vmatprep.mubr.bf16.mxu0 %v10169_v60 }
 0x4f2   :  { %v3990_v28 = vpop.f32.mrf.mxu0  ;;  %v4191_v19 = vpop.f32.mrf.mxu1 }
 0x4f3   :  { %12838 = vst [vmem:[#allocation42_spill] sm:$0xff] %v10409_v32  ;;  %v10414_v1 = vadd.f32 %v4183_v14, %v3990_v28 }
 0x4f4   :  { %v3992_v10 = vpop.f32.mrf.mxu0  ;;  %v4193_v54 = vpop.f32.mrf.mxu1 }
 0x4f5   :  { %12839 = vst [vmem:[#allocation104_spill] sm:$0xff] %v10414_v1  ;;  %v10416_v8 = vadd.f32 %v4185_v48, %v3992_v10 }
 0x4f6   :  { %v10418_v9 = vpop.f32.mrf.mxu0  ;;  %v4195_v61 = vpop.f32.mrf.mxu1 }
 0x4f7   :  { %12840 = vst [vmem:[#allocation45_spill] sm:$0xff] %v10416_v8 }
 0x4f8   :  { %v3998_v13 = vpop.f32.mrf.mxu0  ;;  %4445 = vmatmul.mubr.bf16.gmra.mxu0 %v10150_v27  ;;  %v10424_v60 = vpop.f32.mrf.mxu1 }
 0x4f9   :  { %v10421_v15 = vadd.f32 %v4191_v19, %v3998_v13  ;;  %4452 = vmatprep.mubr.bf16.mxu0 %v10182_v37 }
 0x4fa   :  { %v4000_v62 = vpop.f32.mrf.mxu0  ;;  %v4201_v56 = vpop.f32.mrf.mxu1 }
 0x4fb   :  { %12841 = vst [vmem:[#allocation48_spill] sm:$0xff] %v10421_v15  ;;  %v10426_v29 = vadd.f32 %v4193_v54, %v4000_v62 }
 0x4fc   :  { %v4002_v58 = vpop.f32.mrf.mxu0  ;;  %v4203_v52 = vpop.f32.mrf.mxu1 }
 0x4fd   :  { %12842 = vst [vmem:[#allocation49_spill] sm:$0xff] %v10426_v29  ;;  %v10428_v34 = vadd.f32 %v4195_v61, %v4002_v58 }
 0x4fe   :  { %v10430_v2 = vpop.f32.mrf.mxu0  ;;  %v4205_v41 = vpop.f32.mrf.mxu1 }
 0x4ff   :  { %12843 = vst [vmem:[#allocation51_spill] sm:$0xff] %v10428_v34 }
 0x500   :  { %v4008_v6 = vpop.f32.mrf.mxu0  ;;  %4453 = vmatmul.mubr.bf16.gmra.mxu0 %v10167_v26  ;;  %v10436_v37 = vpop.f32.mrf.mxu1 }
 0x501   :  { %v10433_v27 = vadd.f32 %v4201_v56, %v4008_v6  ;;  %4460 = vmatprep.mubr.bf16.mxu0 %v10205_v25 }
 0x502   :  { %v4010_v4 = vpop.f32.mrf.mxu0  ;;  %v4211_v38 = vpop.f32.mrf.mxu1 }
 0x503   :  { %12844 = vst [vmem:[#allocation63_spill] sm:$0xff] %v10433_v27  ;;  %v10438_v11 = vadd.f32 %v4203_v52, %v4010_v4 }
 0x504   :  { %v4012_v36 = vpop.f32.mrf.mxu0  ;;  %v4213_v45 = vpop.f32.mrf.mxu1 }
 0x505   :  { %12845 = vst [vmem:[#allocation67_spill] sm:$0xff] %v10438_v11  ;;  %v10440_v42 = vadd.f32 %v4205_v41, %v4012_v36 }
 0x506   :  { %v10442_v63 = vpop.f32.mrf.mxu0  ;;  %v4215_v50 = vpop.f32.mrf.mxu1 }
 0x507   :  { %12846 = vst [vmem:[#allocation76_spill] sm:$0xff] %v10440_v42 }
 0x508   :  { %v4018_v43 = vpop.f32.mrf.mxu0  ;;  %4461 = vmatmul.mubr.bf16.gmra.mxu0 %v10188_v47  ;;  %v10448_v25 = vpop.f32.mrf.mxu1 }
 0x509   :  { %v10445_v26 = vadd.f32 %v4211_v38, %v4018_v43  ;;  %4468 = vmatprep.mubr.bf16.mxu0 %v10218_v53 }
 0x50a   :  { %v4020_v31 = vpop.f32.mrf.mxu0  ;;  %v4221_v5 = vpop.f32.mrf.mxu1 }
 0x50b   :  { %12847 = vst [vmem:[#allocation55_spill] sm:$0xff] %v10445_v26  ;;  %v10450_v16 = vadd.f32 %v4213_v45, %v4020_v31 }
 0x50c   :  { %v4022_v18 = vpop.f32.mrf.mxu0  ;;  %v4223_v7 = vpop.f32.mrf.mxu1 }
 0x50d   :  { %12848 = vst [vmem:[#allocation59_spill] sm:$0xff] %v10450_v16  ;;  %v10452_v57 = vadd.f32 %v4215_v50, %v4022_v18 }
 0x50e   :  { %v10454_v40 = vpop.f32.mrf.mxu0  ;;  %v4225_v35 = vpop.f32.mrf.mxu1 }
 0x50f   :  { %12849 = vst [vmem:[#allocation61_spill] sm:$0xff] %v10452_v57 }
 0x510   :  { %v4028_v55 = vpop.f32.mrf.mxu0  ;;  %4469 = vmatmul.mubr.bf16.gmra.mxu0 %v10203_v49  ;;  %v10460_v53 = vpop.f32.mrf.mxu1 }
 0x511   :  { %v10457_v47 = vadd.f32 %v4221_v5, %v4028_v55  ;;  %4476 = vmatprep.mubr.bf16.mxu0 %v10243_v12 }
 0x512   :  { %v4030_v30 = vpop.f32.mrf.mxu0 }
 0x513   :  { %12850 = vst [vmem:[#allocation75_spill] sm:$0xff] %v10457_v47  ;;  %v10462_v24 = vadd.f32 %v4223_v7, %v4030_v30 }
 0x514   :  { %v4032_v51 = vpop.f32.mrf.mxu0 }
 0x515   :  { %12851 = vst [vmem:[#allocation70_spill] sm:$0xff] %v10462_v24  ;;  %v4231_v46 = vpop.f32.mrf.mxu1  ;;  %v10464_v0 = vadd.f32 %v4225_v35, %v4032_v51 }
 0x516   :  { %v10466_v39 = vpop.f32.mrf.mxu0 }
 0x517   :  { %12852 = vst [vmem:[#allocation68_spill] sm:$0xff] %v10464_v0  ;;  %v4233_v23 = vpop.f32.mrf.mxu1 }
 0x518   :  { %v4038_v14 = vpop.f32.mrf.mxu0  ;;  %4477 = vmatmul.mubr.bf16.gmra.mxu0 %v10224_v44 }
 0x519   :  { %v4235_v21 = vpop.f32.mrf.mxu1  ;;  %v10469_v49 = vadd.f32 %v4231_v46, %v4038_v14  ;;  %4484 = vmatprep.mubr.bf16.mxu0 %v10256_v3 }
 0x51a   :  { %v4040_v48 = vpop.f32.mrf.mxu0 }
 0x51b   :  { %12853 = vst [vmem:[#allocation89_spill] sm:$0xff] %v10469_v49  ;;  %v10472_v12 = vpop.f32.mrf.mxu1  ;;  %v10474_v22 = vadd.f32 %v4233_v23, %v4040_v48 }
 0x51c   :  { %v4042_v19 = vpop.f32.mrf.mxu0 }
 0x51d   :  { %12854 = vst [vmem:[#allocation36_spill] sm:$0xff] %v10474_v22  ;;  %v4241_v28 = vpop.f32.mrf.mxu1  ;;  %v10476_v10 = vadd.f32 %v4235_v21, %v4042_v19 }
 0x51e   :  { %v10478_v61 = vpop.f32.mrf.mxu0 }
 0x51f   :  { %12855 = vst [vmem:[#allocation71_spill] sm:$0xff] %v10476_v10  ;;  %v4243_v54 = vpop.f32.mrf.mxu1 }
 0x520   :  { %v4048_v62 = vpop.f32.mrf.mxu0  ;;  %4485 = vmatmul.mubr.bf16.gmra.mxu0 %v10240_v17 }
 0x521   :  { %v4245_v13 = vpop.f32.mrf.mxu1  ;;  %v10481_v44 = vadd.f32 %v4241_v28, %v4048_v62  ;;  %4492 = vmatprep.mubr.bf16.mxu0 %v10284_v33 }
 0x522   :  { %v4050_v56 = vpop.f32.mrf.mxu0 }
 0x523   :  { %12856 = vst [vmem:[#allocation79_spill] sm:$0xff] %v10481_v44  ;;  %v10484_v3 = vpop.f32.mrf.mxu1  ;;  %v10486_v58 = vadd.f32 %v4243_v54, %v4050_v56 }
 0x524   :  { %v4052_v41 = vpop.f32.mrf.mxu0 }
 0x525   :  { %12857 = vst [vmem:[#allocation47_spill] sm:$0xff] %v10486_v58  ;;  %v4251_v52 = vpop.f32.mrf.mxu1  ;;  %v10488_v6 = vadd.f32 %v4245_v13, %v4052_v41 }
 0x526   :  { %v10490_v38 = vpop.f32.mrf.mxu0 }
 0x527   :  { %12858 = vst [vmem:[#allocation52_spill] sm:$0xff] %v10488_v6  ;;  %v4253_v4 = vpop.f32.mrf.mxu1 }
 0x528   :  { %v4058_v45 = vpop.f32.mrf.mxu0  ;;  %4493 = vmatmul.mubr.bf16.gmra.mxu0 %v10262_v59 }
 0x529   :  { %v4255_v36 = vpop.f32.mrf.mxu1  ;;  %v10493_v17 = vadd.f32 %v4251_v52, %v4058_v45 }
 0x52a   :  { %v4060_v33 = vpop.f32.mrf.mxu0 }
 0x52b   :  { %12859 = vst [vmem:[#allocation74_spill] sm:$0xff] %v10493_v17  ;;  %v10495_v50 = vpop.f32.mrf.mxu1  ;;  %v10497_v43 = vadd.f32 %v4253_v4, %v4060_v33 }
 0x52c   :  { %v4062_v5 = vpop.f32.mrf.mxu0 }
 0x52d   :  { %12860 = vst [vmem:[#allocation64_spill] sm:$0xff] %v10497_v43  ;;  %v4261_v31 = vpop.f32.mrf.mxu1  ;;  %v10499_v18 = vadd.f32 %v4255_v36, %v4062_v5 }
 0x52e   :  { %v10501_v35 = vpop.f32.mrf.mxu0 }
 0x52f   :  { %12861 = vst [vmem:[#allocation62_spill] sm:$0xff] %v10499_v18  ;;  %v4263_v7 = vpop.f32.mrf.mxu1 }
 0x530   :  { %v4068_v30 = vpop.f32.mrf.mxu0 }
 0x531   :  { %v4265_v55 = vpop.f32.mrf.mxu1  ;;  %v10503_v46 = vadd.f32 %v4261_v31, %v4068_v30 }
 0x532   :  { %v4070_v59 = vpop.f32.mrf.mxu0 }
 0x533   :  { %12862 = vst [vmem:[#allocation41_spill] sm:$0xff] %v10503_v46  ;;  %v10505_v51 = vpop.f32.mrf.mxu1  ;;  %v10507_v23 = vadd.f32 %v4263_v7, %v4070_v59 }
 0x534   :  { %v4072_v14 = vpop.f32.mrf.mxu0 }
 0x535   :  { %12863 = vst [vmem:[#allocation94_spill] sm:$0xff] %v10507_v23  ;;  %v4271_v21 = vpop.f32.mrf.mxu1  ;;  %v10509_v48 = vadd.f32 %v4265_v55, %v4072_v14 }
 0x536   :  { %v10511_v19 = vpop.f32.mrf.mxu0 }
 0x537   :  { %12864 = vst [vmem:[#allocation72_spill] sm:$0xff] %v10509_v48  ;;  %v4273_v28 = vpop.f32.mrf.mxu1 }
 0x538   :  { %v4078_v13 = vpop.f32.mrf.mxu0 }
 0x539   :  { %v4275_v54 = vpop.f32.mrf.mxu1  ;;  %v10513_v62 = vadd.f32 %v4271_v21, %v4078_v13 }
 0x53a   :  { %v4080_v52 = vpop.f32.mrf.mxu0 }
 0x53b   :  { %12865 = vst [vmem:[#allocation93_spill] sm:$0xff] %v10513_v62  ;;  %v10515_v56 = vpop.f32.mrf.mxu1  ;;  %v10517_v41 = vadd.f32 %v4273_v28, %v4080_v52 }
 0x53c   :  { %12866 = vst [vmem:[#allocation80_spill] sm:$0xff] %v10515_v56  ;;  %v4082_v36 = vpop.f32.mrf.mxu0 }
 0x53d   :  { %12867 = vst [vmem:[#allocation95_spill] sm:$0xff] %v10517_v41  ;;  %v4281_v4 = vpop.f32.mrf.mxu1  ;;  %v10519_v45 = vadd.f32 %v4275_v54, %v4082_v36 }
 0x53e   :  { %v10521_v31 = vpop.f32.mrf.mxu0 }
 0x53f   :  { %12868 = vst [vmem:[#allocation40_spill] sm:$0xff] %v10519_v45  ;;  %v4283_v33 = vpop.f32.mrf.mxu1  ;;  %12869 = vst [vmem:[#allocation44_spill] sm:$0xff] %v10521_v31 }
 0x540   :  { %v4088_v7 = vpop.f32.mrf.mxu0 }
 0x541   :  { %v4285_v5 = vpop.f32.mrf.mxu1  ;;  %v10523_v55 = vadd.f32 %v4281_v4, %v4088_v7 }
 0x542   :  { %v4090_v59 = vpop.f32.mrf.mxu0 }
 0x543   :  { %12870 = vst [vmem:[#allocation56_spill] sm:$0xff] %v10523_v55  ;;  %v10525_v30 = vpop.f32.mrf.mxu1  ;;  %v10527_v21 = vadd.f32 %v4283_v33, %v4090_v59 }
 0x544   :  { %12871 = vst [vmem:[#allocation86_spill] sm:$0xff] %v10525_v30  ;;  %v4092_v13 = vpop.f32.mrf.mxu0 }
 0x545   :  { %12872 = vst [vmem:[#allocation58_spill] sm:$0xff] %v10527_v21  ;;  %v4291_v14 = vpop.f32.mrf.mxu1  ;;  %v10529_v28 = vadd.f32 %v4285_v5, %v4092_v13 }
 0x546   :  { %v10531_v41 = vpop.f32.mrf.mxu0 }
 0x547   :  { %12873 = vst [vmem:[#allocation73_spill] sm:$0xff] %v10529_v28  ;;  %v4293_v52 = vpop.f32.mrf.mxu1  ;;  %12874 = vst [vmem:[#allocation87_spill] sm:$0xff] %v10531_v41 }
 0x548   :  { %v4098_v36 = vpop.f32.mrf.mxu0 }
 0x549   :  { %v4295_v54 = vpop.f32.mrf.mxu1  ;;  %v10533_v45 = vadd.f32 %v4291_v14, %v4098_v36 }
 0x54a   :  { %v4100_v4 = vpop.f32.mrf.mxu0 }
 0x54b   :  { %12875 = vst [vmem:[#allocation77_spill] sm:$0xff] %v10533_v45  ;;  %v10535_v62 = vpop.f32.mrf.mxu1  ;;  %v10537_v7 = vadd.f32 %v4293_v52, %v4100_v4 }
 0x54c   :  { %12876 = vst [vmem:[#allocation57_spill] sm:$0xff] %v10535_v62  ;;  %v4102_v30 = vpop.f32.mrf.mxu0 }
 0x54d   :  { %12877 = vst [vmem:[#allocation19_spill] sm:$0xff] %v10537_v7  ;;  %v4301_v55 = vpop.f32.mrf.mxu1  ;;  %v10539_v33 = vadd.f32 %v4295_v54, %v4102_v30 }
 0x54e   :  { %v10541_v21 = vpop.f32.mrf.mxu0 }
 0x54f   :  { %12878 = vst [vmem:[#allocation78_spill] sm:$0xff] %v10539_v33  ;;  %v4303_v59 = vpop.f32.mrf.mxu1  ;;  %12879 = vst [vmem:[#allocation54_spill] sm:$0xff] %v10541_v21 }
 0x550   :  { %v4108_v13 = vpop.f32.mrf.mxu0 }
 0x551   :  { %v4305_v5 = vpop.f32.mrf.mxu1  ;;  %v10543_v28 = vadd.f32 %v4301_v55, %v4108_v13 }
 0x552   :  { %v4110_v56 = vpop.f32.mrf.mxu0 }
 0x553   :  { %12880 = vst [vmem:[#allocation21_spill] sm:$0xff] %v10543_v28  ;;  %v4307_v41 = vpop.f32.mrf.mxu1  ;;  %v10545_v14 = vadd.f32 %v4303_v59, %v4110_v56 }
 0x554   :  { %v4112_v62 = vpop.f32.mrf.mxu0 }
 0x555   :  { %12881 = vst [vmem:[#allocation98_spill] sm:$0xff] %v10545_v14  ;;  %v4311_v36 = vpop.f32.mrf.mxu1  ;;  %v10547_v45 = vadd.f32 %v4305_v5, %v4112_v62 }
 0x556   :  { %v4114_v4 = vpop.f32.mrf.mxu0 }
 0x557   :  { %12882 = vst [vmem:[#allocation23_spill] sm:$0xff] %v10547_v45  ;;  %v4313_v52 = vpop.f32.mrf.mxu1  ;;  %v10549_v7 = vadd.f32 %v4307_v41, %v4114_v4 }
 0x558   :  { %v4118_v54 = vpop.f32.mrf.mxu0 }
 0x559   :  { %12883 = vst [vmem:[#allocation25_spill] sm:$0xff] %v10549_v7  ;;  %v4315_v30 = vpop.f32.mrf.mxu1  ;;  %v10551_v33 = vadd.f32 %v4311_v36, %v4118_v54 }
 0x55a   :  { %v4120_v31 = vpop.f32.mrf.mxu0 }
 0x55b   :  { %12884 = vst [vmem:[#allocation30_spill] sm:$0xff] %v10551_v33  ;;  %v4317_v21 = vpop.f32.mrf.mxu1  ;;  %v10553_v55 = vadd.f32 %v4313_v52, %v4120_v31 }
 0x55c   :  { %v4122_v28 = vpop.f32.mrf.mxu0 }
 0x55d   :  { %12885 = vst [vmem:[#allocation81_spill] sm:$0xff] %v10553_v55  ;;  %v4321_v13 = vpop.f32.mrf.mxu1  ;;  %v10555_v56 = vadd.f32 %v4315_v30, %v4122_v28 }
 0x55e   :  { %v4124_v14 = vpop.f32.mrf.mxu0 }
 0x55f   :  { %12886 = vst [vmem:[#allocation97_spill] sm:$0xff] %v10555_v56  ;;  %v4323_v59 = vpop.f32.mrf.mxu1  ;;  %v10557_v62 = vadd.f32 %v4317_v21, %v4124_v14 }
 0x560   :  { %v4128_v45 = vpop.f32.mrf.mxu0 }
 0x561   :  { %12887 = vst [vmem:[#allocation91_spill] sm:$0xff] %v10557_v62  ;;  %v4325_v5 = vpop.f32.mrf.mxu1  ;;  %v10559_v41 = vadd.f32 %v4321_v13, %v4128_v45 }
 0x562   :  { %v4130_v7 = vpop.f32.mrf.mxu0 }
 0x563   :  { %12888 = vst [vmem:[#allocation99_spill] sm:$0xff] %v10559_v41  ;;  %v4327_v4 = vpop.f32.mrf.mxu1  ;;  %v10561_v36 = vadd.f32 %v4323_v59, %v4130_v7 }
 0x564   :  { %v4132_v33 = vpop.f32.mrf.mxu0 }
 0x565   :  { %12889 = vst [vmem:[#allocation29_spill] sm:$0xff] %v10561_v36  ;;  %v4331_v54 = vpop.f32.mrf.mxu1  ;;  %v10563_v31 = vadd.f32 %v4325_v5, %v4132_v33  ;;  %v10615_v36 = vadd.f32 %v10424_v60, %v10430_v2  ;;  %v4780_v60 = vmul.f32 %v10426_v29, %v10426_v29 }
 0x566   :  { %v4134_v55 = vpop.f32.mrf.mxu0 }
 0x567   :  { %12890 = vst [vmem:[#allocation26_spill] sm:$0xff] %v10563_v31  ;;  %v4333_v52 = vpop.f32.mrf.mxu1  ;;  %v10565_v28 = vadd.f32 %v4327_v4, %v4134_v55  ;;  %12905 = vst [vmem:[#allocation96_spill] sm:$0xff] %v10615_v36 }
 0x568   :  { %v4138_v56 = vpop.f32.mrf.mxu0 }
 0x569   :  { %12891 = vst [vmem:[#allocation27_spill] sm:$0xff] %v10565_v28  ;;  %v4335_v30 = vpop.f32.mrf.mxu1  ;;  %v10567_v21 = vadd.f32 %v4331_v54, %v4138_v56 }
 0x56a   :  { %v4140_v62 = vpop.f32.mrf.mxu0 }
 0x56b   :  { %12892 = vst [vmem:[#allocation20_spill] sm:$0xff] %v10567_v21  ;;  %v4337_v14 = vpop.f32.mrf.mxu1  ;;  %v10569_v45 = vadd.f32 %v4333_v52, %v4140_v62 }
 0x56c   :  { %v4142_v13 = vpop.f32.mrf.mxu0 }
 0x56d   :  { %12893 = vst [vmem:[#allocation33_spill] sm:$0xff] %v10569_v45  ;;  %v10571_v41 = vpop.f32.mrf.mxu1  ;;  %v10573_v7 = vadd.f32 %v4335_v30, %v4142_v13 }
 0x56e   :  { %12894 = vst [vmem:[#allocation50_spill] sm:$0xff] %v10571_v41  ;;  %v4144_v59 = vpop.f32.mrf.mxu0  ;;  %v4782_v41 = vmul.f32 %v10428_v34, %v10428_v34 }
 0x56f   :  { %12895 = vst [vmem:[#allocation22_spill] sm:$0xff] %v10573_v7  ;;  %v10575_v33 = vadd.f32 %v4337_v14, %v4144_v59  ;;  %v10577_v31 = vpop.f32.mrf.mxu1 }
 0x570   :  { %v6383_v5 = vpop.f32.mrf.mxu0  ;;  %12897 = vst [vmem:[#allocation66_spill] sm:$0xff] %v10577_v31  ;;  %v4783_v31 = vmul.f32 %v10615_v36, %v10615_v36 }
 0x571   :  { %12896 = vst [vmem:[#allocation69_spill] sm:$0xff] %v10575_v33  ;;  %v10581_v56 = vpop.f32.mrf.mxu1  ;;  %v4776_v33 = vmul.f32 %v10416_v8, %v10416_v8 }
 0x572   :  { %v6384_v55 = vpop.f32.mrf.mxu0  ;;  %12899 = vst [vmem:[#allocation100_spill] sm:$0xff] %v10581_v56  ;;  %v4774_v56 = vmul.f32 %v10414_v1, %v10414_v1 }
 0x573   :  { %v10579_v4 = vadd.f32 %v6384_v55, %v6383_v5  ;;  %v10587_v52 = vpop.f32.mrf.mxu1  ;;  %v10601_v5 = vadd.f32 %v10412_v20, %v10418_v9  ;;  %v4773_v20 = vmul.f32 %v10409_v32, %v10409_v32  ;;  %v4779_v9 = vmul.f32 %v10421_v15, %v10421_v15 }
 0x574   :  { %v10583_v54 = vpop.f32.mrf.mxu0 }
 0x575   :  { %12898 = vst [vmem:[#allocation60_spill] sm:$0xff] %v10579_v4  ;;  %v10593_v14 = vpop.f32.mrf.mxu1  ;;  %12901 = vst [vmem:[#allocation37_spill] sm:$0xff] %v10601_v5  ;;  %v4777_v28 = vmul.f32 %v10601_v5, %v10601_v5  ;;  %v4869_v2 = vadd.f32 %v4776_v33, %v4773_v20  ;;  %v4785_v20 = vmul.f32 %v10433_v27, %v10433_v27 }
 0x576   :  { %v10585_v62 = vpop.f32.mrf.mxu0  ;;  %12900 = vst [vmem:[#allocation101_spill] sm:$0xff] %v10593_v14 }
 0x577   :  { %v10603_v55 = vpop.f32.mrf.mxu1 }
 0x578   :  { %v10589_v21 = vpop.f32.mrf.mxu0  ;;  %12902 = vst [vmem:[#allocation38_spill] sm:$0xff] %v10603_v55 }
 0x579   :  { %v10621_v14 = vpop.f32.mrf.mxu1 }
 0x57a   :  { %v10591_v30 = vpop.f32.mrf.mxu0  ;;  %12906 = vst [vmem:[#allocation102_spill] sm:$0xff] %v10621_v14  ;;  %v4906_v14 = vadd.f32 %v4777_v28, %v4774_v56  ;;  %v4786_v56 = vmul.f32 %v10438_v11, %v10438_v11 }
 0x57c   :  { %v10595_v13 = vpop.f32.mrf.mxu0  ;;  %v4907_v28 = vadd.f32 %v4906_v14, %v4780_v60  ;;  %v10664_v14 = vadd.f32 %v10448_v25, %v10454_v40 }
 0x57e   :  { %v10597_v59 = vpop.f32.mrf.mxu0  ;;  %12909 = vst [vmem:[#allocation53_spill] sm:$0xff] %v10664_v14 }
 0x580   :  { %v10605_v7 = vpop.f32.mrf.mxu0 }
 0x581   :  { %12903 = vst [vmem:[#allocation24_spill] sm:$0xff] %v10605_v7  ;;  %v4699_v7 = vadd.f32 %v10601_v5, %v10414_v1  ;;  %v10647_v5 = vpop.f32.mrf.mxu1 }
 0x582   :  { %v10609_v45 = vpop.f32.mrf.mxu0 }
 0x583   :  { %12904 = vst [vmem:[#allocation31_spill] sm:$0xff] %v10609_v45  ;;  %v4662_v45 = vadd.f32 %v10416_v8, %v10409_v32  ;;  %v10642_v8 = vadd.f32 %v10436_v37, %v10442_v63  ;;  %v4870_v32 = vadd.f32 %v4869_v2, %v4779_v9  ;;  %v4700_v33 = vadd.f32 %v4699_v7, %v10426_v29  ;;  %v10669_v60 = vpop.f32.mrf.mxu1 }
 0x584   :  { %v10623_v55 = vpop.f32.mrf.mxu0  ;;  %v4788_v63 = vmul.f32 %v10440_v42, %v10440_v42  ;;  %v4908_v9 = vadd.f32 %v4907_v28, %v4783_v31 }
 0x585   :  { %12907 = vst [vmem:[#allocation88_spill] sm:$0xff] %v10623_v55  ;;  %v4663_v55 = vadd.f32 %v4662_v45, %v10421_v15  ;;  %12908 = vst [vmem:[#allocation65_spill] sm:$0xff] %v10642_v8  ;;  %v4871_v15 = vadd.f32 %v4870_v32, %v4782_v41  ;;  %v4701_v37 = vadd.f32 %v4700_v33, %v10615_v36 }
 0x586   :  { %v10635_v4 = vpop.f32.mrf.mxu0  ;;  %v4789_v29 = vmul.f32 %v10642_v8, %v10642_v8  ;;  %v4791_v41 = vmul.f32 %v10445_v26, %v10445_v26  ;;  %v4909_v31 = vadd.f32 %v4908_v9, %v4786_v56  ;;  %v10686_v56 = vadd.f32 %v10460_v53, %v10466_v39 }
 0x587   :  { %v4664_v45 = vadd.f32 %v4663_v55, %v10428_v34  ;;  %v4872_v55 = vadd.f32 %v4871_v15, %v4785_v20  ;;  %v4702_v32 = vadd.f32 %v4701_v37, %v10438_v11  ;;  %v4794_v15 = vmul.f32 %v10452_v57, %v10452_v57  ;;  %v12947_v34 = vld [vmem:[#allocation30_spill] sm:$0xff] }
 0x588   :  { %v10649_v1 = vpop.f32.mrf.mxu0  ;;  %v4910_v20 = vadd.f32 %v4909_v31, %v4789_v29  ;;  %v4795_v11 = vmul.f32 %v10664_v14, %v10664_v14  ;;  %12910 = vst [vmem:[#allocation34_spill] sm:$0xff] %v10686_v56 }
 0x589   :  { %v4665_v2 = vadd.f32 %v4664_v45, %v10433_v27  ;;  %v4792_v45 = vmul.f32 %v10450_v16, %v10450_v16  ;;  %v4873_v27 = vadd.f32 %v4872_v55, %v4788_v63  ;;  %v4703_v25 = vadd.f32 %v4702_v32, %v10642_v8  ;;  %v10691_v55 = vpop.f32.mrf.mxu1  ;;  %v12936_v8 = vld [vmem:[#allocation24_spill] sm:$0xff] }
 0x58a   :  { %v10657_v7 = vpop.f32.mrf.mxu0 }
 0x58b   :  { %v4666_v28 = vadd.f32 %v4665_v2, %v10440_v42  ;;  %v4874_v9 = vadd.f32 %v4873_v27, %v4791_v41  ;;  %v4704_v63 = vadd.f32 %v4703_v25, %v10450_v16  ;;  %v4797_v2 = vmul.f32 %v10457_v47, %v10457_v47 }
 0x58c   :  { %v10671_v33 = vpop.f32.mrf.mxu0  ;;  %v4911_v29 = vadd.f32 %v4910_v20, %v4792_v45  ;;  %v4800_v27 = vmul.f32 %v10464_v0, %v10464_v0  ;;  %v4801_v16 = vmul.f32 %v10686_v56, %v10686_v56  ;;  %v10708_v45 = vadd.f32 %v10472_v12, %v10478_v61 }
 0x58d   :  { %v4667_v37 = vadd.f32 %v4666_v28, %v10445_v26  ;;  %v4798_v28 = vmul.f32 %v10462_v24, %v10462_v24  ;;  %v4875_v26 = vadd.f32 %v4874_v9, %v4794_v15  ;;  %v4705_v53 = vadd.f32 %v4704_v63, %v10664_v14  ;;  %v10713_v9 = vpop.f32.mrf.mxu1  ;;  %v12934_v14 = vld [vmem:[#allocation60_spill] sm:$0xff] }
 0x58e   :  { %v10679_v40 = vpop.f32.mrf.mxu0  ;;  %v4912_v41 = vadd.f32 %v4911_v29, %v4795_v11  ;;  %12911 = vst [vmem:[#allocation28_spill] sm:$0xff] %v10708_v45 }
 0x58f   :  { %v4668_v31 = vadd.f32 %v4667_v37, %v10452_v57  ;;  %v4876_v20 = vadd.f32 %v4875_v26, %v4797_v2  ;;  %v4706_v15 = vadd.f32 %v4705_v53, %v10462_v24  ;;  %v4803_v37 = vmul.f32 %v10469_v49, %v10469_v49 }
 0x590   :  { %v10693_v32 = vpop.f32.mrf.mxu0  ;;  %v4913_v11 = vadd.f32 %v4912_v41, %v4798_v28  ;;  %v4806_v26 = vmul.f32 %v10476_v10, %v10476_v10  ;;  %v4807_v24 = vmul.f32 %v10708_v45, %v10708_v45  ;;  %v10730_v28 = vadd.f32 %v10484_v3, %v10490_v38 }
 0x591   :  { %v4669_v25 = vadd.f32 %v4668_v31, %v10457_v47  ;;  %v4804_v31 = vmul.f32 %v10474_v22, %v10474_v22  ;;  %v4877_v47 = vadd.f32 %v4876_v20, %v4800_v27  ;;  %v4707_v12 = vadd.f32 %v4706_v15, %v10686_v56  ;;  %v10735_v20 = vpop.f32.mrf.mxu1 }
 0x592   :  { %v10701_v39 = vpop.f32.mrf.mxu0  ;;  %v4914_v2 = vadd.f32 %v4913_v11, %v4801_v16  ;;  %12912 = vst [vmem:[#allocation90_spill] sm:$0xff] %v10730_v28 }
 0x593   :  { %v4670_v29 = vadd.f32 %v4669_v25, %v10464_v0  ;;  %v4878_v41 = vadd.f32 %v4877_v47, %v4803_v37  ;;  %v4708_v27 = vadd.f32 %v4707_v12, %v10474_v22  ;;  %v4809_v25 = vmul.f32 %v10481_v44, %v10481_v44 }
 0x594   :  { %v10715_v63 = vpop.f32.mrf.mxu0  ;;  %v4915_v16 = vadd.f32 %v4914_v2, %v4804_v31  ;;  %v4812_v47 = vmul.f32 %v10488_v6, %v10488_v6  ;;  %v4813_v22 = vmul.f32 %v10730_v28, %v10730_v28  ;;  %v10752_v31 = vadd.f32 %v10495_v50, %v10501_v35 }
 0x595   :  { %v4671_v53 = vadd.f32 %v4670_v29, %v10469_v49  ;;  %v4810_v29 = vmul.f32 %v10486_v58, %v10486_v58  ;;  %v4879_v49 = vadd.f32 %v4878_v41, %v4806_v26  ;;  %v4709_v3 = vadd.f32 %v4708_v27, %v10708_v45  ;;  %v10757_v41 = vpop.f32.mrf.mxu1 }
 0x596   :  { %v10723_v61 = vpop.f32.mrf.mxu0  ;;  %v4916_v37 = vadd.f32 %v4915_v16, %v4807_v24  ;;  %12913 = vst [vmem:[#allocation32_spill] sm:$0xff] %v10752_v31 }
 0x597   :  { %v4672_v11 = vadd.f32 %v4671_v53, %v10476_v10  ;;  %v4880_v2 = vadd.f32 %v4879_v49, %v4809_v25  ;;  %v4710_v26 = vadd.f32 %v4709_v3, %v10486_v58  ;;  %v4815_v53 = vmul.f32 %v10493_v17, %v10493_v17 }
 0x598   :  { %v10737_v15 = vpop.f32.mrf.mxu0  ;;  %v4917_v24 = vadd.f32 %v4916_v37, %v4810_v29  ;;  %v4818_v49 = vmul.f32 %v10499_v18, %v10499_v18  ;;  %v4819_v58 = vmul.f32 %v10752_v31, %v10752_v31  ;;  %v10774_v29 = vadd.f32 %v10505_v51, %v10511_v19 }
 0x599   :  { %v4673_v12 = vadd.f32 %v4672_v11, %v10481_v44  ;;  %v4816_v11 = vmul.f32 %v10497_v43, %v10497_v43  ;;  %v4881_v44 = vadd.f32 %v4880_v2, %v4812_v47  ;;  %v4711_v50 = vadd.f32 %v4710_v26, %v10730_v28  ;;  %v10779_v2 = vpop.f32.mrf.mxu1 }
 0x59a   :  { %v10745_v38 = vpop.f32.mrf.mxu0  ;;  %v4918_v25 = vadd.f32 %v4917_v24, %v4813_v22  ;;  %12914 = vst [vmem:[#allocation103_spill] sm:$0xff] %v10774_v29 }
 0x59b   :  { %v4674_v16 = vadd.f32 %v4673_v12, %v10488_v6  ;;  %v4882_v37 = vadd.f32 %v4881_v44, %v4815_v53  ;;  %v4712_v47 = vadd.f32 %v4711_v50, %v10497_v43  ;;  %v4821_v12 = vmul.f32 %v10503_v46, %v10503_v46 }
 0x59c   :  { %v10759_v27 = vpop.f32.mrf.mxu0  ;;  %v4919_v22 = vadd.f32 %v4918_v25, %v4816_v11  ;;  %v4824_v44 = vmul.f32 %v10509_v48, %v10509_v48  ;;  %v4825_v43 = vmul.f32 %v10774_v29, %v10774_v29  ;;  %v12915_v11 = vld [vmem:[#allocation44_spill] sm:$0xff] }
 0x59d   :  { %v4675_v3 = vadd.f32 %v4674_v16, %v10493_v17  ;;  %v4822_v16 = vmul.f32 %v10507_v23, %v10507_v23  ;;  %v4883_v17 = vadd.f32 %v4882_v37, %v4818_v49  ;;  %v4713_v51 = vadd.f32 %v4712_v47, %v10752_v31  ;;  %v12916_v25 = vld [vmem:[#allocation80_spill] sm:$0xff]  ;;  %v12918_v37 = vld [vmem:[#allocation93_spill] sm:$0xff]  ;;  %v10801_v31 = vpop.f32.mrf.mxu1 }
 0x59e   :  { %v10767_v35 = vpop.f32.mrf.mxu0  ;;  %v4920_v53 = vadd.f32 %v4919_v22, %v4819_v58  ;;  %v4827_v47 = vmul.f32 %v12918_v37, %v12918_v37 }
 0x59f   :  { %v4676_v24 = vadd.f32 %v4675_v3, %v10499_v18  ;;  %v10796_v3 = vadd.f32 %v12916_v25, %v12915_v11  ;;  %v4884_v18 = vadd.f32 %v4883_v17, %v4821_v12  ;;  %v4714_v49 = vadd.f32 %v4713_v51, %v10507_v23  ;;  %v12920_v25 = vld [vmem:[#allocation40_spill] sm:$0xff] }
 0x5a0   :  { %v10781_v26 = vpop.f32.mrf.mxu0  ;;  %v4921_v58 = vadd.f32 %v4920_v53, %v4822_v16  ;;  %v4830_v17 = vmul.f32 %v12920_v25, %v12920_v25  ;;  %v12921_v16 = vld [vmem:[#allocation87_spill] sm:$0xff]  ;;  %v12922_v53 = vld [vmem:[#allocation86_spill] sm:$0xff] }
 0x5a1   :  { %v4677_v50 = vadd.f32 %v4676_v24, %v10503_v46  ;;  %12917 = vst [vmem:[#allocation39_spill] sm:$0xff] %v10796_v3  ;;  %v12919_v24 = vld [vmem:[#allocation95_spill] sm:$0xff]  ;;  %v4885_v28 = vadd.f32 %v4884_v18, %v4824_v44  ;;  %v4715_v11 = vadd.f32 %v4714_v49, %v10774_v29  ;;  %v4831_v45 = vmul.f32 %v10796_v3, %v10796_v3  ;;  %v12924_v44 = vld [vmem:[#allocation56_spill] sm:$0xff]  ;;  %v10823_v29 = vpop.f32.mrf.mxu1 }
 0x5a2   :  { %v10789_v19 = vpop.f32.mrf.mxu0  ;;  %v4828_v46 = vmul.f32 %v12919_v24, %v12919_v24  ;;  %v4922_v51 = vadd.f32 %v4921_v58, %v4825_v43  ;;  %v4833_v49 = vmul.f32 %v12924_v44, %v12924_v44 }
 0x5a3   :  { %v4678_v22 = vadd.f32 %v4677_v50, %v10509_v48  ;;  %v10818_v50 = vadd.f32 %v12922_v53, %v12921_v16  ;;  %v4886_v48 = vadd.f32 %v4885_v28, %v4827_v47  ;;  %v4716_v18 = vadd.f32 %v4715_v11, %v12919_v24  ;;  %v12926_v47 = vld [vmem:[#allocation73_spill] sm:$0xff] }
 0x5a4   :  { %v10803_v6 = vpop.f32.mrf.mxu0  ;;  %v4923_v43 = vadd.f32 %v4922_v51, %v4828_v46  ;;  %v6388_v16 = vadd.f32 %v10585_v62, %v10583_v54  ;;  %v4836_v11 = vmul.f32 %v12926_v47, %v12926_v47 }
 0x5a5   :  { %v4679_v23 = vadd.f32 %v4678_v22, %v12918_v37  ;;  %12923 = vst [vmem:[#allocation92_spill] sm:$0xff] %v10818_v50  ;;  %v12925_v22 = vld [vmem:[#allocation58_spill] sm:$0xff]  ;;  %v4887_v53 = vadd.f32 %v4886_v48, %v4830_v17  ;;  %v4717_v28 = vadd.f32 %v4716_v18, %v10796_v3  ;;  %v4837_v46 = vmul.f32 %v10818_v50, %v10818_v50  ;;  %v12927_v48 = vld [vmem:[#allocation77_spill] sm:$0xff] }
 0x5a6   :  { %v10811_v12 = vpop.f32.mrf.mxu0  ;;  %v4834_v37 = vmul.f32 %v12925_v22, %v12925_v22  ;;  %v4924_v56 = vadd.f32 %v4923_v43, %v4831_v45  ;;  %v4839_v62 = vmul.f32 %v12927_v48, %v12927_v48  ;;  %v12928_v17 = vld [vmem:[#allocation54_spill] sm:$0xff]  ;;  %v12929_v18 = vld [vmem:[#allocation57_spill] sm:$0xff] }
 0x5a7   :  { %v4680_v58 = vadd.f32 %v4679_v23, %v12920_v25  ;;  %v6391_v23 = vadd.f32 %v10591_v30, %v10589_v21  ;;  %v4888_v51 = vadd.f32 %v4887_v53, %v4833_v49  ;;  %v4718_v54 = vadd.f32 %v4717_v28, %v12925_v22  ;;  %v10849_v25 = vpop.f32.mrf.mxu1 }
 0x5a8   :  { %v10825_v10 = vpop.f32.mrf.mxu0  ;;  %v10847_v3 = vadd.f32 %v12929_v18, %v12928_v17  ;;  %v4925_v43 = vadd.f32 %v4924_v56, %v4834_v37  ;;  %v10856_v21 = vadd.f32 %v6388_v16, %v10587_v52  ;;  %v6394_v30 = vadd.f32 %v10597_v59, %v10595_v13  ;;  %v12932_v17 = vld [vmem:[#allocation78_spill] sm:$0xff]  ;;  %v12937_v13 = vld [vmem:[#allocation31_spill] sm:$0xff] }
 0x5a9   :  { %v4681_v0 = vadd.f32 %v4680_v58, %v12924_v44  ;;  %v12931_v58 = vld [vmem:[#allocation19_spill] sm:$0xff]  ;;  %v4889_v53 = vadd.f32 %v4888_v51, %v4836_v11  ;;  %v4719_v28 = vadd.f32 %v4718_v54, %v10818_v50  ;;  %v4842_v18 = vmul.f32 %v12932_v17, %v12932_v17  ;;  %v12933_v37 = vld [vmem:[#allocation66_spill] sm:$0xff]  ;;  %v10878_v54 = vpop.f32.mrf.mxu1 }
 0x5aa   :  { %v10835_v24 = vpop.f32.mrf.mxu0  ;;  %12930 = vst [vmem:[#allocation46_spill] sm:$0xff] %v10847_v3  ;;  %v4840_v44 = vmul.f32 %v12931_v58, %v12931_v58  ;;  %v4926_v56 = vadd.f32 %v4925_v43, %v4837_v46  ;;  %v10868_v57 = vadd.f32 %v12934_v14, %v12933_v37  ;;  %v12935_v52 = vld [vmem:[#allocation50_spill] sm:$0xff]  ;;  %v6397_v59 = vadd.f32 %v12937_v13, %v12936_v8  ;;  %v12938_v43 = vld [vmem:[#allocation100_spill] sm:$0xff] }
 0x5ab   :  { %v4682_v49 = vadd.f32 %v4681_v0, %v12926_v47  ;;  %v10871_v16 = vadd.f32 %v12935_v52, %v6391_v23  ;;  %v4890_v11 = vadd.f32 %v4889_v53, %v4839_v62  ;;  %v4843_v51 = vmul.f32 %v10847_v3, %v10847_v3  ;;  %v12939_v62 = vld [vmem:[#allocation21_spill] sm:$0xff]  ;;  %v12940_v52 = vld [vmem:[#allocation88_spill] sm:$0xff] }
 0x5ac   :  { %v10851_v45 = vpop.f32.mrf.mxu0  ;;  %v4720_v46 = vadd.f32 %v4719_v28, %v12931_v58  ;;  %v4927_v14 = vadd.f32 %v4926_v56, %v4840_v44  ;;  %v4778_v23 = vmul.f32 %v10856_v21, %v10856_v21  ;;  %v10886_v37 = vadd.f32 %v12938_v43, %v6394_v30  ;;  %v12941_v56 = vld [vmem:[#allocation38_spill] sm:$0xff]  ;;  %v12945_v47 = vld [vmem:[#allocation25_spill] sm:$0xff] }
 0x5ad   :  { %v4683_v0 = vadd.f32 %v4682_v49, %v12927_v48  ;;  %v4891_v49 = vadd.f32 %v4890_v11, %v4842_v18  ;;  %v4845_v53 = vmul.f32 %v12939_v62, %v12939_v62  ;;  %v6400_v13 = vadd.f32 %v10635_v4, %v12940_v52  ;;  %v12943_v11 = vld [vmem:[#allocation98_spill] sm:$0xff]  ;;  %v10908_v52 = vpop.f32.mrf.mxu1 }
 0x5ae   :  { %v10864_v22 = vpop.f32.mrf.mxu0  ;;  %v4721_v28 = vadd.f32 %v4720_v46, %v10847_v3  ;;  %v4775_v44 = vmul.f32 %v10868_v57, %v10868_v57  ;;  %v4781_v30 = vmul.f32 %v10871_v16, %v10871_v16  ;;  %v10901_v43 = vadd.f32 %v6397_v59, %v12941_v56  ;;  %v12944_v3 = vld [vmem:[#allocation23_spill] sm:$0xff] }
 0x5af   :  { %v4684_v8 = vadd.f32 %v4683_v0, %v12932_v17  ;;  %v4928_v18 = vadd.f32 %v4927_v14, %v4843_v51  ;;  %v4846_v17 = vmul.f32 %v12943_v11, %v12943_v11  ;;  %v6403_v4 = vadd.f32 %v10657_v7, %v10649_v1 }
 0x5b0   :  { %v10880_v50 = vpop.f32.mrf.mxu0  ;;  %12942 = vst [vmem:[#allocation35_spill] sm:$0xff] %v10901_v43  ;;  %v4848_v58 = vmul.f32 %v12944_v3, %v12944_v3  ;;  %v4736_v59 = vadd.f32 %v10856_v21, %v10868_v57  ;;  %v4943_v56 = vadd.f32 %v4778_v23, %v4775_v44  ;;  %v4784_v51 = vmul.f32 %v10886_v37, %v10886_v37 }
 0x5b1   :  { %v4685_v0 = vadd.f32 %v4684_v8, %v12939_v62  ;;  %v4892_v14 = vadd.f32 %v4891_v49, %v4845_v53  ;;  %v4722_v8 = vadd.f32 %v4721_v28, %v12943_v11  ;;  %v10920_v62 = vadd.f32 %v6400_v13, %v10647_v5  ;;  %v12946_v28 = vld [vmem:[#allocation101_spill] sm:$0xff] }
 0x5b2   :  { %v10893_v48 = vpop.f32.mrf.mxu0  ;;  %v6406_v1 = vadd.f32 %v10679_v40, %v10671_v33  ;;  %v4849_v42 = vmul.f32 %v12945_v47, %v12945_v47  ;;  %v4737_v36 = vadd.f32 %v4736_v59, %v10871_v16  ;;  %v4944_v23 = vadd.f32 %v4943_v56, %v4781_v30  ;;  %v10937_v40 = vpop.f32.mrf.mxu1 }
 0x5b3   :  { %v4787_v44 = vmul.f32 %v10901_v43, %v10901_v43  ;;  %v4929_v49 = vadd.f32 %v4928_v18, %v4846_v17  ;;  %v4686_v53 = vadd.f32 %v4685_v0, %v12944_v3  ;;  %v10933_v5 = vadd.f32 %v12946_v28, %v6403_v4  ;;  %v12948_v0 = vld [vmem:[#allocation102_spill] sm:$0xff]  ;;  %v12949_v3 = vld [vmem:[#allocation81_spill] sm:$0xff] }
 0x5b4   :  { %v10910_v46 = vpop.f32.mrf.mxu0  ;;  %v6409_v33 = vadd.f32 %v10701_v39, %v10693_v32  ;;  %v4893_v11 = vadd.f32 %v4892_v14, %v4848_v58  ;;  %v4851_v30 = vmul.f32 %v12947_v34, %v12947_v34  ;;  %v4738_v59 = vadd.f32 %v4737_v36, %v10886_v37  ;;  %v7086_v58 = vld [vmem:[#allocation10 + $0x78] sm:$0xff]  }
 0x5b5   :  { %v4945_v56 = vadd.f32 %v4944_v23, %v4784_v51  ;;  %v4723_v17 = vadd.f32 %v4722_v8, %v12945_v47  ;;  %v4790_v18 = vmul.f32 %v10920_v62, %v10920_v62  ;;  %v10948_v4 = vadd.f32 %v12948_v0, %v6406_v1  ;;  %v7088_v14 = vld [vmem:[#allocation10 + $0xb8] sm:$0xff]   ;;  %v10962_v0 = vpop.f32.mrf.mxu1  ;;  %6503 = vmatprep.subr.bf16.mxu1 %v7086_v58  ;;  %v7089_v58 = vld [vmem:[#allocation10 + $0x70] sm:$0xff]  }
 0x5b6   :  { %v10924_v7 = vpop.f32.mrf.mxu0  ;;  %v6412_v32 = vadd.f32 %v10723_v61, %v10715_v63  ;;  %v4930_v28 = vadd.f32 %v4929_v49, %v4849_v42  ;;  %v4852_v36 = vmul.f32 %v12949_v3, %v12949_v3  ;;  %v4739_v51 = vadd.f32 %v4738_v59, %v10901_v43  ;;  %v7087_v23 = vld [vmem:[#allocation10 + $0x38] sm:$0xff]   ;;  %6783 = vmatprep.subr.bf16.mxu0 %v7088_v14  ;;  %v12950_v59 = vld [vmem:[#allocation97_spill] sm:$0xff]  ;;  %v7093_v43 = vld [vmem:[#allocation10 + $0xb0] sm:$0xff]  }
 0x5b7   :  { %v4946_v8 = vadd.f32 %v4945_v56, %v4787_v44  ;;  %v4793_v47 = vmul.f32 %v10933_v5, %v10933_v5  ;;  %v10960_v1 = vadd.f32 %v6409_v33, %v10691_v55  ;;  %v6415_v63 = vadd.f32 %v10745_v38, %v10737_v15  ;;  %6504 = vmatpush3.bf16.msra.mxu1 %v7087_v23  ;;  %v10985_v23 = vpop.f32.mrf.mxu1 }
 0x5b8   :  { %v10939_v13 = vpop.f32.mrf.mxu0  ;;  %v4687_v42 = vadd.f32 %v4686_v53, %v12947_v34  ;;  %v4894_v49 = vadd.f32 %v4893_v11, %v4851_v30  ;;  %v4740_v44 = vadd.f32 %v4739_v51, %v10920_v62  ;;  %6784 = vmatpush3.bf16.msra.mxu0 %v7088_v14  ;;  %v4854_v55 = vmul.f32 %v12950_v59, %v12950_v59  ;;  %v7090_v51 = vld [vmem:[#allocation10 + $0x30] sm:$0xff]  }
 0x5b9   :  { %v4947_v33 = vadd.f32 %v4946_v8, %v4790_v18  ;;  %v4796_v56 = vmul.f32 %v10948_v4, %v10948_v4  ;;  %v10975_v15 = vadd.f32 %v6412_v32, %v10735_v20  ;;  %v4724_v11 = vadd.f32 %v4723_v17, %v12949_v3  ;;  %6505 = vmatprep.subr.bf16.mxu1 %v7089_v58  ;;  %v7098_v58 = vld [vmem:[#allocation10 + $0xa8] sm:$0xff]   ;;  %v12952_v3 = vld [vmem:[#allocation99_spill] sm:$0xff] }
 0x5ba   :  { %v10952_v39 = vpop.f32.mrf.mxu0  ;;  %v4931_v53 = vadd.f32 %v4930_v28, %v4852_v36  ;;  %v4741_v30 = vadd.f32 %v4740_v44, %v10933_v5  ;;  %v6418_v14 = vadd.f32 %v10767_v35, %v10759_v27  ;;  %v4799_v8 = vmul.f32 %v10960_v1, %v10960_v1  ;;  %6785 = vmatprep.subr.bf16.mxu0 %v7093_v43  ;;  %v12951_v28 = vld [vmem:[#allocation91_spill] sm:$0xff] }
 0x5bb   :  { %v4948_v18 = vadd.f32 %v4947_v33, %v4793_v47  ;;  %v10988_v20 = vadd.f32 %v10669_v60, %v6415_v63  ;;  %v4688_v17 = vadd.f32 %v4687_v42, %v12950_v59  ;;  %v4855_v36 = vmul.f32 %v12951_v28, %v12951_v28  ;;  %6506 = vmatpush3.bf16.msra.mxu1 %v7090_v51  ;;  %v7091_v33 = vld [vmem:[#allocation10 + $0x68] sm:$0xff]  }
 0x5bc   :  { %v10966_v61 = vpop.f32.mrf.mxu0  ;;  %v6421_v27 = vadd.f32 %v10789_v19, %v10781_v26  ;;  %6786 = vmatpush3.bf16.msra.mxu0 %v7093_v43  ;;  %v4895_v35 = vadd.f32 %v4894_v49, %v4854_v55  ;;  %v4742_v47 = vadd.f32 %v4741_v30, %v10948_v4  ;;  %v4802_v60 = vmul.f32 %v10975_v15, %v10975_v15  ;;  %v7092_v43 = vld [vmem:[#allocation10 + $0x28] sm:$0xff]   ;;  %v11013_v30 = vpop.f32.mrf.mxu1 }
 0x5bd   :  { %v4949_v44 = vadd.f32 %v4948_v18, %v4796_v56  ;;  %v4725_v42 = vadd.f32 %v4724_v11, %v12951_v28  ;;  %v4857_v59 = vmul.f32 %v12952_v3, %v12952_v3  ;;  %v11006_v26 = vadd.f32 %v10713_v9, %v6418_v14  ;;  %6507 = vmatprep.subr.bf16.mxu1 %v7091_v33  ;;  %v12953_v14 = vld [vmem:[#allocation29_spill] sm:$0xff]  ;;  %v7094_v33 = vld [vmem:[#allocation10 + $0x60] sm:$0xff]   ;;  %v7104_v28 = vld [vmem:[#allocation10 + $0x98] sm:$0xff]  }
 0x5be   :  { %v10977_v38 = vpop.f32.mrf.mxu0  ;;  %v6424_v19 = vadd.f32 %v10811_v12, %v10803_v6  ;;  %v4743_v49 = vadd.f32 %v4742_v47, %v10960_v1  ;;  %v4805_v56 = vmul.f32 %v10988_v20, %v10988_v20  ;;  %6787 = vmatprep.subr.bf16.mxu0 %v7098_v58  ;;  %v4932_v11 = vadd.f32 %v4931_v53, %v4855_v36  ;;  %v7101_v53 = vld [vmem:[#allocation10 + $0xa0] sm:$0xff]  }
 0x5bf   :  { %v4950_v55 = vadd.f32 %v4949_v44, %v4799_v8  ;;  %v11018_v9 = vadd.f32 %v6421_v27, %v10779_v2  ;;  %v6427_v6 = vadd.f32 %v10835_v24, %v10825_v10  ;;  %6508 = vmatpush3.bf16.msra.mxu1 %v7092_v43  ;;  %v4689_v12 = vadd.f32 %v4688_v17, %v12952_v3  ;;  %v7095_v17 = vld [vmem:[#allocation10 + $0x20] sm:$0xff]   ;;  %v12954_v27 = vld [vmem:[#allocation26_spill] sm:$0xff] }
 0x5c0   :  { %v10990_v32 = vpop.f32.mrf.mxu0  ;;  %6788 = vmatpush3.bf16.msra.mxu0 %v7098_v58  ;;  %v4858_v18 = vmul.f32 %v12953_v14, %v12953_v14  ;;  %v4744_v8 = vadd.f32 %v4743_v49, %v10975_v15  ;;  %v4896_v36 = vadd.f32 %v4895_v35, %v4857_v59  ;;  %v4808_v2 = vmul.f32 %v11006_v26, %v11006_v26  ;;  %v11038_v49 = vpop.f32.mrf.mxu1 }
 0x5c1   :  { %v4951_v47 = vadd.f32 %v4950_v55, %v4802_v60  ;;  %v11031_v10 = vadd.f32 %v6424_v19, %v10823_v29  ;;  %v6430_v24 = vadd.f32 %v10864_v22, %v10851_v45  ;;  %v4860_v58 = vmul.f32 %v12954_v27, %v12954_v27  ;;  %6509 = vmatprep.subr.bf16.mxu1 %v7094_v33  ;;  %v12955_v19 = vld [vmem:[#allocation27_spill] sm:$0xff] }
 0x5c2   :  { %v11000_v63 = vpop.f32.mrf.mxu0  ;;  %v4745_v60 = vadd.f32 %v4744_v8, %v10988_v20  ;;  %6789 = vmatprep.subr.bf16.mxu0 %v7101_v53  ;;  %v4811_v29 = vmul.f32 %v11018_v9, %v11018_v9  ;;  %v11045_v59 = vadd.f32 %v10757_v41, %v6427_v6  ;;  %v6433_v22 = vadd.f32 %v10893_v48, %v10880_v50  ;;  %v7096_v33 = vld [vmem:[#allocation10 + $0x58] sm:$0xff]  }
 0x5c3   :  { %v4952_v43 = vadd.f32 %v4951_v47, %v4805_v56  ;;  %6510 = vmatpush3.bf16.msra.mxu1 %v7095_v17  ;;  %v4726_v45 = vadd.f32 %v4725_v42, %v12953_v14  ;;  %v4933_v35 = vadd.f32 %v4932_v11, %v4858_v18  ;;  %v4861_v56 = vmul.f32 %v12955_v19, %v12955_v19  ;;  %v7097_v42 = vld [vmem:[#allocation10 + $0x18] sm:$0xff]   ;;  %v11063_v18 = vpop.f32.mrf.mxu1 }
 0x5c4   :  { %v11015_v51 = vpop.f32.mrf.mxu0  ;;  %6790 = vmatpush3.bf16.msra.mxu0 %v7101_v53  ;;  %v4746_v8 = vadd.f32 %v4745_v60, %v11006_v26  ;;  %v4690_v41 = vadd.f32 %v4689_v12, %v12954_v27  ;;  %v4814_v50 = vmul.f32 %v11031_v10, %v11031_v10  ;;  %v11059_v48 = vadd.f32 %v10801_v31, %v6430_v24 }
 0x5c5   :  { %v4953_v6 = vadd.f32 %v4952_v43, %v4808_v2  ;;  %v11061_v11 = vadd.f32 %v4896_v36, %v4860_v58  ;;  %v6436_v17 = vadd.f32 %v10924_v7, %v10910_v46  ;;  %6511 = vmatprep.subr.bf16.mxu1 %v7096_v33  ;;  %6791 = vmatprep.subr.bf16.mxu0 %v7104_v28  ;;  %v12956_v58 = vld [vmem:[#allocation33_spill] sm:$0xff]  ;;  %v12957_v33 = vld [vmem:[#allocation20_spill] sm:$0xff] }
 0x5c6   :  { %v11026_v44 = vpop.f32.mrf.mxu0  ;;  %v4747_v53 = vadd.f32 %v4746_v8, %v11018_v9  ;;  %v4817_v2 = vmul.f32 %v11045_v59, %v11045_v59  ;;  %v11073_v31 = vadd.f32 %v6433_v22, %v10878_v54  ;;  %v4727_v36 = vadd.f32 %v4726_v45, %v12955_v19  ;;  %v7099_v8 = vld [vmem:[#allocation10 + $0x50] sm:$0xff]  }
 0x5c7   :  { %v4954_v12 = vadd.f32 %v4953_v6, %v4811_v29  ;;  %6512 = vmatpush3.bf16.msra.mxu1 %v7097_v42  ;;  %v4934_v24 = vadd.f32 %v4933_v35, %v4861_v56  ;;  %v4864_v43 = vmul.f32 %v12956_v58, %v12956_v58  ;;  %v6439_v46 = vadd.f32 %v10952_v39, %v10939_v13  ;;  %v7105_v29 = vld [vmem:[#allocation10 + $0x90] sm:$0xff]   ;;  %v11085_v35 = vpop.f32.mrf.mxu1 }
 0x5c8   :  { %v11040_v55 = vpop.f32.mrf.mxu0  ;;  %6792 = vmatpush3.bf16.msra.mxu0 %v7104_v28  ;;  %v4691_v6 = vadd.f32 %v4690_v41, %v12957_v33  ;;  %v4748_v14 = vadd.f32 %v4747_v53, %v11031_v10  ;;  %v4820_v28 = vmul.f32 %v11059_v48, %v11059_v48  ;;  %v7100_v22 = vld [vmem:[#allocation10 + $0x10] sm:$0xff]   ;;  %v4728_v45 = vadd.f32 %v4727_v36, %v12956_v58  ;;  %v7103_v36 = vld [vmem:[#allocation10 + $0x8] sm:$0xff]  }
 0x5c9   :  { %v4955_v54 = vadd.f32 %v4954_v12, %v4814_v50  ;;  %v11088_v56 = vadd.f32 %v6436_v17, %v10937_v40  ;;  %v6442_v13 = vadd.f32 %v10977_v38, %v10966_v61  ;;  %6513 = vmatprep.subr.bf16.mxu1 %v7099_v8  ;;  %6793 = vmatprep.subr.bf16.mxu0 %v7105_v29  ;;  %v7102_v17 = vld [vmem:[#allocation10 + $0x48] sm:$0xff]  }
 0x5ca   :  { %v11053_v47 = vpop.f32.mrf.mxu0  ;;  %v4749_v41 = vadd.f32 %v4748_v14, %v11045_v59  ;;  %v4823_v42 = vmul.f32 %v11073_v31, %v11073_v31  ;;  %v4863_v53 = vmul.f32 %v12957_v33, %v12957_v33  ;;  %v4935_v12 = vadd.f32 %v4934_v24, %v4864_v43  ;;  %v7106_v14 = vld [vmem:[#allocation10 + $0x40] sm:$0xff]   ;;  %v7108_v58 = vld [vmem:[#allocation10 + $0x88] sm:$0xff]   ;;  %v12959_v43 = vld [vmem:[#allocation22_spill] sm:$0xff] }
 0x5cb   :  { %v4956_v50 = vadd.f32 %v4955_v54, %v4817_v2  ;;  %6514 = vmatpush3.bf16.msra.mxu1 %v7100_v22  ;;  %v11098_v40 = vadd.f32 %v10849_v25, %v6439_v46  ;;  %v6445_v61 = vadd.f32 %v11000_v63, %v10990_v32  ;;  %v12958_v2 = vld [vmem:[#allocation69_spill] sm:$0xff]  ;;  %v7109_v24 = vld [vmem:[#allocation10 + $0x80] sm:$0xff]   ;;  %v4692_v25 = vadd.f32 %v4691_v6, %v12959_v43  ;;  %v11107_v46 = vpop.f32.mrf.mxu1 }
 0x5cc   :  { %v11068_v60 = vpop.f32.mrf.mxu0  ;;  %6794 = vmatpush3.bf16.msra.mxu0 %v7105_v29  ;;  %v4729_v8 = vadd.f32 %v4728_v45, %v12958_v2  ;;  %v4867_v54 = vmul.f32 %v12958_v2, %v12958_v2  ;;  %v4750_v29 = vadd.f32 %v4749_v41, %v11059_v48  ;;  %v4826_v32 = vmul.f32 %v11088_v56, %v11088_v56  ;;  %v7107_v6 = vld [vmem:[#allocation10] sm:$0xff]  }
 0x5cd   :  { %v4957_v22 = vadd.f32 %v4956_v50, %v4820_v28  ;;  %v11112_v63 = vadd.f32 %v10908_v52, %v6442_v13  ;;  %v6448_v45 = vadd.f32 %v11026_v44, %v11015_v51  ;;  %6515 = vmatprep.subr.bf16.mxu1 %v7102_v17  ;;  %v4866_v28 = vmul.f32 %v12959_v43, %v12959_v43 }
 0x5ce   :  { %v6453_v7 = vpop.f32.mrf.mxu0  ;;  %v4751_v41 = vadd.f32 %v4750_v29, %v11073_v31  ;;  %6795 = vmatprep.subr.bf16.mxu0 %v7108_v58  ;;  %v4829_v2 = vmul.f32 %v11098_v40, %v11098_v40  ;;  %v11122_v52 = vadd.f32 %v6445_v61, %v10985_v23  ;;  %v6451_v51 = vadd.f32 %v11053_v47, %v11040_v55 }
 0x5cf   :  { %v4958_v50 = vadd.f32 %v4957_v22, %v4823_v42  ;;  %6516 = vmatpush3.bf16.msra.mxu1 %v7103_v36  ;;  %v4898_v13 = vadd.f32 %v11061_v11, %v4863_v53  ;;  %v4730_v17 = vrot.slane %v4729_v8, 4  ;;  %v4936_v29 = vadd.f32 %v4935_v12, %v4867_v54  ;;  %v4634_v36 = vpop.f32.mrf.mxu1 }
 0x5d0   :  { %v6455_v39 = vpop.f32.mrf.mxu0  ;;  %6517 = vmatprep.subr.bf16.mxu1 %v7106_v14  ;;  %6796 = vmatpush3.bf16.msra.mxu0 %v7108_v58  ;;  %v4752_v42 = vadd.f32 %v4751_v41, %v11088_v56  ;;  %v4832_v43 = vmul.f32 %v11112_v63, %v11112_v63  ;;  %v11131_v23 = vadd.f32 %v6448_v45, %v11038_v49  ;;  %v4693_v61 = vrot.slane %v4692_v25, 4 }
 0x5d1   :  { %6797 = vmatprep.subr.bf16.mxu0 %v7109_v24  ;;  %v4959_v22 = vadd.f32 %v4958_v50, %v4826_v32  ;;  %v6454_v55 = vadd.f32 %v6453_v7, %v11068_v60  ;;  %v4899_v58 = vadd.f32 %v4898_v13, %v4866_v28  ;;  %v4835_v12 = vmul.f32 %v11122_v52, %v11122_v52  ;;  %v11141_v7 = vpop.f32.mrf.mxu1 }
 0x5d2   :  { %v6456_v38 = vpop.f32.mrf.mxu0  ;;  %v4753_v11 = vadd.f32 %v4752_v42, %v11098_v40  ;;  %v11138_v14 = vadd.f32 %v10962_v0, %v6451_v51  ;;  %v4731_v49 = vadd.f32 %v4730_v17, %v4729_v8  ;;  %v4937_v60 = vrot.slane %v4936_v29, 4 }
 0x5d3   :  { %6518 = vmatpush3.bf16.msra.mxu1 %v7107_v6  ;;  %v4960_v53 = vadd.f32 %v4959_v22, %v4829_v2  ;;  %v6457_v54 = vadd.f32 %v6456_v38, %v6455_v39  ;;  %v4838_v41 = vmul.f32 %v11131_v23, %v11131_v23  ;;  %v11146_v2 = vadd.f32 %v11013_v30, %v6454_v55  ;;  %v4647_v22 = vpop.f32.mrf.mxu1 }
 0x5d4   :  { %v6458_v19 = vpop.f32.mrf.mxu0  ;;  %6798 = vmatpush3.bf16.msra.mxu0 %v7109_v24  ;;  %v4754_v45 = vadd.f32 %v4753_v11, %v11112_v63  ;;  %v4694_v6 = vadd.f32 %v4693_v61, %v4692_v25  ;;  %v4900_v38 = vrot.slane %v4899_v58, 4  ;;  %v4841_v8 = vmul.f32 %v11138_v14, %v11138_v14 }
 0x5d5   :  { %v4961_v28 = vadd.f32 %v4960_v53, %v4832_v43  ;;  %v11152_v51 = vadd.f32 %v6457_v54, %v11085_v35  ;;  %v4732_v42 = vrot.slane %v4731_v49, 2  ;;  %v4938_v30 = vadd.f32 %v4937_v60, %v4936_v29 }
 0x5d6   :  { %v6459_v44 = vpop.f32.mrf.mxu0  ;;  %v4755_v0 = vadd.f32 %v4754_v45, %v11122_v52  ;;  %v4844_v25 = vmul.f32 %v11146_v2, %v11146_v2  ;;  %v4695_v53 = vrot.slane %v4694_v6, 2  ;;  %v4901_v35 = vadd.f32 %v4900_v38, %v4899_v58 }
 0x5d7   :  { %v6460_v39 = vadd.f32 %v6459_v44, %v6458_v19  ;;  %v4962_v24 = vadd.f32 %v4961_v28, %v4835_v12  ;;  %v4847_v54 = vmul.f32 %v11152_v51, %v11152_v51  ;;  %v4733_v60 = vadd.f32 %v4732_v42, %v4731_v49 }
 0x5d8   :  { %v6461_v47 = vpop.f32.mrf.mxu0  ;;  %v4756_v13 = vadd.f32 %v4755_v0, %v11131_v23  ;;  %v4939_v28 = vrot.slane %v4938_v30, 2  ;;  %v4696_v38 = vadd.f32 %v4695_v53, %v4694_v6 }
 0x5d9   :  { %v4963_v55 = vadd.f32 %v4962_v24, %v4838_v41  ;;  %v11158_v61 = vadd.f32 %v6460_v39, %v4634_v36  ;;  %v6782_v41 = vpop.f32.mrf.mxu1  ;;  %v4902_v24 = vrot.slane %v4901_v35, 2  ;;  %v4734_v42 = vrot.slane %v4733_v60, 1 }
 0x5da   :  { %v6462_v32 = vpop.f32.mrf.mxu0  ;;  %v4757_v44 = vadd.f32 %v4756_v13, %v11138_v14  ;;  %v4697_v53 = vrot.slane %v4696_v38, 1 }
 0x5db   :  { %v6463_v17 = vadd.f32 %v6462_v32, %v6461_v47  ;;  %v4964_v12 = vadd.f32 %v4963_v55, %v4841_v8  ;;  %v4850_v58 = vmul.f32 %v11158_v61, %v11158_v61  ;;  %v4940_v55 = vadd.f32 %v4939_v28, %v4938_v30 }
 0x5dc   :  { %v6464_v50 = vpop.f32.mrf.mxu0  ;;  %v4758_v29 = vadd.f32 %v4757_v44, %v11146_v2 }
 0x5dd   :  { %v11164_v32 = vadd.f32 %v11063_v18, %v6463_v17  ;;  %v4965_v0 = vadd.f32 %v4964_v12, %v4844_v25  ;;  %v4650_v25 = vpop.f32.mrf.mxu1  ;;  %v4903_v12 = vadd.f32 %v4902_v24, %v4901_v35  ;;  %v4941_v28 = vrot.slane %v4940_v55, 1 }
 0x5de   :  { %v6465_v43 = vpop.f32.mrf.mxu0  ;;  %v4698_v35 = vadd.f32 %v4697_v53, %v4696_v38 }
 0x5df   :  { %v6466_v11 = vadd.f32 %v6465_v43, %v6464_v50  ;;  %12960 = vst [vmem:[#allocation43_spill] sm:$0xff] %v11164_v32  ;;  %v4759_v50 = vadd.f32 %v4758_v29, %v11152_v51  ;;  %v4966_v8 = vadd.f32 %v4965_v0, %v4847_v54  ;;  %v4853_v49 = vmul.f32 %v11164_v32, %v11164_v32 }
 0x5e0   :  { %v6467_v19 = vpop.f32.mrf.mxu0  ;;  %v4904_v24 = vrot.slane %v4903_v12, 1 }
 0x5e1   :  { %v11170_v39 = vadd.f32 %v11107_v46, %v6466_v11  ;;  %v4760_v18 = vadd.f32 %v4759_v50, %v11158_v61  ;;  %v4967_v44 = vadd.f32 %v4966_v8, %v4850_v58 }
 0x5e2   :  { %v6468_v47 = vpop.f32.mrf.mxu0 }
 0x5e3   :  { %v6469_v45 = vadd.f32 %v6468_v47, %v6467_v19  ;;  %12961 = vst [vmem:[#allocation44_spill] sm:$0xff] %v11170_v39  ;;  %v4761_v46 = vadd.f32 %v4760_v18, %v11164_v32  ;;  %v4856_v6 = vmul.f32 %v11170_v39, %v11170_v39  ;;  %v4968_v47 = vadd.f32 %v4967_v44, %v4853_v49 }
 0x5e4   :  { %v6470_v36 = vpop.f32.mrf.mxu0 }
 0x5e5   :  { %v11175_v13 = vadd.f32 %v6469_v45, %v4647_v22  ;;  %v4762_v22 = vadd.f32 %v4761_v46, %v11170_v39  ;;  %v4735_v45 = vadd.f32 %v4734_v42, %v4733_v60  ;;  %v4942_v42 = vadd.f32 %v4941_v28, %v4940_v55 }
 0x5e6   :  { %v6471_v43 = vpop.f32.mrf.mxu0 }
 0x5e7   :  { %12962 = vst [vmem:[#allocation80_spill] sm:$0xff] %v11175_v13  ;;  %v6472_v17 = vadd.f32 %v6471_v43, %v6470_v36  ;;  %v4859_v29 = vmul.f32 %v11175_v13, %v11175_v13  ;;  %v4969_v36 = vadd.f32 %v4968_v47, %v4856_v6  ;;  %v4763_v50 = vadd.f32 %v4762_v22, %v11175_v13 }
 0x5e8   :  { %v6473_v19 = vpop.f32.mrf.mxu0  ;;  %v4905_v6 = vadd.f32 %v4904_v24, %v4903_v12  ;;  %v4984_v53 = vmul.f32 0.00390625, %v4942_v42 }
 0x5e9   :  { %v11180_v11 = vadd.f32 %v6472_v17, %v4650_v25  ;;  %v4970_v18 = vadd.f32 %v4969_v36, %v4859_v29  ;;  %v4981_v25 = vmul.f32 0.00390625, %v4735_v45 }
 0x5ea   :  { %v6474_v54 = vpop.f32.mrf.mxu0  ;;  %v4983_v36 = vmul.f32 0.00390625, %v4905_v6 }
 0x5eb   :  { %12963 = vst [vmem:[#allocation87_spill] sm:$0xff] %v11180_v11  ;;  %v6475_v30 = vadd.f32 %v6474_v54, %v6473_v19  ;;  %v4862_v58 = vmul.f32 %v11180_v11, %v11180_v11  ;;  %v4764_v49 = vadd.f32 %v4763_v50, %v11180_v11  ;;  %v4980_v54 = vmul.f32 0.00390625, %v4698_v35 }
 0x5ec   :  { %v6476_v0 = vpop.f32.mrf.mxu0  ;;  %v4987_v22 = vmul.f32 %v4981_v25, %v4981_v25 }
 0x5ed   :  { %v11189_v8 = vadd.f32 %v11141_v7, %v6475_v30  ;;  %v4971_v19 = vadd.f32 %v4970_v18, %v4862_v58  ;;  %v4986_v50 = vmul.f32 %v4980_v54, %v4980_v54 }
 0x5ee   :  { %v6477_v43 = vpop.f32.mrf.mxu0 }
 0x5ef   :  { %v4865_v60 = vmul.f32 %v11189_v8, %v11189_v8  ;;  %v6478_v17 = vadd.f32 %v6477_v43, %v6476_v0  ;;  %v4765_v44 = vadd.f32 %v4764_v49, %v11189_v8  ;;  %v4990_v0 = vsub.f32 %v4984_v53, %v4987_v22 }
 0x5f0   :  { %v4989_v28 = vsub.f32 %v4983_v36, %v4986_v50 }
 0x5f1   :  { %v4659_v46 = vadd.f32 %v6782_v41, %v6478_v17  ;;  %v4972_v7 = vadd.f32 %v4971_v19, %v4865_v60  ;;  %v4993_v41 = vmax.f32 %v4990_v0, 0.0  ;;  %v4996_v0 = vld [vmem:[#allocation11 + $0x2] ss:$8 sm:$0x7] }
 0x5f2   :  { %v4992_v24 = vmax.f32 %v4989_v28, 0.0  ;;  %v12965_v28 = vld [vmem:[#allocation83_spill] sm:$0xff] }
 0x5f3   :  { %v4766_v47 = vadd.f32 %v4765_v44, %v4659_v46  ;;  %v4868_v38 = vmul.f32 %v4659_v46, %v4659_v46  ;;  %v5000_v60 = vadd.f32 1e-05, %v4993_v41 }
 0x5f4   :  { %v4999_v19 = vadd.f32 1e-05, %v4992_v24 }
 0x5f5   :  { %v4767_v29 = vrot.slane %v4766_v47, 4  ;;  %v4973_v30 = vadd.f32 %v4972_v7, %v4868_v38  ;;  %7122 = vrsqrt.f32 %v5000_v60 }
 0x5f6   :  { %7124 = vrsqrt.f32 %v4999_v19 }
 0x5f7   :  { %v4768_v11 = vadd.f32 %v4767_v29, %v4766_v47  ;;  %v4974_v13 = vrot.slane %v4973_v30, 4  ;;  %v12964_v29 = vld [vmem:[#allocation82_spill] sm:$0xff] }
 0x5f9   :  { %v4769_v55 = vrot.slane %v4768_v11, 2  ;;  %v4975_v45 = vadd.f32 %v4974_v13, %v4973_v30 }
 0x5fb   :  { %v4770_v58 = vadd.f32 %v4769_v55, %v4768_v11  ;;  %v4976_v43 = vrot.slane %v4975_v45, 2 }
 0x5fd   :  { %v4771_v12 = vrot.slane %v4770_v58, 1  ;;  %v4977_v35 = vadd.f32 %v4976_v43, %v4975_v45  ;;  %v12967_v43 = vld [vmem:[#allocation84_spill] sm:$0xff] }
 0x5ff   :  { %v4772_v18 = vadd.f32 %v4771_v12, %v4770_v58  ;;  %v4978_v49 = vrot.slane %v4977_v35, 1  ;;  %v12969_v12 = vld [vmem:[#allocation85_spill] sm:$0xff] }
 0x601   :  { %v4979_v17 = vadd.f32 %v4978_v49, %v4977_v35  ;;  %v4982_v42 = vmul.f32 0.00390625, %v4772_v18 }
 0x602   :  { %v7123_v11 = vpop.eup %7122 }
 0x603   :  { %v4985_v44 = vmul.f32 0.00390625, %v4979_v17  ;;  %v4988_v6 = vmul.f32 %v4982_v42, %v4982_v42  ;;  %v7125_v38 = vpop.eup %7124 }
 0x604   :  { %v5008_v53 = vcombine.low %v7125_v38, %v7123_v11 }
 0x605   :  { %v4991_v7 = vsub.f32 %v4985_v44, %v4988_v6 }
 0x606   :  { %v5015_v30 = vrot.slane %v5008_v53, %v12964_v29  ;;  %v12973_v53 = vld [vmem:[#allocation37_spill] sm:$0xff] }
 0x607   :  { %v4994_v47 = vmax.f32 %v4991_v7, 0.0 }
 0x609   :  { %v5001_v13 = vadd.f32 1e-05, %v4994_v47  ;;  %v4998_v47 = vld [vmem:[#allocation11 + $0x5] ss:$8 sm:$0x7] }
 0x60b   :  { %7126 = vrsqrt.f32 %v5001_v13  ;;  %v12970_v13 = vld [vmem:[#allocation42_spill] sm:$0xff] }
 0x618   :  { %v7127_v22 = vpop.eup %7126 }
 0x619   :  { %v5022_v36 = vrot.slane %v7127_v22, %v12964_v29 }
 0x61b   :  { %v5023_v50 = vcombine.low %v5015_v30, %v5022_v36  ;;  %v12974_v30 = vld [vmem:[#allocation48_spill] sm:$0xff] }
 0x61d   :  { %v5030_v55 = vrot.slane %v5023_v50, %v12964_v29  ;;  %v12975_v50 = vld [vmem:[#allocation49_spill] sm:$0xff] }
 0x61f   :  { %v5032_v45 = vmul.f32 %v5030_v55, %v4996_v0 }
 0x621   :  { %v11199_v58 = vrot.slane %v5032_v45, %v12965_v28  ;;  %v11202_v41 = vrot.slane %v5032_v45, %v12967_v43  ;;  %v11205_v35 = vrot.slane %v5032_v45, %v12969_v12  ;;  %v12976_v45 = vld [vmem:[#allocation51_spill] sm:$0xff] }
 0x623   :  { %12966 = vst [vmem:[#allocation86_spill] sm:$0xff] %v11199_v58  ;;  %12968 = vst [vmem:[#allocation54_spill] sm:$0xff] %v11202_v41  ;;  %v5049_v24 = vmul.f32 %v11199_v58, %v4980_v54  ;;  %v5050_v18 = vmul.f32 %v11202_v41, %v4981_v25  ;;  %v5175_v49 = vmul.f32 %v11205_v35, %v4659_v46  ;;  %v12971_v54 = vld [vmem:[#allocation104_spill] sm:$0xff] }
 0x624   :  { %v5051_v17 = vmul.f32 %v11205_v35, %v4982_v42  ;;  %v11216_v11 = vmul.f32 %v11199_v58, %v12970_v13  ;;  %v11220_v25 = vmul.f32 %v11202_v41, %v12971_v54  ;;  %v11224_v46 = vmul.f32 %v11205_v35, %v10868_v57  ;;  %v12972_v42 = vld [vmem:[#allocation45_spill] sm:$0xff] }
 0x625   :  { %v5055_v60 = vcombine.low %v5049_v24, %v5050_v18  ;;  %v11228_v38 = vmul.f32 %v11199_v58, %v12972_v42  ;;  %v11232_v22 = vmul.f32 %v11202_v41, %v12973_v53  ;;  %v11240_v36 = vmul.f32 %v11199_v58, %v12974_v30  ;;  %v12977_v18 = vld [vmem:[#allocation96_spill] sm:$0xff]  ;;  %v12983_v54 = vld [vmem:[#allocation65_spill] sm:$0xff]  ;;  %v12985_v53 = vld [vmem:[#allocation55_spill] sm:$0xff] }
 0x626   :  { %v5069_v44 = vrot.slane %v5051_v17, %v12964_v29  ;;  %v11244_v57 = vmul.f32 %v11202_v41, %v12975_v50  ;;  %v11248_v0 = vmul.f32 %v11205_v35, %v10871_v16  ;;  %v11252_v24 = vmul.f32 %v11199_v58, %v12976_v45  ;;  %v12978_v17 = vld [vmem:[#allocation63_spill] sm:$0xff] }
 0x627   :  { %v5062_v19 = vrot.slane %v5055_v60, %v12964_v29  ;;  %v11260_v60 = vmul.f32 %v11205_v35, %v10886_v37  ;;  %v11280_v37 = vmul.f32 %v11202_v41, %v12983_v54  ;;  %v11284_v42 = vmul.f32 %v11205_v35, %v10920_v62  ;;  %v12986_v50 = vld [vmem:[#allocation59_spill] sm:$0xff] }
 0x628   :  { %v11288_v30 = vmul.f32 %v11199_v58, %v12985_v53  ;;  %v11292_v45 = vmul.f32 %v11202_v41, %v12986_v50  ;;  %v12991_v53 = vld [vmem:[#allocation75_spill] sm:$0xff] }
 0x629   :  { %v5070_v6 = vcombine.low %v5062_v19, %v5069_v44  ;;  %v11264_v19 = vmul.f32 %v11199_v58, %v12978_v17  ;;  %v12979_v44 = vld [vmem:[#allocation67_spill] sm:$0xff]  ;;  %12984 = vst [vmem:[#allocation66_spill] sm:$0xff] %v11280_v37  ;;  %v12988_v17 = vld [vmem:[#allocation61_spill] sm:$0xff]  ;;  %v11315_v50 = vmul.f32 %v11199_v58, %v12991_v53  ;;  %v11335_v53 = vmul.f32 %v11205_v35, %v10975_v15 }
 0x62a   :  { %v11268_v16 = vmul.f32 %v11202_v41, %v12979_v44  ;;  %12987 = vst [vmem:[#allocation60_spill] sm:$0xff] %v11292_v45  ;;  %v11300_v44 = vmul.f32 %v11199_v58, %v12988_v17  ;;  %v11323_v17 = vmul.f32 %v11205_v35, %v10960_v1  ;;  %v13002_v45 = vld [vmem:[#allocation71_spill] sm:$0xff]  ;;  %v13035_v37 = vld [vmem:[#allocation21_spill] sm:$0xff] }
 0x62b   :  { %v5077_v7 = vrot.slane %v5070_v6, %v12964_v29  ;;  %v11236_v29 = vmul.f32 %v11205_v35, %v10856_v21  ;;  %v11256_v21 = vmul.f32 %v11202_v41, %v12977_v18  ;;  %v12981_v6 = vld [vmem:[#allocation35_spill] sm:$0xff]  ;;  %v11296_v18 = vmul.f32 %v11205_v35, %v10933_v5  ;;  %v12992_v5 = vld [vmem:[#allocation70_spill] sm:$0xff]  ;;  %12998 = vst [vmem:[#allocation88_spill] sm:$0xff] %v11335_v53 }
 0x62c   :  { %12980 = vst [vmem:[#allocation57_spill] sm:$0xff] %v11268_v16  ;;  %v11319_v39 = vmul.f32 %v11202_v41, %v12992_v5  ;;  %12994 = vst [vmem:[#allocation31_spill] sm:$0xff] %v11323_v17  ;;  %v13036_v16 = vld [vmem:[#allocation23_spill] sm:$0xff] }
 0x62d   :  { %v5079_v55 = vsub.f32 %v4998_v47, %v5077_v7  ;;  %v11272_v7 = vmul.f32 %v11205_v35, %v12981_v6  ;;  %v12982_v47 = vld [vmem:[#allocation76_spill] sm:$0xff]  ;;  %v12989_v6 = vld [vmem:[#allocation53_spill] sm:$0xff] }
 0x62e   :  { %v11276_v13 = vmul.f32 %v11199_v58, %v12982_v47  ;;  %v11304_v62 = vmul.f32 %v11202_v41, %v12989_v6  ;;  %v11308_v47 = vmul.f32 %v11205_v35, %v10948_v4  ;;  %12993 = vst [vmem:[#allocation24_spill] sm:$0xff] %v11319_v39  ;;  %v12995_v6 = vld [vmem:[#allocation68_spill] sm:$0xff]  ;;  %v12996_v4 = vld [vmem:[#allocation34_spill] sm:$0xff] }
 0x62f   :  { %v11311_v54 = vrot.slane %v5079_v55, %v12969_v12  ;;  %v11327_v32 = vmul.f32 %v11199_v58, %v12995_v6  ;;  %v11331_v12 = vmul.f32 %v11202_v41, %v12996_v4  ;;  %v13000_v39 = vld [vmem:[#allocation36_spill] sm:$0xff]  ;;  %v11347_v6 = vmul.f32 %v11205_v35, %v10988_v20  ;;  %v13006_v20 = vld [vmem:[#allocation47_spill] sm:$0xff] }
 0x630   :  { %12990 = vst [vmem:[#allocation50_spill] sm:$0xff] %v11304_v62  ;;  %v12999_v62 = vld [vmem:[#allocation89_spill] sm:$0xff]  ;;  %v11343_v1 = vmul.f32 %v11202_v41, %v13000_v39  ;;  %v11351_v4 = vmul.f32 %v11199_v58, %v13002_v45  ;;  %v11358_v53 = vrot.slane %v5079_v55, %v12965_v28  ;;  %v11365_v39 = vmul.f32 %v11205_v35, %v11006_v26  ;;  %v13010_v28 = vld [vmem:[#allocation90_spill] sm:$0xff] }
 0x631   :  { %12997 = vst [vmem:[#allocation100_spill] sm:$0xff] %v11331_v12  ;;  %v11339_v5 = vmul.f32 %v11199_v58, %v12999_v62  ;;  %v13003_v12 = vld [vmem:[#allocation28_spill] sm:$0xff]  ;;  %v11361_v62 = vrot.slane %v5079_v55, %v12967_v43  ;;  %v11372_v45 = vadd.f32 %v11311_v54, %v5175_v49  ;;  %v11384_v43 = vmul.f32 %v11205_v35, %v11031_v10  ;;  %v13013_v55 = vld [vmem:[#allocation41_spill] sm:$0xff] }
 0x632   :  { %13001 = vst [vmem:[#allocation38_spill] sm:$0xff] %v11343_v1  ;;  %v11355_v15 = vmul.f32 %v11202_v41, %v13003_v12  ;;  %13005 = vst [vmem:[#allocation30_spill] sm:$0xff] %v11358_v53  ;;  %v11369_v1 = vmul.f32 %v11202_v41, %v13006_v20  ;;  %v11376_v12 = vmul.f32 %v11205_v35, %v11018_v9 }
 0x633   :  { %13008 = vst [vmem:[#allocation99_spill] sm:$0xff] %v11372_v45  ;;  %13012 = vst [vmem:[#allocation82_spill] sm:$0xff] %v11384_v43  ;;  %v11388_v26 = vmul.f32 %v11205_v35, %v11045_v59  ;;  %v11392_v49 = vmul.f32 %v11205_v35, %v11059_v48  ;;  %v5128_v9 = vmul.f32 %v11199_v58, %v13013_v55  ;;  %v13017_v59 = vld [vmem:[#allocation93_spill] sm:$0xff]  ;;  %v13018_v45 = vld [vmem:[#allocation95_spill] sm:$0xff] }
 0x634   :  { %13004 = vst [vmem:[#allocation101_spill] sm:$0xff] %v11355_v15  ;;  %13007 = vst [vmem:[#allocation102_spill] sm:$0xff] %v11369_v1  ;;  %v11380_v15 = vmul.f32 %v11202_v41, %v13010_v28  ;;  %v11398_v20 = vmul.f32 %v11205_v35, %v11073_v31  ;;  %v13015_v28 = vld [vmem:[#allocation72_spill] sm:$0xff]  ;;  %v11404_v10 = vmul.f32 %v11205_v35, %v11088_v56  ;;  %v13021_v43 = vld [vmem:[#allocation39_spill] sm:$0xff] }
 0x635   :  { %13009 = vst [vmem:[#allocation26_spill] sm:$0xff] %v11376_v12  ;;  %v5134_v1 = vmul.f32 %v11199_v58, %v13017_v59  ;;  %v11410_v48 = vmul.f32 %v11202_v41, %v13018_v45  ;;  %v11414_v55 = vmul.f32 %v11205_v35, %v11098_v40  ;;  %v13020_v31 = vld [vmem:[#allocation40_spill] sm:$0xff]  ;;  %v11424_v56 = vmul.f32 %v11205_v35, %v11112_v63  ;;  %v13024_v45 = vld [vmem:[#allocation58_spill] sm:$0xff] }
 0x636   :  { %13011 = vst [vmem:[#allocation20_spill] sm:$0xff] %v11380_v15  ;;  %13014 = vst [vmem:[#allocation83_spill] sm:$0xff] %v11398_v20  ;;  %v5131_v15 = vmul.f32 %v11199_v58, %v13015_v28  ;;  %v5137_v20 = vmul.f32 %v11199_v58, %v13020_v31  ;;  %v11420_v28 = vmul.f32 %v11202_v41, %v13021_v43  ;;  %v13023_v59 = vld [vmem:[#allocation56_spill] sm:$0xff]  ;;  %v13027_v31 = vld [vmem:[#allocation73_spill] sm:$0xff] }
 0x637   :  { %13016 = vst [vmem:[#allocation84_spill] sm:$0xff] %v11404_v10  ;;  %13019 = vst [vmem:[#allocation85_spill] sm:$0xff] %v11410_v48  ;;  %v5140_v10 = vmul.f32 %v11199_v58, %v13023_v59  ;;  %v11430_v48 = vmul.f32 %v11202_v41, %v13024_v45  ;;  %v11434_v40 = vmul.f32 %v11205_v35, %v11122_v52  ;;  %v13028_v43 = vld [vmem:[#allocation92_spill] sm:$0xff]  ;;  %v13031_v59 = vld [vmem:[#allocation77_spill] sm:$0xff] }
 0x638   :  { %13022 = vst [vmem:[#allocation42_spill] sm:$0xff] %v11420_v28  ;;  %v5143_v12 = vmul.f32 %v11199_v58, %v13027_v31  ;;  %v11440_v28 = vmul.f32 %v11202_v41, %v13028_v43  ;;  %v11444_v63 = vmul.f32 %v11205_v35, %v11131_v23  ;;  %v5146_v17 = vmul.f32 %v11199_v58, %v13031_v59  ;;  %v13032_v45 = vld [vmem:[#allocation19_spill] sm:$0xff]  ;;  %v13034_v52 = vld [vmem:[#allocation78_spill] sm:$0xff] }
 0x639   :  { %13025 = vst [vmem:[#allocation104_spill] sm:$0xff] %v11430_v48  ;;  %13026 = vst [vmem:[#allocation45_spill] sm:$0xff] %v11434_v40  ;;  %v11450_v48 = vmul.f32 %v11202_v41, %v13032_v45  ;;  %v5149_v40 = vmul.f32 %v11199_v58, %v13034_v52  ;;  %v5152_v31 = vmul.f32 %v11199_v58, %v13035_v37 }
 0x63a   :  { %13029 = vst [vmem:[#allocation37_spill] sm:$0xff] %v11440_v28  ;;  %13030 = vst [vmem:[#allocation48_spill] sm:$0xff] %v11444_v63  ;;  %v5155_v43 = vmul.f32 %v11199_v58, %v13036_v16  ;;  %v5158_v23 = vmul.f32 %v11199_v58, %v12947_v34  ;;  %v13037_v28 = vld [vmem:[#allocation97_spill] sm:$0xff]  ;;  %v11463_v59 = vadd.f32 %v11358_v53, %v5128_v9 }
 0x63b   :  { %13033 = vst [vmem:[#allocation49_spill] sm:$0xff] %v11450_v48  ;;  %v5161_v63 = vmul.f32 %v11199_v58, %v13037_v28  ;;  %v11466_v45 = vadd.f32 %v11358_v53, %v5131_v15  ;;  %v11469_v52 = vadd.f32 %v11358_v53, %v5134_v1  ;;  %v5164_v37 = vmul.f32 %v11199_v58, %v12952_v3  ;;  %v13039_v48 = vld [vmem:[#allocation22_spill] sm:$0xff] }
 0x63c   :  { %v5167_v16 = vmul.f32 %v11199_v58, %v12954_v27  ;;  %v11476_v34 = vadd.f32 %v11358_v53, %v5137_v20  ;;  %v11479_v28 = vadd.f32 %v11358_v53, %v5140_v10  ;;  %v5170_v9 = vmul.f32 %v11199_v58, %v12957_v33 }
 0x63d   :  { %v11484_v15 = vadd.f32 %v11358_v53, %v5143_v12  ;;  %v11487_v1 = vadd.f32 %v11358_v53, %v5146_v17  ;;  %v11490_v3 = vadd.f32 %v11358_v53, %v5149_v40  ;;  %v5173_v27 = vmul.f32 %v11199_v58, %v13039_v48  ;;  %v13040_v17 = vld [vmem:[#allocation46_spill] sm:$0xff] }
 0x63e   :  { %v11495_v20 = vadd.f32 %v11358_v53, %v5152_v31  ;;  %v11498_v10 = vadd.f32 %v11358_v53, %v5155_v43  ;;  %v11501_v33 = vadd.f32 %v11358_v53, %v5158_v23  ;;  %v11505_v12 = vmul.f32 %v11205_v35, %v11138_v14 }
 0x63f   :  { %13038 = vst [vmem:[#allocation51_spill] sm:$0xff] %v11490_v3  ;;  %v11509_v40 = vmul.f32 %v11202_v41, %v13040_v17  ;;  %v11512_v3 = vadd.f32 %v11358_v53, %v5161_v63  ;;  %v11515_v48 = vadd.f32 %v11358_v53, %v5164_v37  ;;  %v11519_v31 = vmul.f32 %v11205_v35, %v11146_v2 }
 0x640   :  { %v11522_v43 = vadd.f32 %v11358_v53, %v5167_v16  ;;  %v11525_v14 = vadd.f32 %v11358_v53, %v5170_v9  ;;  %v11528_v23 = vadd.f32 %v11358_v53, %v5173_v27  ;;  %v5192_v63 = vadd.f32 %v11358_v53, %v11216_v11  ;;  %v13042_v16 = vld [vmem:[#allocation98_spill] sm:$0xff]  ;;  %v13045_v27 = vld [vmem:[#allocation25_spill] sm:$0xff] }
 0x641   :  { %13041 = vst [vmem:[#allocation96_spill] sm:$0xff] %v11509_v40  ;;  %v5195_v37 = vadd.f32 %v11358_v53, %v11228_v38  ;;  %v5200_v17 = vadd.f32 %v11311_v54, %v11248_v0  ;;  %v5203_v2 = vadd.f32 %v11311_v54, %v11260_v60  ;;  %v11540_v58 = vmul.f32 %v11202_v41, %v13042_v16  ;;  %v13048_v0 = vld [vmem:[#allocation81_spill] sm:$0xff]  ;;  %v13050_v60 = vld [vmem:[#allocation91_spill] sm:$0xff] }
 0x642   :  { %v11544_v9 = vmul.f32 %v11205_v35, %v11152_v51  ;;  %v11548_v11 = vmul.f32 %v11202_v41, %v13045_v27  ;;  %v11552_v38 = vmul.f32 %v11205_v35, %v11158_v61  ;;  %v11556_v40 = vmul.f32 %v11202_v41, %v13048_v0 }
 0x643   :  { %13043 = vst [vmem:[#allocation63_spill] sm:$0xff] %v11540_v58  ;;  %v11560_v16 = vmul.f32 %v11202_v41, %v13050_v60  ;;  %v13052_v58 = vld [vmem:[#allocation29_spill] sm:$0xff]  ;;  %v5172_v0 = vmul.f32 %v11205_v35, %v11189_v8  ;;  %v11582_v60 = vadd.f32 %v11358_v53, %v11240_v36  ;;  %v11594_v8 = vadd.f32 %v11358_v53, %v11276_v13 }
 0x644   :  { %13044 = vst [vmem:[#allocation67_spill] sm:$0xff] %v11544_v9  ;;  %13046 = vst [vmem:[#allocation35_spill] sm:$0xff] %v11548_v11  ;;  %v11564_v51 = vmul.f32 %v11202_v41, %v13052_v58  ;;  %v13054_v9 = vld [vmem:[#allocation27_spill] sm:$0xff]  ;;  %v13056_v11 = vld [vmem:[#allocation33_spill] sm:$0xff]  ;;  %v5288_v58 = vmax.f32 %v5192_v63, 0.0  ;;  %v11598_v36 = vadd.f32 %v11358_v53, %v11288_v30  ;;  %v11602_v63 = vadd.f32 %v11311_v54, %v11296_v18 }
 0x645   :  { %13047 = vst [vmem:[#allocation76_spill] sm:$0xff] %v11552_v38  ;;  %13049 = vst [vmem:[#allocation65_spill] sm:$0xff] %v11556_v40  ;;  %v11568_v27 = vmul.f32 %v11202_v41, %v13054_v9  ;;  %v11572_v61 = vmul.f32 %v11202_v41, %v13056_v11  ;;  %v13057_v38 = vld [vmem:[#allocation69_spill] sm:$0xff]  ;;  %v5299_v9 = vmax.f32 %v5203_v2, 0.0  ;;  %v11590_v11 = vadd.f32 %v11358_v53, %v11264_v19 }
 0x646   :  { %13051 = vst [vmem:[#allocation55_spill] sm:$0xff] %v11560_v16  ;;  %13053 = vst [vmem:[#allocation59_spill] sm:$0xff] %v11564_v51  ;;  %v11578_v40 = vmul.f32 %v11202_v41, %v13057_v38  ;;  %v5291_v51 = vmax.f32 %v5195_v37, 0.0  ;;  %v5296_v16 = vmax.f32 %v5200_v17, 0.0  ;;  %v11610_v19 = vadd.f32 %v11311_v54, %v11308_v47 }
 0x647   :  { %13055 = vst [vmem:[#allocation61_spill] sm:$0xff] %v11568_v27  ;;  %v11586_v27 = vadd.f32 %v11358_v53, %v11252_v24  ;;  %v11606_v24 = vadd.f32 %v11358_v53, %v11300_v44  ;;  %v11614_v13 = vadd.f32 %v11358_v53, %v11315_v50  ;;  %v11618_v30 = vadd.f32 %v11358_v53, %v11327_v32 }
 0x648   :  { %v11622_v18 = vadd.f32 %v11358_v53, %v11339_v5  ;;  %v11626_v44 = vadd.f32 %v11311_v54, %v11347_v6  ;;  %v11630_v47 = vadd.f32 %v11358_v53, %v11351_v4  ;;  %v11634_v50 = vadd.f32 %v11311_v54, %v11365_v39 }
 0x649   :  { %v11638_v32 = vadd.f32 %v11311_v54, %v11388_v26  ;;  %v5384_v37 = vpack.c.bf16 %v5291_v51, %v5288_v58  ;;  %v5389_v17 = vpack.c.bf16 %v5299_v9, %v5296_v16  ;;  %v5193_v5 = vadd.f32 %v11361_v62, %v11220_v25 }
 0x64a   :  { %v5196_v6 = vadd.f32 %v11361_v62, %v11232_v22  ;;  %v5194_v4 = vadd.f32 %v11311_v54, %v11224_v46  ;;  %v5197_v2 = vadd.f32 %v11311_v54, %v11236_v29  ;;  %v5199_v39 = vadd.f32 %v11361_v62, %v11244_v57 }
 0x64b   :  { %v5202_v26 = vadd.f32 %v11361_v62, %v11256_v21  ;;  %v5206_v38 = vadd.f32 %v11311_v54, %v11272_v7  ;;  %v5209_v25 = vadd.f32 %v11311_v54, %v11284_v42  ;;  %v5289_v16 = vmax.f32 %v5193_v5, 0.0 }
 0x64c   :  { %v5292_v22 = vmax.f32 %v5196_v6, 0.0  ;;  %v5290_v51 = vmax.f32 %v5194_v4, 0.0  ;;  %v5293_v58 = vmax.f32 %v5197_v2, 0.0  ;;  %v5295_v46 = vmax.f32 %v5199_v39, 0.0  ;;  %v13058_v4 = vld [vmem:[#allocation57_spill] sm:$0xff]  ;;  %v13059_v39 = vld [vmem:[#allocation66_spill] sm:$0xff] }
 0x64d   :  { %v5298_v9 = vmax.f32 %v5202_v26, 0.0  ;;  %v5302_v53 = vmax.f32 %v5206_v38, 0.0  ;;  %v5305_v29 = vmax.f32 %v5209_v25, 0.0  ;;  %v11658_v57 = vadd.f32 %v11311_v54, %v11392_v49  ;;  %v13060_v26 = vld [vmem:[#allocation31_spill] sm:$0xff]  ;;  %v13061_v38 = vld [vmem:[#allocation88_spill] sm:$0xff] }
 0x64e   :  { %v11662_v21 = vadd.f32 %v11311_v54, %v11414_v55  ;;  %v5385_v7 = vpack.c.bf16 %v5292_v22, %v5289_v16  ;;  %v5386_v41 = vpack.c.bf16 %v5293_v58, %v5290_v51  ;;  %v11666_v42 = vadd.f32 %v11311_v54, %v11424_v56 }
 0x64f   :  { %v5388_v5 = vpack.c.bf16 %v5298_v9, %v5295_v46  ;;  %v5392_v6 = vpack.c.bf16 %v5305_v29, %v5302_v53  ;;  %v5205_v2 = vadd.f32 %v11361_v62, %v13058_v4  ;;  %v5208_v49 = vadd.f32 %v11361_v62, %v13059_v39 }
 0x650   :  { %5657 = vmatprep.mubr.bf16.mxu1 %v5385_v7  ;;  %6799 = vmatprep.mubr.bf16.mxu0 %v5386_v41  ;;  %v5218_v55 = vadd.f32 %v11311_v54, %v13060_v26  ;;  %v5221_v25 = vadd.f32 %v11311_v54, %v13061_v38  ;;  %v11678_v56 = vadd.f32 %v11311_v54, %v11505_v12  ;;  %v5294_v41 = vmax.f32 %v11582_v60, 0.0  ;;  %v13064_v38 = vld [vmem:[#allocation26_spill] sm:$0xff] }
 0x651   :  { %v11682_v53 = vadd.f32 %v11311_v54, %v11519_v31  ;;  %v11685_v16 = vadd.f32 %v11311_v54, %v5172_v0  ;;  %5658 = vmatmul.mubr.bf16.vlgmr.msra.gmra.mxu1 %v5384_v37  ;;  %6800 = vmatmul.mubr.bf16.vlgmr.msra.gmra.mxu0 %v5389_v17  ;;  %v5297_v22 = vmax.f32 %v11586_v27, 0.0  ;;  %v5300_v51 = vmax.f32 %v11590_v11, 0.0  ;;  %v13065_v7 = vld [vmem:[#allocation82_spill] sm:$0xff] }
 0x652   :  { %v5303_v58 = vmax.f32 %v11594_v8, 0.0  ;;  %5665 = vmatprep.mubr.bf16.mxu1 %v5388_v5  ;;  %6803 = vmatprep.mubr.bf16.mxu0 %v5392_v6  ;;  %v5306_v12 = vmax.f32 %v11598_v36, 0.0  ;;  %v5309_v31 = vmax.f32 %v11606_v24, 0.0  ;;  %v5308_v46 = vmax.f32 %v11602_v63, 0.0  ;;  %v13062_v6 = vld [vmem:[#allocation60_spill] sm:$0xff] }
 0x653   :  { %v5311_v0 = vmax.f32 %v11610_v19, 0.0  ;;  %v5301_v37 = vmax.f32 %v5205_v2, 0.0  ;;  %v5304_v17 = vmax.f32 %v5208_v49, 0.0  ;;  %v5314_v9 = vmax.f32 %v5218_v55, 0.0  ;;  %v13063_v19 = vld [vmem:[#allocation50_spill] sm:$0xff] }
 0x654   :  { %v5317_v60 = vmax.f32 %v5221_v25, 0.0  ;;  %v5312_v27 = vmax.f32 %v11614_v13, 0.0  ;;  %v5315_v11 = vmax.f32 %v11618_v30, 0.0  ;;  %v5211_v63 = vadd.f32 %v11361_v62, %v13062_v6  ;;  %v13066_v6 = vld [vmem:[#allocation51_spill] sm:$0xff]  ;;  %v13078_v13 = vld [vmem:[#allocation85_spill] sm:$0xff] }
 0x655   :  { %v5214_v4 = vadd.f32 %v11361_v62, %v13063_v19  ;;  %v5387_v49 = vpack.c.bf16 %v5297_v22, %v5294_v41  ;;  %v5395_v30 = vpack.c.bf16 %v5311_v0, %v5308_v46  ;;  %v5391_v26 = vpack.c.bf16 %v5304_v17, %v5301_v37  ;;  %v13067_v46 = vld [vmem:[#allocation24_spill] sm:$0xff] }
 0x656   :  { %v5398_v55 = vpack.c.bf16 %v5317_v60, %v5314_v9  ;;  %v5230_v25 = vadd.f32 %v11311_v54, %v13064_v38  ;;  %v5233_v5 = vadd.f32 %v11311_v54, %v13065_v7  ;;  %v5320_v19 = vmax.f32 %v11626_v44, 0.0  ;;  %v13068_v37 = vld [vmem:[#allocation100_spill] sm:$0xff]  ;;  %v13069_v7 = vld [vmem:[#allocation83_spill] sm:$0xff] }
 0x657   :  { %v5323_v39 = vmax.f32 %v11634_v50, 0.0  ;;  %v5307_v41 = vmax.f32 %v5211_v63, 0.0  ;;  %v5310_v22 = vmax.f32 %v5214_v4, 0.0  ;;  %v5217_v0 = vadd.f32 %v11361_v62, %v13067_v46  ;;  %v13070_v44 = vld [vmem:[#allocation84_spill] sm:$0xff] }
 0x658   :  { %v5220_v17 = vadd.f32 %v11361_v62, %v13068_v37  ;;  %v5245_v50 = vadd.f32 %v11311_v54, %v13070_v44  ;;  %v5326_v4 = vmax.f32 %v5230_v25, 0.0  ;;  %v5390_v38 = vpack.c.bf16 %v5303_v58, %v5300_v51  ;;  %v13071_v25 = vld [vmem:[#allocation38_spill] sm:$0xff]  ;;  %v13073_v58 = vld [vmem:[#allocation45_spill] sm:$0xff] }
 0x659   :  { %5666 = vmatmul.mubr.bf16.gmra.mxu1 %v5387_v49  ;;  %6804 = vmatmul.mubr.bf16.gmra.mxu0 %v5395_v30  ;;  %v5242_v49 = vadd.f32 %v11311_v54, %v13069_v7  ;;  %v5401_v46 = vpack.c.bf16 %v5323_v39, %v5320_v19  ;;  %v5332_v37 = vmax.f32 %v11638_v32, 0.0  ;;  %v5394_v9 = vpack.c.bf16 %v5310_v22, %v5307_v41 }
 0x65a   :  { %5673 = vmatprep.mubr.bf16.mxu1 %v5391_v26  ;;  %6807 = vmatprep.mubr.bf16.mxu0 %v5398_v55  ;;  %v5329_v26 = vmax.f32 %v5233_v5, 0.0  ;;  %v5335_v60 = vmax.f32 %v11658_v57, 0.0  ;;  %v5313_v8 = vmax.f32 %v5217_v0, 0.0  ;;  %v5316_v7 = vmax.f32 %v5220_v17, 0.0  ;;  %v13072_v55 = vld [vmem:[#allocation101_spill] sm:$0xff] }
 0x65b   :  { %v5338_v29 = vmax.f32 %v5242_v49, 0.0  ;;  %v5341_v2 = vmax.f32 %v5245_v50, 0.0  ;;  %v5344_v44 = vmax.f32 %v11662_v21, 0.0  ;;  %v5347_v30 = vmax.f32 %v11666_v42, 0.0  ;;  %v13074_v21 = vld [vmem:[#allocation48_spill] sm:$0xff] }
 0x65c   :  { %v5404_v63 = vpack.c.bf16 %v5329_v26, %v5326_v4  ;;  %v5223_v5 = vadd.f32 %v11361_v62, %v13071_v25  ;;  %v5226_v51 = vadd.f32 %v11361_v62, %v13072_v55  ;;  %v11738_v32 = vadd.f32 %v11311_v54, %v13073_v58  ;;  %v13075_v4 = vld [vmem:[#allocation99_spill] sm:$0xff] }
 0x65d   :  { %v5375_v57 = vmax.f32 %v11522_v43, 0.0  ;;  %v5378_v39 = vmax.f32 %v11525_v14, 0.0  ;;  %v11744_v42 = vadd.f32 %v11311_v54, %v13074_v21  ;;  %v5380_v19 = vmax.f32 %v11685_v16, 0.0 }
 0x65e   :  { %v5381_v41 = vmax.f32 %v11528_v23, 0.0  ;;  %v5393_v22 = vpack.c.bf16 %v5309_v31, %v5306_v12  ;;  %v5407_v43 = vpack.c.bf16 %v5335_v60, %v5332_v37  ;;  %v5396_v0 = vpack.c.bf16 %v5315_v11, %v5312_v27  ;;  %v13079_v27 = vld [vmem:[#allocation42_spill] sm:$0xff] }
 0x65f   :  { %v5397_v17 = vpack.c.bf16 %v5316_v7, %v5313_v8  ;;  %v5410_v49 = vpack.c.bf16 %v5341_v2, %v5338_v29  ;;  %v5413_v50 = vpack.c.bf16 %v5347_v30, %v5344_v44  ;;  %v5383_v26 = vmax.f32 %v13075_v4, 0.0  ;;  %v13080_v8 = vld [vmem:[#allocation102_spill] sm:$0xff]  ;;  %v13081_v2 = vld [vmem:[#allocation20_spill] sm:$0xff] }
 0x660   :  { %v5319_v55 = vmax.f32 %v5223_v5, 0.0  ;;  %v5322_v16 = vmax.f32 %v5226_v51, 0.0  ;;  %v5350_v23 = vmax.f32 %v11738_v32, 0.0  ;;  %v13077_v36 = vmax.f32 %v11466_v45, 0.0  ;;  %v13082_v45 = vld [vmem:[#allocation67_spill] sm:$0xff]  ;;  %v13085_v44 = vld [vmem:[#allocation104_spill] sm:$0xff] }
 0x661   :  { %5674 = vmatmul.mubr.bf16.gmra.mxu1 %v5390_v38  ;;  %6808 = vmatmul.mubr.bf16.gmra.mxu0 %v5401_v46  ;;  %v5353_v24 = vmax.f32 %v11744_v42, 0.0  ;;  %v11763_v12 = vpack.c.bf16 %v5383_v26, %v5380_v19  ;;  %v5247_v31 = vadd.f32 %v11361_v62, %v13078_v13  ;;  %v5250_v11 = vadd.f32 %v11361_v62, %v13079_v27  ;;  %v13086_v5 = vld [vmem:[#allocation37_spill] sm:$0xff]  ;;  %v13090_v19 = vld [vmem:[#allocation96_spill] sm:$0xff] }
 0x662   :  { %5681 = vmatprep.mubr.bf16.mxu1 %v5394_v9  ;;  %6811 = vmatprep.mubr.bf16.mxu0 %v5404_v63  ;;  %v13076_v9 = vmax.f32 %v11463_v59, 0.0  ;;  %v11771_v29 = vadd.f32 %v11361_v62, %v13080_v8  ;;  %v11775_v59 = vadd.f32 %v11361_v62, %v13081_v2  ;;  %v11779_v60 = vadd.f32 %v11311_v54, %v13082_v45 }
 0x663   :  { %v13083_v30 = vmax.f32 %v11469_v52, 0.0  ;;  %v13084_v38 = vmax.f32 %v11476_v34, 0.0  ;;  %v5343_v37 = vmax.f32 %v5247_v31, 0.0  ;;  %v5346_v7 = vmax.f32 %v5250_v11, 0.0  ;;  %v13089_v52 = vld [vmem:[#allocation49_spill] sm:$0xff]  ;;  %v13093_v31 = vld [vmem:[#allocation63_spill] sm:$0xff] }
 0x664   :  { %v11760_v63 = vpack.c.bf16 %v13077_v36, %v13076_v9  ;;  %v5253_v25 = vadd.f32 %v11361_v62, %v13085_v44  ;;  %v5256_v51 = vadd.f32 %v11361_v62, %v13086_v5  ;;  %v5400_v58 = vpack.c.bf16 %v5322_v16, %v5319_v55  ;;  %v13094_v11 = vld [vmem:[#allocation35_spill] sm:$0xff] }
 0x665   :  { %v11785_v46 = vpack.c.bf16 %v13084_v38, %v13083_v30  ;;  %v13087_v32 = vmax.f32 %v11479_v28, 0.0  ;;  %v13088_v21 = vmax.f32 %v11484_v15, 0.0  ;;  %v5259_v34 = vadd.f32 %v11361_v62, %v13089_v52  ;;  %v13101_v5 = vld [vmem:[#allocation59_spill] sm:$0xff] }
 0x666   :  { %v5262_v4 = vadd.f32 %v11361_v62, %v13090_v19  ;;  %v11801_v26 = vpack.c.bf16 %v5346_v7, %v5343_v37  ;;  %v5349_v9 = vmax.f32 %v5253_v25, 0.0  ;;  %v5352_v36 = vmax.f32 %v5256_v51, 0.0 }
 0x667   :  { %v11795_v42 = vpack.c.bf16 %v13088_v21, %v13087_v32  ;;  %v13091_v55 = vmax.f32 %v11487_v1, 0.0  ;;  %v13092_v28 = vmax.f32 %v13066_v6, 0.0  ;;  %v5355_v15 = vmax.f32 %v5259_v34, 0.0  ;;  %v13097_v6 = vld [vmem:[#allocation65_spill] sm:$0xff] }
 0x668   :  { %v5358_v13 = vmax.f32 %v5262_v4, 0.0  ;;  %v5265_v27 = vadd.f32 %v11361_v62, %v13093_v31  ;;  %v13095_v8 = vmax.f32 %v11495_v20, 0.0  ;;  %v13096_v1 = vmax.f32 %v11498_v10, 0.0  ;;  %v13102_v32 = vld [vmem:[#allocation61_spill] sm:$0xff]  ;;  %v13105_v31 = vld [vmem:[#allocation79_spill] sm:$0xff] }
 0x669   :  { %5682 = vmatmul.mubr.bf16.gmra.mxu1 %v5393_v22  ;;  %6812 = vmatmul.mubr.bf16.gmra.mxu0 %v5407_v43  ;;  %v11807_v16 = vpack.c.bf16 %v13092_v28, %v13091_v55  ;;  %v5268_v22 = vadd.f32 %v11361_v62, %v13094_v11  ;;  %v11813_v43 = vpack.c.bf16 %v5352_v36, %v5349_v9  ;;  %v13099_v7 = vmax.f32 %v11501_v33, 0.0  ;;  %v13107_v11 = vld [vmem:[#allocation52_spill] sm:$0xff] }
 0x66a   :  { %5689 = vmatprep.mubr.bf16.mxu1 %v5397_v17  ;;  %6815 = vmatprep.mubr.bf16.mxu0 %v5410_v49  ;;  %v11819_v2 = vpack.c.bf16 %v13096_v1, %v13095_v8  ;;  %v5271_v17 = vadd.f32 %v11361_v62, %v13097_v6  ;;  %v13098_v49 = vld [vmem:[#allocation55_spill] sm:$0xff]  ;;  %v11825_v30 = vpack.c.bf16 %v5358_v13, %v5355_v15  ;;  %v5361_v38 = vmax.f32 %v5265_v27, 0.0  ;;  %v13104_v15 = vld [vmem:[#allocation76_spill] sm:$0xff]  ;;  %v13106_v27 = vld [vmem:[#allocation86_spill] sm:$0xff] }
 0x66b   :  { %v5274_v45 = vadd.f32 %v11361_v62, %v13098_v49  ;;  %v5364_v37 = vmax.f32 %v5268_v22, 0.0  ;;  %v13100_v44 = vmax.f32 %v11512_v3, 0.0  ;;  %v5277_v51 = vadd.f32 %v11361_v62, %v13101_v5  ;;  %v13108_v8 = vld [vmem:[#allocation43_spill] sm:$0xff]  ;;  %v13109_v6 = vld [vmem:[#allocation44_spill] sm:$0xff]  ;;  %v13111_v49 = vld [vmem:[#allocation54_spill] sm:$0xff] }
 0x66c   :  { %v5367_v20 = vmax.f32 %v5271_v17, 0.0  ;;  %v5280_v21 = vadd.f32 %v11361_v62, %v13102_v32  ;;  %v13103_v34 = vmax.f32 %v11515_v48, 0.0  ;;  %v5283_v33 = vadd.f32 %v11361_v62, %v11572_v61  ;;  %v13110_v17 = vld [vmem:[#allocation64_spill] sm:$0xff] }
 0x66d   :  { %v11831_v25 = vpack.c.bf16 %v13100_v44, %v13099_v7  ;;  %v5370_v10 = vmax.f32 %v5274_v45, 0.0  ;;  %v11837_v52 = vpack.c.bf16 %v5364_v37, %v5361_v38  ;;  %v5286_v3 = vadd.f32 %v11361_v62, %v11578_v40  ;;  %v13112_v38 = vld [vmem:[#allocation32_spill] sm:$0xff]  ;;  %v13114_v37 = vld [vmem:[#allocation87_spill] sm:$0xff]  ;;  %v13115_v7 = vld [vmem:[#allocation30_spill] sm:$0xff] }
 0x66e   :  { %v11841_v19 = vpack.c.bf16 %v5375_v57, %v13103_v34  ;;  %v5373_v9 = vmax.f32 %v5277_v51, 0.0  ;;  %v5376_v36 = vmax.f32 %v5280_v21, 0.0  ;;  %v11851_v55 = vpack.c.bf16 %v5381_v41, %v5378_v39 }
 0x66f   :  { %v11847_v4 = vpack.c.bf16 %v5370_v10, %v5367_v20  ;;  %v5416_v28 = vpack.c.bf16 %v5353_v24, %v5350_v23  ;;  %v5269_v48 = vadd.f32 %v11311_v54, %v13104_v15  ;;  %v5379_v57 = vmax.f32 %v5283_v33, 0.0 }
 0x670   :  { %v5382_v13 = vmax.f32 %v5286_v3, 0.0  ;;  %v5116_v61 = vmul.f32 %v13106_v27, %v13105_v31  ;;  %v11857_v40 = vpack.c.bf16 %v5376_v36, %v5373_v9  ;;  %v5119_v22 = vmul.f32 %v13106_v27, %v13107_v11 }
 0x671   :  { %5690 = vmatmul.mubr.bf16.gmra.mxu1 %v5396_v0  ;;  %6816 = vmatmul.mubr.bf16.gmra.mxu0 %v5413_v50  ;;  %v5318_v14 = vmax.f32 %v11622_v18, 0.0  ;;  %v5321_v39 = vmax.f32 %v11630_v47, 0.0  ;;  %v5356_v23 = vmax.f32 %v11678_v56, 0.0  ;;  %v5359_v24 = vmax.f32 %v11682_v53, 0.0  ;;  %v13113_v53 = vld [vmem:[#allocation80_spill] sm:$0xff] }
 0x672   :  { %5697 = vmatprep.mubr.bf16.mxu1 %v5400_v58  ;;  %6819 = vmatprep.mubr.bf16.mxu0 %v5416_v28  ;;  %v11863_v41 = vpack.c.bf16 %v5382_v13, %v5379_v57  ;;  %v5325_v0 = vmax.f32 %v11771_v29, 0.0  ;;  %v5328_v50 = vmax.f32 %v11775_v59, 0.0  ;;  %v5160_v1 = vmul.f32 %v11205_v35, %v13108_v8 }
 0x673   :  { %v5163_v18 = vmul.f32 %v11205_v35, %v13109_v6  ;;  %v5362_v47 = vmax.f32 %v11779_v60, 0.0  ;;  %v5365_v58 = vmax.f32 %v5269_v48, 0.0  ;;  %v5123_v45 = vmul.f32 %v13111_v49, %v13110_v17 }
 0x674   :  { %v5126_v56 = vmul.f32 %v13111_v49, %v13112_v38  ;;  %v5166_v29 = vmul.f32 %v11205_v35, %v13113_v53  ;;  %v5169_v59 = vmul.f32 %v11205_v35, %v13114_v37  ;;  %v5228_v44 = vadd.f32 %v13115_v7, %v5116_v61  ;;  %v13116_v61 = vld [vmem:[#allocation74_spill] sm:$0xff] }
 0x675   :  { %v5231_v20 = vadd.f32 %v13115_v7, %v5119_v22  ;;  %v5272_v10 = vadd.f32 %v11311_v54, %v5160_v1  ;;  %v5275_v60 = vadd.f32 %v11311_v54, %v5163_v18  ;;  %v5399_v5 = vpack.c.bf16 %v5321_v39, %v5318_v14  ;;  %v13117_v22 = vld [vmem:[#allocation62_spill] sm:$0xff] }
 0x676   :  { %v5419_v51 = vpack.c.bf16 %v5359_v24, %v5356_v23  ;;  %v5403_v32 = vpack.c.bf16 %v5328_v50, %v5325_v0  ;;  %v5235_v21 = vadd.f32 %v11361_v62, %v5123_v45  ;;  %v5422_v34 = vpack.c.bf16 %v5365_v58, %v5362_v47  ;;  %v13118_v39 = vld [vmem:[#allocation94_spill] sm:$0xff]  ;;  %v13119_v23 = vld [vmem:[#allocation103_spill] sm:$0xff] }
 0x677   :  { %v5238_v33 = vadd.f32 %v11361_v62, %v5126_v56  ;;  %v5278_v3 = vadd.f32 %v11311_v54, %v5166_v29  ;;  %v5281_v35 = vadd.f32 %v11311_v54, %v5169_v59  ;;  %v5324_v9 = vmax.f32 %v5228_v44, 0.0 }
 0x678   :  { %v5327_v36 = vmax.f32 %v5231_v20, 0.0  ;;  %v5368_v28 = vmax.f32 %v5272_v10, 0.0  ;;  %v5371_v15 = vmax.f32 %v5275_v60, 0.0  ;;  %v5331_v48 = vmax.f32 %v5235_v21, 0.0 }
 0x679   :  { %5698 = vmatmul.mubr.bf16.gmra.mxu1 %v5399_v5  ;;  %6820 = vmatmul.mubr.bf16.gmra.mxu0 %v5419_v51  ;;  %v5334_v57 = vmax.f32 %v5238_v33, 0.0  ;;  %v5374_v13 = vmax.f32 %v5278_v3, 0.0  ;;  %v5377_v31 = vmax.f32 %v5281_v35, 0.0  ;;  %v5122_v11 = vmul.f32 %v13106_v27, %v13116_v61 }
 0x67a   :  { %5705 = vmatprep.mubr.bf16.mxu1 %v5403_v32  ;;  %6823 = vmatprep.mubr.bf16.mxu0 %v5422_v34  ;;  %v5125_v14 = vmul.f32 %v13106_v27, %v13117_v22  ;;  %v5129_v54 = vmul.f32 %v13111_v49, %v13118_v39  ;;  %v5132_v24 = vmul.f32 %v13111_v49, %v13119_v23 }
 0x67b   :  { %v5234_v0 = vadd.f32 %v13115_v7, %v5122_v11  ;;  %v5402_v8 = vpack.c.bf16 %v5327_v36, %v5324_v9  ;;  %v5425_v1 = vpack.c.bf16 %v5371_v15, %v5368_v28  ;;  %v5406_v6 = vpack.c.bf16 %v5334_v57, %v5331_v48 }
 0x67c   :  { %v5237_v50 = vadd.f32 %v13115_v7, %v5125_v14  ;;  %v5428_v18 = vpack.c.bf16 %v5377_v31, %v5374_v13  ;;  %v5241_v47 = vadd.f32 %v11361_v62, %v5129_v54  ;;  %v5244_v58 = vadd.f32 %v11361_v62, %v5132_v24 }
 0x67d   :  { %v5330_v27 = vmax.f32 %v5234_v0, 0.0 }
 0x67e   :  { %v5333_v17 = vmax.f32 %v5237_v50, 0.0  ;;  %v5337_v45 = vmax.f32 %v5241_v47, 0.0  ;;  %v5340_v49 = vmax.f32 %v5244_v58, 0.0 }
 0x680   :  { %v5405_v38 = vpack.c.bf16 %v5333_v17, %v5330_v27  ;;  %v5409_v56 = vpack.c.bf16 %v5340_v49, %v5337_v45 }
 0x681   :  { %5706 = vmatmul.mubr.bf16.gmra.mxu1 %v5402_v8  ;;  %6824 = vmatmul.mubr.bf16.gmra.mxu0 %v5425_v1 }
 0x682   :  { %5713 = vmatprep.mubr.bf16.mxu1 %v5406_v6  ;;  %6827 = vmatprep.mubr.bf16.mxu0 %v5428_v18 }
 0x689   :  { %5714 = vmatmul.mubr.bf16.gmra.mxu1 %v5405_v38  ;;  %6828 = vmatmul.mubr.bf16.gmra.mxu0 %v11763_v12 }
 0x68a   :  { %5721 = vmatprep.mubr.bf16.mxu1 %v5409_v56 }
 0x691   :  { %5722 = vmatmul.mubr.bf16.gmra.mxu1 %v11760_v63 }
 0x692   :  { %5729 = vmatprep.mubr.bf16.mxu1 %v11801_v26 }
 0x699   :  { %5730 = vmatmul.mubr.bf16.gmra.mxu1 %v11785_v46  ;;  %v11918_v46 = vld [vmem:[#allocation11 + $0x6] ss:$0 sm:$0xff] }
 0x69a   :  { %5737 = vmatprep.mubr.bf16.mxu1 %v11813_v43 }
 0x6a1   :  { %5738 = vmatmul.mubr.bf16.gmra.mxu1 %v11795_v42 }
 0x6a2   :  { %5745 = vmatprep.mubr.bf16.mxu1 %v11825_v30 }
 0x6a9   :  { %5746 = vmatmul.mubr.bf16.gmra.mxu1 %v11807_v16 }
 0x6aa   :  { %5753 = vmatprep.mubr.bf16.mxu1 %v11837_v52 }
 0x6b1   :  { %5754 = vmatmul.mubr.bf16.gmra.mxu1 %v11819_v2 }
 0x6b2   :  { %5761 = vmatprep.mubr.bf16.mxu1 %v11847_v4 }
 0x6b9   :  { %5762 = vmatmul.mubr.bf16.gmra.mxu1 %v11831_v25 }
 0x6ba   :  { %5769 = vmatprep.mubr.bf16.mxu1 %v11857_v40 }
 0x6c1   :  { %5770 = vmatmul.mubr.bf16.gmra.mxu1 %v11841_v19 }
 0x6c2   :  { %5777 = vmatprep.mubr.bf16.mxu1 %v11863_v41 }
 0x6c9   :  { %5778 = vmatmul.mubr.bf16.gmra.mxu1 %v11851_v55 }
 0x711   :  { %v6519_v62 = vpop.f32.mrf.mxu1  ;;  %v6801_v63 = vpop.f32.mrf.mxu0 }
 0x713   :  { %v6520_v12 = vpop.f32.mrf.mxu1  ;;  %v5820_v42 = vpop.f32.mrf.mxu0 }
 0x714   :  { %v6521_v26 = vadd.f32 %v6520_v12, %v6519_v62 }
 0x715   :  { %v6522_v16 = vpop.f32.mrf.mxu1  ;;  %v6802_v2 = vpop.f32.mrf.mxu0 }
 0x716   :  { %v5660_v43 = vadd.f32 %v6521_v26, %v11918_v46 }
 0x717   :  { %v6523_v30 = vpop.f32.mrf.mxu1  ;;  %v5823_v40 = vpop.f32.mrf.mxu0 }
 0x718   :  { %v5821_v25 = vadd.f32 %v5820_v42, %v5660_v43  ;;  %v6524_v52 = vadd.f32 %v6523_v30, %v6522_v16 }
 0x719   :  { %v6525_v4 = vpop.f32.mrf.mxu1  ;;  %v6805_v59 = vpop.f32.mrf.mxu0 }
 0x71a   :  { %5947 = vst [vmem:[#allocation13] sm:$0xff] %v5821_v25  ;;  %v5663_v19 = vadd.f32 %v6524_v52, %v11918_v46 }
 0x71b   :  { %v6526_v55 = vpop.f32.mrf.mxu1  ;;  %v5836_v5 = vpop.f32.mrf.mxu0 }
 0x71c   :  { %v5824_v41 = vadd.f32 %v5823_v40, %v5663_v19  ;;  %v6527_v53 = vadd.f32 %v6526_v55, %v6525_v4 }
 0x71d   :  { %v6528_v29 = vpop.f32.mrf.mxu1  ;;  %v6806_v3 = vpop.f32.mrf.mxu0 }
 0x71e   :  { %5948 = vst [vmem:[#allocation13 + $0x8] sm:$0xff] %v5824_v41  ;;  %v5668_v37 = vadd.f32 %v6527_v53, %v11918_v46 }
 0x71f   :  { %v6529_v7 = vpop.f32.mrf.mxu1  ;;  %v5839_v48 = vpop.f32.mrf.mxu0 }
 0x720   :  { %v5829_v44 = vadd.f32 %v6801_v63, %v5668_v37  ;;  %v6530_v20 = vadd.f32 %v6529_v7, %v6528_v29 }
 0x721   :  { %v6531_v10 = vpop.f32.mrf.mxu1  ;;  %v6809_v22 = vpop.f32.mrf.mxu0 }
 0x722   :  { %5949 = vst [vmem:[#allocation13 + $0x10] sm:$0xff] %v5829_v44  ;;  %v5671_v60 = vadd.f32 %v6530_v20, %v11918_v46 }
 0x723   :  { %v6532_v51 = vpop.f32.mrf.mxu1  ;;  %v5852_v0 = vpop.f32.mrf.mxu0 }
 0x724   :  { %v5832_v32 = vadd.f32 %v6802_v2, %v5671_v60  ;;  %v6533_v21 = vadd.f32 %v6532_v51, %v6531_v10 }
 0x725   :  { %v6534_v34 = vpop.f32.mrf.mxu1  ;;  %v6810_v47 = vpop.f32.mrf.mxu0 }
 0x726   :  { %5950 = vst [vmem:[#allocation13 + $0x18] sm:$0xff] %v5832_v32  ;;  %v5676_v33 = vadd.f32 %v6533_v21, %v11918_v46 }
 0x727   :  { %v6535_v35 = vpop.f32.mrf.mxu1  ;;  %v5855_v38 = vpop.f32.mrf.mxu0 }
 0x728   :  { %v5837_v9 = vadd.f32 %v5836_v5, %v5676_v33  ;;  %v6536_v36 = vadd.f32 %v6535_v35, %v6534_v34 }
 0x729   :  { %v6537_v28 = vpop.f32.mrf.mxu1  ;;  %v6813_v26 = vpop.f32.mrf.mxu0 }
 0x72a   :  { %5951 = vst [vmem:[#allocation13 + $0x20] sm:$0xff] %v5837_v9  ;;  %v5679_v15 = vadd.f32 %v6536_v36, %v11918_v46 }
 0x72b   :  { %v6538_v57 = vpop.f32.mrf.mxu1  ;;  %v5868_v52 = vpop.f32.mrf.mxu0 }
 0x72c   :  { %v5840_v13 = vadd.f32 %v5839_v48, %v5679_v15  ;;  %v6539_v31 = vadd.f32 %v6538_v57, %v6537_v28 }
 0x72d   :  { %v6540_v61 = vpop.f32.mrf.mxu1  ;;  %v6814_v53 = vpop.f32.mrf.mxu0 }
 0x72e   :  { %5952 = vst [vmem:[#allocation13 + $0x28] sm:$0xff] %v5840_v13  ;;  %v5684_v11 = vadd.f32 %v6539_v31, %v11918_v46 }
 0x72f   :  { %v6541_v14 = vpop.f32.mrf.mxu1  ;;  %v5871_v20 = vpop.f32.mrf.mxu0 }
 0x730   :  { %v5845_v39 = vadd.f32 %v6805_v59, %v5684_v11  ;;  %v6542_v54 = vadd.f32 %v6541_v14, %v6540_v61 }
 0x731   :  { %v6543_v23 = vpop.f32.mrf.mxu1  ;;  %v6817_v21 = vpop.f32.mrf.mxu0 }
 0x732   :  { %5953 = vst [vmem:[#allocation13 + $0x30] sm:$0xff] %v5845_v39  ;;  %v5687_v24 = vadd.f32 %v6542_v54, %v11918_v46 }
 0x733   :  { %v6544_v50 = vpop.f32.mrf.mxu1  ;;  %v5884_v36 = vpop.f32.mrf.mxu0 }
 0x734   :  { %v5848_v8 = vadd.f32 %v6806_v3, %v5687_v24  ;;  %v6545_v1 = vadd.f32 %v6544_v50, %v6543_v23 }
 0x735   :  { %v6546_v6 = vpop.f32.mrf.mxu1  ;;  %v6818_v31 = vpop.f32.mrf.mxu0 }
 0x736   :  { %5954 = vst [vmem:[#allocation13 + $0x38] sm:$0xff] %v5848_v8  ;;  %v5692_v18 = vadd.f32 %v6545_v1, %v11918_v46 }
 0x737   :  { %v6547_v58 = vpop.f32.mrf.mxu1  ;;  %v5887_v54 = vpop.f32.mrf.mxu0 }
 0x738   :  { %v5853_v27 = vadd.f32 %v5852_v0, %v5692_v18  ;;  %v6548_v17 = vadd.f32 %v6547_v58, %v6546_v6 }
 0x739   :  { %v6549_v45 = vpop.f32.mrf.mxu1  ;;  %v6821_v1 = vpop.f32.mrf.mxu0 }
 0x73a   :  { %5955 = vst [vmem:[#allocation13 + $0x40] sm:$0xff] %v5853_v27  ;;  %v5695_v49 = vadd.f32 %v6548_v17, %v11918_v46 }
 0x73b   :  { %v6550_v56 = vpop.f32.mrf.mxu1  ;;  %v5900_v17 = vpop.f32.mrf.mxu0 }
 0x73c   :  { %v5856_v62 = vadd.f32 %v5855_v38, %v5695_v49  ;;  %v6551_v63 = vadd.f32 %v6550_v56, %v6549_v45 }
 0x73d   :  { %v6552_v12 = vpop.f32.mrf.mxu1 }
 0x73e   :  { %5956 = vst [vmem:[#allocation13 + $0x48] sm:$0xff] %v5856_v62  ;;  %v5700_v42 = vadd.f32 %v6551_v63, %v11918_v46  ;;  %v6822_v63 = vpop.f32.mrf.mxu0 }
 0x73f   :  { %v6553_v16 = vpop.f32.mrf.mxu1 }
 0x740   :  { %v5861_v43 = vadd.f32 %v6809_v22, %v5700_v42  ;;  %v6554_v2 = vadd.f32 %v6553_v16, %v6552_v12 }
 0x741   :  { %v6555_v30 = vpop.f32.mrf.mxu1 }
 0x742   :  { %5957 = vst [vmem:[#allocation13 + $0x50] sm:$0xff] %v5861_v43  ;;  %v5703_v25 = vadd.f32 %v6554_v2, %v11918_v46  ;;  %v5903_v2 = vpop.f32.mrf.mxu0 }
 0x743   :  { %v6556_v4 = vpop.f32.mrf.mxu1 }
 0x744   :  { %v5864_v19 = vadd.f32 %v6810_v47, %v5703_v25  ;;  %v6557_v40 = vadd.f32 %v6556_v4, %v6555_v30 }
 0x745   :  { %v6558_v55 = vpop.f32.mrf.mxu1 }
 0x746   :  { %5958 = vst [vmem:[#allocation13 + $0x58] sm:$0xff] %v5864_v19  ;;  %v5708_v41 = vadd.f32 %v6557_v40, %v11918_v46  ;;  %v6825_v40 = vpop.f32.mrf.mxu0 }
 0x747   :  { %v6559_v29 = vpop.f32.mrf.mxu1 }
 0x748   :  { %v5869_v37 = vadd.f32 %v5868_v52, %v5708_v41  ;;  %v6560_v59 = vadd.f32 %v6559_v29, %v6558_v55 }
 0x749   :  { %v6561_v7 = vpop.f32.mrf.mxu1 }
 0x74a   :  { %5959 = vst [vmem:[#allocation13 + $0x60] sm:$0xff] %v5869_v37  ;;  %v5711_v44 = vadd.f32 %v6560_v59, %v11918_v46  ;;  %v5916_v59 = vpop.f32.mrf.mxu0 }
 0x74b   :  { %v6562_v10 = vpop.f32.mrf.mxu1 }
 0x74c   :  { %v5872_v60 = vadd.f32 %v5871_v20, %v5711_v44  ;;  %v6563_v5 = vadd.f32 %v6562_v10, %v6561_v7 }
 0x74d   :  { %v6564_v51 = vpop.f32.mrf.mxu1 }
 0x74e   :  { %5960 = vst [vmem:[#allocation13 + $0x68] sm:$0xff] %v5872_v60  ;;  %v5716_v32 = vadd.f32 %v6563_v5, %v11918_v46  ;;  %v6826_v5 = vpop.f32.mrf.mxu0 }
 0x74f   :  { %v6565_v34 = vpop.f32.mrf.mxu1 }
 0x750   :  { %v5877_v33 = vadd.f32 %v6813_v26, %v5716_v32  ;;  %v6566_v3 = vadd.f32 %v6565_v34, %v6564_v51 }
 0x751   :  { %v6567_v35 = vpop.f32.mrf.mxu1 }
 0x752   :  { %5961 = vst [vmem:[#allocation13 + $0x70] sm:$0xff] %v5877_v33  ;;  %v5719_v9 = vadd.f32 %v6566_v3, %v11918_v46  ;;  %v5919_v3 = vpop.f32.mrf.mxu0 }
 0x753   :  { %v6568_v28 = vpop.f32.mrf.mxu1 }
 0x754   :  { %v5880_v15 = vadd.f32 %v6814_v53, %v5719_v9  ;;  %v6569_v48 = vadd.f32 %v6568_v28, %v6567_v35 }
 0x755   :  { %v6570_v57 = vpop.f32.mrf.mxu1 }
 0x756   :  { %5962 = vst [vmem:[#allocation13 + $0x78] sm:$0xff] %v5880_v15  ;;  %v5724_v13 = vadd.f32 %v6569_v48, %v11918_v46  ;;  %v6829_v48 = vpop.f32.mrf.mxu0 }
 0x757   :  { %v6571_v61 = vpop.f32.mrf.mxu1 }
 0x758   :  { %v5885_v11 = vadd.f32 %v5884_v36, %v5724_v13  ;;  %v6572_v22 = vadd.f32 %v6571_v61, %v6570_v57 }
 0x759   :  { %v6573_v14 = vpop.f32.mrf.mxu1 }
 0x75a   :  { %5963 = vst [vmem:[#allocation13 + $0x80] sm:$0xff] %v5885_v11  ;;  %v5727_v39 = vadd.f32 %v6572_v22, %v11918_v46  ;;  %v5932_v22 = vpop.f32.mrf.mxu0 }
 0x75b   :  { %v6574_v23 = vpop.f32.mrf.mxu1 }
 0x75c   :  { %v5888_v24 = vadd.f32 %v5887_v54, %v5727_v39  ;;  %v6575_v0 = vadd.f32 %v6574_v23, %v6573_v14 }
 0x75d   :  { %v6576_v50 = vpop.f32.mrf.mxu1 }
 0x75e   :  { %5964 = vst [vmem:[#allocation13 + $0x88] sm:$0xff] %v5888_v24  ;;  %v5732_v8 = vadd.f32 %v6575_v0, %v11918_v46  ;;  %v6830_v0 = vpop.f32.mrf.mxu0 }
 0x75f   :  { %v6577_v6 = vpop.f32.mrf.mxu1 }
 0x760   :  { %v5893_v18 = vadd.f32 %v6817_v21, %v5732_v8  ;;  %v6578_v47 = vadd.f32 %v6577_v6, %v6576_v50 }
 0x761   :  { %v6579_v58 = vpop.f32.mrf.mxu1 }
 0x762   :  { %5965 = vst [vmem:[#allocation13 + $0x90] sm:$0xff] %v5893_v18  ;;  %v5735_v27 = vadd.f32 %v6578_v47, %v11918_v46  ;;  %v5935_v47 = vpop.f32.mrf.mxu0 }
 0x763   :  { %v6580_v45 = vpop.f32.mrf.mxu1 }
 0x764   :  { %v5896_v49 = vadd.f32 %v6818_v31, %v5735_v27  ;;  %v6581_v38 = vadd.f32 %v6580_v45, %v6579_v58 }
 0x765   :  { %v6582_v56 = vpop.f32.mrf.mxu1 }
 0x766   :  { %5966 = vst [vmem:[#allocation13 + $0x98] sm:$0xff] %v5896_v49  ;;  %v5740_v62 = vadd.f32 %v6581_v38, %v11918_v46 }
 0x767   :  { %v6583_v12 = vpop.f32.mrf.mxu1 }
 0x768   :  { %v5901_v42 = vadd.f32 %v5900_v17, %v5740_v62  ;;  %v6584_v26 = vadd.f32 %v6583_v12, %v6582_v56 }
 0x769   :  { %v6585_v16 = vpop.f32.mrf.mxu1 }
 0x76a   :  { %5967 = vst [vmem:[#allocation13 + $0xa0] sm:$0xff] %v5901_v42  ;;  %v5743_v43 = vadd.f32 %v6584_v26, %v11918_v46 }
 0x76b   :  { %v6586_v30 = vpop.f32.mrf.mxu1 }
 0x76c   :  { %v5904_v25 = vadd.f32 %v5903_v2, %v5743_v43  ;;  %v6587_v52 = vadd.f32 %v6586_v30, %v6585_v16 }
 0x76d   :  { %v6588_v4 = vpop.f32.mrf.mxu1 }
 0x76e   :  { %5968 = vst [vmem:[#allocation13 + $0xa8] sm:$0xff] %v5904_v25  ;;  %v5748_v19 = vadd.f32 %v6587_v52, %v11918_v46 }
 0x76f   :  { %v6589_v55 = vpop.f32.mrf.mxu1 }
 0x770   :  { %v5909_v41 = vadd.f32 %v6821_v1, %v5748_v19  ;;  %v6590_v53 = vadd.f32 %v6589_v55, %v6588_v4 }
 0x771   :  { %v6591_v29 = vpop.f32.mrf.mxu1 }
 0x772   :  { %5969 = vst [vmem:[#allocation13 + $0xb0] sm:$0xff] %v5909_v41  ;;  %v5751_v37 = vadd.f32 %v6590_v53, %v11918_v46 }
 0x773   :  { %v6592_v7 = vpop.f32.mrf.mxu1 }
 0x774   :  { %v5912_v44 = vadd.f32 %v6822_v63, %v5751_v37  ;;  %v6593_v20 = vadd.f32 %v6592_v7, %v6591_v29 }
 0x775   :  { %v6594_v10 = vpop.f32.mrf.mxu1 }
 0x776   :  { %5970 = vst [vmem:[#allocation13 + $0xb8] sm:$0xff] %v5912_v44  ;;  %v5756_v60 = vadd.f32 %v6593_v20, %v11918_v46 }
 0x777   :  { %v6595_v51 = vpop.f32.mrf.mxu1 }
 0x778   :  { %v5917_v32 = vadd.f32 %v5916_v59, %v5756_v60  ;;  %v6596_v21 = vadd.f32 %v6595_v51, %v6594_v10 }
 0x779   :  { %v6597_v34 = vpop.f32.mrf.mxu1 }
 0x77a   :  { %5971 = vst [vmem:[#allocation13 + $0xc0] sm:$0xff] %v5917_v32  ;;  %v5759_v33 = vadd.f32 %v6596_v21, %v11918_v46 }
 0x77b   :  { %v6598_v35 = vpop.f32.mrf.mxu1 }
 0x77c   :  { %v5920_v9 = vadd.f32 %v5919_v3, %v5759_v33  ;;  %v6599_v36 = vadd.f32 %v6598_v35, %v6597_v34 }
 0x77d   :  { %v6600_v28 = vpop.f32.mrf.mxu1 }
 0x77e   :  { %5972 = vst [vmem:[#allocation13 + $0xc8] sm:$0xff] %v5920_v9  ;;  %v5764_v15 = vadd.f32 %v6599_v36, %v11918_v46 }
 0x77f   :  { %v6601_v57 = vpop.f32.mrf.mxu1 }
 0x780   :  { %v5925_v13 = vadd.f32 %v6825_v40, %v5764_v15  ;;  %v6602_v31 = vadd.f32 %v6601_v57, %v6600_v28 }
 0x781   :  { %v6603_v61 = vpop.f32.mrf.mxu1 }
 0x782   :  { %5973 = vst [vmem:[#allocation13 + $0xd0] sm:$0xff] %v5925_v13  ;;  %v5767_v11 = vadd.f32 %v6602_v31, %v11918_v46 }
 0x783   :  { %v6604_v14 = vpop.f32.mrf.mxu1 }
 0x784   :  { %v5928_v39 = vadd.f32 %v6826_v5, %v5767_v11  ;;  %v6605_v54 = vadd.f32 %v6604_v14, %v6603_v61 }
 0x785   :  { %v6606_v23 = vpop.f32.mrf.mxu1 }
 0x786   :  { %5974 = vst [vmem:[#allocation13 + $0xd8] sm:$0xff] %v5928_v39  ;;  %v5772_v24 = vadd.f32 %v6605_v54, %v11918_v46 }
 0x787   :  { %v6607_v50 = vpop.f32.mrf.mxu1 }
 0x788   :  { %v5933_v8 = vadd.f32 %v5932_v22, %v5772_v24  ;;  %v6608_v1 = vadd.f32 %v6607_v50, %v6606_v23 }
 0x789   :  { %v6609_v6 = vpop.f32.mrf.mxu1 }
 0x78a   :  { %5975 = vst [vmem:[#allocation13 + $0xe0] sm:$0xff] %v5933_v8  ;;  %v5775_v18 = vadd.f32 %v6608_v1, %v11918_v46 }
 0x78b   :  { %v6610_v58 = vpop.f32.mrf.mxu1 }
 0x78c   :  { %v5936_v27 = vadd.f32 %v5935_v47, %v5775_v18  ;;  %v6611_v17 = vadd.f32 %v6610_v58, %v6609_v6 }
 0x78d   :  { %v6612_v45 = vpop.f32.mrf.mxu1 }
 0x78e   :  { %5976 = vst [vmem:[#allocation13 + $0xe8] sm:$0xff] %v5936_v27  ;;  %v5780_v49 = vadd.f32 %v6611_v17, %v11918_v46 }
 0x78f   :  { %v6613_v38 = vpop.f32.mrf.mxu1 }
 0x790   :  { %v5941_v56 = vadd.f32 %v6829_v48, %v5780_v49  ;;  %v6614_v62 = vadd.f32 %v6613_v38, %v6612_v45 }
 0x792   :  { %5977 = vst [vmem:[#allocation13 + $0xf0] sm:$0xff] %v5941_v56  ;;  %v5783_v63 = vadd.f32 %v6614_v62, %v11918_v46 }
 0x794   :  { %v5944_v12 = vadd.f32 %v6830_v0, %v5783_v63 }
 0x796   :  { %5978 = vst [vmem:[#allocation13 + $0xf8] sm:$0xff] %v5944_v12 }
 0x797   :  { %7259 = shalt.err (!%p7256_p6)
}
 0x798   :  { %s7291_s28 = smov 128   ;;  %s7292_s29 = smov 8  }
 0x799   :  { %5990 = dma.vmem_to_hbm [thread:$0]  %s5985_s5, 4096, %s11961_s6, [#allocation4], %s7291_s28, %s7291_s28, %s7292_s29  }
 0x79a   :  { %7276 = dma.done.wait [#allocation4], 4096  }
 0x79b   :  { %7277 = vsyncadd [#allocation4], 4294963200 }
 0x79c   :  { %5994 = vsyncpa [#allocation3], 1 }
 0x79d   :  { %5995 = vsyncpa [#allocation6], 1 }
 0x79e   :  { %5996 = vsyncpa [#allocation9], 1 }
 0x79f   :  { %5997 = vsyncpa [#allocation12], 1 }
 0x7a0   :  { %5998 = vsyncpa [#allocation4], 1 }

</bundles_post_ra>
